<compile_context>
chip_gen: v6e
topology: v6e:2x2x1
jax: 0.10.0
libtpu: 0.0.40
codegen_flags: <defaults>
</compile_context>

<pallas_src>
import jax
import jax.numpy as jnp
from jax.experimental import pallas as pl
from jax.experimental.pallas import tpu as pltpu


def _lrelu(v):
    # LeakyReLU(0.2)
    return jnp.where(v > 0, v, 0.2 * v)


def ax_fused_kernel(x_ref, w1_ref, b1_ref, w2_ref, b2_ref, w3_ref, b3_ref,
                    w4_ref, b4_ref, w5_ref, b5_ref, a_ref,
                    dw_out_ref, x_out_ref):
    """One grid step = (one encoder branch, one batch tile).

    The leading encoder dim of every operand is squeezed by the BlockSpec.
    Weights / a_ref are bf16; activations and accumulation are f32
    (MXU bf16 x bf16 -> f32 via preferred_element_type)."""

    def layer(h, w_ref, b_ref, act):
        y = jnp.dot(h.astype(w_ref.dtype), w_ref[...],
                    preferred_element_type=jnp.float32) + b_ref[...]
        return _lrelu(y) if act else y

    h = x_ref[...]                        # (tm, 1536) f32
    h = layer(h, w1_ref, b1_ref, True)    # (tm, 1024)
    h = layer(h, w2_ref, b2_ref, True)    # (tm, 1024)
    h = layer(h, w3_ref, b3_ref, True)    # (tm, 512)
    h = layer(h, w4_ref, b4_ref, True)    # (tm, dim)
    h = layer(h, w5_ref, b5_ref, False)   # (tm, dim)
    x_out_ref[...] = h
    # output_dw half: (tm, dim) @ (dim, 1536) -> (tm, 1536)
    dw_out_ref[...] = jnp.dot(h.astype(a_ref.dtype), a_ref[...],
                              preferred_element_type=jnp.float32)


def ax_fused_call(x_stacked, params, tm_max=256):
    """x_stacked: (2, B, 1536) f32.
    Returns (dw_out (2, B, 1536) f32, x_out (2, B, dim) f32)."""
    n_enc, B, n_cols = x_stacked.shape
    dim = params["A_t"].shape[1]

    # ---- batch (M) tiling ----
    if B <= tm_max:
        tm, Bp = B, B                       # full-batch tile; block == full dim
    else:
        tm = max(8, (tm_max // 8) * 8)      # tile must satisfy the (8,128) rule
        Bp = ((B + tm - 1) // tm) * tm
        if Bp != B:
            x_stacked = jnp.pad(x_stacked, ((0, 0), (0, Bp - B), (0, 0)))
    num_m = Bp // tm

    args = [x_stacked]
    for w, b in zip(params["W"], params["b"]):
        args += [w, b]
    args.append(params["A_t"])

    def weight_spec(arr):
        # leading encoder dim squeezed; constant along the M axis so the
        # weight tile is DMA'd once per encoder and reused across M tiles.
        nd = arr.ndim
        return pl.BlockSpec((None,) + arr.shape[1:],
                            lambda g, m, _nd=nd: (g,) + (0,) * (_nd - 1))

    in_specs = [pl.BlockSpec((None, tm, n_cols), lambda g, m: (g, m, 0))]
    in_specs += [weight_spec(a) for a in args[1:]]

    dw_out, x_out = pl.pallas_call(
        ax_fused_kernel,
        grid=(2, num_m),                    # encoder outermost, batch tile inner
        in_specs=in_specs,
        out_specs=(pl.BlockSpec((None, tm, n_cols), lambda g, m: (g, m, 0)),
                   pl.BlockSpec((None, tm, dim), lambda g, m: (g, m, 0))),
        out_shape=(jax.ShapeDtypeStruct((2, Bp, n_cols), jnp.float32),
                   jax.ShapeDtypeStruct((2, Bp, dim), jnp.float32)),
        compiler_params=pltpu.CompilerParams(
            dimension_semantics=("parallel", "parallel"),
            vmem_limit_bytes=48 * 1024 * 1024),
    )(*args)

    if Bp != B:
        dw_out = dw_out[:, :B]
        x_out = x_out[:, :B]
    return dw_out, x_out


# ---------------- parameter construction (deterministic, glue) ----------------

def linear_params(key, in_dim, out_dim):
    """Weights stored already transposed to (in, out); bias as (1, out)."""
    kw, kb = jax.random.split(key)
    bound = 1.0 / (in_dim ** 0.5)
    w = jax.random.uniform(kw, (in_dim, out_dim), jnp.float32, -bound, bound)
    b = jax.random.uniform(kb, (1, out_dim), jnp.float32, -bound, bound)
    return w, b


def make_ax_params(key, dim):
    k_a, k_e0, k_e1 = jax.random.split(key, 3)
    layer_dims = [(512 * 3, 512 * 2),   # fc1
                  (512 * 2, 512 * 2),   # fc2
                  (512 * 2, 512),       # fc3
                  (512, dim),           # fc4
                  (dim, dim)]           # fc5
    per_enc = []
    for k_enc in (k_e0, k_e1):
        keys = jax.random.split(k_enc, 5)
        per_enc.append([linear_params(keys[l], *layer_dims[l]) for l in range(5)])

    # stack each layer across the two encoders; weights bf16, biases f32
    W = [jnp.stack([per_enc[g][l][0] for g in range(2)]).astype(jnp.bfloat16)
         for l in range(5)]
    b = [jnp.stack([per_enc[g][l][1] for g in range(2)]) for l in range(5)]

    A = jax.random.normal(k_a, (6, 512, dim), jnp.float32)
    # Precompute A_t once: A[3g:3g+3] -> (1536, dim) -> transpose -> (dim, 1536)
    A_t = jnp.stack([A[3 * g:3 * g + 3].reshape(3 * 512, dim).T
                     for g in range(2)]).astype(jnp.bfloat16)   # (2, dim, 1536)
    return {"A": A, "A_t": A_t, "W": W, "b": b}


# ---------------- forward (wrapper = glue, compute = Pallas) ----------------

def ax_forward(dw, params, tm_max=256):
    """dw: (B, 6, 512) f32. Returns (output_dw (B,6,512), A (6,512,dim), [x0, x1])."""
    B = dw.shape[0]
    A = params["A"]
    # flatten each encoder's 3 slots to (B, 1536) and stack over encoders (glue)
    x_stacked = jnp.stack([dw[:, :3].reshape(B, -1), dw[:, 3:6].reshape(B, -1)])
    dw_out, x_out = ax_fused_call(x_stacked, params, tm_max=tm_max)
    output_dw = dw_out.reshape(2, B, 3, 512).transpose(1, 0, 2, 3).reshape(B, 6, 512)
    xs = [x_out[0][:, None, :], x_out[1][:, None, :]]   # each (B, 1, dim)
    return output_dw, A, xs


# ---------------- pure-JAX reference for verification ----------------

def ax_forward_ref(dw, params):
    """Reference using the same bf16 weights / f32 accumulation as the kernel."""
    B = dw.shape[0]
    A = params["A"]
    outs, xs = [], []
    for g in range(2):
        h = dw[:, 3 * g:3 * g + 3].reshape(B, -1)
        for l in range(5):
            w = params["W"][l][g]
            h = jnp.dot(h.astype(w.dtype), w,
                        preferred_element_type=jnp.float32) + params["b"][l][g]
            if l < 4:
                h = jnp.where(h > 0, h, 0.2 * h)
        xs.append(h[:, None, :])
        a_t = params["A_t"][g]
        outs.append(jnp.dot(h.astype(a_t.dtype), a_t,
                            preferred_element_type=jnp.float32).reshape(B, 3, 512))
    return jnp.concatenate(outs, axis=1), A, xs


def _check(dw, params, tm_max):
    output_dw, A_out, xs = ax_forward(dw, params, tm_max=tm_max)
    jax.block_until_ready(output_dw)
    jax.block_until_ready(xs)
    ref_dw, _, ref_xs = ax_forward_ref(dw, params)
    B = dw.shape[0]
    dim = params["A_t"].shape[1]
    assert output_dw.shape == (B, 6, 512)
    assert A_out.shape == (6, 512, dim)
    assert xs[0].shape == (B, 1, dim) and xs[1].shape == (B, 1, dim)
    assert jnp.allclose(output_dw, ref_dw, atol=1e-3, rtol=1e-3)
    assert jnp.allclose(xs[0], ref_xs[0], atol=1e-3, rtol=1e-3)
    assert jnp.allclose(xs[1], ref_xs[1], atol=1e-3, rtol=1e-3)


if __name__ == "__main__":
    key = jax.random.PRNGKey(0)
    k_params, k_x, k_x2 = jax.random.split(key, 3)

    dim = 32
    params = make_ax_params(k_params, dim)

    # main case: tiny batch (matches the original module usage)
    dw = jax.random.normal(k_x, (2, 6, 512), jnp.float32)
    _check(dw, params, tm_max=256)

    # exercise the batch-tiling / padding path (forced small tile)
    dw_big = jax.random.normal(k_x2, (10, 6, 512), jnp.float32)
    _check(dw_big, params, tm_max=8)

    print("KERNEL_OK")
</pallas_src>

<mosaic_0001>
module attributes {stable_mosaic.version = 11 : i64} {
  func.func @ax_fused_kernel(%arg0: i32, %arg1: i32, %arg2: memref<1x2x1536xf32, #tpu.memory_space<vmem>>, %arg3: memref<1x1536x1024xbf16, #tpu.memory_space<vmem>>, %arg4: memref<1x1x1024xf32, #tpu.memory_space<vmem>>, %arg5: memref<1x1024x1024xbf16, #tpu.memory_space<vmem>>, %arg6: memref<1x1x1024xf32, #tpu.memory_space<vmem>>, %arg7: memref<1x1024x512xbf16, #tpu.memory_space<vmem>>, %arg8: memref<1x1x512xf32, #tpu.memory_space<vmem>>, %arg9: memref<1x512x32xbf16, #tpu.memory_space<vmem>>, %arg10: memref<1x1x32xf32, #tpu.memory_space<vmem>>, %arg11: memref<1x32x32xbf16, #tpu.memory_space<vmem>>, %arg12: memref<1x1x32xf32, #tpu.memory_space<vmem>>, %arg13: memref<1x32x1536xbf16, #tpu.memory_space<vmem>>, %arg14: memref<1x2x1536xf32, #tpu.memory_space<vmem>>, %arg15: memref<1x2x32xf32, #tpu.memory_space<vmem>>) attributes {dimension_semantics = [#tpu.dimension_semantics<parallel>, #tpu.dimension_semantics<parallel>], iteration_bounds = array<i64: 2, 1>, scalar_prefetch = 0 : i64, scratch_operands = 0 : i64, tpu.core_type = #tpu.core_type<tc>, window_params = [{transform_indices = @transform_0, window_bounds = array<i64: 1, 2, 1536>}, {transform_indices = @transform_1, window_bounds = array<i64: 1, 1536, 1024>}, {transform_indices = @transform_2, window_bounds = array<i64: 1, 1, 1024>}, {transform_indices = @transform_3, window_bounds = array<i64: 1, 1024, 1024>}, {transform_indices = @transform_4, window_bounds = array<i64: 1, 1, 1024>}, {transform_indices = @transform_5, window_bounds = array<i64: 1, 1024, 512>}, {transform_indices = @transform_6, window_bounds = array<i64: 1, 1, 512>}, {transform_indices = @transform_7, window_bounds = array<i64: 1, 512, 32>}, {transform_indices = @transform_8, window_bounds = array<i64: 1, 1, 32>}, {transform_indices = @transform_9, window_bounds = array<i64: 1, 32, 32>}, {transform_indices = @transform_10, window_bounds = array<i64: 1, 1, 32>}, {transform_indices = @transform_11, window_bounds = array<i64: 1, 32, 1536>}, {transform_indices = @transform_12, window_bounds = array<i64: 1, 2, 1536>}, {transform_indices = @transform_13, window_bounds = array<i64: 1, 2, 32>}]} {
    %c0 = arith.constant 0 : index
    %c0_0 = arith.constant 0 : index
    %c0_1 = arith.constant 0 : index
    %0 = vector.load %arg2[%c0, %c0_0, %c0_1] : memref<1x2x1536xf32, #tpu.memory_space<vmem>>, vector<1x2x1536xf32>
    %1 = vector.shape_cast %0 : vector<1x2x1536xf32> to vector<2x1536xf32>
    %2 = arith.truncf %1 : vector<2x1536xf32> to vector<2x1536xbf16>
    %c0_2 = arith.constant 0 : index
    %c0_3 = arith.constant 0 : index
    %c0_4 = arith.constant 0 : index
    %3 = vector.load %arg3[%c0_2, %c0_3, %c0_4] : memref<1x1536x1024xbf16, #tpu.memory_space<vmem>>, vector<1x1536x1024xbf16>
    %4 = vector.shape_cast %3 : vector<1x1536x1024xbf16> to vector<1536x1024xbf16>
    %cst = arith.constant dense<0.000000e+00> : vector<2x1024xf32>
    %5 = tpu.matmul %2, %4, %cst {dimension_numbers = #tpu.dot_dimension_numbers<[1], [0], [0], [1], [0, 0, 1, 1], [], []>} : vector<2x1536xbf16>, vector<1536x1024xbf16>, vector<2x1024xf32> -> vector<2x1024xf32>
    %c0_5 = arith.constant 0 : index
    %c0_6 = arith.constant 0 : index
    %c0_7 = arith.constant 0 : index
    %6 = vector.load %arg4[%c0_5, %c0_6, %c0_7] : memref<1x1x1024xf32, #tpu.memory_space<vmem>>, vector<1x1x1024xf32>
    %7 = vector.shape_cast %6 : vector<1x1x1024xf32> to vector<1x1024xf32>
    %8 = vector.broadcast %7 : vector<1x1024xf32> to vector<2x1024xf32>
    %9 = arith.addf %5, %8 : vector<2x1024xf32>
    %cst_8 = arith.constant 0.000000e+00 : f32
    %10 = vector.broadcast %cst_8 : f32 to vector<2x1024xf32>
    %11 = arith.cmpf ogt, %9, %10 : vector<2x1024xf32>
    %cst_9 = arith.constant 2.000000e-01 : f32
    %12 = vector.broadcast %cst_9 : f32 to vector<2x1024xf32>
    %13 = arith.mulf %12, %9 : vector<2x1024xf32>
    %14 = arith.select %11, %9, %13 : vector<2x1024xi1>, vector<2x1024xf32>
    %15 = arith.truncf %14 : vector<2x1024xf32> to vector<2x1024xbf16>
    %c0_10 = arith.constant 0 : index
    %c0_11 = arith.constant 0 : index
    %c0_12 = arith.constant 0 : index
    %16 = vector.load %arg5[%c0_10, %c0_11, %c0_12] : memref<1x1024x1024xbf16, #tpu.memory_space<vmem>>, vector<1x1024x1024xbf16>
    %17 = vector.shape_cast %16 : vector<1x1024x1024xbf16> to vector<1024x1024xbf16>
    %cst_13 = arith.constant dense<0.000000e+00> : vector<2x1024xf32>
    %18 = tpu.matmul %15, %17, %cst_13 {dimension_numbers = #tpu.dot_dimension_numbers<[1], [0], [0], [1], [0, 0, 1, 1], [], []>} : vector<2x1024xbf16>, vector<1024x1024xbf16>, vector<2x1024xf32> -> vector<2x1024xf32>
    %c0_14 = arith.constant 0 : index
    %c0_15 = arith.constant 0 : index
    %c0_16 = arith.constant 0 : index
    %19 = vector.load %arg6[%c0_14, %c0_15, %c0_16] : memref<1x1x1024xf32, #tpu.memory_space<vmem>>, vector<1x1x1024xf32>
    %20 = vector.shape_cast %19 : vector<1x1x1024xf32> to vector<1x1024xf32>
    %21 = vector.broadcast %20 : vector<1x1024xf32> to vector<2x1024xf32>
    %22 = arith.addf %18, %21 : vector<2x1024xf32>
    %cst_17 = arith.constant 0.000000e+00 : f32
    %23 = vector.broadcast %cst_17 : f32 to vector<2x1024xf32>
    %24 = arith.cmpf ogt, %22, %23 : vector<2x1024xf32>
    %cst_18 = arith.constant 2.000000e-01 : f32
    %25 = vector.broadcast %cst_18 : f32 to vector<2x1024xf32>
    %26 = arith.mulf %25, %22 : vector<2x1024xf32>
    %27 = arith.select %24, %22, %26 : vector<2x1024xi1>, vector<2x1024xf32>
    %28 = arith.truncf %27 : vector<2x1024xf32> to vector<2x1024xbf16>
    %c0_19 = arith.constant 0 : index
    %c0_20 = arith.constant 0 : index
    %c0_21 = arith.constant 0 : index
    %29 = vector.load %arg7[%c0_19, %c0_20, %c0_21] : memref<1x1024x512xbf16, #tpu.memory_space<vmem>>, vector<1x1024x512xbf16>
    %30 = vector.shape_cast %29 : vector<1x1024x512xbf16> to vector<1024x512xbf16>
    %cst_22 = arith.constant dense<0.000000e+00> : vector<2x512xf32>
    %31 = tpu.matmul %28, %30, %cst_22 {dimension_numbers = #tpu.dot_dimension_numbers<[1], [0], [0], [1], [0, 0, 1, 1], [], []>} : vector<2x1024xbf16>, vector<1024x512xbf16>, vector<2x512xf32> -> vector<2x512xf32>
    %c0_23 = arith.constant 0 : index
    %c0_24 = arith.constant 0 : index
    %c0_25 = arith.constant 0 : index
    %32 = vector.load %arg8[%c0_23, %c0_24, %c0_25] : memref<1x1x512xf32, #tpu.memory_space<vmem>>, vector<1x1x512xf32>
    %33 = vector.shape_cast %32 : vector<1x1x512xf32> to vector<1x512xf32>
    %34 = vector.broadcast %33 : vector<1x512xf32> to vector<2x512xf32>
    %35 = arith.addf %31, %34 : vector<2x512xf32>
    %cst_26 = arith.constant 0.000000e+00 : f32
    %36 = vector.broadcast %cst_26 : f32 to vector<2x512xf32>
    %37 = arith.cmpf ogt, %35, %36 : vector<2x512xf32>
    %cst_27 = arith.constant 2.000000e-01 : f32
    %38 = vector.broadcast %cst_27 : f32 to vector<2x512xf32>
    %39 = arith.mulf %38, %35 : vector<2x512xf32>
    %40 = arith.select %37, %35, %39 : vector<2x512xi1>, vector<2x512xf32>
    %41 = arith.truncf %40 : vector<2x512xf32> to vector<2x512xbf16>
    %c0_28 = arith.constant 0 : index
    %c0_29 = arith.constant 0 : index
    %c0_30 = arith.constant 0 : index
    %42 = vector.load %arg9[%c0_28, %c0_29, %c0_30] : memref<1x512x32xbf16, #tpu.memory_space<vmem>>, vector<1x512x32xbf16>
    %43 = vector.shape_cast %42 : vector<1x512x32xbf16> to vector<512x32xbf16>
    %cst_31 = arith.constant dense<0.000000e+00> : vector<2x32xf32>
    %44 = tpu.matmul %41, %43, %cst_31 {dimension_numbers = #tpu.dot_dimension_numbers<[1], [0], [0], [1], [0, 0, 1, 1], [], []>} : vector<2x512xbf16>, vector<512x32xbf16>, vector<2x32xf32> -> vector<2x32xf32>
    %c0_32 = arith.constant 0 : index
    %c0_33 = arith.constant 0 : index
    %c0_34 = arith.constant 0 : index
    %45 = vector.load %arg10[%c0_32, %c0_33, %c0_34] : memref<1x1x32xf32, #tpu.memory_space<vmem>>, vector<1x1x32xf32>
    %46 = vector.shape_cast %45 : vector<1x1x32xf32> to vector<1x32xf32>
    %47 = vector.broadcast %46 : vector<1x32xf32> to vector<2x32xf32>
    %48 = arith.addf %44, %47 : vector<2x32xf32>
    %cst_35 = arith.constant 0.000000e+00 : f32
    %49 = vector.broadcast %cst_35 : f32 to vector<2x32xf32>
    %50 = arith.cmpf ogt, %48, %49 : vector<2x32xf32>
    %cst_36 = arith.constant 2.000000e-01 : f32
    %51 = vector.broadcast %cst_36 : f32 to vector<2x32xf32>
    %52 = arith.mulf %51, %48 : vector<2x32xf32>
    %53 = arith.select %50, %48, %52 : vector<2x32xi1>, vector<2x32xf32>
    %54 = arith.truncf %53 : vector<2x32xf32> to vector<2x32xbf16>
    %c0_37 = arith.constant 0 : index
    %c0_38 = arith.constant 0 : index
    %c0_39 = arith.constant 0 : index
    %55 = vector.load %arg11[%c0_37, %c0_38, %c0_39] : memref<1x32x32xbf16, #tpu.memory_space<vmem>>, vector<1x32x32xbf16>
    %56 = vector.shape_cast %55 : vector<1x32x32xbf16> to vector<32x32xbf16>
    %cst_40 = arith.constant dense<0.000000e+00> : vector<2x32xf32>
    %57 = tpu.matmul %54, %56, %cst_40 {dimension_numbers = #tpu.dot_dimension_numbers<[1], [0], [0], [1], [0, 0, 1, 1], [], []>} : vector<2x32xbf16>, vector<32x32xbf16>, vector<2x32xf32> -> vector<2x32xf32>
    %c0_41 = arith.constant 0 : index
    %c0_42 = arith.constant 0 : index
    %c0_43 = arith.constant 0 : index
    %58 = vector.load %arg12[%c0_41, %c0_42, %c0_43] : memref<1x1x32xf32, #tpu.memory_space<vmem>>, vector<1x1x32xf32>
    %59 = vector.shape_cast %58 : vector<1x1x32xf32> to vector<1x32xf32>
    %60 = vector.broadcast %59 : vector<1x32xf32> to vector<2x32xf32>
    %61 = arith.addf %57, %60 : vector<2x32xf32>
    %c0_44 = arith.constant 0 : index
    %c0_45 = arith.constant 0 : index
    %c0_46 = arith.constant 0 : index
    %62 = vector.load %arg15[%c0_44, %c0_45, %c0_46] : memref<1x2x32xf32, #tpu.memory_space<vmem>>, vector<1x2x32xf32>
    %63 = vector.shape_cast %62 : vector<1x2x32xf32> to vector<2x32xf32>
    %64 = vector.shape_cast %61 : vector<2x32xf32> to vector<1x2x32xf32>
    tpu.vector_store %arg15[%c0_44, %c0_45, %c0_46], %64 {strides = array<i32>} : memref<1x2x32xf32, #tpu.memory_space<vmem>>, vector<1x2x32xf32>,
    %65 = arith.truncf %61 : vector<2x32xf32> to vector<2x32xbf16>
    %c0_47 = arith.constant 0 : index
    %c0_48 = arith.constant 0 : index
    %c0_49 = arith.constant 0 : index
    %66 = vector.load %arg13[%c0_47, %c0_48, %c0_49] : memref<1x32x1536xbf16, #tpu.memory_space<vmem>>, vector<1x32x1536xbf16>
    %67 = vector.shape_cast %66 : vector<1x32x1536xbf16> to vector<32x1536xbf16>
    %cst_50 = arith.constant dense<0.000000e+00> : vector<2x1536xf32>
    %68 = tpu.matmul %65, %67, %cst_50 {dimension_numbers = #tpu.dot_dimension_numbers<[1], [0], [0], [1], [0, 0, 1, 1], [], []>} : vector<2x32xbf16>, vector<32x1536xbf16>, vector<2x1536xf32> -> vector<2x1536xf32>
    %c0_51 = arith.constant 0 : index
    %c0_52 = arith.constant 0 : index
    %c0_53 = arith.constant 0 : index
    %69 = vector.load %arg14[%c0_51, %c0_52, %c0_53] : memref<1x2x1536xf32, #tpu.memory_space<vmem>>, vector<1x2x1536xf32>
    %70 = vector.shape_cast %69 : vector<1x2x1536xf32> to vector<2x1536xf32>
    %71 = vector.shape_cast %68 : vector<2x1536xf32> to vector<1x2x1536xf32>
    tpu.vector_store %arg14[%c0_51, %c0_52, %c0_53], %71 {strides = array<i32>} : memref<1x2x1536xf32, #tpu.memory_space<vmem>>, vector<1x2x1536xf32>,
    return
  }
  func.func @transform_0(%arg0: i32, %arg1: i32) -> (i32, i32, i32) {
    %c0_i32 = arith.constant 0 : i32
    %c0_i32_0 = arith.constant 0 : i32
    return %arg0, %arg1, %c0_i32 : i32, i32, i32
  }
  func.func @transform_1(%arg0: i32, %arg1: i32) -> (i32, i32, i32) {
    %c0_i32 = arith.constant 0 : i32
    %c0_i32_0 = arith.constant 0 : i32
    %c0_i32_1 = arith.constant 0 : i32
    return %arg0, %c0_i32, %c0_i32_0 : i32, i32, i32
  }
  func.func @transform_2(%arg0: i32, %arg1: i32) -> (i32, i32, i32) {
    %c0_i32 = arith.constant 0 : i32
    %c0_i32_0 = arith.constant 0 : i32
    %c0_i32_1 = arith.constant 0 : i32
    return %arg0, %c0_i32, %c0_i32_0 : i32, i32, i32
  }
  func.func @transform_3(%arg0: i32, %arg1: i32) -> (i32, i32, i32) {
    %c0_i32 = arith.constant 0 : i32
    %c0_i32_0 = arith.constant 0 : i32
    %c0_i32_1 = arith.constant 0 : i32
    return %arg0, %c0_i32, %c0_i32_0 : i32, i32, i32
  }
  func.func @transform_4(%arg0: i32, %arg1: i32) -> (i32, i32, i32) {
    %c0_i32 = arith.constant 0 : i32
    %c0_i32_0 = arith.constant 0 : i32
    %c0_i32_1 = arith.constant 0 : i32
    return %arg0, %c0_i32, %c0_i32_0 : i32, i32, i32
  }
  func.func @transform_5(%arg0: i32, %arg1: i32) -> (i32, i32, i32) {
    %c0_i32 = arith.constant 0 : i32
    %c0_i32_0 = arith.constant 0 : i32
    %c0_i32_1 = arith.constant 0 : i32
    return %arg0, %c0_i32, %c0_i32_0 : i32, i32, i32
  }
  func.func @transform_6(%arg0: i32, %arg1: i32) -> (i32, i32, i32) {
    %c0_i32 = arith.constant 0 : i32
    %c0_i32_0 = arith.constant 0 : i32
    %c0_i32_1 = arith.constant 0 : i32
    return %arg0, %c0_i32, %c0_i32_0 : i32, i32, i32
  }
  func.func @transform_7(%arg0: i32, %arg1: i32) -> (i32, i32, i32) {
    %c0_i32 = arith.constant 0 : i32
    %c0_i32_0 = arith.constant 0 : i32
    %c0_i32_1 = arith.constant 0 : i32
    return %arg0, %c0_i32, %c0_i32_0 : i32, i32, i32
  }
  func.func @transform_8(%arg0: i32, %arg1: i32) -> (i32, i32, i32) {
    %c0_i32 = arith.constant 0 : i32
    %c0_i32_0 = arith.constant 0 : i32
    %c0_i32_1 = arith.constant 0 : i32
    return %arg0, %c0_i32, %c0_i32_0 : i32, i32, i32
  }
  func.func @transform_9(%arg0: i32, %arg1: i32) -> (i32, i32, i32) {
    %c0_i32 = arith.constant 0 : i32
    %c0_i32_0 = arith.constant 0 : i32
    %c0_i32_1 = arith.constant 0 : i32
    return %arg0, %c0_i32, %c0_i32_0 : i32, i32, i32
  }
  func.func @transform_10(%arg0: i32, %arg1: i32) -> (i32, i32, i32) {
    %c0_i32 = arith.constant 0 : i32
    %c0_i32_0 = arith.constant 0 : i32
    %c0_i32_1 = arith.constant 0 : i32
    return %arg0, %c0_i32, %c0_i32_0 : i32, i32, i32
  }
  func.func @transform_11(%arg0: i32, %arg1: i32) -> (i32, i32, i32) {
    %c0_i32 = arith.constant 0 : i32
    %c0_i32_0 = arith.constant 0 : i32
    %c0_i32_1 = arith.constant 0 : i32
    return %arg0, %c0_i32, %c0_i32_0 : i32, i32, i32
  }
  func.func @transform_12(%arg0: i32, %arg1: i32) -> (i32, i32, i32) {
    %c0_i32 = arith.constant 0 : i32
    %c0_i32_0 = arith.constant 0 : i32
    return %arg0, %arg1, %c0_i32 : i32, i32, i32
  }
  func.func @transform_13(%arg0: i32, %arg1: i32) -> (i32, i32, i32) {
    %c0_i32 = arith.constant 0 : i32
    %c0_i32_0 = arith.constant 0 : i32
    return %arg0, %arg1, %c0_i32 : i32, i32, i32
  }
}

</mosaic_0001>

<bundles_post_ra>
// kernel: tpu_custom_call.1
= control target key start
LH: loop header
LB: loop body
LE: loop exit
PB: predicated region body
PF: predicated region fallthrough
CT: control target
= control target key end

     0   :  { %s18855_s0 = inlined_call_operand.hbm [shape: f32[2,2,1536], index: 0, kind: input, shape index: {}]   ;;  %s18856_s1 = inlined_call_operand.hbm [shape: bf16[2,1536,1024], index: 1, kind: input, shape index: {}]   ;;  %s18857_s2 = inlined_call_operand.hbm [shape: f32[2,1,1024], index: 2, kind: input, shape index: {}]   ;;  %s18858_s3 = inlined_call_operand.hbm [shape: bf16[2,1024,1024], index: 3, kind: input, shape index: {}]   ;;  %s18859_s4 = inlined_call_operand.hbm [shape: f32[2,1,1024], index: 4, kind: input, shape index: {}]   ;;  %s18860_s5 = inlined_call_operand.hbm [shape: bf16[2,1024,512], index: 5, kind: input, shape index: {}]   ;;  %s18861_s6 = inlined_call_operand.hbm [shape: f32[2,1,512], index: 6, kind: input, shape index: {}]   ;;  %s18862_s7 = inlined_call_operand.vmem [shape: bf16[2,512,32], index: 7, kind: input, shape index: {}]   ;;  %s18863_s8 = inlined_call_operand.hbm [shape: f32[2,1,32], index: 8, kind: input, shape index: {}]   ;;  %s18864_s9 = inlined_call_operand.hbm [shape: bf16[2,32,32], index: 9, kind: input, shape index: {}]   ;;  %s18865_s10 = inlined_call_operand.hbm [shape: f32[2,1,32], index: 10, kind: input, shape index: {}]   ;;  %s18866_s11 = inlined_call_operand.hbm [shape: bf16[2,32,1536], index: 11, kind: input, shape index: {}]   ;;  %s18867_s12 = inlined_call_operand.hbm [shape: f32[2,2,1536], index: 12, kind: output, shape index: {0}]   ;;  %s18868_s13 = inlined_call_operand.hbm [shape: f32[2,2,32], index: 13, kind: output, shape index: {1}]  }
   0x1   :  { %18888 = sst [smem:[#allocation43_spill]] %s18856_s1 }
   0x2   :  { %18889 = sst [smem:[#allocation44_spill]] %s18858_s3 }
   0x3   :  { %18890 = sst [smem:[#allocation45_spill]] %s18862_s7 }
   0x4   :  { %18891 = sst [smem:[#allocation46_spill]] %s18867_s12 }
   0x5   :  { %18892 = sst [smem:[#allocation47_spill]] %s18868_s13 }
   0x6   :  { %19 = vsyncpa [#allocation3], 0 }
   0x7   :  { %21 = vsyncpa [#allocation3 + $0x1], 0 }
   0x8   :  { %22 = vsyncpa [#allocation6], 0 }
   0x9   :  { %24 = vsyncpa [#allocation6 + $0x1], 0 }
   0xa   :  { %25 = vsyncpa [#allocation9], 0 }
   0xb   :  { %27 = vsyncpa [#allocation9 + $0x1], 0 }
   0xc   :  { %28 = vsyncpa [#allocation12], 0 }
   0xd   :  { %30 = vsyncpa [#allocation12 + $0x1], 0 }
   0xe   :  { %31 = vsyncpa [#allocation15], 0 }
   0xf   :  { %33 = vsyncpa [#allocation15 + $0x1], 0 }
  0x10   :  { %34 = vsyncpa [#allocation18], 0 }
  0x11   :  { %36 = vsyncpa [#allocation18 + $0x1], 0 }
  0x12   :  { %37 = vsyncpa [#allocation4], 0 }
  0x13   :  { %39 = vsyncpa [#allocation4 + $0x1], 0 }
  0x14   :  { %40 = vsyncpa [#allocation22], 0 }
  0x15   :  { %42 = vsyncpa [#allocation22 + $0x1], 0  ;;  %s16423_s25 = smov 0   ;;  %s16425_s26 = smov 0  }
  0x16   :  { %s16427_s27 = smov 0   ;;  %s16429_s28 = smov 0  }
  0x17   :  { %s16431_s29 = smov 0   ;;  %s16433_s30 = smov 0  }
  0x18 LB: > { %18893 = sst [smem:[#allocation31_spill]] %s16306_s25  ;;  %s16454_s14 = sadd.s32 4294967295, %s16326_s30   ;;  %s16326_s30 = sphi %s16433_s30, %s48_s30   ;;  %s16322_s29 = sphi %s16431_s29, %s18935_s29   ;;  %s16318_s28 = sphi %s16429_s28, %s18934_s28   ;;  %s16314_s27 = sphi %s16427_s27, %s18932_s27   ;;  %s16310_s26 = sphi %s16425_s26, %s18931_s26   ;;  %s16306_s25 = sphi %s16423_s25, %s18930_s25  }
  0x19   : > { %18894 = sst [smem:[#allocation32_spill]] %s16310_s26  ;;  %s13581_s15 = sadd.s32 4294967294, %s16326_s30  }
  0x1a   : > { %18895 = sst [smem:[#allocation33_spill]] %s16314_s27  ;;  %s60_s16 = sadd.s32 1, %s16322_s29 }
  0x1b   : > { %18896 = sst [smem:[#allocation34_spill]] %s16318_s28  ;;  %s69_s17 = sadd.s32 1, %s16314_s27 }
  0x1c   : > { %18897 = sst [smem:[#allocation35_spill]] %s16326_s30  ;;  %p62_p0 = scmp.ge.s32.totalorder %s60_s16, 2 }
  0x1d   : > { %18898 = sst [smem:[#allocation36_spill]] %s16454_s14  ;;  %p76_p1 = scmp.ne.s32.totalorder %s16314_s27, %s16310_s26 }
  0x1e   : > { %p77_p2 = scmp.eq.s32.totalorder %s16326_s30, 0  ;;  %p82_p3 = scmp.ne.s32.totalorder %s16310_s26, %s16306_s25 }
  0x1f   : > { %s18937_s16 = smov (%p62_p0, %s60_s16), 0  ;;  %p83_p5 = scmp.eq.s32.totalorder %s16454_s14, 0 }
  0x20   : > { %18899 = sst [smem:[#allocation37_spill]] %s18937_s16  ;;  %p16466_p4 = por %p77_p2, %p76_p1 }
  0x21   : > { %s64_s19 = ssub.s32 %s16322_s29, %s18937_s16  ;;  %p394_p6 = scmp.eq.s32.totalorder %s16454_s14, 1 }
  0x22   : > { %p67_p7 = scmp.eq.s32.totalorder %s64_s19, 0  ;;  %p16474_p8 = por %p83_p5, %p82_p3 }
  0x23   : > { %p16478_p9 = por %p394_p6, %p76_p1  ;;  %p400_p10 = scmp.eq.s32.totalorder %s13581_s15, 1 }
  0x24   : > { %s18901_s20 = scalar_select %p16474_p8, 1, 0 }
  0x25   : > { %s18903_s21 = scalar_select %p16478_p9, 1, 0 }
  0x26   : > { %18902 = sst [smem:[#allocation38_spill]] %s18901_s20  ;;  %p16485_p11 = por %p400_p10, %p82_p3 }
  0x27   : > { %18904 = sst [smem:[#allocation39_spill]] %s18903_s21  ;;  %p15364_p13 = scmp.lt.s32.totalorder %s16326_s30, 2 }
  0x28   : > { %s16483_s22 = scalar_select %p67_p7, %s16314_s27, %s69_s17  }
  0x29   : > { %s18906_s23 = scalar_select %p16485_p11, 1, 0 }
  0x2a   : > { %18905 = sst [smem:[#allocation40_spill]] %s16483_s22  ;;  %s16492_s24 = sand.u32 1, %s16314_s27  }
  0x2b   : > { %18907 = sst [smem:[#allocation41_spill]] %s18906_s23  ;;  %s16495_s19 = sand.u32 1, %s16326_s30  }
  0x2c   : > { %s15289_s16 = smul.u32 6144, %s16492_s24  ;;  %p16500_p0 = pnand %p15364_p13, %p16466_p4 }
  0x2d   : > { %s15290_s15 = smul.u32 98304, %s16322_s29  ;;  %s18909_s1 = sld [smem:[#allocation43_spill]] }
  0x2e   : > { %s473_s17 = scalar_lea.vmem [#allocation5], %s15289_s16  ;;  %s18882_s27 = scalar_lea.sflag [#allocation6], %s16495_s19 }
  0x2f   : > { %s480_s22 = sshll.u32 %s473_s17, 4  ;;  %p16511_p1 = pneg %p16500_p0  ;;  %s481_s22 = int_to_ptr.vmem [resolvable:$true] %s480_s22 }
  0x30   : > { %s15901_s18 = scalar_lea.vmem %s481_s22, 98304  ;;  %s16328_s7 = smov [#allocation5]  }
  0x31   : > { %p15902_p2 = scmp.ne.s32.totalorder %s481_s22, %s15901_s18  ;;  %s15906_s16 = sshll.u32 %s16328_s7, 4  ;;  %s15907_s16 = int_to_ptr.vmem [resolvable:$false] %s15906_s16 }
  0x32   : > { %s15908_s17 = scalar_lea.vmem %s15907_s16, 196608  ;;  %p15909_p5 = scmp.lt.s32.totalorder %s481_s22, %s15907_s16 }
  0x33   : > { %s479_s13 = scalar_lea.hbm %s18909_s1, %s15290_s15  ;;  %p15904_p3 = pnand %p15902_p2, %p16511_p1 }
  0x34   : > { %p15910_p6 = scmp.lt.s32.totalorder %s15908_s17, %s15901_s18 }
  0x35   : > { %p15905_p4 = pneg %p15904_p3 }
  0x36   : > { %p15911_p7 = por %p15910_p6, %p15909_p5 }
  0x38   : > { %p15912_p10 = pnand %p15911_p7, %p15905_p4 }
  0x3a   : > { %15915 = shalt.err (!%p15912_p10)
}
  0x3b   : > { %s16329_s12 = smov 512   ;;  %s16330_s23 = smov 32  }
  0x3c   : > { %15329 = dma.hbm_to_vmem [thread:$0]  (!%p16500_p0), %s479_s13, 98304, %s481_s22, %s18882_s27, %s16329_s12, %s16329_s12, %s16330_s23  }
  0x3d   : > { %p13607_p13 = scmp.ge.s32.totalorder %s16326_s30, 1  ;;  %p671_p2 = scmp.lt.s32.totalorder %s16326_s30, 3 }
  0x3e   : > { %s13589_s7 = sshll.u32 %s16492_s24, 12  ;;  %s15226_s18 = sshll.u32 %s16322_s29, 16 }
  0x3f   : > { %p16527_p3 = pnand %p13607_p13, %p671_p2  ;;  %s513_s16 = scalar_lea.vmem [#allocation8], %s13589_s7 }
  0x40   : > { %s520_s17 = sshll.u32 %s513_s16, 4  ;;  %s18913_s3 = sld [smem:[#allocation44_spill]]  ;;  %s521_s17 = int_to_ptr.vmem [resolvable:$true] %s520_s17 }
  0x41   : > { %s18911_s15 = scalar_select %p16527_p3, 1, 0 }
  0x42   : > { %s510_s20 = scalar_lea.sflag [#allocation9], %s16495_s19  ;;  %s15929_s26 = scalar_lea.vmem %s521_s17, 65536 }
  0x43   : > { %18912 = sst [smem:[#allocation42_spill]] %s18911_s15  ;;  %p15930_p4 = scmp.ne.s32.totalorder %s521_s17, %s15929_s26 }
  0x44   : > { %s16331_s13 = smov [#allocation8]  }
  0x45   : > { %p15932_p5 = pnand %p15930_p4, %p16511_p1  ;;  %s15934_s22 = sshll.u32 %s16331_s13, 4  ;;  %s15935_s22 = int_to_ptr.vmem [resolvable:$false] %s15934_s22 }
  0x46   : > { %s519_s14 = scalar_lea.hbm %s18913_s3, %s15226_s18  ;;  %s15936_s27 = scalar_lea.vmem %s15935_s22, 131072 }
  0x47   : > { %p15933_p6 = pneg %p15932_p5  ;;  %p15937_p7 = scmp.lt.s32.totalorder %s521_s17, %s15935_s22 }
  0x48   : > { %p15938_p10 = scmp.lt.s32.totalorder %s15936_s27, %s15929_s26 }
  0x4a   : > { %p15939_p13 = por %p15938_p10, %p15937_p7 }
  0x4c   : > { %p15940_p2 = pnand %p15939_p13, %p15933_p6 }
  0x4e   : > { %15943 = shalt.err (!%p15940_p2)
}
  0x4f   : > { %15335 = dma.hbm_to_vmem [thread:$0]  (!%p16500_p0), %s519_s14, 65536, %s521_s17, %s510_s20, %s16329_s12, %s16329_s12, %s16330_s23  }
  0x50   : > { %s13595_s1 = sshll.u32 %s16492_s24, 11  ;;  %s15228_s28 = sshll.u32 %s16322_s29, 15 }
  0x51   : > { %s559_s26 = scalar_lea.hbm %s18860_s5, %s15228_s28  ;;  %s553_s27 = scalar_lea.vmem [#allocation11], %s13595_s1 }
  0x52   : > { %s560_s16 = sshll.u32 %s553_s27, 4  ;;  %s18887_s13 = scalar_lea.sflag [#allocation12], %s16495_s19  ;;  %s561_s16 = int_to_ptr.vmem [resolvable:$true] %s560_s16 }
  0x53   : > { %s15957_s22 = scalar_lea.vmem %s561_s16, 32768  ;;  %s16332_s3 = smov [#allocation11]  }
  0x54   : > { %p15958_p4 = scmp.ne.s32.totalorder %s561_s16, %s15957_s22  ;;  %s15962_s30 = sshll.u32 %s16332_s3, 4  ;;  %s15963_s30 = int_to_ptr.vmem [resolvable:$false] %s15962_s30 }
  0x55   : > { %s15964_s15 = scalar_lea.vmem %s15963_s30, 65536  ;;  %p15965_p7 = scmp.lt.s32.totalorder %s561_s16, %s15963_s30 }
  0x56   : > { %p15960_p5 = pnand %p15958_p4, %p16511_p1  ;;  %p15966_p10 = scmp.lt.s32.totalorder %s15964_s15, %s15957_s22 }
  0x58   : > { %p15961_p6 = pneg %p15960_p5  ;;  %p15967_p13 = por %p15966_p10, %p15965_p7 }
  0x5a   : > { %p15968_p2 = pnand %p15967_p13, %p15961_p6 }
  0x5c   : > { %15971 = shalt.err (!%p15968_p2)
}
  0x5d   : > { %s16333_s14 = smov 256   ;;  %s16334_s12 = smov 16  }
  0x5e   : > { %15341 = dma.hbm_to_vmem [thread:$0]  (!%p16500_p0), %s559_s26, 32768, %s561_s16, %s18887_s13, %s16333_s14, %s16333_s14, %s16334_s12  }
  0x5f   : > { %s13601_s23 = sshll.u32 %s16322_s29, 4  ;;  %s600_s15 = scalar_lea.vmem [#allocation14], %s16492_s24 }
  0x60   : > { %s605_s30 = scalar_lea.hbm %s18863_s8, %s13601_s23  ;;  %s607_s1 = sshll.u32 %s600_s15, 4  ;;  %s608_s1 = int_to_ptr.vmem [resolvable:$true] %s607_s1 }
  0x61   : > { %s18886_s28 = scalar_lea.sflag [#allocation15], %s16495_s19  ;;  %s15985_s7 = scalar_lea.vmem %s608_s1, 16 }
  0x62   : > { %p15986_p4 = scmp.ne.s32.totalorder %s608_s1, %s15985_s7  ;;  %s16335_s18 = smov [#allocation14]  }
  0x63   : > { %s15990_s27 = sshll.u32 %s16335_s18, 4  ;;  %s15991_s27 = int_to_ptr.vmem [resolvable:$false] %s15990_s27 }
  0x64   : > { %p15988_p5 = pnand %p15986_p4, %p16511_p1  ;;  %s15992_s22 = scalar_lea.vmem %s15991_s27, 32 }
  0x65   : > { %p15993_p7 = scmp.lt.s32.totalorder %s608_s1, %s15991_s27  ;;  %p15994_p10 = scmp.lt.s32.totalorder %s15992_s22, %s15985_s7 }
  0x66   : > { %p15989_p6 = pneg %p15988_p5 }
  0x67   : > { %p15995_p13 = por %p15994_p10, %p15993_p7 }
  0x69   : > { %p15996_p2 = pnand %p15995_p13, %p15989_p6 }
  0x6b   : > { %15999 = shalt.err (!%p15996_p2)
}
  0x6c   : > { %15347 = dma.hbm_to_vmem [thread:$0]  (!%p16500_p0), %s605_s30, 16, %s608_s1, %s18886_s28  }
  0x6d   : > { %s643_s14 = scalar_lea.hbm %s18865_s10, %s13601_s23  ;;  %s638_s12 = scalar_lea.vmem [#allocation17], %s16492_s24 }
  0x6e   : > { %s645_s3 = sshll.u32 %s638_s12, 4  ;;  %s636_s17 = scalar_lea.sflag [#allocation18], %s16495_s19  ;;  %s646_s3 = int_to_ptr.vmem [resolvable:$true] %s645_s3 }
  0x6f   : > { %s16013_s15 = scalar_lea.vmem %s646_s3, 16  ;;  %s16336_s7 = smov [#allocation17]  }
  0x70   : > { %p16014_p4 = scmp.ne.s32.totalorder %s646_s3, %s16013_s15  ;;  %s16018_s18 = sshll.u32 %s16336_s7, 4  ;;  %s16019_s18 = int_to_ptr.vmem [resolvable:$false] %s16018_s18 }
  0x71   : > { %s16020_s27 = scalar_lea.vmem %s16019_s18, 32  ;;  %p16021_p7 = scmp.lt.s32.totalorder %s646_s3, %s16019_s18 }
  0x72   : > { %p16016_p5 = pnand %p16014_p4, %p16511_p1  ;;  %p16022_p10 = scmp.lt.s32.totalorder %s16020_s27, %s16013_s15 }
  0x74   : > { %p16017_p6 = pneg %p16016_p5  ;;  %p16023_p13 = por %p16022_p10, %p16021_p7 }
  0x76   : > { %p16024_p2 = pnand %p16023_p13, %p16017_p6 }
  0x78   : > { %16027 = shalt.err (!%p16024_p2)
}
  0x79   : > { %15353 = dma.hbm_to_vmem [thread:$0]  (!%p16500_p0), %s643_s14, 16, %s646_s3, %s636_s17  }
  0x7a   : > { %s15287_s23 = smul.u32 24, %s16492_s24  ;;  %s13586_s1 = sshll.u32 %s16492_s24, 3 }
  0x7b   : > { %s15288_s30 = smul.u32 384, %s16322_s29  ;;  %s15225_s7 = sshll.u32 %s16322_s29, 7 }
  0x7c   : > { %s452_s12 = scalar_lea.vmem [#allocation2], %s15287_s23  ;;  %s449_s18 = scalar_lea.sflag [#allocation3], %s16492_s24 }
  0x7d   : > { %s460_s16 = scalar_lea.hbm %s18855_s0, %s15288_s30  ;;  %s462_s15 = sshll.u32 %s452_s12, 4  ;;  %s463_s15 = int_to_ptr.vmem [resolvable:$true] %s462_s15 }
  0x7e   : > { %s16041_s27 = scalar_lea.vmem %s463_s15, 384  ;;  %s16337_s28 = smov [#allocation2]  }
  0x7f   : > { %p16042_p4 = scmp.ne.s32.totalorder %s463_s15, %s16041_s27  ;;  %s16046_s13 = sshll.u32 %s16337_s28, 4  ;;  %s16047_s13 = int_to_ptr.vmem [resolvable:$false] %s16046_s13 }
  0x80   : > { %s16048_s14 = scalar_lea.vmem %s16047_s13, 768  ;;  %p16049_p7 = scmp.lt.s32.totalorder %s463_s15, %s16047_s13 }
  0x81   : > { %p16044_p5 = pnand %p16042_p4, %p16511_p1  ;;  %p16050_p10 = scmp.lt.s32.totalorder %s16048_s14, %s16041_s27 }
  0x83   : > { %p16045_p6 = pneg %p16044_p5  ;;  %p16051_p13 = por %p16050_p10, %p16049_p7 }
  0x85   : > { %p16052_p2 = pnand %p16051_p13, %p16045_p6 }
  0x87   : > { %16055 = shalt.err (!%p16052_p2)
}
  0x88   : > { %15326 = dma.hbm_to_vmem [thread:$0]  (!%p16500_p0), %s460_s16, 384, %s463_s15, %s449_s18  }
  0x89   : > { %s500_s30 = scalar_lea.hbm %s18857_s2, %s15225_s7  ;;  %s494_s28 = scalar_lea.vmem [#allocation7], %s13586_s1 }
  0x8a   : > { %s502_s22 = sshll.u32 %s494_s28, 4  ;;  %s16338_s26 = smov [#allocation7]   ;;  %s503_s22 = int_to_ptr.vmem [resolvable:$true] %s502_s22 }
  0x8b   : > { %s16069_s13 = scalar_lea.vmem %s503_s22, 128  ;;  %s16074_s12 = sshll.u32 %s16338_s26, 4  ;;  %s16075_s12 = int_to_ptr.vmem [resolvable:$false] %s16074_s12 }
  0x8c   : > { %p16070_p4 = scmp.ne.s32.totalorder %s503_s22, %s16069_s13  ;;  %s16076_s27 = scalar_lea.vmem %s16075_s12, 256 }
  0x8d   : > { %p16077_p7 = scmp.lt.s32.totalorder %s503_s22, %s16075_s12  ;;  %p16078_p10 = scmp.lt.s32.totalorder %s16076_s27, %s16069_s13 }
  0x8e   : > { %p16072_p5 = pnand %p16070_p4, %p16511_p1 }
  0x8f   : > { %p16079_p13 = por %p16078_p10, %p16077_p7 }
  0x90   : > { %p16073_p6 = pneg %p16072_p5 }
  0x92   : > { %p16080_p2 = pnand %p16079_p13, %p16073_p6 }
  0x94   : > { %16083 = shalt.err (!%p16080_p2)
}
  0x95   : > { %s18914_s16 = scalar_lea.sflag [#allocation6], %s16495_s19  ;;  %s540_s14 = scalar_lea.hbm %s18859_s4, %s15225_s7 }
  0x96   : > { %15332 = dma.hbm_to_vmem [thread:$0]  (!%p16500_p0), %s500_s30, 128, %s503_s22, %s18914_s16  }
  0x97   : > { %s534_s3 = scalar_lea.vmem [#allocation10], %s13586_s1  ;;  %s13598_s28 = sshll.u32 %s16492_s24, 2 }
  0x98   : > { %s542_s23 = sshll.u32 %s534_s3, 4  ;;  %s16339_s26 = smov [#allocation10]   ;;  %s543_s23 = int_to_ptr.vmem [resolvable:$true] %s542_s23 }
  0x99   : > { %s16097_s13 = scalar_lea.vmem %s543_s23, 128  ;;  %s16102_s12 = sshll.u32 %s16339_s26, 4  ;;  %s16103_s12 = int_to_ptr.vmem [resolvable:$false] %s16102_s12 }
  0x9a   : > { %p16098_p4 = scmp.ne.s32.totalorder %s543_s23, %s16097_s13  ;;  %s16104_s27 = scalar_lea.vmem %s16103_s12, 256 }
  0x9b   : > { %p16105_p7 = scmp.lt.s32.totalorder %s543_s23, %s16103_s12  ;;  %p16106_p10 = scmp.lt.s32.totalorder %s16104_s27, %s16097_s13 }
  0x9c   : > { %p16100_p5 = pnand %p16098_p4, %p16511_p1 }
  0x9d   : > { %p16107_p13 = por %p16106_p10, %p16105_p7 }
  0x9e   : > { %p16101_p6 = pneg %p16100_p5 }
  0xa0   : > { %p16108_p2 = pnand %p16107_p13, %p16101_p6 }
  0xa2   : > { %16111 = shalt.err (!%p16108_p2)
}
  0xa3   : > { %15338 = dma.hbm_to_vmem [thread:$0]  (!%p16500_p0), %s540_s14, 128, %s543_s23, %s510_s20  }
  0xa4   : > { %s15229_s1 = sshll.u32 %s16322_s29, 6  ;;  %s574_s16 = scalar_lea.vmem [#allocation13], %s13598_s28 }
  0xa5   : > { %s580_s22 = scalar_lea.hbm %s18861_s6, %s15229_s1  ;;  %s582_s15 = sshll.u32 %s574_s16, 4  ;;  %s583_s15 = int_to_ptr.vmem [resolvable:$true] %s582_s15 }
  0xa6   : > { %s13602_s18 = sshll.u32 %s16492_s24, 4  ;;  %s16125_s3 = scalar_lea.vmem %s583_s15, 64 }
  0xa7   : > { %p16126_p4 = scmp.ne.s32.totalorder %s583_s15, %s16125_s3  ;;  %s16340_s13 = smov [#allocation13]  }
  0xa8   : > { %s16130_s26 = sshll.u32 %s16340_s13, 4  ;;  %s16131_s26 = int_to_ptr.vmem [resolvable:$false] %s16130_s26 }
  0xa9   : > { %p16128_p5 = pnand %p16126_p4, %p16511_p1  ;;  %s16132_s12 = scalar_lea.vmem %s16131_s26, 128 }
  0xaa   : > { %p16133_p7 = scmp.lt.s32.totalorder %s583_s15, %s16131_s26  ;;  %p16134_p10 = scmp.lt.s32.totalorder %s16132_s12, %s16125_s3 }
  0xab   : > { %p16129_p6 = pneg %p16128_p5 }
  0xac   : > { %p16135_p13 = por %p16134_p10, %p16133_p7 }
  0xae   : > { %p16136_p2 = pnand %p16135_p13, %p16129_p6 }
  0xb0   : > { %16139 = shalt.err (!%p16136_p2)
}
  0xb1   : > { %s18915_s20 = scalar_lea.sflag [#allocation12], %s16495_s19  ;;  %s15230_s14 = sshll.u32 %s16322_s29, 8 }
  0xb2   : > { %15344 = dma.hbm_to_vmem [thread:$0]  (!%p16500_p0), %s580_s22, 64, %s583_s15, %s18915_s20  }
  0xb3   : > { %s624_s27 = scalar_lea.hbm %s18864_s9, %s15230_s14  ;;  %s618_s1 = scalar_lea.vmem [#allocation16], %s13602_s18 }
  0xb4   : > { %s625_s7 = sshll.u32 %s618_s1, 4  ;;  %s15291_s30 = smul.u32 192, %s16492_s24  ;;  %s626_s7 = int_to_ptr.vmem [resolvable:$true] %s625_s7 }
  0xb5   : > { %s16153_s16 = scalar_lea.vmem %s626_s7, 256  ;;  %s16341_s3 = smov [#allocation16]  }
  0xb6   : > { %p16154_p4 = scmp.ne.s32.totalorder %s626_s7, %s16153_s16  ;;  %s16158_s13 = sshll.u32 %s16341_s3, 4  ;;  %s16159_s13 = int_to_ptr.vmem [resolvable:$false] %s16158_s13 }
  0xb7   : > { %s16160_s26 = scalar_lea.vmem %s16159_s13, 512  ;;  %p16161_p7 = scmp.lt.s32.totalorder %s626_s7, %s16159_s13 }
  0xb8   : > { %p16156_p5 = pnand %p16154_p4, %p16511_p1  ;;  %p16162_p10 = scmp.lt.s32.totalorder %s16160_s26, %s16153_s16 }
  0xba   : > { %p16157_p6 = pneg %p16156_p5  ;;  %p16163_p13 = por %p16162_p10, %p16161_p7 }
  0xbc   : > { %p16164_p2 = pnand %p16163_p13, %p16157_p6 }
  0xbe   : > { %16167 = shalt.err (!%p16164_p2)
}
  0xbf   : > { %s16342_s22 = smov 64   ;;  %s16343_s24 = smov 4  }
  0xc0   : > { %s18916_s15 = scalar_lea.sflag [#allocation15], %s16495_s19  ;;  %s15292_s18 = smul.u32 3072, %s16322_s29 }
  0xc1   : > { %15350 = dma.hbm_to_vmem [thread:$0]  (!%p16500_p0), %s624_s27, 256, %s626_s7, %s18916_s15, %s16342_s22, %s16342_s22, %s16343_s24  }
  0xc2   : > { %s656_s12 = scalar_lea.vmem [#allocation19], %s15291_s30  ;;  %s662_s28 = scalar_lea.hbm %s18866_s11, %s15292_s18 }
  0xc3   : > { %s663_s20 = sshll.u32 %s656_s12, 4  ;;  %s16344_s16 = smov [#allocation19]   ;;  %s664_s20 = int_to_ptr.vmem [resolvable:$true] %s663_s20 }
  0xc4   : > { %s16181_s1 = scalar_lea.vmem %s664_s20, 3072  ;;  %s16186_s3 = sshll.u32 %s16344_s16, 4  ;;  %s16187_s3 = int_to_ptr.vmem [resolvable:$false] %s16186_s3 }
  0xc5   : > { %p16182_p4 = scmp.ne.s32.totalorder %s664_s20, %s16181_s1  ;;  %s16188_s13 = scalar_lea.vmem %s16187_s3, 6144 }
  0xc6   : > { %p16189_p7 = scmp.lt.s32.totalorder %s664_s20, %s16187_s3  ;;  %p16190_p10 = scmp.lt.s32.totalorder %s16188_s13, %s16181_s1 }
  0xc7   : > { %p16184_p5 = pnand %p16182_p4, %p16511_p1 }
  0xc8   : > { %p16191_p13 = por %p16190_p10, %p16189_p7 }
  0xc9   : > { %p16185_p6 = pneg %p16184_p5 }
  0xcb   : > { %p16192_p2 = pnand %p16191_p13, %p16185_p6 }
  0xcd   : > { %16195 = shalt.err (!%p16192_p2)
}
  0xce   : > { %s16345_s27 = smov 768   ;;  %s16346_s7 = smov 48  }
  0xcf   : > { %15356 = dma.hbm_to_vmem [thread:$0]  (!%p16500_p0), %s662_s28, 3072, %s664_s20, %s636_s17, %s16345_s27, %s16345_s27, %s16346_s7  }
  0xd0   : > { %675 = sbr.rel (%p16527_p3) target bundleno = 2768 (0xad0), region = 68  ;;  %s18918_s21 = sld [smem:[#allocation32_spill]] (!%p16527_p3) }
  0xd6   : > { %s16654_s22 = sand.u32 1, %s18918_s21  }
  0xd7   : > { %s15293_s24 = smul.u32 24, %s16654_s22  ;;  %s678_s15 = scalar_lea.sflag [#allocation3], %s16654_s22 }
  0xd9   : > { %s16660_s18 = scalar_lea.vmem [#allocation2], %s15293_s24 }
  0xda   : > { %16273 = dma.done.wait (%p16474_p8), %s678_s15, 384  }
  0xdb   : > { %16275 = vsyncadd (%p16474_p8), %s678_s15, 4294966912  ;;  %s18920_s25 = sld [smem:[#allocation36_spill]]  ;;  %s15294_s17 = smul.u32 6144, %s16654_s22 }
  0xdd   : > { %s16671_s20 = scalar_lea.vmem [#allocation5], %s15294_s17 }
  0xe1   : > { %s16667_s19 = sand.u32 1, %s18920_s25  }
  0xe2   : > { %s687_s12 = scalar_lea.sflag [#allocation6], %s16667_s19 }
  0xe3   : > { %16277 = dma.done.wait (%p16474_p8), %s687_s12, 98432  }
  0xe4   : > { %16279 = vsyncadd (%p16474_p8), %s687_s12, 4294868864  ;;  %s13608_s14 = sshll.u32 %s16654_s22, 3  ;;  %s13609_s23 = sshll.u32 %s16654_s22, 12 }
  0xe5   : > { %s16679_s28 = scalar_lea.vmem [#allocation7], %s13608_s14  ;;  %s705_s1 = scalar_lea.sflag [#allocation9], %s16667_s19 }
  0xe6   : > { %s16682_s16 = scalar_lea.vmem [#allocation8], %s13609_s23 }
  0xe7   : > { %16281 = dma.done.wait (%p16474_p8), %s705_s1, 65664  }
  0xe8   : > { %16283 = vsyncadd (%p16474_p8), %s705_s1, 4294901632  ;;  %s13611_s3 = sshll.u32 %s16654_s22, 11  ;;  %s16689_s13 = scalar_lea.vmem [#allocation10], %s13608_s14 }
  0xe9   : > { %s723_s27 = scalar_lea.sflag [#allocation12], %s16667_s19  ;;  %s16692_s7 = scalar_lea.vmem [#allocation11], %s13611_s3 }
  0xea   : > { %16285 = dma.done.wait (%p16474_p8), %s723_s27, 32832  }
  0xeb   : > { %16287 = vsyncadd (%p16474_p8), %s723_s27, 4294934464  ;;  %s13612_s30 = sshll.u32 %s16654_s22, 2  ;;  %s741_s15 = scalar_lea.sflag [#allocation15], %s16667_s19 }
  0xec   : > { %s16699_s21 = scalar_lea.vmem [#allocation13], %s13612_s30  ;;  %s743_s25 = scalar_lea.vmem [#allocation14], %s16654_s22 }
  0xed   : > { %16289 = dma.done.wait (%p16474_p8), %s741_s15, 272  }
  0xee   : > { %16291 = vsyncadd (%p16474_p8), %s741_s15, 4294967024  ;;  %s13613_s17 = sshll.u32 %s16654_s22, 4  ;;  %s758_s14 = scalar_lea.sflag [#allocation18], %s16667_s19 }
  0xef   : > { %s16708_s12 = scalar_lea.vmem [#allocation16], %s13613_s17  ;;  %s760_s23 = scalar_lea.vmem [#allocation17], %s16654_s22 }
  0xf0   : > { %16293 = dma.done.wait (%p16474_p8), %s758_s14, 3088  }
  0xf1   : > { %16295 = vsyncadd (%p16474_p8), %s758_s14, 4294964208  ;;  %v1013_v0 = vld [vmem:[%s16671_s20 + $0x1c0] sm:$0xff]  ;;  %v16347_v32 = vmov 1983009808   ;;  %v886_v34 = vlaneseq  ;;  %v876_v59 = vld [vmem:[%s16660_s18] sm:$0xff]  ;;  %s18921_s26 = sld [smem:[#allocation34_spill]] }
  0xf2   : > { %v1017_v1 = vld [vmem:[%s16671_s20 + $0x1e0] sm:$0xff]  ;;  %v884_v33 = vunpack.c.l.s4 %v16347_v32  ;;  %s18922_s1 = sld [smem:[#allocation45_spill]]  ;;  %s15295_s3 = smul.u32 192, %s16654_s22 }
  0xf3   : > { %v1141_v2 = vld [vmem:[%s16671_s20 + $0x5c0] sm:$0xff]  ;;  %v13674_v3 = vcombine.high %v1013_v0, %v1017_v1  ;;  %v13673_v5 = vcombine.low %v1013_v0, %v1017_v1  ;;  %v16738_v44 = vshrl.u32 %v886_v34, 7  ;;  %v882_v0 = vcombine.high %v876_v59, %v876_v59  ;;  %s13614_s27 = sshll.u32 %s16654_s22, 1  ;;  %s18924_s17 = sld [smem:[#allocation47_spill]] }
  0xf4   : > { %v1145_v4 = vld [vmem:[%s16671_s20 + $0x5e0] sm:$0xff]  ;;  %v885_v43 = vunpack.c.0.s8 %v884_v33 }
  0xf5   : > { %v1005_v6 = vld [vmem:[%s16671_s20 + $0x180] sm:$0xff]  ;;  %v13802_v8 = vcombine.high %v1141_v2, %v1145_v4  ;;  %v13801_v9 = vcombine.low %v1141_v2, %v1145_v4  ;;  %5607 = vmatprep.subr.bf16.mxu0 %v13674_v3 }
  0xf6   : > { %v1009_v7 = vld [vmem:[%s16671_s20 + $0x1a0] sm:$0xff]  ;;  %5608 = vmatpush1.bf16.msra.mxu0 %v13673_v5  ;;  %v16745_v53 = vsub.s32 %v885_v43, %v16738_v44 }
  0xf7   : > { %v13666_v10 = vcombine.high %v1005_v6, %v1009_v7  ;;  %v1133_v11 = vld [vmem:[%s16671_s20 + $0x580] sm:$0xff]  ;;  %5648 = vmatprep.subr.bf16.mxu1 %v13802_v8  ;;  %v13665_v18 = vcombine.low %v1005_v6, %v1009_v7  ;;  %p870_p8 = scmp.lt.s32.totalorder %s18921_s26, 1 }
  0xf8   : > { %v1137_v12 = vld [vmem:[%s16671_s20 + $0x5a0] sm:$0xff]  ;;  %5649 = vmatpush1.bf16.msra.mxu1 %v13801_v9  ;;  %v16753_v63 = vrot.slane %v876_v59, %v16745_v53  ;;  %v16760_v5 = vrot.slane %v882_v0, %v16745_v53 }
  0xf9   : > { %v997_v13 = vld [vmem:[%s16671_s20 + $0x140] sm:$0xff]  ;;  %v13794_v14 = vcombine.high %v1133_v11, %v1137_v12  ;;  %5609 = vmatprep.subr.bf16.mxu0 %v13666_v10  ;;  %v13793_v19 = vcombine.low %v1133_v11, %v1137_v12 }
  0xfa   : > { %v1001_v15 = vld [vmem:[%s16671_s20 + $0x160] sm:$0xff]  ;;  %5610 = vmatpush1.bf16.msra.mxu0 %v13665_v18  ;;  %v897_v4 = vcombine.high %v16753_v63, %v16753_v63  ;;  %v898_v12 = vcombine.high %v16760_v5, %v16760_v5 }
  0xfb   : > { %v1125_v16 = vld [vmem:[%s16671_s20 + $0x540] sm:$0xff]  ;;  %v13658_v20 = vcombine.high %v997_v13, %v1001_v15  ;;  %5650 = vmatprep.subr.bf16.mxu1 %v13794_v14  ;;  %v13657_v26 = vcombine.low %v997_v13, %v1001_v15 }
  0xfc   : > { %v1129_v17 = vld [vmem:[%s16671_s20 + $0x560] sm:$0xff]  ;;  %5651 = vmatpush1.bf16.msra.mxu1 %v13793_v19  ;;  %v16764_v11 = vpack.c.bf16 %v897_v4, %v897_v4  ;;  %v877_v4 = vld [vmem:[%s16660_s18 + $0x8] sm:$0xff] }
  0xfd   : > { %v13786_v21 = vcombine.high %v1125_v16, %v1129_v17  ;;  %v989_v22 = vld [vmem:[%s16671_s20 + $0x100] sm:$0xff]  ;;  %5611 = vmatprep.subr.bf16.mxu0 %v13658_v20  ;;  %v13785_v27 = vcombine.low %v1125_v16, %v1129_v17  ;;  %v16771_v16 = vpack.c.bf16 %v898_v12, %v898_v12 }
  0xfe   : > { %v993_v23 = vld [vmem:[%s16671_s20 + $0x120] sm:$0xff]  ;;  %5612 = vmatpush1.bf16.msra.mxu0 %v13657_v26  ;;  %5639 = vmatprep.mubr.bf16.mxu0 %v16764_v11 }
  0xff   : > { %v1117_v24 = vld [vmem:[%s16671_s20 + $0x500] sm:$0xff]  ;;  %v13650_v28 = vcombine.high %v989_v22, %v993_v23  ;;  %5652 = vmatprep.subr.bf16.mxu1 %v13786_v21  ;;  %v13649_v37 = vcombine.low %v989_v22, %v993_v23  ;;  %5680 = vmatprep.mubr.bf16.mxu1 %v16771_v16 }
 0x100   : > { %v1121_v25 = vld [vmem:[%s16671_s20 + $0x520] sm:$0xff]  ;;  %5653 = vmatpush1.bf16.msra.mxu1 %v13785_v27 }
 0x101   : > { %v13778_v29 = vcombine.high %v1117_v24, %v1121_v25  ;;  %v981_v30 = vld [vmem:[%s16671_s20 + $0xc0] sm:$0xff]  ;;  %5613 = vmatprep.subr.bf16.mxu0 %v13650_v28  ;;  %v13777_v38 = vcombine.low %v1117_v24, %v1121_v25 }
 0x102   : > { %v985_v31 = vld [vmem:[%s16671_s20 + $0xe0] sm:$0xff]  ;;  %5614 = vmatpush1.bf16.msra.mxu0 %v13649_v37 }
 0x103   : > { %v1109_v35 = vld [vmem:[%s16671_s20 + $0x4c0] sm:$0xff]  ;;  %v13642_v39 = vcombine.high %v981_v30, %v985_v31  ;;  %5654 = vmatprep.subr.bf16.mxu1 %v13778_v29  ;;  %v13641_v47 = vcombine.low %v981_v30, %v985_v31 }
 0x104   : > { %v1113_v36 = vld [vmem:[%s16671_s20 + $0x4e0] sm:$0xff]  ;;  %5655 = vmatpush1.bf16.msra.mxu1 %v13777_v38 }
 0x105   : > { %v13770_v40 = vcombine.high %v1109_v35, %v1113_v36  ;;  %v973_v41 = vld [vmem:[%s16671_s20 + $0x80] sm:$0xff]  ;;  %5615 = vmatprep.subr.bf16.mxu0 %v13642_v39  ;;  %v13769_v48 = vcombine.low %v1109_v35, %v1113_v36 }
 0x106   : > { %v977_v42 = vld [vmem:[%s16671_s20 + $0xa0] sm:$0xff]  ;;  %5616 = vmatpush1.bf16.msra.mxu0 %v13641_v47 }
 0x107   : > { %v1101_v45 = vld [vmem:[%s16671_s20 + $0x480] sm:$0xff]  ;;  %v13634_v49 = vcombine.high %v973_v41, %v977_v42  ;;  %5656 = vmatprep.subr.bf16.mxu1 %v13770_v40  ;;  %v13633_v56 = vcombine.low %v973_v41, %v977_v42 }
 0x108   : > { %v1105_v46 = vld [vmem:[%s16671_s20 + $0x4a0] sm:$0xff]  ;;  %5657 = vmatpush1.bf16.msra.mxu1 %v13769_v48 }
 0x109   : > { %v13762_v50 = vcombine.high %v1101_v45, %v1105_v46  ;;  %v965_v51 = vld [vmem:[%s16671_s20 + $0x40] sm:$0xff]  ;;  %5617 = vmatprep.subr.bf16.mxu0 %v13634_v49  ;;  %v13761_v57 = vcombine.low %v1101_v45, %v1105_v46 }
 0x10a   : > { %v969_v52 = vld [vmem:[%s16671_s20 + $0x60] sm:$0xff]  ;;  %5618 = vmatpush1.bf16.msra.mxu0 %v13633_v56 }
 0x10b   : > { %v1093_v54 = vld [vmem:[%s16671_s20 + $0x440] sm:$0xff]  ;;  %v13626_v58 = vcombine.high %v965_v51, %v969_v52  ;;  %5658 = vmatprep.subr.bf16.mxu1 %v13762_v50  ;;  %v13625_v3 = vcombine.low %v965_v51, %v969_v52 }
 0x10c   : > { %v1097_v55 = vld [vmem:[%s16671_s20 + $0x460] sm:$0xff]  ;;  %5659 = vmatpush1.bf16.msra.mxu1 %v13761_v57 }
 0x10d   : > { %v13754_v60 = vcombine.high %v1093_v54, %v1097_v55  ;;  %v957_v61 = vld [vmem:[%s16671_s20] sm:$0xff]  ;;  %5619 = vmatprep.subr.bf16.mxu0 %v13626_v58  ;;  %v13753_v6 = vcombine.low %v1093_v54, %v1097_v55 }
 0x10e   : > { %v961_v62 = vld [vmem:[%s16671_s20 + $0x20] sm:$0xff]  ;;  %5620 = vmatpush1.bf16.msra.mxu0 %v13625_v3 }
 0x10f   : > { %v1085_v1 = vld [vmem:[%s16671_s20 + $0x400] sm:$0xff]  ;;  %v13618_v7 = vcombine.high %v957_v61, %v961_v62  ;;  %5660 = vmatprep.subr.bf16.mxu1 %v13754_v60  ;;  %v13617_v15 = vcombine.low %v957_v61, %v961_v62 }
 0x110   : > { %v1089_v2 = vld [vmem:[%s16671_s20 + $0x420] sm:$0xff]  ;;  %5661 = vmatpush1.bf16.msra.mxu1 %v13753_v6 }
 0x111   : > { %v13746_v8 = vcombine.high %v1085_v1, %v1089_v2  ;;  %v1077_v9 = vld [vmem:[%s16671_s20 + $0x3c0] sm:$0xff]  ;;  %5621 = vmatprep.subr.bf16.mxu0 %v13618_v7  ;;  %v13745_v17 = vcombine.low %v1085_v1, %v1089_v2 }
 0x112   : > { %v1081_v10 = vld [vmem:[%s16671_s20 + $0x3e0] sm:$0xff]  ;;  %5622 = vmatpush1.bf16.msra.mxu0 %v13617_v15 }
 0x113   : > { %v1205_v13 = vld [vmem:[%s16671_s20 + $0x7c0] sm:$0xff]  ;;  %v13738_v18 = vcombine.high %v1077_v9, %v1081_v10  ;;  %5662 = vmatprep.subr.bf16.mxu1 %v13746_v8  ;;  %v13737_v24 = vcombine.low %v1077_v9, %v1081_v10 }
 0x114   : > { %v1209_v14 = vld [vmem:[%s16671_s20 + $0x7e0] sm:$0xff]  ;;  %5663 = vmatpush1.bf16.msra.mxu1 %v13745_v17 }
 0x115   : > { %v13866_v19 = vcombine.high %v1205_v13, %v1209_v14  ;;  %v1069_v20 = vld [vmem:[%s16671_s20 + $0x380] sm:$0xff]  ;;  %5623 = vmatprep.subr.bf16.mxu0 %v13738_v18  ;;  %v13865_v25 = vcombine.low %v1205_v13, %v1209_v14  ;;  %v899_v14 = vcombine.high %v877_v4, %v877_v4 }
 0x116   : > { %v1073_v21 = vld [vmem:[%s16671_s20 + $0x3a0] sm:$0xff]  ;;  %5624 = vmatpush2.bf16.msra.mxu0 %v13737_v24 }
 0x117   : > { %v1197_v22 = vld [vmem:[%s16671_s20 + $0x780] sm:$0xff]  ;;  %v13730_v26 = vcombine.high %v1069_v20, %v1073_v21  ;;  %5664 = vmatprep.subr.bf16.mxu1 %v13866_v19  ;;  %v13729_v32 = vcombine.low %v1069_v20, %v1073_v21 }
 0x118   : > { %v1201_v23 = vld [vmem:[%s16671_s20 + $0x7a0] sm:$0xff]  ;;  %5665 = vmatpush2.bf16.msra.mxu1 %v13865_v25  ;;  %v16811_v25 = vrot.slane %v899_v14, %v16745_v53 }
 0x119   : > { %v13858_v27 = vcombine.high %v1197_v22, %v1201_v23  ;;  %v1061_v28 = vld [vmem:[%s16671_s20 + $0x340] sm:$0xff]  ;;  %5625 = vmatprep.subr.bf16.mxu0 %v13730_v26  ;;  %v13857_v33 = vcombine.low %v1197_v22, %v1201_v23  ;;  %v16806_v22 = vrot.slane %v877_v4, %v16745_v53 }
 0x11a   : > { %v1065_v29 = vld [vmem:[%s16671_s20 + $0x360] sm:$0xff]  ;;  %5626 = vmatpush2.bf16.msra.mxu0 %v13729_v32 }
 0x11b   : > { %v1189_v30 = vld [vmem:[%s16671_s20 + $0x740] sm:$0xff]  ;;  %v13722_v34 = vcombine.high %v1061_v28, %v1065_v29  ;;  %5666 = vmatprep.subr.bf16.mxu1 %v13858_v27  ;;  %v13721_v40 = vcombine.low %v1061_v28, %v1065_v29  ;;  %v914_v32 = vcombine.high %v16806_v22, %v16806_v22 }
 0x11c   : > { %v1193_v31 = vld [vmem:[%s16671_s20 + $0x760] sm:$0xff]  ;;  %5667 = vmatpush2.bf16.msra.mxu1 %v13857_v33  ;;  %v16819_v33 = vpack.c.bf16 %v16753_v63, %v16753_v63 }
 0x11d   : > { %v13850_v35 = vcombine.high %v1189_v30, %v1193_v31  ;;  %v1053_v36 = vld [vmem:[%s16671_s20 + $0x300] sm:$0xff]  ;;  %5627 = vmatprep.subr.bf16.mxu0 %v13722_v34  ;;  %v13849_v41 = vcombine.low %v1189_v30, %v1193_v31 }
 0x11e   : > { %v1057_v37 = vld [vmem:[%s16671_s20 + $0x320] sm:$0xff]  ;;  %5628 = vmatpush2.bf16.msra.mxu0 %v13721_v40 }
 0x11f   : > { %v1181_v38 = vld [vmem:[%s16671_s20 + $0x700] sm:$0xff]  ;;  %v13714_v42 = vcombine.high %v1053_v36, %v1057_v37  ;;  %5668 = vmatprep.subr.bf16.mxu1 %v13850_v35  ;;  %v13713_v49 = vcombine.low %v1053_v36, %v1057_v37  ;;  %v915_v36 = vcombine.high %v16811_v25, %v16811_v25  ;;  %v16827_v37 = vpack.c.bf16 %v16760_v5, %v16760_v5 }
 0x120   : > { %v1185_v39 = vld [vmem:[%s16671_s20 + $0x720] sm:$0xff]  ;;  %5669 = vmatpush2.bf16.msra.mxu1 %v13849_v41 }
 0x121   : > { %v13842_v43 = vcombine.high %v1181_v38, %v1185_v39  ;;  %v1045_v45 = vld [vmem:[%s16671_s20 + $0x2c0] sm:$0xff]  ;;  %5629 = vmatprep.subr.bf16.mxu0 %v13714_v42  ;;  %v13841_v50 = vcombine.low %v1181_v38, %v1185_v39  ;;  %v16836_v5 = vpack.c.bf16 %v915_v36, %v915_v36 }
 0x122   : > { %v1049_v46 = vld [vmem:[%s16671_s20 + $0x2e0] sm:$0xff]  ;;  %5630 = vmatpush2.bf16.msra.mxu0 %v13713_v49 }
 0x123   : > { %v1173_v47 = vld [vmem:[%s16671_s20 + $0x6c0] sm:$0xff]  ;;  %v13706_v51 = vcombine.high %v1045_v45, %v1049_v46  ;;  %5670 = vmatprep.subr.bf16.mxu1 %v13842_v43  ;;  %v13705_v58 = vcombine.low %v1045_v45, %v1049_v46  ;;  %v16833_v46 = vpack.c.bf16 %v914_v32, %v914_v32 }
 0x124   : > { %v1177_v48 = vld [vmem:[%s16671_s20 + $0x6e0] sm:$0xff]  ;;  %5671 = vmatpush2.bf16.msra.mxu1 %v13841_v50 }
 0x125   : > { %v13834_v52 = vcombine.high %v1173_v47, %v1177_v48  ;;  %v1037_v54 = vld [vmem:[%s16671_s20 + $0x280] sm:$0xff]  ;;  %5631 = vmatprep.subr.bf16.mxu0 %v13706_v51  ;;  %v13833_v59 = vcombine.low %v1173_v47, %v1177_v48 }
 0x126   : > { %v1041_v55 = vld [vmem:[%s16671_s20 + $0x2a0] sm:$0xff]  ;;  %5632 = vmatpush2.bf16.msra.mxu0 %v13705_v58 }
 0x127   : > { %v1165_v56 = vld [vmem:[%s16671_s20 + $0x680] sm:$0xff]  ;;  %v13698_v60 = vcombine.high %v1037_v54, %v1041_v55  ;;  %5672 = vmatprep.subr.bf16.mxu1 %v13834_v52  ;;  %v13697_v3 = vcombine.low %v1037_v54, %v1041_v55 }
 0x128   : > { %v1169_v57 = vld [vmem:[%s16671_s20 + $0x6a0] sm:$0xff]  ;;  %5673 = vmatpush2.bf16.msra.mxu1 %v13833_v59 }
 0x129   : > { %v13826_v61 = vcombine.high %v1165_v56, %v1169_v57  ;;  %v1029_v62 = vld [vmem:[%s16671_s20 + $0x240] sm:$0xff]  ;;  %5633 = vmatprep.subr.bf16.mxu0 %v13698_v60  ;;  %v13825_v6 = vcombine.low %v1165_v56, %v1169_v57 }
 0x12a   : > { %v1033_v0 = vld [vmem:[%s16671_s20 + $0x260] sm:$0xff]  ;;  %5634 = vmatpush2.bf16.msra.mxu0 %v13697_v3 }
 0x12b   : > { %v1157_v1 = vld [vmem:[%s16671_s20 + $0x640] sm:$0xff]  ;;  %v13690_v7 = vcombine.high %v1029_v62, %v1033_v0  ;;  %5674 = vmatprep.subr.bf16.mxu1 %v13826_v61  ;;  %v13689_v15 = vcombine.low %v1029_v62, %v1033_v0 }
 0x12c   : > { %v1161_v2 = vld [vmem:[%s16671_s20 + $0x660] sm:$0xff]  ;;  %5675 = vmatpush2.bf16.msra.mxu1 %v13825_v6 }
 0x12d   : > { %v13818_v8 = vcombine.high %v1157_v1, %v1161_v2  ;;  %v1021_v9 = vld [vmem:[%s16671_s20 + $0x200] sm:$0xff]  ;;  %5635 = vmatprep.subr.bf16.mxu0 %v13690_v7  ;;  %v13817_v17 = vcombine.low %v1157_v1, %v1161_v2 }
 0x12e   : > { %v1025_v10 = vld [vmem:[%s16671_s20 + $0x220] sm:$0xff]  ;;  %5636 = vmatpush2.bf16.msra.mxu0 %v13689_v15 }
 0x12f   : > { %v1149_v12 = vld [vmem:[%s16671_s20 + $0x600] sm:$0xff]  ;;  %v13682_v18 = vcombine.high %v1021_v9, %v1025_v10  ;;  %5676 = vmatprep.subr.bf16.mxu1 %v13818_v8  ;;  %v13681_v26 = vcombine.low %v1021_v9, %v1025_v10 }
 0x130   : > { %v1153_v13 = vld [vmem:[%s16671_s20 + $0x620] sm:$0xff]  ;;  %5677 = vmatpush2.bf16.msra.mxu1 %v13817_v17 }
 0x131   : > { %v13810_v19 = vcombine.high %v1149_v12, %v1153_v13  ;;  %v1269_v20 = vld [vmem:[%s16671_s20 + $0x9c0] sm:$0xff]  ;;  %5637 = vmatprep.subr.bf16.mxu0 %v13682_v18  ;;  %v13809_v27 = vcombine.low %v1149_v12, %v1153_v13 }
 0x132   : > { %v1273_v21 = vld [vmem:[%s16671_s20 + $0x9e0] sm:$0xff]  ;;  %5638 = vmatpush2.bf16.msra.mxu0 %v13681_v26 }
 0x133   : > { %v1397_v23 = vld [vmem:[%s16671_s20 + $0xdc0] sm:$0xff]  ;;  %v13930_v28 = vcombine.high %v1269_v20, %v1273_v21  ;;  %5678 = vmatprep.subr.bf16.mxu1 %v13810_v19  ;;  %v13929_v38 = vcombine.low %v1269_v20, %v1273_v21 }
 0x134   : > { %v1401_v24 = vld [vmem:[%s16671_s20 + $0xde0] sm:$0xff]  ;;  %5679 = vmatpush2.bf16.msra.mxu1 %v13809_v27 }
 0x135   : > { %v14058_v29 = vcombine.high %v1397_v23, %v1401_v24  ;;  %v1261_v30 = vld [vmem:[%s16671_s20 + $0x980] sm:$0xff]  ;;  %5689 = vmatprep.subr.bf16.mxu0 %v13930_v28  ;;  %v14057_v39 = vcombine.low %v1397_v23, %v1401_v24  ;;  %5640 = vmatmul.mubr.bf16.vlgmr.msra.gmra.mxu0 %v16819_v33 }
 0x136   : > { %v1265_v31 = vld [vmem:[%s16671_s20 + $0x9a0] sm:$0xff]  ;;  %5690 = vmatpush1.bf16.msra.mxu0 %v13929_v38  ;;  %5721 = vmatprep.mubr.bf16.mxu0 %v16833_v46 }
 0x137   : > { %v1389_v34 = vld [vmem:[%s16671_s20 + $0xd80] sm:$0xff]  ;;  %v13922_v40 = vcombine.high %v1261_v30, %v1265_v31  ;;  %5730 = vmatprep.subr.bf16.mxu1 %v14058_v29  ;;  %5681 = vmatmul.mubr.bf16.vlgmr.msra.gmra.mxu1 %v16827_v37  ;;  %v13921_v47 = vcombine.low %v1261_v30, %v1265_v31 }
 0x138   : > { %v1393_v35 = vld [vmem:[%s16671_s20 + $0xda0] sm:$0xff]  ;;  %5731 = vmatpush1.bf16.msra.mxu1 %v14057_v39  ;;  %5762 = vmatprep.mubr.bf16.mxu1 %v16836_v5 }
 0x139   : > { %v1253_v41 = vld [vmem:[%s16671_s20 + $0x940] sm:$0xff]  ;;  %v14050_v43 = vcombine.high %v1389_v34, %v1393_v35  ;;  %5691 = vmatprep.subr.bf16.mxu0 %v13922_v40  ;;  %v14049_v48 = vcombine.low %v1389_v34, %v1393_v35 }
 0x13a   : > { %v1257_v63 = vld [vmem:[%s16671_s20 + $0x960] sm:$0xff]  ;;  %5692 = vmatpush1.bf16.msra.mxu0 %v13921_v47 }
 0x13b   : > { %v1381_v42 = vld [vmem:[%s16671_s20 + $0xd40] sm:$0xff]  ;;  %v13914_v49 = vcombine.high %v1253_v41, %v1257_v63  ;;  %5732 = vmatprep.subr.bf16.mxu1 %v14050_v43  ;;  %v13913_v56 = vcombine.low %v1253_v41, %v1257_v63 }
 0x13c   : > { %v1385_v45 = vld [vmem:[%s16671_s20 + $0xd60] sm:$0xff]  ;;  %5733 = vmatpush1.bf16.msra.mxu1 %v14049_v48 }
 0x13d   : > { %v1245_v50 = vld [vmem:[%s16671_s20 + $0x900] sm:$0xff]  ;;  %v14042_v54 = vcombine.high %v1381_v42, %v1385_v45  ;;  %5693 = vmatprep.subr.bf16.mxu0 %v13914_v49  ;;  %v14041_v57 = vcombine.low %v1381_v42, %v1385_v45 }
 0x13e   : > { %v1249_v51 = vld [vmem:[%s16671_s20 + $0x920] sm:$0xff]  ;;  %5694 = vmatpush1.bf16.msra.mxu0 %v13913_v56 }
 0x13f   : > { %v1373_v52 = vld [vmem:[%s16671_s20 + $0xd00] sm:$0xff]  ;;  %v13906_v58 = vcombine.high %v1245_v50, %v1249_v51  ;;  %5734 = vmatprep.subr.bf16.mxu1 %v14042_v54  ;;  %v13905_v1 = vcombine.low %v1245_v50, %v1249_v51 }
 0x140   : > { %v1377_v55 = vld [vmem:[%s16671_s20 + $0xd20] sm:$0xff]  ;;  %5735 = vmatpush1.bf16.msra.mxu1 %v14041_v57 }
 0x141   : > { %v1237_v59 = vld [vmem:[%s16671_s20 + $0x8c0] sm:$0xff]  ;;  %v14034_v62 = vcombine.high %v1373_v52, %v1377_v55  ;;  %5695 = vmatprep.subr.bf16.mxu0 %v13906_v58  ;;  %v14033_v2 = vcombine.low %v1373_v52, %v1377_v55 }
 0x142   : > { %v1241_v60 = vld [vmem:[%s16671_s20 + $0x8e0] sm:$0xff]  ;;  %5696 = vmatpush1.bf16.msra.mxu0 %v13905_v1 }
 0x143   : > { %v1365_v61 = vld [vmem:[%s16671_s20 + $0xcc0] sm:$0xff]  ;;  %v13898_v3 = vcombine.high %v1237_v59, %v1241_v60  ;;  %5736 = vmatprep.subr.bf16.mxu1 %v14034_v62  ;;  %v13897_v10 = vcombine.low %v1237_v59, %v1241_v60 }
 0x144   : > { %v1369_v0 = vld [vmem:[%s16671_s20 + $0xce0] sm:$0xff]  ;;  %5737 = vmatpush1.bf16.msra.mxu1 %v14033_v2 }
 0x145   : > { %v1229_v4 = vld [vmem:[%s16671_s20 + $0x880] sm:$0xff]  ;;  %v14026_v8 = vcombine.high %v1365_v61, %v1369_v0  ;;  %5697 = vmatprep.subr.bf16.mxu0 %v13898_v3  ;;  %v14025_v12 = vcombine.low %v1365_v61, %v1369_v0 }
 0x146   : > { %v1233_v6 = vld [vmem:[%s16671_s20 + $0x8a0] sm:$0xff]  ;;  %5698 = vmatpush1.bf16.msra.mxu0 %v13897_v10 }
 0x147   : > { %v1357_v7 = vld [vmem:[%s16671_s20 + $0xc80] sm:$0xff]  ;;  %v13890_v13 = vcombine.high %v1229_v4, %v1233_v6  ;;  %5738 = vmatprep.subr.bf16.mxu1 %v14026_v8  ;;  %v13889_v20 = vcombine.low %v1229_v4, %v1233_v6 }
 0x148   : > { %v1361_v9 = vld [vmem:[%s16671_s20 + $0xca0] sm:$0xff]  ;;  %5739 = vmatpush1.bf16.msra.mxu1 %v14025_v12 }
 0x149   : > { %v1221_v14 = vld [vmem:[%s16671_s20 + $0x840] sm:$0xff]  ;;  %v14018_v18 = vcombine.high %v1357_v7, %v1361_v9  ;;  %5699 = vmatprep.subr.bf16.mxu0 %v13890_v13  ;;  %v14017_v21 = vcombine.low %v1357_v7, %v1361_v9 }
 0x14a   : > { %v1225_v15 = vld [vmem:[%s16671_s20 + $0x860] sm:$0xff]  ;;  %5700 = vmatpush1.bf16.msra.mxu0 %v13889_v20 }
 0x14b   : > { %v1349_v17 = vld [vmem:[%s16671_s20 + $0xc40] sm:$0xff]  ;;  %v13882_v23 = vcombine.high %v1221_v14, %v1225_v15  ;;  %5740 = vmatprep.subr.bf16.mxu1 %v14018_v18  ;;  %v13881_v30 = vcombine.low %v1221_v14, %v1225_v15 }
 0x14c   : > { %v1353_v19 = vld [vmem:[%s16671_s20 + $0xc60] sm:$0xff]  ;;  %5741 = vmatpush1.bf16.msra.mxu1 %v14017_v21 }
 0x14d   : > { %v1213_v24 = vld [vmem:[%s16671_s20 + $0x800] sm:$0xff]  ;;  %v14010_v28 = vcombine.high %v1349_v17, %v1353_v19  ;;  %5701 = vmatprep.subr.bf16.mxu0 %v13882_v23  ;;  %v14009_v31 = vcombine.low %v1349_v17, %v1353_v19 }
 0x14e   : > { %v1217_v26 = vld [vmem:[%s16671_s20 + $0x820] sm:$0xff]  ;;  %5702 = vmatpush1.bf16.msra.mxu0 %v13881_v30 }
 0x14f   : > { %v1341_v27 = vld [vmem:[%s16671_s20 + $0xc00] sm:$0xff]  ;;  %v13874_v32 = vcombine.high %v1213_v24, %v1217_v26  ;;  %5742 = vmatprep.subr.bf16.mxu1 %v14010_v28  ;;  %v13873_v40 = vcombine.low %v1213_v24, %v1217_v26 }
 0x150   : > { %v1345_v29 = vld [vmem:[%s16671_s20 + $0xc20] sm:$0xff]  ;;  %5743 = vmatpush1.bf16.msra.mxu1 %v14009_v31 }
 0x151   : > { %v1333_v34 = vld [vmem:[%s16671_s20 + $0xbc0] sm:$0xff]  ;;  %v14002_v38 = vcombine.high %v1341_v27, %v1345_v29  ;;  %5703 = vmatprep.subr.bf16.mxu0 %v13874_v32  ;;  %v14001_v41 = vcombine.low %v1341_v27, %v1345_v29 }
 0x152   : > { %v1337_v35 = vld [vmem:[%s16671_s20 + $0xbe0] sm:$0xff]  ;;  %5704 = vmatpush1.bf16.msra.mxu0 %v13873_v40 }
 0x153   : > { %v1461_v36 = vld [vmem:[%s16671_s20 + $0xfc0] sm:$0xff]  ;;  %v13994_v63 = vcombine.high %v1333_v34, %v1337_v35  ;;  %5744 = vmatprep.subr.bf16.mxu1 %v14002_v38  ;;  %v13993_v49 = vcombine.low %v1333_v34, %v1337_v35 }
 0x154   : > { %v1465_v39 = vld [vmem:[%s16671_s20 + $0xfe0] sm:$0xff]  ;;  %5745 = vmatpush1.bf16.msra.mxu1 %v14001_v41 }
 0x155   : > { %v1325_v42 = vld [vmem:[%s16671_s20 + $0xb80] sm:$0xff]  ;;  %v14122_v47 = vcombine.high %v1461_v36, %v1465_v39  ;;  %5705 = vmatprep.subr.bf16.mxu0 %v13994_v63  ;;  %v14121_v50 = vcombine.low %v1461_v36, %v1465_v39 }
 0x156   : > { %v1329_v43 = vld [vmem:[%s16671_s20 + $0xba0] sm:$0xff]  ;;  %5706 = vmatpush2.bf16.msra.mxu0 %v13993_v49 }
 0x157   : > { %v1453_v45 = vld [vmem:[%s16671_s20 + $0xf80] sm:$0xff]  ;;  %v13986_v51 = vcombine.high %v1325_v42, %v1329_v43  ;;  %5746 = vmatprep.subr.bf16.mxu1 %v14122_v47  ;;  %v13985_v58 = vcombine.low %v1325_v42, %v1329_v43 }
 0x158   : > { %v1457_v48 = vld [vmem:[%s16671_s20 + $0xfa0] sm:$0xff]  ;;  %5747 = vmatpush2.bf16.msra.mxu1 %v14121_v50 }
 0x159   : > { %v1317_v52 = vld [vmem:[%s16671_s20 + $0xb40] sm:$0xff]  ;;  %v14114_v56 = vcombine.high %v1453_v45, %v1457_v48  ;;  %5707 = vmatprep.subr.bf16.mxu0 %v13986_v51  ;;  %v14113_v59 = vcombine.low %v1453_v45, %v1457_v48 }
 0x15a   : > { %v1321_v54 = vld [vmem:[%s16671_s20 + $0xb60] sm:$0xff]  ;;  %5708 = vmatpush2.bf16.msra.mxu0 %v13985_v58 }
 0x15b   : > { %v1445_v55 = vld [vmem:[%s16671_s20 + $0xf40] sm:$0xff]  ;;  %v13978_v60 = vcombine.high %v1317_v52, %v1321_v54  ;;  %5748 = vmatprep.subr.bf16.mxu1 %v14114_v56  ;;  %v13977_v3 = vcombine.low %v1317_v52, %v1321_v54 }
 0x15c   : > { %v1449_v57 = vld [vmem:[%s16671_s20 + $0xf60] sm:$0xff]  ;;  %5749 = vmatpush2.bf16.msra.mxu1 %v14113_v59 }
 0x15d   : > { %v1309_v61 = vld [vmem:[%s16671_s20 + $0xb00] sm:$0xff]  ;;  %v14106_v1 = vcombine.high %v1445_v55, %v1449_v57  ;;  %5709 = vmatprep.subr.bf16.mxu0 %v13978_v60  ;;  %v14105_v4 = vcombine.low %v1445_v55, %v1449_v57 }
 0x15e   : > { %v1313_v62 = vld [vmem:[%s16671_s20 + $0xb20] sm:$0xff]  ;;  %5710 = vmatpush2.bf16.msra.mxu0 %v13977_v3 }
 0x15f   : > { %v1437_v0 = vld [vmem:[%s16671_s20 + $0xf00] sm:$0xff]  ;;  %v13970_v6 = vcombine.high %v1309_v61, %v1313_v62  ;;  %5750 = vmatprep.subr.bf16.mxu1 %v14106_v1  ;;  %v13969_v13 = vcombine.low %v1309_v61, %v1313_v62 }
 0x160   : > { %v1441_v2 = vld [vmem:[%s16671_s20 + $0xf20] sm:$0xff]  ;;  %5751 = vmatpush2.bf16.msra.mxu1 %v14105_v4  ;;  %v16918_v4 = vpack.c.bf16 %v16811_v25, %v16811_v25 }
 0x161   : > { %v1301_v7 = vld [vmem:[%s16671_s20 + $0xac0] sm:$0xff]  ;;  %v14098_v10 = vcombine.high %v1437_v0, %v1441_v2  ;;  %5711 = vmatprep.subr.bf16.mxu0 %v13970_v6  ;;  %v14097_v14 = vcombine.low %v1437_v0, %v1441_v2  ;;  %v16912_v2 = vpack.c.bf16 %v16806_v22, %v16806_v22 }
 0x162   : > { %v1305_v8 = vld [vmem:[%s16671_s20 + $0xae0] sm:$0xff]  ;;  %5712 = vmatpush2.bf16.msra.mxu0 %v13969_v13 }
 0x163   : > { %v1429_v9 = vld [vmem:[%s16671_s20 + $0xec0] sm:$0xff]  ;;  %v13962_v15 = vcombine.high %v1301_v7, %v1305_v8  ;;  %5752 = vmatprep.subr.bf16.mxu1 %v14098_v10  ;;  %v13961_v23 = vcombine.low %v1301_v7, %v1305_v8 }
 0x164   : > { %v1433_v12 = vld [vmem:[%s16671_s20 + $0xee0] sm:$0xff]  ;;  %5753 = vmatpush2.bf16.msra.mxu1 %v14097_v14 }
 0x165   : > { %v1293_v17 = vld [vmem:[%s16671_s20 + $0xa80] sm:$0xff]  ;;  %v14090_v20 = vcombine.high %v1429_v9, %v1433_v12  ;;  %5713 = vmatprep.subr.bf16.mxu0 %v13962_v15  ;;  %v14089_v26 = vcombine.low %v1429_v9, %v1433_v12 }
 0x166   : > { %v1297_v18 = vld [vmem:[%s16671_s20 + $0xaa0] sm:$0xff]  ;;  %5714 = vmatpush2.bf16.msra.mxu0 %v13961_v23 }
 0x167   : > { %v1421_v19 = vld [vmem:[%s16671_s20 + $0xe80] sm:$0xff]  ;;  %v13954_v27 = vcombine.high %v1293_v17, %v1297_v18  ;;  %5754 = vmatprep.subr.bf16.mxu1 %v14090_v20  ;;  %v13953_v34 = vcombine.low %v1293_v17, %v1297_v18 }
 0x168   : > { %v1425_v21 = vld [vmem:[%s16671_s20 + $0xea0] sm:$0xff]  ;;  %5755 = vmatpush2.bf16.msra.mxu1 %v14089_v26 }
 0x169   : > { %v1285_v24 = vld [vmem:[%s16671_s20 + $0xa40] sm:$0xff]  ;;  %v14082_v31 = vcombine.high %v1421_v19, %v1425_v21  ;;  %5715 = vmatprep.subr.bf16.mxu0 %v13954_v27  ;;  %v14081_v35 = vcombine.low %v1421_v19, %v1425_v21 }
 0x16a   : > { %v1289_v28 = vld [vmem:[%s16671_s20 + $0xa60] sm:$0xff]  ;;  %5716 = vmatpush2.bf16.msra.mxu0 %v13953_v34 }
 0x16b   : > { %v1413_v29 = vld [vmem:[%s16671_s20 + $0xe40] sm:$0xff]  ;;  %v13946_v36 = vcombine.high %v1285_v24, %v1289_v28  ;;  %5756 = vmatprep.subr.bf16.mxu1 %v14082_v31  ;;  %v13945_v43 = vcombine.low %v1285_v24, %v1289_v28 }
 0x16c   : > { %v1417_v30 = vld [vmem:[%s16671_s20 + $0xe60] sm:$0xff]  ;;  %5757 = vmatpush2.bf16.msra.mxu1 %v14081_v35 }
 0x16d   : > { %v878_v32 = vld [vmem:[%s16660_s18 + $0x10] sm:$0xff]  ;;  %v14074_v41 = vcombine.high %v1413_v29, %v1417_v30  ;;  %5717 = vmatprep.subr.bf16.mxu0 %v13946_v36  ;;  %v14073_v45 = vcombine.low %v1413_v29, %v1417_v30  ;;  %s871_s18 = scalar_select %p870_p8, %s18921_s26, 1 }
 0x16e   : > { %v1277_v38 = vld [vmem:[%s16671_s20 + $0xa00] sm:$0xff]  ;;  %v916_v42 = vcombine.high %v878_v32, %v878_v32  ;;  %v16899_v54 = vrot.slane %v878_v32, %v16745_v53  ;;  %5718 = vmatpush2.bf16.msra.mxu0 %v13945_v43 }
 0x16f   : > { %v1281_v39 = vld [vmem:[%s16671_s20 + $0xa20] sm:$0xff]  ;;  %5758 = vmatprep.subr.bf16.mxu1 %v14074_v41  ;;  %s15231_s19 = sshll.u32 %s871_s18, 8 }
 0x170   : > { %v1405_v40 = vld [vmem:[%s16671_s20 + $0xe00] sm:$0xff]  ;;  %v13938_v47 = vcombine.high %v1277_v38, %v1281_v39  ;;  %v16902_v55 = vrot.slane %v916_v42, %v16745_v53  ;;  %v13937_v56 = vcombine.low %v1277_v38, %v1281_v39  ;;  %5759 = vmatpush2.bf16.msra.mxu1 %v14073_v45  ;;  %v931_v1 = vcombine.high %v16899_v54, %v16899_v54 }
 0x171   : > { %v1409_v63 = vld [vmem:[%s16671_s20 + $0xe20] sm:$0xff] }
 0x172   : > { %v1525_v48 = vld [vmem:[%s16671_s20 + $0x11c0] sm:$0xff]  ;;  %v14066_v51 = vcombine.high %v1405_v40, %v1409_v63  ;;  %5719 = vmatprep.subr.bf16.mxu0 %v13938_v47  ;;  %v14065_v57 = vcombine.low %v1405_v40, %v1409_v63  ;;  %v932_v3 = vcombine.high %v16902_v55, %v16902_v55  ;;  %v16924_v14 = vpack.c.bf16 %v931_v1, %v931_v1 }
 0x173   : > { %v1529_v49 = vld [vmem:[%s16671_s20 + $0x11e0] sm:$0xff]  ;;  %5720 = vmatpush2.bf16.msra.mxu0 %v13937_v56 }
 0x174   : > { %v1653_v50 = vld [vmem:[%s16671_s20 + $0x15c0] sm:$0xff]  ;;  %v14186_v58 = vcombine.high %v1525_v48, %v1529_v49  ;;  %5760 = vmatprep.subr.bf16.mxu1 %v14066_v51  ;;  %v14185_v6 = vcombine.low %v1525_v48, %v1529_v49  ;;  %v16927_v25 = vpack.c.bf16 %v932_v3, %v932_v3 }
 0x175   : > { %v1657_v52 = vld [vmem:[%s16671_s20 + $0x15e0] sm:$0xff]  ;;  %5761 = vmatpush2.bf16.msra.mxu1 %v14065_v57 }
 0x176   : > { %v1517_v59 = vld [vmem:[%s16671_s20 + $0x1180] sm:$0xff]  ;;  %v14314_v62 = vcombine.high %v1653_v50, %v1657_v52  ;;  %5771 = vmatprep.subr.bf16.mxu0 %v14186_v58  ;;  %v14313_v7 = vcombine.low %v1653_v50, %v1657_v52  ;;  %5722 = vmatmul.mubr.bf16.vlgmr.msra.gmra.mxu0 %v16912_v2 }
 0x177   : > { %v1521_v60 = vld [vmem:[%s16671_s20 + $0x11a0] sm:$0xff]  ;;  %5772 = vmatpush1.bf16.msra.mxu0 %v14185_v6  ;;  %5803 = vmatprep.mubr.bf16.mxu0 %v16924_v14 }
 0x178   : > { %v1645_v61 = vld [vmem:[%s16671_s20 + $0x1580] sm:$0xff]  ;;  %v14178_v8 = vcombine.high %v1517_v59, %v1521_v60  ;;  %5812 = vmatprep.subr.bf16.mxu1 %v14314_v62  ;;  %5763 = vmatmul.mubr.bf16.vlgmr.msra.gmra.mxu1 %v16918_v4  ;;  %v14177_v15 = vcombine.low %v1517_v59, %v1521_v60 }
 0x179   : > { %v1649_v0 = vld [vmem:[%s16671_s20 + $0x15a0] sm:$0xff]  ;;  %5813 = vmatpush1.bf16.msra.mxu1 %v14313_v7  ;;  %5844 = vmatprep.mubr.bf16.mxu1 %v16927_v25 }
 0x17a   : > { %v1509_v9 = vld [vmem:[%s16671_s20 + $0x1140] sm:$0xff]  ;;  %v14306_v22 = vcombine.high %v1645_v61, %v1649_v0  ;;  %5773 = vmatprep.subr.bf16.mxu0 %v14178_v8  ;;  %v14305_v17 = vcombine.low %v1645_v61, %v1649_v0 }
 0x17b   : > { %v1513_v10 = vld [vmem:[%s16671_s20 + $0x1160] sm:$0xff]  ;;  %5774 = vmatpush1.bf16.msra.mxu0 %v14177_v15 }
 0x17c   : > { %v1637_v12 = vld [vmem:[%s16671_s20 + $0x1540] sm:$0xff]  ;;  %v14170_v18 = vcombine.high %v1509_v9, %v1513_v10  ;;  %5814 = vmatprep.subr.bf16.mxu1 %v14306_v22  ;;  %v14169_v26 = vcombine.low %v1509_v9, %v1513_v10 }
 0x17d   : > { %v1641_v13 = vld [vmem:[%s16671_s20 + $0x1560] sm:$0xff]  ;;  %5815 = vmatpush1.bf16.msra.mxu1 %v14305_v17 }
 0x17e   : > { %v1501_v19 = vld [vmem:[%s16671_s20 + $0x1100] sm:$0xff]  ;;  %v14298_v23 = vcombine.high %v1637_v12, %v1641_v13  ;;  %5775 = vmatprep.subr.bf16.mxu0 %v14170_v18  ;;  %v14297_v27 = vcombine.low %v1637_v12, %v1641_v13 }
 0x17f   : > { %v1505_v20 = vld [vmem:[%s16671_s20 + $0x1120] sm:$0xff]  ;;  %5776 = vmatpush1.bf16.msra.mxu0 %v14169_v26 }
 0x180   : > { %v1629_v21 = vld [vmem:[%s16671_s20 + $0x1500] sm:$0xff]  ;;  %v14162_v28 = vcombine.high %v1501_v19, %v1505_v20  ;;  %5816 = vmatprep.subr.bf16.mxu1 %v14298_v23  ;;  %v14161_v35 = vcombine.low %v1501_v19, %v1505_v20 }
 0x181   : > { %v1633_v24 = vld [vmem:[%s16671_s20 + $0x1520] sm:$0xff]  ;;  %5817 = vmatpush1.bf16.msra.mxu1 %v14297_v27 }
 0x182   : > { %v1493_v29 = vld [vmem:[%s16671_s20 + $0x10c0] sm:$0xff]  ;;  %v14290_v32 = vcombine.high %v1629_v21, %v1633_v24  ;;  %5777 = vmatprep.subr.bf16.mxu0 %v14162_v28  ;;  %v14289_v36 = vcombine.low %v1629_v21, %v1633_v24 }
 0x183   : > { %v1497_v30 = vld [vmem:[%s16671_s20 + $0x10e0] sm:$0xff]  ;;  %5778 = vmatpush1.bf16.msra.mxu0 %v14161_v35 }
 0x184   : > { %v1621_v31 = vld [vmem:[%s16671_s20 + $0x14c0] sm:$0xff]  ;;  %v14154_v38 = vcombine.high %v1493_v29, %v1497_v30  ;;  %5818 = vmatprep.subr.bf16.mxu1 %v14290_v32  ;;  %v14153_v43 = vcombine.low %v1493_v29, %v1497_v30 }
 0x185   : > { %v1625_v34 = vld [vmem:[%s16671_s20 + $0x14e0] sm:$0xff]  ;;  %5819 = vmatpush1.bf16.msra.mxu1 %v14289_v36 }
 0x186   : > { %v1485_v39 = vld [vmem:[%s16671_s20 + $0x1080] sm:$0xff]  ;;  %v14282_v63 = vcombine.high %v1621_v31, %v1625_v34  ;;  %5779 = vmatprep.subr.bf16.mxu0 %v14154_v38  ;;  %v14281_v45 = vcombine.low %v1621_v31, %v1625_v34 }
 0x187   : > { %v1489_v40 = vld [vmem:[%s16671_s20 + $0x10a0] sm:$0xff]  ;;  %5780 = vmatpush1.bf16.msra.mxu0 %v14153_v43 }
 0x188   : > { %v1613_v41 = vld [vmem:[%s16671_s20 + $0x1480] sm:$0xff]  ;;  %v14146_v47 = vcombine.high %v1485_v39, %v1489_v40  ;;  %5820 = vmatprep.subr.bf16.mxu1 %v14282_v63  ;;  %v14145_v56 = vcombine.low %v1485_v39, %v1489_v40 }
 0x189   : > { %v1617_v42 = vld [vmem:[%s16671_s20 + $0x14a0] sm:$0xff]  ;;  %5821 = vmatpush1.bf16.msra.mxu1 %v14281_v45 }
 0x18a   : > { %v1477_v48 = vld [vmem:[%s16671_s20 + $0x1040] sm:$0xff]  ;;  %v14274_v51 = vcombine.high %v1613_v41, %v1617_v42  ;;  %5781 = vmatprep.subr.bf16.mxu0 %v14146_v47  ;;  %v14273_v57 = vcombine.low %v1613_v41, %v1617_v42 }
 0x18b   : > { %v1481_v49 = vld [vmem:[%s16671_s20 + $0x1060] sm:$0xff]  ;;  %5782 = vmatpush1.bf16.msra.mxu0 %v14145_v56 }
 0x18c   : > { %v1605_v50 = vld [vmem:[%s16671_s20 + $0x1440] sm:$0xff]  ;;  %v14138_v58 = vcombine.high %v1477_v48, %v1481_v49  ;;  %5822 = vmatprep.subr.bf16.mxu1 %v14274_v51  ;;  %v14137_v1 = vcombine.low %v1477_v48, %v1481_v49 }
 0x18d   : > { %v1609_v52 = vld [vmem:[%s16671_s20 + $0x1460] sm:$0xff]  ;;  %5823 = vmatpush1.bf16.msra.mxu1 %v14273_v57 }
 0x18e   : > { %v1469_v59 = vld [vmem:[%s16671_s20 + $0x1000] sm:$0xff]  ;;  %v14266_v62 = vcombine.high %v1605_v50, %v1609_v52  ;;  %5783 = vmatprep.subr.bf16.mxu0 %v14138_v58  ;;  %v14265_v3 = vcombine.low %v1605_v50, %v1609_v52 }
 0x18f   : > { %v1473_v60 = vld [vmem:[%s16671_s20 + $0x1020] sm:$0xff]  ;;  %5784 = vmatpush1.bf16.msra.mxu0 %v14137_v1 }
 0x190   : > { %v1597_v61 = vld [vmem:[%s16671_s20 + $0x1400] sm:$0xff]  ;;  %v14130_v6 = vcombine.high %v1469_v59, %v1473_v60  ;;  %5824 = vmatprep.subr.bf16.mxu1 %v14266_v62  ;;  %v14129_v12 = vcombine.low %v1469_v59, %v1473_v60 }
 0x191   : > { %v1601_v0 = vld [vmem:[%s16671_s20 + $0x1420] sm:$0xff]  ;;  %5825 = vmatpush1.bf16.msra.mxu1 %v14265_v3 }
 0x192   : > { %v1589_v7 = vld [vmem:[%s16671_s20 + $0x13c0] sm:$0xff]  ;;  %v14258_v10 = vcombine.high %v1597_v61, %v1601_v0  ;;  %5785 = vmatprep.subr.bf16.mxu0 %v14130_v6  ;;  %v14257_v13 = vcombine.low %v1597_v61, %v1601_v0 }
 0x193   : > { %v1593_v8 = vld [vmem:[%s16671_s20 + $0x13e0] sm:$0xff]  ;;  %5786 = vmatpush1.bf16.msra.mxu0 %v14129_v12 }
 0x194   : > { %v1717_v9 = vld [vmem:[%s16671_s20 + $0x17c0] sm:$0xff]  ;;  %v14250_v15 = vcombine.high %v1589_v7, %v1593_v8  ;;  %5826 = vmatprep.subr.bf16.mxu1 %v14258_v10  ;;  %v14249_v23 = vcombine.low %v1589_v7, %v1593_v8 }
 0x195   : > { %v1721_v22 = vld [vmem:[%s16671_s20 + $0x17e0] sm:$0xff]  ;;  %5827 = vmatpush1.bf16.msra.mxu1 %v14257_v13 }
 0x196   : > { %v1581_v17 = vld [vmem:[%s16671_s20 + $0x1380] sm:$0xff]  ;;  %v14378_v20 = vcombine.high %v1717_v9, %v1721_v22  ;;  %5787 = vmatprep.subr.bf16.mxu0 %v14250_v15  ;;  %v14377_v24 = vcombine.low %v1717_v9, %v1721_v22 }
 0x197   : > { %v1585_v18 = vld [vmem:[%s16671_s20 + $0x13a0] sm:$0xff]  ;;  %5788 = vmatpush2.bf16.msra.mxu0 %v14249_v23 }
 0x198   : > { %v1709_v19 = vld [vmem:[%s16671_s20 + $0x1780] sm:$0xff]  ;;  %v14242_v26 = vcombine.high %v1581_v17, %v1585_v18  ;;  %5828 = vmatprep.subr.bf16.mxu1 %v14378_v20  ;;  %v14241_v32 = vcombine.low %v1581_v17, %v1585_v18 }
 0x199   : > { %v1713_v21 = vld [vmem:[%s16671_s20 + $0x17a0] sm:$0xff]  ;;  %5829 = vmatpush2.bf16.msra.mxu1 %v14377_v24  ;;  %v1014_v24 = vld [vmem:[%s16671_s20 + $0x1c8] sm:$0xff] }
 0x19a   : > { %v1573_v27 = vld [vmem:[%s16671_s20 + $0x1340] sm:$0xff]  ;;  %v14370_v30 = vcombine.high %v1709_v19, %v1713_v21  ;;  %5789 = vmatprep.subr.bf16.mxu0 %v14242_v26  ;;  %v14369_v34 = vcombine.low %v1709_v19, %v1713_v21  ;;  %v1018_v26 = vld [vmem:[%s16671_s20 + $0x1e8] sm:$0xff] }
 0x19b   : > { %v1577_v28 = vld [vmem:[%s16671_s20 + $0x1360] sm:$0xff]  ;;  %5790 = vmatpush2.bf16.msra.mxu0 %v14241_v32  ;;  %v13676_v32 = vcombine.high %v1014_v24, %v1018_v26 }
 0x19c   : > { %v1701_v29 = vld [vmem:[%s16671_s20 + $0x1740] sm:$0xff]  ;;  %v14234_v35 = vcombine.high %v1573_v27, %v1577_v28  ;;  %5830 = vmatprep.subr.bf16.mxu1 %v14370_v30  ;;  %v14233_v63 = vcombine.low %v1573_v27, %v1577_v28  ;;  %v1142_v27 = vld [vmem:[%s16671_s20 + $0x5c8] sm:$0xff] }
 0x19d   : > { %v1705_v31 = vld [vmem:[%s16671_s20 + $0x1760] sm:$0xff]  ;;  %5831 = vmatpush2.bf16.msra.mxu1 %v14369_v34  ;;  %v1006_v34 = vld [vmem:[%s16671_s20 + $0x188] sm:$0xff] }
 0x19e   : > { %v1565_v36 = vld [vmem:[%s16671_s20 + $0x1300] sm:$0xff]  ;;  %v14362_v40 = vcombine.high %v1701_v29, %v1705_v31  ;;  %5791 = vmatprep.subr.bf16.mxu0 %v14234_v35  ;;  %v14361_v42 = vcombine.low %v1701_v29, %v1705_v31  ;;  %v1146_v29 = vld [vmem:[%s16671_s20 + $0x5e8] sm:$0xff] }
 0x19f   : > { %v1569_v38 = vld [vmem:[%s16671_s20 + $0x1320] sm:$0xff]  ;;  %5792 = vmatpush2.bf16.msra.mxu0 %v14233_v63  ;;  %v1010_v35 = vld [vmem:[%s16671_s20 + $0x1a8] sm:$0xff]  ;;  %v13675_v63 = vcombine.low %v1014_v24, %v1018_v26 }
 0x1a0   : > { %v1693_v39 = vld [vmem:[%s16671_s20 + $0x1700] sm:$0xff]  ;;  %v14226_v43 = vcombine.high %v1565_v36, %v1569_v38  ;;  %5832 = vmatprep.subr.bf16.mxu1 %v14362_v40  ;;  %v14225_v51 = vcombine.low %v1565_v36, %v1569_v38  ;;  %v1134_v36 = vld [vmem:[%s16671_s20 + $0x588] sm:$0xff]  ;;  %v13804_v38 = vcombine.high %v1142_v27, %v1146_v29  ;;  %v16994_v40 = vpack.c.bf16 %v16899_v54, %v16899_v54 }
 0x1a1   : > { %v1697_v41 = vld [vmem:[%s16671_s20 + $0x1720] sm:$0xff]  ;;  %5833 = vmatpush2.bf16.msra.mxu1 %v14361_v42  ;;  %v13803_v42 = vcombine.low %v1142_v27, %v1146_v29  ;;  %v1130_v54 = vld [vmem:[%s16671_s20 + $0x568] sm:$0xff] }
 0x1a2   : > { %v1557_v45 = vld [vmem:[%s16671_s20 + $0x12c0] sm:$0xff]  ;;  %v14354_v49 = vcombine.high %v1693_v39, %v1697_v41  ;;  %5793 = vmatprep.subr.bf16.mxu0 %v14226_v43  ;;  %v14353_v52 = vcombine.low %v1693_v39, %v1697_v41  ;;  %v1138_v39 = vld [vmem:[%s16671_s20 + $0x5a8] sm:$0xff]  ;;  %v16998_v41 = vpack.c.bf16 %v16902_v55, %v16902_v55  ;;  %v13668_v43 = vcombine.high %v1006_v34, %v1010_v35 }
 0x1a3   : > { %v1561_v47 = vld [vmem:[%s16671_s20 + $0x12e0] sm:$0xff]  ;;  %5794 = vmatpush2.bf16.msra.mxu0 %v14225_v51  ;;  %v13667_v55 = vcombine.low %v1006_v34, %v1010_v35  ;;  %v970_v24 = vld [vmem:[%s16671_s20 + $0x68] sm:$0xff] }
 0x1a4   : > { %v1685_v48 = vld [vmem:[%s16671_s20 + $0x16c0] sm:$0xff]  ;;  %v14218_v56 = vcombine.high %v1557_v45, %v1561_v47  ;;  %5834 = vmatprep.subr.bf16.mxu1 %v14354_v49  ;;  %v14217_v62 = vcombine.low %v1557_v45, %v1561_v47  ;;  %v998_v45 = vld [vmem:[%s16671_s20 + $0x148] sm:$0xff]  ;;  %v13796_v49 = vcombine.high %v1134_v36, %v1138_v39 }
 0x1a5   : > { %v1689_v50 = vld [vmem:[%s16671_s20 + $0x16e0] sm:$0xff]  ;;  %5835 = vmatpush2.bf16.msra.mxu1 %v14353_v52  ;;  %v1002_v47 = vld [vmem:[%s16671_s20 + $0x168] sm:$0xff] }
 0x1a6   : > { %v1549_v57 = vld [vmem:[%s16671_s20 + $0x1280] sm:$0xff]  ;;  %v14346_v60 = vcombine.high %v1685_v48, %v1689_v50  ;;  %5795 = vmatprep.subr.bf16.mxu0 %v14218_v56  ;;  %v14345_v0 = vcombine.low %v1685_v48, %v1689_v50  ;;  %v1126_v48 = vld [vmem:[%s16671_s20 + $0x548] sm:$0xff]  ;;  %v13795_v50 = vcombine.low %v1134_v36, %v1138_v39  ;;  %v13660_v51 = vcombine.high %v998_v45, %v1002_v47 }
 0x1a7   : > { %v1553_v58 = vld [vmem:[%s16671_s20 + $0x12a0] sm:$0xff]  ;;  %5796 = vmatpush2.bf16.msra.mxu0 %v14217_v62  ;;  %v13788_v52 = vcombine.high %v1126_v48, %v1130_v54  ;;  %v990_v56 = vld [vmem:[%s16671_s20 + $0x108] sm:$0xff] }
 0x1a8   : > { %v1677_v59 = vld [vmem:[%s16671_s20 + $0x1680] sm:$0xff]  ;;  %v14210_v1 = vcombine.high %v1549_v57, %v1553_v58  ;;  %5836 = vmatprep.subr.bf16.mxu1 %v14346_v60  ;;  %v14209_v10 = vcombine.low %v1549_v57, %v1553_v58  ;;  %v994_v57 = vld [vmem:[%s16671_s20 + $0x128] sm:$0xff]  ;;  %v13659_v60 = vcombine.low %v998_v45, %v1002_v47 }
 0x1a9   : > { %v1681_v61 = vld [vmem:[%s16671_s20 + $0x16a0] sm:$0xff]  ;;  %5837 = vmatpush2.bf16.msra.mxu1 %v14345_v0  ;;  %v1118_v58 = vld [vmem:[%s16671_s20 + $0x508] sm:$0xff]  ;;  %v13652_v62 = vcombine.high %v990_v56, %v994_v57 }
 0x1aa   : > { %v1541_v3 = vld [vmem:[%s16671_s20 + $0x1240] sm:$0xff]  ;;  %v14338_v8 = vcombine.high %v1677_v59, %v1681_v61  ;;  %5797 = vmatprep.subr.bf16.mxu0 %v14210_v1  ;;  %v14337_v22 = vcombine.low %v1677_v59, %v1681_v61  ;;  %v1122_v59 = vld [vmem:[%s16671_s20 + $0x528] sm:$0xff]  ;;  %v13787_v61 = vcombine.low %v1126_v48, %v1130_v54 }
 0x1ab   : > { %v1545_v6 = vld [vmem:[%s16671_s20 + $0x1260] sm:$0xff]  ;;  %5798 = vmatpush2.bf16.msra.mxu0 %v14209_v10  ;;  %v13780_v0 = vcombine.high %v1118_v58, %v1122_v59  ;;  %v982_v1 = vld [vmem:[%s16671_s20 + $0xc8] sm:$0xff] }
 0x1ac   : > { %v1669_v7 = vld [vmem:[%s16671_s20 + $0x1640] sm:$0xff]  ;;  %v14202_v12 = vcombine.high %v1541_v3, %v1545_v6  ;;  %5838 = vmatprep.subr.bf16.mxu1 %v14338_v8  ;;  %v14201_v20 = vcombine.low %v1541_v3, %v1545_v6  ;;  %v986_v3 = vld [vmem:[%s16671_s20 + $0xe8] sm:$0xff]  ;;  %v13651_v8 = vcombine.low %v990_v56, %v994_v57 }
 0x1ad   : > { %v1673_v9 = vld [vmem:[%s16671_s20 + $0x1660] sm:$0xff]  ;;  %5839 = vmatpush2.bf16.msra.mxu1 %v14337_v22  ;;  %v1110_v6 = vld [vmem:[%s16671_s20 + $0x4c8] sm:$0xff]  ;;  %v13644_v10 = vcombine.high %v982_v1, %v986_v3 }
 0x1ae   : > { %v1533_v13 = vld [vmem:[%s16671_s20 + $0x1200] sm:$0xff]  ;;  %v14330_v18 = vcombine.high %v1669_v7, %v1673_v9  ;;  %5799 = vmatprep.subr.bf16.mxu0 %v14202_v12  ;;  %v14329_v21 = vcombine.low %v1669_v7, %v1673_v9  ;;  %v1114_v7 = vld [vmem:[%s16671_s20 + $0x4e8] sm:$0xff]  ;;  %v13779_v9 = vcombine.low %v1118_v58, %v1122_v59 }
 0x1af   : > { %v1537_v15 = vld [vmem:[%s16671_s20 + $0x1220] sm:$0xff]  ;;  %5800 = vmatpush2.bf16.msra.mxu0 %v14201_v20  ;;  %v13772_v22 = vcombine.high %v1110_v6, %v1114_v7  ;;  %v974_v12 = vld [vmem:[%s16671_s20 + $0x88] sm:$0xff] }
 0x1b0   : > { %v1661_v17 = vld [vmem:[%s16671_s20 + $0x1600] sm:$0xff]  ;;  %v14194_v23 = vcombine.high %v1533_v13, %v1537_v15  ;;  %5840 = vmatprep.subr.bf16.mxu1 %v14330_v18  ;;  %v14193_v30 = vcombine.low %v1533_v13, %v1537_v15  ;;  %v978_v13 = vld [vmem:[%s16671_s20 + $0xa8] sm:$0xff]  ;;  %v13643_v18 = vcombine.low %v982_v1, %v986_v3 }
 0x1b1   : > { %v1665_v19 = vld [vmem:[%s16671_s20 + $0x1620] sm:$0xff]  ;;  %5841 = vmatpush2.bf16.msra.mxu1 %v14329_v21  ;;  %v1102_v15 = vld [vmem:[%s16671_s20 + $0x488] sm:$0xff]  ;;  %v13636_v20 = vcombine.high %v974_v12, %v978_v13 }
 0x1b2   : > { %v14322_v28 = vcombine.high %v1661_v17, %v1665_v19  ;;  %5801 = vmatprep.subr.bf16.mxu0 %v14194_v23  ;;  %v14321_v31 = vcombine.low %v1661_v17, %v1665_v19  ;;  %v1106_v17 = vld [vmem:[%s16671_s20 + $0x4a8] sm:$0xff]  ;;  %v13771_v19 = vcombine.low %v1110_v6, %v1114_v7 }
 0x1b3   : > { %5802 = vmatpush2.bf16.msra.mxu0 %v14193_v30  ;;  %v13764_v21 = vcombine.high %v1102_v15, %v1106_v17  ;;  %v966_v23 = vld [vmem:[%s16671_s20 + $0x48] sm:$0xff]  ;;  %v13763_v29 = vcombine.low %v1102_v15, %v1106_v17 }
 0x1b4   : > { %5842 = vmatprep.subr.bf16.mxu1 %v14322_v28  ;;  %5853 = vmatprep.subr.bf16.mxu0 %v13676_v32  ;;  %v1094_v26 = vld [vmem:[%s16671_s20 + $0x448] sm:$0xff]  ;;  %v13635_v28 = vcombine.low %v974_v12, %v978_v13  ;;  %v13628_v30 = vcombine.high %v966_v23, %v970_v24 }
 0x1b5   : > { %5843 = vmatpush2.bf16.msra.mxu1 %v14321_v31  ;;  %v1098_v27 = vld [vmem:[%s16671_s20 + $0x468] sm:$0xff] }
 0x1b6   : > { %5894 = vmatprep.subr.bf16.mxu1 %v13804_v38  ;;  %5804 = vmatmul.mubr.bf16.vlgmr.msra.gmra.mxu0 %v16994_v40  ;;  %v13756_v31 = vcombine.high %v1094_v26, %v1098_v27  ;;  %v958_v32 = vld [vmem:[%s16671_s20 + $0x8] sm:$0xff]  ;;  %v13627_v38 = vcombine.low %v966_v23, %v970_v24  ;;  %v13755_v39 = vcombine.low %v1094_v26, %v1098_v27 }
 0x1b7   : > { %5854 = vmatpush1.bf16.msra.mxu0 %v13675_v63  ;;  %5885 = vmatprep.mubr.bf16.mxu0 %v16764_v11  ;;  %v962_v34 = vld [vmem:[%s16671_s20 + $0x28] sm:$0xff] }
 0x1b8   : > { %5845 = vmatmul.mubr.bf16.vlgmr.msra.gmra.mxu1 %v16998_v41  ;;  %5855 = vmatprep.subr.bf16.mxu0 %v13668_v43  ;;  %v1086_v35 = vld [vmem:[%s16671_s20 + $0x408] sm:$0xff]  ;;  %v13620_v63 = vcombine.high %v958_v32, %v962_v34 }
 0x1b9   : > { %5895 = vmatpush1.bf16.msra.mxu1 %v13803_v42  ;;  %5926 = vmatprep.mubr.bf16.mxu1 %v16771_v16  ;;  %v1090_v36 = vld [vmem:[%s16671_s20 + $0x428] sm:$0xff] }
 0x1ba   : > { %5896 = vmatprep.subr.bf16.mxu1 %v13796_v49  ;;  %v13748_v42 = vcombine.high %v1086_v35, %v1090_v36  ;;  %v1078_v43 = vld [vmem:[%s16671_s20 + $0x3c8] sm:$0xff]  ;;  %v13619_v49 = vcombine.low %v958_v32, %v962_v34  ;;  %v13747_v54 = vcombine.low %v1086_v35, %v1090_v36 }
 0x1bb   : > { %5856 = vmatpush1.bf16.msra.mxu0 %v13667_v55  ;;  %v1082_v45 = vld [vmem:[%s16671_s20 + $0x3e8] sm:$0xff] }
 0x1bc   : > { %5857 = vmatprep.subr.bf16.mxu0 %v13660_v51  ;;  %v1206_v47 = vld [vmem:[%s16671_s20 + $0x7c8] sm:$0xff]  ;;  %v13740_v55 = vcombine.high %v1078_v43, %v1082_v45  ;;  %v13739_v58 = vcombine.low %v1078_v43, %v1082_v45 }
 0x1bd   : > { %5897 = vmatpush1.bf16.msra.mxu1 %v13795_v50  ;;  %v1210_v48 = vld [vmem:[%s16671_s20 + $0x7e8] sm:$0xff] }
 0x1be   : > { %5898 = vmatprep.subr.bf16.mxu1 %v13788_v52  ;;  %v13868_v50 = vcombine.high %v1206_v47, %v1210_v48  ;;  %v1070_v51 = vld [vmem:[%s16671_s20 + $0x388] sm:$0xff]  ;;  %v13867_v59 = vcombine.low %v1206_v47, %v1210_v48 }
 0x1bf   : > { %5858 = vmatpush1.bf16.msra.mxu0 %v13659_v60  ;;  %v1074_v52 = vld [vmem:[%s16671_s20 + $0x3a8] sm:$0xff] }
 0x1c0   : > { %5859 = vmatprep.subr.bf16.mxu0 %v13652_v62  ;;  %v1198_v56 = vld [vmem:[%s16671_s20 + $0x788] sm:$0xff]  ;;  %v13732_v60 = vcombine.high %v1070_v51, %v1074_v52  ;;  %v13731_v6 = vcombine.low %v1070_v51, %v1074_v52 }
 0x1c1   : > { %5899 = vmatpush1.bf16.msra.mxu1 %v13787_v61  ;;  %v1202_v57 = vld [vmem:[%s16671_s20 + $0x7a8] sm:$0xff] }
 0x1c2   : > { %5900 = vmatprep.subr.bf16.mxu1 %v13780_v0  ;;  %v13860_v61 = vcombine.high %v1198_v56, %v1202_v57  ;;  %v1062_v62 = vld [vmem:[%s16671_s20 + $0x348] sm:$0xff]  ;;  %v13859_v7 = vcombine.low %v1198_v56, %v1202_v57 }
 0x1c3   : > { %5860 = vmatpush1.bf16.msra.mxu0 %v13651_v8  ;;  %v1066_v0 = vld [vmem:[%s16671_s20 + $0x368] sm:$0xff] }
 0x1c4   : > { %5861 = vmatprep.subr.bf16.mxu0 %v13644_v10  ;;  %v1190_v1 = vld [vmem:[%s16671_s20 + $0x748] sm:$0xff]  ;;  %v13724_v8 = vcombine.high %v1062_v62, %v1066_v0  ;;  %v13723_v15 = vcombine.low %v1062_v62, %v1066_v0 }
 0x1c5   : > { %5901 = vmatpush1.bf16.msra.mxu1 %v13779_v9  ;;  %v1194_v3 = vld [vmem:[%s16671_s20 + $0x768] sm:$0xff] }
 0x1c6   : > { %5902 = vmatprep.subr.bf16.mxu1 %v13772_v22  ;;  %v13852_v9 = vcombine.high %v1190_v1, %v1194_v3  ;;  %v1054_v10 = vld [vmem:[%s16671_s20 + $0x308] sm:$0xff]  ;;  %v13851_v17 = vcombine.low %v1190_v1, %v1194_v3  ;;  %v17065_v3 = vsub.s32 0, %v16738_v44 }
 0x1c7   : > { %5862 = vmatpush1.bf16.msra.mxu0 %v13643_v18  ;;  %v1058_v22 = vld [vmem:[%s16671_s20 + $0x328] sm:$0xff] }
 0x1c8   : > { %5863 = vmatprep.subr.bf16.mxu0 %v13636_v20  ;;  %v1182_v12 = vld [vmem:[%s16671_s20 + $0x708] sm:$0xff]  ;;  %v13716_v18 = vcombine.high %v1054_v10, %v1058_v22  ;;  %v13715_v26 = vcombine.low %v1054_v10, %v1058_v22  ;;  %v17069_v10 = vsub.s32 1, %v16738_v44 }
 0x1c9   : > { %5903 = vmatpush1.bf16.msra.mxu1 %v13771_v19  ;;  %v1186_v13 = vld [vmem:[%s16671_s20 + $0x728] sm:$0xff] }
 0x1ca   : > { %5904 = vmatprep.subr.bf16.mxu1 %v13764_v21  ;;  %v13844_v19 = vcombine.high %v1182_v12, %v1186_v13  ;;  %v1046_v20 = vld [vmem:[%s16671_s20 + $0x2c8] sm:$0xff]  ;;  %v13843_v27 = vcombine.low %v1182_v12, %v1186_v13 }
 0x1cb   : > { %5864 = vmatpush1.bf16.msra.mxu0 %v13635_v28  ;;  %v1050_v21 = vld [vmem:[%s16671_s20 + $0x2e8] sm:$0xff] }
 0x1cc   : > { %5865 = vmatprep.subr.bf16.mxu0 %v13628_v30  ;;  %v1174_v23 = vld [vmem:[%s16671_s20 + $0x6c8] sm:$0xff]  ;;  %v13708_v28 = vcombine.high %v1046_v20, %v1050_v21  ;;  %v13707_v35 = vcombine.low %v1046_v20, %v1050_v21 }
 0x1cd   : > { %5905 = vmatpush1.bf16.msra.mxu1 %v13763_v29  ;;  %v1178_v24 = vld [vmem:[%s16671_s20 + $0x6e8] sm:$0xff] }
 0x1ce   : > { %5906 = vmatprep.subr.bf16.mxu1 %v13756_v31  ;;  %v13836_v29 = vcombine.high %v1174_v23, %v1178_v24  ;;  %v1038_v30 = vld [vmem:[%s16671_s20 + $0x288] sm:$0xff]  ;;  %v13835_v36 = vcombine.low %v1174_v23, %v1178_v24 }
 0x1cf   : > { %5866 = vmatpush1.bf16.msra.mxu0 %v13627_v38  ;;  %v1042_v31 = vld [vmem:[%s16671_s20 + $0x2a8] sm:$0xff] }
 0x1d0   : > { %5867 = vmatprep.subr.bf16.mxu0 %v13620_v63  ;;  %v1166_v32 = vld [vmem:[%s16671_s20 + $0x688] sm:$0xff]  ;;  %v13700_v38 = vcombine.high %v1038_v30, %v1042_v31  ;;  %v13699_v47 = vcombine.low %v1038_v30, %v1042_v31 }
 0x1d1   : > { %5907 = vmatpush1.bf16.msra.mxu1 %v13755_v39  ;;  %v1170_v34 = vld [vmem:[%s16671_s20 + $0x6a8] sm:$0xff] }
 0x1d2   : > { %5908 = vmatprep.subr.bf16.mxu1 %v13748_v42  ;;  %v13828_v39 = vcombine.high %v1166_v32, %v1170_v34  ;;  %v1030_v63 = vld [vmem:[%s16671_s20 + $0x248] sm:$0xff]  ;;  %v13827_v48 = vcombine.low %v1166_v32, %v1170_v34 }
 0x1d3   : > { %5868 = vmatpush1.bf16.msra.mxu0 %v13619_v49  ;;  %v1034_v42 = vld [vmem:[%s16671_s20 + $0x268] sm:$0xff] }
 0x1d4   : > { %5869 = vmatprep.subr.bf16.mxu0 %v13740_v55  ;;  %v1158_v43 = vld [vmem:[%s16671_s20 + $0x648] sm:$0xff]  ;;  %v13692_v49 = vcombine.high %v1030_v63, %v1034_v42  ;;  %v13691_v56 = vcombine.low %v1030_v63, %v1034_v42 }
 0x1d5   : > { %5909 = vmatpush1.bf16.msra.mxu1 %v13747_v54  ;;  %v1162_v45 = vld [vmem:[%s16671_s20 + $0x668] sm:$0xff] }
 0x1d6   : > { %5910 = vmatprep.subr.bf16.mxu1 %v13868_v50  ;;  %v13820_v54 = vcombine.high %v1158_v43, %v1162_v45  ;;  %v1022_v55 = vld [vmem:[%s16671_s20 + $0x208] sm:$0xff]  ;;  %v13819_v57 = vcombine.low %v1158_v43, %v1162_v45 }
 0x1d7   : > { %5870 = vmatpush2.bf16.msra.mxu0 %v13739_v58  ;;  %v1026_v50 = vld [vmem:[%s16671_s20 + $0x228] sm:$0xff] }
 0x1d8   : > { %5871 = vmatprep.subr.bf16.mxu0 %v13732_v60  ;;  %v1150_v51 = vld [vmem:[%s16671_s20 + $0x608] sm:$0xff]  ;;  %v13684_v58 = vcombine.high %v1022_v55, %v1026_v50  ;;  %v13683_v1 = vcombine.low %v1022_v55, %v1026_v50 }
 0x1d9   : > { %5911 = vmatpush2.bf16.msra.mxu1 %v13867_v59  ;;  %v1154_v52 = vld [vmem:[%s16671_s20 + $0x628] sm:$0xff] }
 0x1da   : > { %5912 = vmatprep.subr.bf16.mxu1 %v13860_v61  ;;  %v13812_v59 = vcombine.high %v1150_v51, %v1154_v52  ;;  %v1270_v60 = vld [vmem:[%s16671_s20 + $0x9c8] sm:$0xff] }
 0x1db   : > { %5872 = vmatpush2.bf16.msra.mxu0 %v13731_v6  ;;  %v1274_v61 = vld [vmem:[%s16671_s20 + $0x9e8] sm:$0xff]  ;;  %v13811_v6 = vcombine.low %v1150_v51, %v1154_v52 }
 0x1dc   : > { %5873 = vmatprep.subr.bf16.mxu0 %v13724_v8  ;;  %v1398_v62 = vld [vmem:[%s16671_s20 + $0xdc8] sm:$0xff]  ;;  %v13932_v8 = vcombine.high %v1270_v60, %v1274_v61 }
 0x1dd   : > { %5913 = vmatpush2.bf16.msra.mxu1 %v13859_v7  ;;  %v1402_v0 = vld [vmem:[%s16671_s20 + $0xde8] sm:$0xff] }
 0x1de   : > { %5914 = vmatprep.subr.bf16.mxu1 %v13852_v9  ;;  %v1725_v7 = vld [vmem:[%s16679_s28] sm:$0xff]  ;;  %v14060_v9 = vcombine.high %v1398_v62, %v1402_v0 }
 0x1df   : > { %5874 = vmatpush2.bf16.msra.mxu0 %v13723_v15  ;;  %v1262_v22 = vld [vmem:[%s16671_s20 + $0x988] sm:$0xff]  ;;  %v1734_v21 = vrot.slane %v1725_v7, %v17069_v10 }
 0x1e0   : > { %5875 = vmatprep.subr.bf16.mxu0 %v13716_v18  ;;  %v1266_v12 = vld [vmem:[%s16671_s20 + $0x9a8] sm:$0xff]  ;;  %v13931_v18 = vcombine.low %v1270_v60, %v1274_v61 }
 0x1e1   : > { %5915 = vmatpush2.bf16.msra.mxu1 %v13851_v17  ;;  %v1390_v13 = vld [vmem:[%s16671_s20 + $0xd88] sm:$0xff]  ;;  %v1730_v17 = vrot.slane %v1725_v7, %v17065_v3  ;;  %v13924_v20 = vcombine.high %v1262_v22, %v1266_v12  ;;  %v13923_v32 = vcombine.low %v1262_v22, %v1266_v12 }
 0x1e2   : > { %5916 = vmatprep.subr.bf16.mxu1 %v13844_v19  ;;  %v1394_v15 = vld [vmem:[%s16671_s20 + $0xda8] sm:$0xff]  ;;  %v14059_v19 = vcombine.low %v1398_v62, %v1402_v0 }
 0x1e3   : > { %5876 = vmatpush2.bf16.msra.mxu0 %v13715_v26  ;;  %v14052_v23 = vcombine.high %v1390_v13, %v1394_v15  ;;  %v1254_v24 = vld [vmem:[%s16671_s20 + $0x948] sm:$0xff] }
 0x1e4   : > { %5877 = vmatprep.subr.bf16.mxu0 %v13708_v28  ;;  %v1258_v26 = vld [vmem:[%s16671_s20 + $0x968] sm:$0xff] }
 0x1e5   : > { %5917 = vmatpush2.bf16.msra.mxu1 %v13843_v27  ;;  %v1382_v28 = vld [vmem:[%s16671_s20 + $0xd48] sm:$0xff]  ;;  %v13915_v50 = vcombine.low %v1254_v24, %v1258_v26 }
 0x1e6   : > { %5918 = vmatprep.subr.bf16.mxu1 %v13836_v29  ;;  %v1386_v29 = vld [vmem:[%s16671_s20 + $0xd68] sm:$0xff] }
 0x1e7   : > { %5878 = vmatpush2.bf16.msra.mxu0 %v13707_v35  ;;  %v14051_v35 = vcombine.low %v1390_v13, %v1394_v15  ;;  %v14044_v42 = vcombine.high %v1382_v28, %v1386_v29  ;;  %v1246_v43 = vld [vmem:[%s16671_s20 + $0x908] sm:$0xff]  ;;  %v14043_v52 = vcombine.low %v1382_v28, %v1386_v29 }
 0x1e8   : > { %5879 = vmatprep.subr.bf16.mxu0 %v13700_v38  ;;  %v1250_v45 = vld [vmem:[%s16671_s20 + $0x928] sm:$0xff] }
 0x1e9   : > { %5919 = vmatpush2.bf16.msra.mxu1 %v13835_v36  ;;  %v13916_v36 = vcombine.high %v1254_v24, %v1258_v26  ;;  %v1242_v60 = vld [vmem:[%s16671_s20 + $0x8e8] sm:$0xff]  ;;  %v13907_v0 = vcombine.low %v1246_v43, %v1250_v45 }
 0x1ea   : > { %5920 = vmatprep.subr.bf16.mxu1 %v13828_v39  ;;  %v1366_v61 = vld [vmem:[%s16671_s20 + $0xcc8] sm:$0xff] }
 0x1eb   : > { %5880 = vmatpush2.bf16.msra.mxu0 %v13699_v47  ;;  %v1370_v62 = vld [vmem:[%s16671_s20 + $0xce8] sm:$0xff] }
 0x1ec   : > { %5881 = vmatprep.subr.bf16.mxu0 %v13692_v49  ;;  %v1378_v49 = vld [vmem:[%s16671_s20 + $0xd28] sm:$0xff]  ;;  %v14028_v7 = vcombine.high %v1366_v61, %v1370_v62  ;;  %v14027_v15 = vcombine.low %v1366_v61, %v1370_v62 }
 0x1ed   : > { %5921 = vmatpush2.bf16.msra.mxu1 %v13827_v48  ;;  %v1374_v48 = vld [vmem:[%s16671_s20 + $0xd08] sm:$0xff] }
 0x1ee   : > { %5922 = vmatprep.subr.bf16.mxu1 %v13820_v54  ;;  %v1358_v22 = vld [vmem:[%s16671_s20 + $0xc88] sm:$0xff] }
 0x1ef   : > { %5882 = vmatpush2.bf16.msra.mxu0 %v13691_v56  ;;  %v13908_v56 = vcombine.high %v1246_v43, %v1250_v45  ;;  %v1362_v12 = vld [vmem:[%s16671_s20 + $0xca8] sm:$0xff] }
 0x1f0   : > { %5883 = vmatprep.subr.bf16.mxu0 %v13684_v58  ;;  %v14036_v58 = vcombine.high %v1374_v48, %v1378_v49  ;;  %v14019_v26 = vcombine.low %v1358_v22, %v1362_v12  ;;  %v1214_v29 = vld [vmem:[%s16671_s20 + $0x808] sm:$0xff] }
 0x1f1   : > { %5923 = vmatpush2.bf16.msra.mxu1 %v13819_v57  ;;  %v1462_v43 = vld [vmem:[%s16671_s20 + $0xfc8] sm:$0xff] }
 0x1f2   : > { %5924 = vmatprep.subr.bf16.mxu1 %v13812_v59  ;;  %v1238_v59 = vld [vmem:[%s16671_s20 + $0x8c8] sm:$0xff] }
 0x1f3   : > { %5884 = vmatpush2.bf16.msra.mxu0 %v13683_v1  ;;  %v14035_v1 = vcombine.low %v1374_v48, %v1378_v49  ;;  %v13899_v13 = vcombine.low %v1238_v59, %v1242_v60  ;;  %v1466_v45 = vld [vmem:[%s16671_s20 + $0xfe8] sm:$0xff] }
 0x1f4   : > { %5935 = vmatprep.subr.bf16.mxu0 %v13932_v8  ;;  %v1230_v8 = vld [vmem:[%s16671_s20 + $0x888] sm:$0xff] }
 0x1f5   : > { %5925 = vmatpush2.bf16.msra.mxu1 %v13811_v6  ;;  %v5641_v27 = vpop.f32.mrf.mxu0  ;;  %v13900_v6 = vcombine.high %v1238_v59, %v1242_v60  ;;  %v1318_v61 = vld [vmem:[%s16671_s20 + $0xb48] sm:$0xff] }
 0x1f6   : > { %5976 = vmatprep.subr.bf16.mxu1 %v14060_v9  ;;  %5886 = vmatmul.mubr.bf16.vlgmr.msra.gmra.mxu0 %v16819_v33  ;;  %v5642_v30 = vadd.f32 %v5641_v27, %v1730_v17  ;;  %v1234_v9 = vld [vmem:[%s16671_s20 + $0x8a8] sm:$0xff] }
 0x1f7   : > { %v5682_v31 = vpop.f32.mrf.mxu1  ;;  %5936 = vmatpush1.bf16.msra.mxu0 %v13931_v18  ;;  %v5643_v34 = vpop.f32.mrf.mxu0  ;;  %5967 = vmatprep.mubr.bf16.mxu0 %v16833_v46  ;;  %v13892_v17 = vcombine.high %v1230_v8, %v1234_v9  ;;  %v14020_v18 = vcombine.high %v1358_v22, %v1362_v12  ;;  %v13891_v24 = vcombine.low %v1230_v8, %v1234_v9  ;;  %v1322_v62 = vld [vmem:[%s16671_s20 + $0xb68] sm:$0xff] }
 0x1f8   : > { %5927 = vmatmul.mubr.bf16.vlgmr.msra.gmra.mxu1 %v16827_v37  ;;  %5937 = vmatprep.subr.bf16.mxu0 %v13924_v20  ;;  %v17083_v38 = vadd.f32 %v5682_v31, %v5642_v30  ;;  %v5644_v39 = vadd.f32 %v5643_v34, %v1734_v21  ;;  %v1226_v20 = vld [vmem:[%s16671_s20 + $0x868] sm:$0xff]  ;;  %v13980_v8 = vcombine.high %v1318_v61, %v1322_v62 }
 0x1f9   : > { %5977 = vmatpush1.bf16.msra.mxu1 %v14059_v19  ;;  %v5684_v63 = vpop.f32.mrf.mxu1  ;;  %v5645_v47 = vpop.f32.mrf.mxu0  ;;  %6008 = vmatprep.mubr.bf16.mxu1 %v16836_v5  ;;  %v1222_v19 = vld [vmem:[%s16671_s20 + $0x848] sm:$0xff] }
 0x1fa   : > { %5978 = vmatprep.subr.bf16.mxu1 %v14052_v23  ;;  %v17091_v54 = vadd.f32 %v5684_v63, %v5644_v39  ;;  %v1350_v21 = vld [vmem:[%s16671_s20 + $0xc48] sm:$0xff]  ;;  %v13884_v27 = vcombine.high %v1222_v19, %v1226_v20  ;;  %v13883_v34 = vcombine.low %v1222_v19, %v1226_v20 }
 0x1fb   : > { %v5686_v55 = vpop.f32.mrf.mxu1  ;;  %5938 = vmatpush1.bf16.msra.mxu0 %v13923_v32  ;;  %v5646_v51 = vpop.f32.mrf.mxu0  ;;  %v1354_v23 = vld [vmem:[%s16671_s20 + $0xc68] sm:$0xff] }
 0x1fc   : > { %5939 = vmatprep.subr.bf16.mxu0 %v13916_v36  ;;  %v14012_v28 = vcombine.high %v1350_v21, %v1354_v23  ;;  %v1218_v30 = vld [vmem:[%s16671_s20 + $0x828] sm:$0xff]  ;;  %v14124_v55 = vcombine.high %v1462_v43, %v1466_v45 }
 0x1fd   : > { %5979 = vmatpush1.bf16.msra.mxu1 %v14051_v35  ;;  %v5687_v57 = vpop.f32.mrf.mxu1  ;;  %v1342_v31 = vld [vmem:[%s16671_s20 + $0xc08] sm:$0xff]  ;;  %v14011_v35 = vcombine.low %v1350_v21, %v1354_v23  ;;  %v13876_v36 = vcombine.high %v1214_v29, %v1218_v30  ;;  %v13875_v47 = vcombine.low %v1214_v29, %v1218_v30 }
 0x1fe   : > { %5980 = vmatprep.subr.bf16.mxu1 %v14044_v42  ;;  %v1346_v32 = vld [vmem:[%s16671_s20 + $0xc28] sm:$0xff] }
 0x1ff   : > { %5940 = vmatpush1.bf16.msra.mxu0 %v13915_v50  ;;  %v14004_v39 = vcombine.high %v1342_v31, %v1346_v32  ;;  %v1334_v63 = vld [vmem:[%s16671_s20 + $0xbc8] sm:$0xff]  ;;  %v14003_v48 = vcombine.low %v1342_v31, %v1346_v32 }
 0x200   : > { %5941 = vmatprep.subr.bf16.mxu0 %v13908_v56  ;;  %v1338_v42 = vld [vmem:[%s16671_s20 + $0xbe8] sm:$0xff] }
 0x201   : > { %5981 = vmatpush1.bf16.msra.mxu1 %v14043_v52  ;;  %v13996_v49 = vcombine.high %v1334_v63, %v1338_v42  ;;  %v1326_v50 = vld [vmem:[%s16671_s20 + $0xb88] sm:$0xff]  ;;  %v13995_v57 = vcombine.low %v1334_v63, %v1338_v42 }
 0x202   : > { %5982 = vmatprep.subr.bf16.mxu1 %v14036_v58  ;;  %v1330_v51 = vld [vmem:[%s16671_s20 + $0xba8] sm:$0xff]  ;;  %v14123_v58 = vcombine.low %v1462_v43, %v1466_v45 }
 0x203   : > { %5942 = vmatpush1.bf16.msra.mxu0 %v13907_v0  ;;  %v1454_v52 = vld [vmem:[%s16671_s20 + $0xf88] sm:$0xff]  ;;  %v13988_v59 = vcombine.high %v1326_v50, %v1330_v51 }
 0x204   : > { %5943 = vmatprep.subr.bf16.mxu0 %v13900_v6  ;;  %v1458_v56 = vld [vmem:[%s16671_s20 + $0xfa8] sm:$0xff]  ;;  %v13987_v6 = vcombine.low %v1326_v50, %v1330_v51 }
 0x205   : > { %5983 = vmatpush1.bf16.msra.mxu1 %v14035_v1  ;;  %v14116_v60 = vcombine.high %v1454_v52, %v1458_v56  ;;  %v1446_v0 = vld [vmem:[%s16671_s20 + $0xf48] sm:$0xff] }
 0x206   : > { %5984 = vmatprep.subr.bf16.mxu1 %v14028_v7  ;;  %v1450_v1 = vld [vmem:[%s16671_s20 + $0xf68] sm:$0xff]  ;;  %v14115_v7 = vcombine.low %v1454_v52, %v1458_v56 }
 0x207   : > { %5944 = vmatpush1.bf16.msra.mxu0 %v13899_v13  ;;  %v14108_v9 = vcombine.high %v1446_v0, %v1450_v1  ;;  %v1310_v22 = vld [vmem:[%s16671_s20 + $0xb08] sm:$0xff] }
 0x208   : > { %5945 = vmatprep.subr.bf16.mxu0 %v13892_v17  ;;  %v1314_v12 = vld [vmem:[%s16671_s20 + $0xb28] sm:$0xff]  ;;  %v13979_v17 = vcombine.low %v1318_v61, %v1322_v62 }
 0x209   : > { %5985 = vmatpush1.bf16.msra.mxu1 %v14027_v15  ;;  %v1438_v13 = vld [vmem:[%s16671_s20 + $0xf08] sm:$0xff]  ;;  %v13972_v19 = vcombine.high %v1310_v22, %v1314_v12 }
 0x20a   : > { %5986 = vmatprep.subr.bf16.mxu1 %v14020_v18  ;;  %v1442_v15 = vld [vmem:[%s16671_s20 + $0xf28] sm:$0xff]  ;;  %v14107_v18 = vcombine.low %v1446_v0, %v1450_v1 }
 0x20b   : > { %5946 = vmatpush1.bf16.msra.mxu0 %v13891_v24  ;;  %v14100_v20 = vcombine.high %v1438_v13, %v1442_v15  ;;  %v1302_v21 = vld [vmem:[%s16671_s20 + $0xac8] sm:$0xff] }
 0x20c   : > { %5947 = vmatprep.subr.bf16.mxu0 %v13884_v27  ;;  %v1306_v23 = vld [vmem:[%s16671_s20 + $0xae8] sm:$0xff]  ;;  %v13971_v27 = vcombine.low %v1310_v22, %v1314_v12 }
 0x20d   : > { %5987 = vmatpush1.bf16.msra.mxu1 %v14019_v26  ;;  %v1430_v24 = vld [vmem:[%s16671_s20 + $0xec8] sm:$0xff]  ;;  %v13964_v29 = vcombine.high %v1302_v21, %v1306_v23 }
 0x20e   : > { %5988 = vmatprep.subr.bf16.mxu1 %v14012_v28  ;;  %v1434_v26 = vld [vmem:[%s16671_s20 + $0xee8] sm:$0xff]  ;;  %v14099_v28 = vcombine.low %v1438_v13, %v1442_v15 }
 0x20f   : > { %5948 = vmatpush1.bf16.msra.mxu0 %v13883_v34  ;;  %v14092_v30 = vcombine.high %v1430_v24, %v1434_v26  ;;  %v1294_v31 = vld [vmem:[%s16671_s20 + $0xa88] sm:$0xff] }
 0x210   : > { %5949 = vmatprep.subr.bf16.mxu0 %v13876_v36  ;;  %v1298_v32 = vld [vmem:[%s16671_s20 + $0xaa8] sm:$0xff]  ;;  %v13963_v36 = vcombine.low %v1302_v21, %v1306_v23 }
 0x211   : > { %5989 = vmatpush1.bf16.msra.mxu1 %v14011_v35  ;;  %v1422_v34 = vld [vmem:[%s16671_s20 + $0xe88] sm:$0xff]  ;;  %v13956_v63 = vcombine.high %v1294_v31, %v1298_v32 }
 0x212   : > { %5990 = vmatprep.subr.bf16.mxu1 %v14004_v39  ;;  %v1426_v35 = vld [vmem:[%s16671_s20 + $0xea8] sm:$0xff]  ;;  %v14091_v39 = vcombine.low %v1430_v24, %v1434_v26 }
 0x213   : > { %5950 = vmatpush1.bf16.msra.mxu0 %v13875_v47  ;;  %v14084_v42 = vcombine.high %v1422_v34, %v1426_v35  ;;  %v1286_v43 = vld [vmem:[%s16671_s20 + $0xa48] sm:$0xff] }
 0x214   : > { %5951 = vmatprep.subr.bf16.mxu0 %v13996_v49  ;;  %v1290_v45 = vld [vmem:[%s16671_s20 + $0xa68] sm:$0xff]  ;;  %v13955_v49 = vcombine.low %v1294_v31, %v1298_v32 }
 0x215   : > { %5991 = vmatpush1.bf16.msra.mxu1 %v14003_v48  ;;  %v1414_v47 = vld [vmem:[%s16671_s20 + $0xe48] sm:$0xff]  ;;  %v13948_v50 = vcombine.high %v1286_v43, %v1290_v45 }
 0x216   : > { %5992 = vmatprep.subr.bf16.mxu1 %v14124_v55  ;;  %v1418_v48 = vld [vmem:[%s16671_s20 + $0xe68] sm:$0xff]  ;;  %v14083_v55 = vcombine.low %v1422_v34, %v1426_v35 }
 0x217   : > { %5952 = vmatpush2.bf16.msra.mxu0 %v13995_v57  ;;  %v14076_v51 = vcombine.high %v1414_v47, %v1418_v48  ;;  %v1278_v52 = vld [vmem:[%s16671_s20 + $0xa08] sm:$0xff] }
 0x218   : > { %5953 = vmatprep.subr.bf16.mxu0 %v13988_v59  ;;  %v1282_v56 = vld [vmem:[%s16671_s20 + $0xa28] sm:$0xff]  ;;  %v13947_v59 = vcombine.low %v1286_v43, %v1290_v45 }
 0x219   : > { %5993 = vmatpush2.bf16.msra.mxu1 %v14123_v58  ;;  %v1406_v57 = vld [vmem:[%s16671_s20 + $0xe08] sm:$0xff]  ;;  %v13940_v61 = vcombine.high %v1278_v52, %v1282_v56 }
 0x21a   : > { %5994 = vmatprep.subr.bf16.mxu1 %v14116_v60  ;;  %v1410_v58 = vld [vmem:[%s16671_s20 + $0xe28] sm:$0xff]  ;;  %v14075_v60 = vcombine.low %v1414_v47, %v1418_v48 }
 0x21b   : > { %5954 = vmatpush2.bf16.msra.mxu0 %v13987_v6  ;;  %v14068_v62 = vcombine.high %v1406_v57, %v1410_v58  ;;  %v1526_v0 = vld [vmem:[%s16671_s20 + $0x11c8] sm:$0xff] }
 0x21c   : > { %5955 = vmatprep.subr.bf16.mxu0 %v13980_v8  ;;  %v1530_v1 = vld [vmem:[%s16671_s20 + $0x11e8] sm:$0xff]  ;;  %v13939_v8 = vcombine.low %v1278_v52, %v1282_v56 }
 0x21d   : > { %5995 = vmatpush2.bf16.msra.mxu1 %v14115_v7  ;;  %v1654_v6 = vld [vmem:[%s16671_s20 + $0x15c8] sm:$0xff]  ;;  %v14188_v22 = vcombine.high %v1526_v0, %v1530_v1 }
 0x21e   : > { %5996 = vmatprep.subr.bf16.mxu1 %v14108_v9  ;;  %v1658_v7 = vld [vmem:[%s16671_s20 + $0x15e8] sm:$0xff]  ;;  %v14067_v9 = vcombine.low %v1406_v57, %v1410_v58 }
 0x21f   : > { %5956 = vmatpush2.bf16.msra.mxu0 %v13979_v17  ;;  %v14316_v12 = vcombine.high %v1654_v6, %v1658_v7  ;;  %v1518_v13 = vld [vmem:[%s16671_s20 + $0x1188] sm:$0xff] }
 0x220   : > { %5957 = vmatprep.subr.bf16.mxu0 %v13972_v19  ;;  %v1522_v15 = vld [vmem:[%s16671_s20 + $0x11a8] sm:$0xff]  ;;  %v14187_v19 = vcombine.low %v1526_v0, %v1530_v1 }
 0x221   : > { %5997 = vmatpush2.bf16.msra.mxu1 %v14107_v18  ;;  %v1646_v17 = vld [vmem:[%s16671_s20 + $0x1588] sm:$0xff]  ;;  %v14180_v21 = vcombine.high %v1518_v13, %v1522_v15  ;;  %v14179_v32 = vcombine.low %v1518_v13, %v1522_v15 }
 0x222   : > { %5998 = vmatprep.subr.bf16.mxu1 %v14100_v20  ;;  %v1650_v18 = vld [vmem:[%s16671_s20 + $0x15a8] sm:$0xff]  ;;  %v14315_v20 = vcombine.low %v1654_v6, %v1658_v7 }
 0x223   : > { %5958 = vmatpush2.bf16.msra.mxu0 %v13971_v27  ;;  %v14308_v23 = vcombine.high %v1646_v17, %v1650_v18  ;;  %v1510_v24 = vld [vmem:[%s16671_s20 + $0x1148] sm:$0xff]  ;;  %v14307_v35 = vcombine.low %v1646_v17, %v1650_v18 }
 0x224   : > { %5959 = vmatprep.subr.bf16.mxu0 %v13964_v29  ;;  %v1514_v26 = vld [vmem:[%s16671_s20 + $0x1168] sm:$0xff] }
 0x225   : > { %5999 = vmatpush2.bf16.msra.mxu1 %v14099_v28  ;;  %v1638_v28 = vld [vmem:[%s16671_s20 + $0x1548] sm:$0xff] }
 0x226   : > { %6000 = vmatprep.subr.bf16.mxu1 %v14092_v30  ;;  %v1642_v29 = vld [vmem:[%s16671_s20 + $0x1568] sm:$0xff] }
 0x227   : > { %5960 = vmatpush2.bf16.msra.mxu0 %v13963_v36  ;;  %v14172_v36 = vcombine.high %v1510_v24, %v1514_v26  ;;  %v1502_v43 = vld [vmem:[%s16671_s20 + $0x1108] sm:$0xff]  ;;  %v14299_v52 = vcombine.low %v1638_v28, %v1642_v29 }
 0x228   : > { %5961 = vmatprep.subr.bf16.mxu0 %v13956_v63  ;;  %v1506_v45 = vld [vmem:[%s16671_s20 + $0x1128] sm:$0xff] }
 0x229   : > { %6001 = vmatpush2.bf16.msra.mxu1 %v14091_v39  ;;  %v1630_v48 = vld [vmem:[%s16671_s20 + $0x1508] sm:$0xff]  ;;  %v14164_v56 = vcombine.high %v1502_v43, %v1506_v45  ;;  %v14163_v0 = vcombine.low %v1502_v43, %v1506_v45 }
 0x22a   : > { %6002 = vmatprep.subr.bf16.mxu1 %v14084_v42  ;;  %v1718_v43 = vld [vmem:[%s16671_s20 + $0x17c8] sm:$0xff] }
 0x22b   : > { %5962 = vmatpush2.bf16.msra.mxu0 %v13955_v49  ;;  %v1634_v49 = vld [vmem:[%s16671_s20 + $0x1528] sm:$0xff] }
 0x22c   : > { %5963 = vmatprep.subr.bf16.mxu0 %v13948_v50  ;;  %v14292_v58 = vcombine.high %v1630_v48, %v1634_v49  ;;  %v14291_v1 = vcombine.low %v1630_v48, %v1634_v49  ;;  %v1722_v45 = vld [vmem:[%s16671_s20 + $0x17e8] sm:$0xff] }
 0x22d   : > { %6003 = vmatpush2.bf16.msra.mxu1 %v14083_v55 }
 0x22e   : > { %6004 = vmatprep.subr.bf16.mxu1 %v14076_v51 }
 0x22f   : > { %5964 = vmatpush2.bf16.msra.mxu0 %v13947_v59  ;;  %v1494_v59 = vld [vmem:[%s16671_s20 + $0x10c8] sm:$0xff] }
 0x230   : > { %5965 = vmatprep.subr.bf16.mxu0 %v13940_v61  ;;  %v1622_v61 = vld [vmem:[%s16671_s20 + $0x14c8] sm:$0xff] }
 0x231   : > { %6005 = vmatpush2.bf16.msra.mxu1 %v14075_v60  ;;  %v1498_v60 = vld [vmem:[%s16671_s20 + $0x10e8] sm:$0xff] }
 0x232   : > { %6006 = vmatprep.subr.bf16.mxu1 %v14068_v62  ;;  %v1626_v62 = vld [vmem:[%s16671_s20 + $0x14e8] sm:$0xff]  ;;  %v14156_v6 = vcombine.high %v1494_v59, %v1498_v60  ;;  %v14155_v13 = vcombine.low %v1494_v59, %v1498_v60 }
 0x233   : > { %5966 = vmatpush2.bf16.msra.mxu0 %v13939_v8  ;;  %v14284_v7 = vcombine.high %v1622_v61, %v1626_v62  ;;  %v1486_v8 = vld [vmem:[%s16671_s20 + $0x1088] sm:$0xff]  ;;  %v14283_v15 = vcombine.low %v1622_v61, %v1626_v62 }
 0x234   : > { %6017 = vmatprep.subr.bf16.mxu0 %v14188_v22  ;;  %v1614_v22 = vld [vmem:[%s16671_s20 + $0x1488] sm:$0xff] }
 0x235   : > { %6007 = vmatpush2.bf16.msra.mxu1 %v14067_v9  ;;  %v1490_v9 = vld [vmem:[%s16671_s20 + $0x10a8] sm:$0xff] }
 0x236   : > { %6058 = vmatprep.subr.bf16.mxu1 %v14316_v12  ;;  %v5723_v27 = vpop.f32.mrf.mxu0  ;;  %5968 = vmatmul.mubr.bf16.vlgmr.msra.gmra.mxu0 %v16912_v2  ;;  %v1618_v12 = vld [vmem:[%s16671_s20 + $0x14a8] sm:$0xff]  ;;  %v14148_v17 = vcombine.high %v1486_v8, %v1490_v9 }
 0x237   : > { %v5724_v30 = vadd.f32 %v5723_v27, %v17083_v38  ;;  %6018 = vmatpush1.bf16.msra.mxu0 %v14187_v19  ;;  %v14300_v38 = vcombine.high %v1638_v28, %v1642_v29  ;;  %6049 = vmatprep.mubr.bf16.mxu0 %v16924_v14  ;;  %v14276_v18 = vcombine.high %v1614_v22, %v1618_v12  ;;  %v1478_v19 = vld [vmem:[%s16671_s20 + $0x1048] sm:$0xff] }
 0x238   : > { %v5764_v31 = vpop.f32.mrf.mxu1  ;;  %6009 = vmatmul.mubr.bf16.vlgmr.msra.gmra.mxu1 %v16918_v4  ;;  %v5725_v34 = vpop.f32.mrf.mxu0  ;;  %6019 = vmatprep.subr.bf16.mxu0 %v14180_v21  ;;  %v1606_v21 = vld [vmem:[%s16671_s20 + $0x1448] sm:$0xff] }
 0x239   : > { %6059 = vmatpush1.bf16.msra.mxu1 %v14315_v20  ;;  %v17156_v39 = vadd.f32 %v5764_v31, %v5724_v30  ;;  %v5726_v63 = vadd.f32 %v5725_v34, %v17091_v54  ;;  %6090 = vmatprep.mubr.bf16.mxu1 %v16927_v25  ;;  %v14171_v54 = vcombine.low %v1510_v24, %v1514_v26  ;;  %v1482_v20 = vld [vmem:[%s16671_s20 + $0x1068] sm:$0xff] }
 0x23a   : > { %v5766_v42 = vpop.f32.mrf.mxu1  ;;  %6060 = vmatprep.subr.bf16.mxu1 %v14308_v23  ;;  %v5727_v47 = vpop.f32.mrf.mxu0  ;;  %v1610_v23 = vld [vmem:[%s16671_s20 + $0x1468] sm:$0xff]  ;;  %v14147_v24 = vcombine.low %v1486_v8, %v1490_v9  ;;  %v14275_v26 = vcombine.low %v1614_v22, %v1618_v12  ;;  %v14140_v27 = vcombine.high %v1478_v19, %v1482_v20  ;;  %v14139_v34 = vcombine.low %v1478_v19, %v1482_v20 }
 0x23b   : > { %v17165_v55 = vadd.f32 %v5766_v42, %v5726_v63  ;;  %6020 = vmatpush1.bf16.msra.mxu0 %v14179_v32  ;;  %v14268_v28 = vcombine.high %v1606_v21, %v1610_v23  ;;  %v1470_v29 = vld [vmem:[%s16671_s20 + $0x1008] sm:$0xff] }
 0x23c   : > { %v5768_v50 = vpop.f32.mrf.mxu1  ;;  %v5728_v51 = vpop.f32.mrf.mxu0  ;;  %6021 = vmatprep.subr.bf16.mxu0 %v14172_v36  ;;  %v1474_v30 = vld [vmem:[%s16671_s20 + $0x1028] sm:$0xff] }
 0x23d   : > { %6061 = vmatpush1.bf16.msra.mxu1 %v14307_v35  ;;  %v1598_v31 = vld [vmem:[%s16671_s20 + $0x1408] sm:$0xff]  ;;  %v14267_v35 = vcombine.low %v1606_v21, %v1610_v23  ;;  %v14132_v36 = vcombine.high %v1470_v29, %v1474_v30  ;;  %v14131_v47 = vcombine.low %v1470_v29, %v1474_v30  ;;  %v14380_v50 = vcombine.high %v1718_v43, %v1722_v45 }
 0x23e   : > { %v5769_v57 = vpop.f32.mrf.mxu1  ;;  %6062 = vmatprep.subr.bf16.mxu1 %v14300_v38  ;;  %v1602_v32 = vld [vmem:[%s16671_s20 + $0x1428] sm:$0xff] }
 0x23f   : > { %6022 = vmatpush1.bf16.msra.mxu0 %v14171_v54  ;;  %v14260_v63 = vcombine.high %v1598_v31, %v1602_v32  ;;  %v1590_v42 = vld [vmem:[%s16671_s20 + $0x13c8] sm:$0xff]  ;;  %v14259_v48 = vcombine.low %v1598_v31, %v1602_v32 }
 0x240   : > { %6023 = vmatprep.subr.bf16.mxu0 %v14164_v56  ;;  %v1594_v38 = vld [vmem:[%s16671_s20 + $0x13e8] sm:$0xff] }
 0x241   : > { %6063 = vmatpush1.bf16.msra.mxu1 %v14299_v52  ;;  %v14252_v49 = vcombine.high %v1590_v42, %v1594_v38  ;;  %v1582_v54 = vld [vmem:[%s16671_s20 + $0x1388] sm:$0xff]  ;;  %v14251_v57 = vcombine.low %v1590_v42, %v1594_v38 }
 0x242   : > { %6064 = vmatprep.subr.bf16.mxu1 %v14292_v58  ;;  %v1586_v51 = vld [vmem:[%s16671_s20 + $0x13a8] sm:$0xff]  ;;  %v14379_v58 = vcombine.low %v1718_v43, %v1722_v45 }
 0x243   : > { %6024 = vmatpush1.bf16.msra.mxu0 %v14163_v0  ;;  %v1710_v52 = vld [vmem:[%s16671_s20 + $0x1788] sm:$0xff]  ;;  %v14244_v59 = vcombine.high %v1582_v54, %v1586_v51 }
 0x244   : > { %6025 = vmatprep.subr.bf16.mxu0 %v14156_v6  ;;  %v1714_v56 = vld [vmem:[%s16671_s20 + $0x17a8] sm:$0xff]  ;;  %v14243_v6 = vcombine.low %v1582_v54, %v1586_v51 }
 0x245   : > { %6065 = vmatpush1.bf16.msra.mxu1 %v14291_v1  ;;  %v14372_v60 = vcombine.high %v1710_v52, %v1714_v56  ;;  %v1574_v61 = vld [vmem:[%s16671_s20 + $0x1348] sm:$0xff] }
 0x246   : > { %6066 = vmatprep.subr.bf16.mxu1 %v14284_v7  ;;  %v1578_v62 = vld [vmem:[%s16671_s20 + $0x1368] sm:$0xff]  ;;  %v14371_v7 = vcombine.low %v1710_v52, %v1714_v56 }
 0x247   : > { %6026 = vmatpush1.bf16.msra.mxu0 %v14155_v13  ;;  %v1702_v0 = vld [vmem:[%s16671_s20 + $0x1748] sm:$0xff]  ;;  %v14236_v8 = vcombine.high %v1574_v61, %v1578_v62 }
 0x248   : > { %6027 = vmatprep.subr.bf16.mxu0 %v14148_v17  ;;  %v1706_v1 = vld [vmem:[%s16671_s20 + $0x1768] sm:$0xff]  ;;  %v14235_v17 = vcombine.low %v1574_v61, %v1578_v62 }
 0x249   : > { %6067 = vmatpush1.bf16.msra.mxu1 %v14283_v15  ;;  %v14364_v9 = vcombine.high %v1702_v0, %v1706_v1  ;;  %v1566_v22 = vld [vmem:[%s16671_s20 + $0x1308] sm:$0xff] }
 0x24a   : > { %6068 = vmatprep.subr.bf16.mxu1 %v14276_v18  ;;  %v1570_v12 = vld [vmem:[%s16671_s20 + $0x1328] sm:$0xff]  ;;  %v14363_v18 = vcombine.low %v1702_v0, %v1706_v1  ;;  %v1015_v0 = vld [vmem:[%s16671_s20 + $0x1d0] sm:$0xff] }
 0x24b   : > { %6028 = vmatpush1.bf16.msra.mxu0 %v14147_v24  ;;  %v1694_v13 = vld [vmem:[%s16671_s20 + $0x1708] sm:$0xff]  ;;  %v14228_v19 = vcombine.high %v1566_v22, %v1570_v12  ;;  %v1019_v1 = vld [vmem:[%s16671_s20 + $0x1f0] sm:$0xff] }
 0x24c   : > { %6029 = vmatprep.subr.bf16.mxu0 %v14140_v27  ;;  %v1698_v15 = vld [vmem:[%s16671_s20 + $0x1728] sm:$0xff]  ;;  %v14227_v27 = vcombine.low %v1566_v22, %v1570_v12  ;;  %v13678_v22 = vcombine.high %v1015_v0, %v1019_v1 }
 0x24d   : > { %6069 = vmatpush1.bf16.msra.mxu1 %v14275_v26  ;;  %v14356_v20 = vcombine.high %v1694_v13, %v1698_v15  ;;  %v1558_v21 = vld [vmem:[%s16671_s20 + $0x12c8] sm:$0xff] }
 0x24e   : > { %6070 = vmatprep.subr.bf16.mxu1 %v14268_v28  ;;  %v1562_v23 = vld [vmem:[%s16671_s20 + $0x12e8] sm:$0xff]  ;;  %v14355_v28 = vcombine.low %v1694_v13, %v1698_v15  ;;  %v1007_v13 = vld [vmem:[%s16671_s20 + $0x190] sm:$0xff] }
 0x24f   : > { %6030 = vmatpush1.bf16.msra.mxu0 %v14139_v34  ;;  %v1686_v24 = vld [vmem:[%s16671_s20 + $0x16c8] sm:$0xff]  ;;  %v14220_v29 = vcombine.high %v1558_v21, %v1562_v23  ;;  %v1011_v15 = vld [vmem:[%s16671_s20 + $0x1b0] sm:$0xff] }
 0x250   : > { %6031 = vmatprep.subr.bf16.mxu0 %v14132_v36  ;;  %v1690_v26 = vld [vmem:[%s16671_s20 + $0x16e8] sm:$0xff]  ;;  %v14219_v36 = vcombine.low %v1558_v21, %v1562_v23  ;;  %v13670_v21 = vcombine.high %v1007_v13, %v1011_v15 }
 0x251   : > { %6071 = vmatpush1.bf16.msra.mxu1 %v14267_v35  ;;  %v14348_v30 = vcombine.high %v1686_v24, %v1690_v26  ;;  %v1550_v31 = vld [vmem:[%s16671_s20 + $0x1288] sm:$0xff] }
 0x252   : > { %6072 = vmatprep.subr.bf16.mxu1 %v14260_v63  ;;  %v1554_v32 = vld [vmem:[%s16671_s20 + $0x12a8] sm:$0xff]  ;;  %v14347_v63 = vcombine.low %v1686_v24, %v1690_v26  ;;  %v999_v24 = vld [vmem:[%s16671_s20 + $0x150] sm:$0xff] }
 0x253   : > { %6032 = vmatpush1.bf16.msra.mxu0 %v14131_v47  ;;  %v1678_v34 = vld [vmem:[%s16671_s20 + $0x1688] sm:$0xff]  ;;  %v14212_v42 = vcombine.high %v1550_v31, %v1554_v32  ;;  %v1003_v26 = vld [vmem:[%s16671_s20 + $0x170] sm:$0xff] }
 0x254   : > { %6033 = vmatprep.subr.bf16.mxu0 %v14252_v49  ;;  %v1682_v35 = vld [vmem:[%s16671_s20 + $0x16a8] sm:$0xff]  ;;  %v14211_v49 = vcombine.low %v1550_v31, %v1554_v32  ;;  %v13669_v32 = vcombine.low %v1007_v13, %v1011_v15 }
 0x255   : > { %6073 = vmatpush1.bf16.msra.mxu1 %v14259_v48  ;;  %v14340_v38 = vcombine.high %v1678_v34, %v1682_v35  ;;  %v1542_v43 = vld [vmem:[%s16671_s20 + $0x1248] sm:$0xff] }
 0x256   : > { %6074 = vmatprep.subr.bf16.mxu1 %v14380_v50  ;;  %v1546_v45 = vld [vmem:[%s16671_s20 + $0x1268] sm:$0xff]  ;;  %v14339_v50 = vcombine.low %v1678_v34, %v1682_v35 }
 0x257   : > { %6034 = vmatpush2.bf16.msra.mxu0 %v14251_v57  ;;  %v1670_v47 = vld [vmem:[%s16671_s20 + $0x1648] sm:$0xff]  ;;  %v14204_v54 = vcombine.high %v1542_v43, %v1546_v45 }
 0x258   : > { %6035 = vmatprep.subr.bf16.mxu0 %v14244_v59  ;;  %v1674_v48 = vld [vmem:[%s16671_s20 + $0x1668] sm:$0xff]  ;;  %v14203_v59 = vcombine.low %v1542_v43, %v1546_v45  ;;  %v991_v43 = vld [vmem:[%s16671_s20 + $0x110] sm:$0xff] }
 0x259   : > { %6075 = vmatpush2.bf16.msra.mxu1 %v14379_v58  ;;  %v14332_v51 = vcombine.high %v1670_v47, %v1674_v48  ;;  %v1534_v52 = vld [vmem:[%s16671_s20 + $0x1208] sm:$0xff]  ;;  %v995_v45 = vld [vmem:[%s16671_s20 + $0x130] sm:$0xff] }
 0x25a   : > { %6076 = vmatprep.subr.bf16.mxu1 %v14372_v60  ;;  %v1538_v56 = vld [vmem:[%s16671_s20 + $0x1228] sm:$0xff]  ;;  %v14331_v60 = vcombine.low %v1670_v47, %v1674_v48  ;;  %v1119_v48 = vld [vmem:[%s16671_s20 + $0x510] sm:$0xff] }
 0x25b   : > { %6036 = vmatpush2.bf16.msra.mxu0 %v14243_v6  ;;  %v1662_v57 = vld [vmem:[%s16671_s20 + $0x1608] sm:$0xff]  ;;  %v14196_v61 = vcombine.high %v1534_v52, %v1538_v56  ;;  %v1143_v6 = vld [vmem:[%s16671_s20 + $0x5d0] sm:$0xff] }
 0x25c   : > { %6037 = vmatprep.subr.bf16.mxu0 %v14236_v8  ;;  %v1666_v58 = vld [vmem:[%s16671_s20 + $0x1628] sm:$0xff]  ;;  %v14195_v8 = vcombine.low %v1534_v52, %v1538_v56  ;;  %v13654_v56 = vcombine.high %v991_v43, %v995_v45 }
 0x25d   : > { %6077 = vmatpush2.bf16.msra.mxu1 %v14371_v7  ;;  %v14324_v62 = vcombine.high %v1662_v57, %v1666_v58  ;;  %v1147_v7 = vld [vmem:[%s16671_s20 + $0x5f0] sm:$0xff] }
 0x25e   : > { %6078 = vmatprep.subr.bf16.mxu1 %v14364_v9  ;;  %v14323_v9 = vcombine.low %v1662_v57, %v1666_v58  ;;  %v13806_v12 = vcombine.high %v1143_v6, %v1147_v7 }
 0x25f   : > { %6038 = vmatpush2.bf16.msra.mxu0 %v14235_v17  ;;  %v1135_v17 = vld [vmem:[%s16671_s20 + $0x590] sm:$0xff] }
 0x260   : > { %6039 = vmatprep.subr.bf16.mxu0 %v14228_v19  ;;  %v13677_v19 = vcombine.low %v1015_v0, %v1019_v1  ;;  %v13653_v0 = vcombine.low %v991_v43, %v995_v45  ;;  %v1207_v43 = vld [vmem:[%s16671_s20 + $0x7d0] sm:$0xff] }
 0x261   : > { %6079 = vmatpush2.bf16.msra.mxu1 %v14363_v18  ;;  %v1139_v18 = vld [vmem:[%s16671_s20 + $0x5b0] sm:$0xff] }
 0x262   : > { %6080 = vmatprep.subr.bf16.mxu1 %v14356_v20  ;;  %v13805_v20 = vcombine.low %v1143_v6, %v1147_v7  ;;  %v13798_v23 = vcombine.high %v1135_v17, %v1139_v18  ;;  %v13797_v35 = vcombine.low %v1135_v17, %v1139_v18  ;;  %v1211_v45 = vld [vmem:[%s16671_s20 + $0x7f0] sm:$0xff] }
 0x263   : > { %6040 = vmatpush2.bf16.msra.mxu0 %v14227_v27 }
 0x264   : > { %6041 = vmatprep.subr.bf16.mxu0 %v14220_v29  ;;  %v1131_v29 = vld [vmem:[%s16671_s20 + $0x570] sm:$0xff] }
 0x265   : > { %6081 = vmatpush2.bf16.msra.mxu1 %v14355_v28  ;;  %v1127_v28 = vld [vmem:[%s16671_s20 + $0x550] sm:$0xff] }
 0x266   : > { %6082 = vmatprep.subr.bf16.mxu1 %v14348_v30  ;;  %v13789_v52 = vcombine.low %v1127_v28, %v1131_v29 }
 0x267   : > { %6042 = vmatpush2.bf16.msra.mxu0 %v14219_v36  ;;  %v13662_v36 = vcombine.high %v999_v24, %v1003_v26 }
 0x268   : > { %6043 = vmatprep.subr.bf16.mxu0 %v14212_v42 }
 0x269   : > { %6083 = vmatpush2.bf16.msra.mxu1 %v14347_v63 }
 0x26a   : > { %6084 = vmatprep.subr.bf16.mxu1 %v14340_v38 }
 0x26b   : > { %6044 = vmatpush2.bf16.msra.mxu0 %v14211_v49  ;;  %v1123_v49 = vld [vmem:[%s16671_s20 + $0x530] sm:$0xff] }
 0x26c   : > { %6045 = vmatprep.subr.bf16.mxu0 %v14204_v54  ;;  %v13782_v58 = vcombine.high %v1119_v48, %v1123_v49  ;;  %v13781_v1 = vcombine.low %v1119_v48, %v1123_v49 }
 0x26d   : > { %6085 = vmatpush2.bf16.msra.mxu1 %v14339_v50 }
 0x26e   : > { %6086 = vmatprep.subr.bf16.mxu1 %v14332_v51 }
 0x26f   : > { %6046 = vmatpush2.bf16.msra.mxu0 %v14203_v59  ;;  %v983_v59 = vld [vmem:[%s16671_s20 + $0xd0] sm:$0xff] }
 0x270   : > { %6047 = vmatprep.subr.bf16.mxu0 %v14196_v61  ;;  %v1111_v61 = vld [vmem:[%s16671_s20 + $0x4d0] sm:$0xff] }
 0x271   : > { %6087 = vmatpush2.bf16.msra.mxu1 %v14331_v60  ;;  %v987_v60 = vld [vmem:[%s16671_s20 + $0xf0] sm:$0xff] }
 0x272   : > { %6088 = vmatprep.subr.bf16.mxu1 %v14324_v62  ;;  %v1115_v62 = vld [vmem:[%s16671_s20 + $0x4f0] sm:$0xff]  ;;  %v13646_v6 = vcombine.high %v983_v59, %v987_v60  ;;  %v13645_v13 = vcombine.low %v983_v59, %v987_v60 }
 0x273   : > { %6048 = vmatpush2.bf16.msra.mxu0 %v14195_v8  ;;  %v13774_v7 = vcombine.high %v1111_v61, %v1115_v62  ;;  %v975_v8 = vld [vmem:[%s16671_s20 + $0x90] sm:$0xff]  ;;  %v13773_v15 = vcombine.low %v1111_v61, %v1115_v62 }
 0x274   : > { %6099 = vmatprep.subr.bf16.mxu0 %v13678_v22  ;;  %v1103_v22 = vld [vmem:[%s16671_s20 + $0x490] sm:$0xff] }
 0x275   : > { %6089 = vmatpush2.bf16.msra.mxu1 %v14323_v9  ;;  %v979_v9 = vld [vmem:[%s16671_s20 + $0xb0] sm:$0xff] }
 0x276   : > { %6140 = vmatprep.subr.bf16.mxu1 %v13806_v12  ;;  %v5805_v27 = vpop.f32.mrf.mxu0  ;;  %6050 = vmatmul.mubr.bf16.vlgmr.msra.gmra.mxu0 %v16994_v40  ;;  %v1107_v12 = vld [vmem:[%s16671_s20 + $0x4b0] sm:$0xff]  ;;  %v13638_v17 = vcombine.high %v975_v8, %v979_v9 }
 0x277   : > { %v5806_v30 = vadd.f32 %v5805_v27, %v17156_v39  ;;  %6100 = vmatpush1.bf16.msra.mxu0 %v13677_v19  ;;  %v13790_v39 = vcombine.high %v1127_v28, %v1131_v29  ;;  %6131 = vmatprep.mubr.bf16.mxu0 %v16764_v11  ;;  %v13766_v18 = vcombine.high %v1103_v22, %v1107_v12  ;;  %v967_v19 = vld [vmem:[%s16671_s20 + $0x50] sm:$0xff] }
 0x278   : > { %v5846_v31 = vpop.f32.mrf.mxu1  ;;  %6091 = vmatmul.mubr.bf16.vlgmr.msra.gmra.mxu1 %v16998_v41  ;;  %v5807_v34 = vpop.f32.mrf.mxu0  ;;  %6101 = vmatprep.subr.bf16.mxu0 %v13670_v21  ;;  %v1095_v21 = vld [vmem:[%s16671_s20 + $0x450] sm:$0xff] }
 0x279   : > { %6141 = vmatpush1.bf16.msra.mxu1 %v13805_v20  ;;  %v17230_v63 = vadd.f32 %v5846_v31, %v5806_v30  ;;  %v5808_v42 = vadd.f32 %v5807_v34, %v17165_v55  ;;  %6172 = vmatprep.mubr.bf16.mxu1 %v16771_v16  ;;  %v13661_v55 = vcombine.low %v999_v24, %v1003_v26  ;;  %v971_v20 = vld [vmem:[%s16671_s20 + $0x70] sm:$0xff] }
 0x27a   : > { %v5848_v38 = vpop.f32.mrf.mxu1  ;;  %6142 = vmatprep.subr.bf16.mxu1 %v13798_v23  ;;  %v5809_v47 = vpop.f32.mrf.mxu0  ;;  %v1099_v23 = vld [vmem:[%s16671_s20 + $0x470] sm:$0xff]  ;;  %v13637_v24 = vcombine.low %v975_v8, %v979_v9  ;;  %v13765_v26 = vcombine.low %v1103_v22, %v1107_v12  ;;  %v13630_v27 = vcombine.high %v967_v19, %v971_v20  ;;  %v13629_v34 = vcombine.low %v967_v19, %v971_v20 }
 0x27b   : > { %v17239_v50 = vadd.f32 %v5848_v38, %v5808_v42  ;;  %6102 = vmatpush1.bf16.msra.mxu0 %v13669_v32  ;;  %v13758_v28 = vcombine.high %v1095_v21, %v1099_v23  ;;  %v959_v29 = vld [vmem:[%s16671_s20 + $0x10] sm:$0xff]  ;;  %vm6591_vm2 = vcmp.gt.f32.partialorder %v17230_v63, 0.0 }
 0x27c   : > { %v5850_v54 = vpop.f32.mrf.mxu1  ;;  %v5810_v51 = vpop.f32.mrf.mxu0  ;;  %6103 = vmatprep.subr.bf16.mxu0 %v13662_v36  ;;  %v963_v30 = vld [vmem:[%s16671_s20 + $0x30] sm:$0xff] }
 0x27d   : > { %6143 = vmatpush1.bf16.msra.mxu1 %v13797_v35  ;;  %v1087_v31 = vld [vmem:[%s16671_s20 + $0x410] sm:$0xff]  ;;  %v13757_v35 = vcombine.low %v1095_v21, %v1099_v23  ;;  %v13622_v36 = vcombine.high %v959_v29, %v963_v30  ;;  %v13621_v47 = vcombine.low %v959_v29, %v963_v30  ;;  %v13870_v54 = vcombine.high %v1207_v43, %v1211_v45 }
 0x27e   : > { %v5851_v57 = vpop.f32.mrf.mxu1  ;;  %6144 = vmatprep.subr.bf16.mxu1 %v13790_v39  ;;  %v1091_v32 = vld [vmem:[%s16671_s20 + $0x430] sm:$0xff]  ;;  %vm6592_vm0 = vcmp.gt.f32.partialorder %v17239_v50, 0.0 }
 0x27f   : > { %6104 = vmatpush1.bf16.msra.mxu0 %v13661_v55  ;;  %v13750_v42 = vcombine.high %v1087_v31, %v1091_v32  ;;  %v1079_v38 = vld [vmem:[%s16671_s20 + $0x3d0] sm:$0xff]  ;;  %v13749_v48 = vcombine.low %v1087_v31, %v1091_v32 }
 0x280   : > { %6105 = vmatprep.subr.bf16.mxu0 %v13654_v56  ;;  %v1083_v39 = vld [vmem:[%s16671_s20 + $0x3f0] sm:$0xff] }
 0x281   : > { %6145 = vmatpush1.bf16.msra.mxu1 %v13789_v52  ;;  %v13742_v49 = vcombine.high %v1079_v38, %v1083_v39  ;;  %v1071_v55 = vld [vmem:[%s16671_s20 + $0x390] sm:$0xff]  ;;  %v13741_v57 = vcombine.low %v1079_v38, %v1083_v39 }
 0x282   : > { %6146 = vmatprep.subr.bf16.mxu1 %v13782_v58  ;;  %v1075_v51 = vld [vmem:[%s16671_s20 + $0x3b0] sm:$0xff]  ;;  %v13869_v58 = vcombine.low %v1207_v43, %v1211_v45 }
 0x283   : > { %6106 = vmatpush1.bf16.msra.mxu0 %v13653_v0  ;;  %v1199_v52 = vld [vmem:[%s16671_s20 + $0x790] sm:$0xff]  ;;  %v13734_v59 = vcombine.high %v1071_v55, %v1075_v51 }
 0x284   : > { %6107 = vmatprep.subr.bf16.mxu0 %v13646_v6  ;;  %v1203_v56 = vld [vmem:[%s16671_s20 + $0x7b0] sm:$0xff]  ;;  %v13733_v6 = vcombine.low %v1071_v55, %v1075_v51 }
 0x285   : > { %6147 = vmatpush1.bf16.msra.mxu1 %v13781_v1  ;;  %v13862_v60 = vcombine.high %v1199_v52, %v1203_v56  ;;  %v1063_v61 = vld [vmem:[%s16671_s20 + $0x350] sm:$0xff] }
 0x286   : > { %6148 = vmatprep.subr.bf16.mxu1 %v13774_v7  ;;  %v1067_v62 = vld [vmem:[%s16671_s20 + $0x370] sm:$0xff]  ;;  %v13861_v7 = vcombine.low %v1199_v52, %v1203_v56 }
 0x287   : > { %6108 = vmatpush1.bf16.msra.mxu0 %v13645_v13  ;;  %v1191_v0 = vld [vmem:[%s16671_s20 + $0x750] sm:$0xff]  ;;  %v13726_v8 = vcombine.high %v1063_v61, %v1067_v62 }
 0x288   : > { %6109 = vmatprep.subr.bf16.mxu0 %v13638_v17  ;;  %v1195_v1 = vld [vmem:[%s16671_s20 + $0x770] sm:$0xff]  ;;  %v13725_v17 = vcombine.low %v1063_v61, %v1067_v62 }
 0x289   : > { %6149 = vmatpush1.bf16.msra.mxu1 %v13773_v15  ;;  %v13854_v9 = vcombine.high %v1191_v0, %v1195_v1  ;;  %v1055_v22 = vld [vmem:[%s16671_s20 + $0x310] sm:$0xff] }
 0x28a   : > { %6150 = vmatprep.subr.bf16.mxu1 %v13766_v18  ;;  %v1059_v12 = vld [vmem:[%s16671_s20 + $0x330] sm:$0xff]  ;;  %v13853_v18 = vcombine.low %v1191_v0, %v1195_v1 }
 0x28b   : > { %6110 = vmatpush1.bf16.msra.mxu0 %v13637_v24  ;;  %v1183_v13 = vld [vmem:[%s16671_s20 + $0x710] sm:$0xff]  ;;  %v13718_v19 = vcombine.high %v1055_v22, %v1059_v12 }
 0x28c   : > { %6111 = vmatprep.subr.bf16.mxu0 %v13630_v27  ;;  %v1187_v15 = vld [vmem:[%s16671_s20 + $0x730] sm:$0xff]  ;;  %v13717_v27 = vcombine.low %v1055_v22, %v1059_v12 }
 0x28d   : > { %6151 = vmatpush1.bf16.msra.mxu1 %v13765_v26  ;;  %v13846_v20 = vcombine.high %v1183_v13, %v1187_v15  ;;  %v1047_v21 = vld [vmem:[%s16671_s20 + $0x2d0] sm:$0xff] }
 0x28e   : > { %6152 = vmatprep.subr.bf16.mxu1 %v13758_v28  ;;  %v1051_v23 = vld [vmem:[%s16671_s20 + $0x2f0] sm:$0xff]  ;;  %v13845_v28 = vcombine.low %v1183_v13, %v1187_v15  ;;  %v17297_v15 = vsub.s32 3, %v16738_v44 }
 0x28f   : > { %6112 = vmatpush1.bf16.msra.mxu0 %v13629_v34  ;;  %v1175_v24 = vld [vmem:[%s16671_s20 + $0x6d0] sm:$0xff]  ;;  %v13710_v29 = vcombine.high %v1047_v21, %v1051_v23 }
 0x290   : > { %6113 = vmatprep.subr.bf16.mxu0 %v13622_v36  ;;  %v1179_v26 = vld [vmem:[%s16671_s20 + $0x6f0] sm:$0xff]  ;;  %v13709_v36 = vcombine.low %v1047_v21, %v1051_v23  ;;  %v15883_v21 = vld [vmem:[%s16679_s28] sm:$0xff] }
 0x291   : > { %6153 = vmatpush1.bf16.msra.mxu1 %v13757_v35  ;;  %v13838_v30 = vcombine.high %v1175_v24, %v1179_v26  ;;  %v1039_v31 = vld [vmem:[%s16671_s20 + $0x290] sm:$0xff] }
 0x292   : > { %6154 = vmatprep.subr.bf16.mxu1 %v13750_v42  ;;  %v1043_v32 = vld [vmem:[%s16671_s20 + $0x2b0] sm:$0xff]  ;;  %v13837_v42 = vcombine.low %v1175_v24, %v1179_v26 }
 0x293   : > { %6114 = vmatpush1.bf16.msra.mxu0 %v13621_v47  ;;  %v1167_v34 = vld [vmem:[%s16671_s20 + $0x690] sm:$0xff]  ;;  %v13702_v38 = vcombine.high %v1039_v31, %v1043_v32 }
 0x294   : > { %6115 = vmatprep.subr.bf16.mxu0 %v13742_v49  ;;  %v1171_v35 = vld [vmem:[%s16671_s20 + $0x6b0] sm:$0xff]  ;;  %v13701_v49 = vcombine.low %v1039_v31, %v1043_v32 }
 0x295   : > { %6155 = vmatpush1.bf16.msra.mxu1 %v13749_v48  ;;  %v13830_v39 = vcombine.high %v1167_v34, %v1171_v35  ;;  %v1031_v43 = vld [vmem:[%s16671_s20 + $0x250] sm:$0xff] }
 0x296   : > { %6156 = vmatprep.subr.bf16.mxu1 %v13870_v54  ;;  %v1035_v45 = vld [vmem:[%s16671_s20 + $0x270] sm:$0xff]  ;;  %v13829_v54 = vcombine.low %v1167_v34, %v1171_v35 }
 0x297   : > { %6116 = vmatpush2.bf16.msra.mxu0 %v13741_v57  ;;  %v1159_v47 = vld [vmem:[%s16671_s20 + $0x650] sm:$0xff]  ;;  %v13694_v55 = vcombine.high %v1031_v43, %v1035_v45 }
 0x298   : > { %6117 = vmatprep.subr.bf16.mxu0 %v13734_v59  ;;  %v1163_v48 = vld [vmem:[%s16671_s20 + $0x670] sm:$0xff]  ;;  %v13693_v59 = vcombine.low %v1031_v43, %v1035_v45 }
 0x299   : > { %6157 = vmatpush2.bf16.msra.mxu1 %v13869_v58  ;;  %v13822_v51 = vcombine.high %v1159_v47, %v1163_v48  ;;  %v1023_v52 = vld [vmem:[%s16671_s20 + $0x210] sm:$0xff] }
 0x29a   : > { %6158 = vmatprep.subr.bf16.mxu1 %v13862_v60  ;;  %v1027_v56 = vld [vmem:[%s16671_s20 + $0x230] sm:$0xff]  ;;  %v13821_v60 = vcombine.low %v1159_v47, %v1163_v48 }
 0x29b   : > { %6118 = vmatpush2.bf16.msra.mxu0 %v13733_v6  ;;  %v1151_v57 = vld [vmem:[%s16671_s20 + $0x610] sm:$0xff]  ;;  %v13686_v61 = vcombine.high %v1023_v52, %v1027_v56 }
 0x29c   : > { %6119 = vmatprep.subr.bf16.mxu0 %v13726_v8  ;;  %v1155_v58 = vld [vmem:[%s16671_s20 + $0x630] sm:$0xff]  ;;  %v13685_v8 = vcombine.low %v1023_v52, %v1027_v56 }
 0x29d   : > { %6159 = vmatpush2.bf16.msra.mxu1 %v13861_v7  ;;  %v13814_v62 = vcombine.high %v1151_v57, %v1155_v58  ;;  %v1271_v0 = vld [vmem:[%s16671_s20 + $0x9d0] sm:$0xff]  ;;  %v13813_v22 = vcombine.low %v1151_v57, %v1155_v58 }
 0x29e   : > { %6160 = vmatprep.subr.bf16.mxu1 %v13854_v9  ;;  %v1275_v1 = vld [vmem:[%s16671_s20 + $0x9f0] sm:$0xff]  ;;  %v17294_v9 = vsub.s32 2, %v16738_v44 }
 0x29f   : > { %6120 = vmatpush2.bf16.msra.mxu0 %v13725_v17  ;;  %v1399_v6 = vld [vmem:[%s16671_s20 + $0xdd0] sm:$0xff]  ;;  %v13934_v12 = vcombine.high %v1271_v0, %v1275_v1  ;;  %v13933_v24 = vcombine.low %v1271_v0, %v1275_v1 }
 0x2a0   : > { %6121 = vmatprep.subr.bf16.mxu0 %v13718_v19  ;;  %v1403_v7 = vld [vmem:[%s16671_s20 + $0xdf0] sm:$0xff]  ;;  %v1738_v23 = vrot.slane %v15883_v21, %v17294_v9 }
 0x2a1   : > { %6161 = vmatpush2.bf16.msra.mxu1 %v13853_v18  ;;  %v14062_v13 = vcombine.high %v1399_v6, %v1403_v7  ;;  %v1263_v17 = vld [vmem:[%s16671_s20 + $0x990] sm:$0xff]  ;;  %v14061_v26 = vcombine.low %v1399_v6, %v1403_v7 }
 0x2a2   : > { %6162 = vmatprep.subr.bf16.mxu1 %v13846_v20  ;;  %v1267_v18 = vld [vmem:[%s16671_s20 + $0x9b0] sm:$0xff] }
 0x2a3   : > { %6122 = vmatpush2.bf16.msra.mxu0 %v13717_v27  ;;  %v1391_v19 = vld [vmem:[%s16671_s20 + $0xd90] sm:$0xff]  ;;  %v13926_v27 = vcombine.high %v1263_v17, %v1267_v18 }
 0x2a4   : > { %6123 = vmatprep.subr.bf16.mxu0 %v13710_v29  ;;  %v1395_v20 = vld [vmem:[%s16671_s20 + $0xdb0] sm:$0xff] }
 0x2a5   : > { %6163 = vmatpush2.bf16.msra.mxu1 %v13845_v28  ;;  %v1742_v28 = vrot.slane %v15883_v21, %v17297_v15  ;;  %v14054_v29 = vcombine.high %v1391_v19, %v1395_v20  ;;  %v1259_v31 = vld [vmem:[%s16671_s20 + $0x970] sm:$0xff]  ;;  %v14053_v43 = vcombine.low %v1391_v19, %v1395_v20 }
 0x2a6   : > { %6164 = vmatprep.subr.bf16.mxu1 %v13838_v30  ;;  %v1255_v30 = vld [vmem:[%s16671_s20 + $0x950] sm:$0xff] }
 0x2a7   : > { %6124 = vmatpush2.bf16.msra.mxu0 %v13709_v36  ;;  %v1383_v34 = vld [vmem:[%s16671_s20 + $0xd50] sm:$0xff]  ;;  %v13918_v45 = vcombine.high %v1255_v30, %v1259_v31 }
 0x2a8   : > { %6125 = vmatprep.subr.bf16.mxu0 %v13702_v38  ;;  %v1387_v35 = vld [vmem:[%s16671_s20 + $0xd70] sm:$0xff]  ;;  %v13925_v38 = vcombine.low %v1263_v17, %v1267_v18 }
 0x2a9   : > { %6165 = vmatpush2.bf16.msra.mxu1 %v13837_v42  ;;  %v1375_v56 = vld [vmem:[%s16671_s20 + $0xd10] sm:$0xff] }
 0x2aa   : > { %6166 = vmatprep.subr.bf16.mxu1 %v13830_v39  ;;  %v1379_v57 = vld [vmem:[%s16671_s20 + $0xd30] sm:$0xff] }
 0x2ab   : > { %6126 = vmatpush2.bf16.msra.mxu0 %v13701_v49  ;;  %v14038_v6 = vcombine.high %v1375_v56, %v1379_v57  ;;  %v1239_v7 = vld [vmem:[%s16671_s20 + $0x8d0] sm:$0xff]  ;;  %v14037_v17 = vcombine.low %v1375_v56, %v1379_v57 }
 0x2ac   : > { %6127 = vmatprep.subr.bf16.mxu0 %v13694_v55  ;;  %v1247_v55 = vld [vmem:[%s16671_s20 + $0x910] sm:$0xff] }
 0x2ad   : > { %6167 = vmatpush2.bf16.msra.mxu1 %v13829_v54  ;;  %v14046_v54 = vcombine.high %v1383_v34, %v1387_v35  ;;  %v1231_v20 = vld [vmem:[%s16671_s20 + $0x890] sm:$0xff] }
 0x2ae   : > { %6168 = vmatprep.subr.bf16.mxu1 %v13822_v51  ;;  %v1251_v51 = vld [vmem:[%s16671_s20 + $0x930] sm:$0xff] }
 0x2af   : > { %6128 = vmatpush2.bf16.msra.mxu0 %v13693_v59  ;;  %v13910_v0 = vcombine.high %v1247_v55, %v1251_v51  ;;  %v1235_v21 = vld [vmem:[%s16671_s20 + $0x8b0] sm:$0xff] }
 0x2b0   : > { %6129 = vmatprep.subr.bf16.mxu0 %v13686_v61  ;;  %v1339_v56 = vld [vmem:[%s16671_s20 + $0xbf0] sm:$0xff] }
 0x2b1   : > { %6169 = vmatpush2.bf16.msra.mxu1 %v13821_v60  ;;  %v13917_v60 = vcombine.low %v1255_v30, %v1259_v31  ;;  %v1223_v30 = vld [vmem:[%s16671_s20 + $0x850] sm:$0xff] }
 0x2b2   : > { %6170 = vmatprep.subr.bf16.mxu1 %v13814_v62  ;;  %v14045_v62 = vcombine.low %v1383_v34, %v1387_v35  ;;  %v1227_v31 = vld [vmem:[%s16671_s20 + $0x870] sm:$0xff]  ;;  %v13893_v35 = vcombine.low %v1231_v20, %v1235_v21 }
 0x2b3   : > { %6130 = vmatpush2.bf16.msra.mxu0 %v13685_v8  ;;  %v1243_v8 = vld [vmem:[%s16671_s20 + $0x8f0] sm:$0xff] }
 0x2b4   : > { %6181 = vmatprep.subr.bf16.mxu0 %v13934_v12  ;;  %v1371_v12 = vld [vmem:[%s16671_s20 + $0xcf0] sm:$0xff]  ;;  %v13902_v18 = vcombine.high %v1239_v7, %v1243_v8 }
 0x2b5   : > { %6171 = vmatpush2.bf16.msra.mxu1 %v13813_v22  ;;  %v1367_v22 = vld [vmem:[%s16671_s20 + $0xcd0] sm:$0xff] }
 0x2b6   : > { %6222 = vmatprep.subr.bf16.mxu1 %v14062_v13  ;;  %v5887_v32 = vpop.f32.mrf.mxu0  ;;  %6132 = vmatmul.mubr.bf16.vlgmr.msra.gmra.mxu0 %v16819_v33  ;;  %v13909_v13 = vcombine.low %v1247_v55, %v1251_v51  ;;  %v14030_v19 = vcombine.high %v1367_v22, %v1371_v12  ;;  %v1355_v34 = vld [vmem:[%s16671_s20 + $0xc70] sm:$0xff] }
 0x2b7   : > { %v5888_v36 = vadd.f32 %v5887_v32, %v1738_v23  ;;  %6182 = vmatpush1.bf16.msra.mxu0 %v13933_v24  ;;  %6213 = vmatprep.mubr.bf16.mxu0 %v16833_v46  ;;  %v1359_v23 = vld [vmem:[%s16671_s20 + $0xc90] sm:$0xff] }
 0x2b8   : > { %v5928_v42 = vpop.f32.mrf.mxu1  ;;  %6173 = vmatmul.mubr.bf16.vlgmr.msra.gmra.mxu1 %v16827_v37  ;;  %v5889_v39 = vpop.f32.mrf.mxu0  ;;  %6183 = vmatprep.subr.bf16.mxu0 %v13926_v27  ;;  %v1363_v24 = vld [vmem:[%s16671_s20 + $0xcb0] sm:$0xff]  ;;  %v14029_v27 = vcombine.low %v1367_v22, %v1371_v12 }
 0x2b9   : > { %6223 = vmatpush1.bf16.msra.mxu1 %v14061_v26  ;;  %v17312_v47 = vadd.f32 %v5928_v42, %v5888_v36  ;;  %v5890_v48 = vadd.f32 %v5889_v39, %v1742_v28  ;;  %6254 = vmatprep.mubr.bf16.mxu1 %v16836_v5  ;;  %v13901_v26 = vcombine.low %v1239_v7, %v1243_v8  ;;  %v1351_v32 = vld [vmem:[%s16671_s20 + $0xc50] sm:$0xff] }
 0x2ba   : > { %v5930_v49 = vpop.f32.mrf.mxu1  ;;  %6224 = vmatprep.subr.bf16.mxu1 %v14054_v29  ;;  %v5891_v52 = vpop.f32.mrf.mxu0  ;;  %v13894_v28 = vcombine.high %v1231_v20, %v1235_v21  ;;  %v14022_v29 = vcombine.high %v1359_v23, %v1363_v24  ;;  %v14021_v36 = vcombine.low %v1359_v23, %v1363_v24  ;;  %v13886_v42 = vcombine.high %v1223_v30, %v1227_v31  ;;  %v1215_v39 = vld [vmem:[%s16671_s20 + $0x810] sm:$0xff] }
 0x2bb   : > { %v17320_v58 = vadd.f32 %v5930_v49, %v5890_v48  ;;  %6184 = vmatpush1.bf16.msra.mxu0 %v13925_v38  ;;  %v14014_v38 = vcombine.high %v1351_v32, %v1355_v34  ;;  %v1347_v48 = vld [vmem:[%s16671_s20 + $0xc30] sm:$0xff]  ;;  %v13885_v49 = vcombine.low %v1223_v30, %v1227_v31 }
 0x2bc   : > { %v5932_v59 = vpop.f32.mrf.mxu1  ;;  %v5892_v61 = vpop.f32.mrf.mxu0  ;;  %6185 = vmatprep.subr.bf16.mxu0 %v13918_v45  ;;  %v1343_v45 = vld [vmem:[%s16671_s20 + $0xc10] sm:$0xff] }
 0x2bd   : > { %6225 = vmatpush1.bf16.msra.mxu1 %v14053_v43  ;;  %v1219_v43 = vld [vmem:[%s16671_s20 + $0x830] sm:$0xff]  ;;  %v14006_v51 = vcombine.high %v1343_v45, %v1347_v48  ;;  %v14005_v61 = vcombine.low %v1343_v45, %v1347_v48 }
 0x2be   : > { %v5933_v1 = vpop.f32.mrf.mxu1  ;;  %6226 = vmatprep.subr.bf16.mxu1 %v14046_v54  ;;  %v14013_v54 = vcombine.low %v1351_v32, %v1355_v34  ;;  %v13878_v55 = vcombine.high %v1215_v39, %v1219_v43  ;;  %v1335_v52 = vld [vmem:[%s16671_s20 + $0xbd0] sm:$0xff] }
 0x2bf   : > { %6186 = vmatpush1.bf16.msra.mxu0 %v13917_v60  ;;  %v1463_v57 = vld [vmem:[%s16671_s20 + $0xfd0] sm:$0xff]  ;;  %v13877_v60 = vcombine.low %v1215_v39, %v1219_v43  ;;  %v13997_v22 = vcombine.low %v1335_v52, %v1339_v56 }
 0x2c0   : > { %6187 = vmatprep.subr.bf16.mxu0 %v13910_v0  ;;  %v1467_v59 = vld [vmem:[%s16671_s20 + $0xff0] sm:$0xff] }
 0x2c1   : > { %6227 = vmatpush1.bf16.msra.mxu1 %v14045_v62  ;;  %v13998_v62 = vcombine.high %v1335_v52, %v1339_v56  ;;  %v14126_v0 = vcombine.high %v1463_v57, %v1467_v59  ;;  %v1327_v1 = vld [vmem:[%s16671_s20 + $0xb90] sm:$0xff]  ;;  %v14125_v12 = vcombine.low %v1463_v57, %v1467_v59 }
 0x2c2   : > { %6228 = vmatprep.subr.bf16.mxu1 %v14038_v6  ;;  %v1331_v6 = vld [vmem:[%s16671_s20 + $0xbb0] sm:$0xff] }
 0x2c3   : > { %6188 = vmatpush1.bf16.msra.mxu0 %v13909_v13  ;;  %v1455_v7 = vld [vmem:[%s16671_s20 + $0xf90] sm:$0xff]  ;;  %v13990_v13 = vcombine.high %v1327_v1, %v1331_v6  ;;  %v13989_v23 = vcombine.low %v1327_v1, %v1331_v6 }
 0x2c4   : > { %6189 = vmatprep.subr.bf16.mxu0 %v13902_v18  ;;  %v1459_v8 = vld [vmem:[%s16671_s20 + $0xfb0] sm:$0xff] }
 0x2c5   : > { %6229 = vmatpush1.bf16.msra.mxu1 %v14037_v17  ;;  %v14118_v17 = vcombine.high %v1455_v7, %v1459_v8  ;;  %v1319_v18 = vld [vmem:[%s16671_s20 + $0xb50] sm:$0xff]  ;;  %v14117_v24 = vcombine.low %v1455_v7, %v1459_v8 }
 0x2c6   : > { %6230 = vmatprep.subr.bf16.mxu1 %v14030_v19  ;;  %v1323_v19 = vld [vmem:[%s16671_s20 + $0xb70] sm:$0xff] }
 0x2c7   : > { %6190 = vmatpush1.bf16.msra.mxu0 %v13901_v26  ;;  %v1447_v20 = vld [vmem:[%s16671_s20 + $0xf50] sm:$0xff]  ;;  %v13982_v26 = vcombine.high %v1319_v18, %v1323_v19  ;;  %v13981_v32 = vcombine.low %v1319_v18, %v1323_v19 }
 0x2c8   : > { %6191 = vmatprep.subr.bf16.mxu0 %v13894_v28  ;;  %v1451_v21 = vld [vmem:[%s16671_s20 + $0xf70] sm:$0xff] }
 0x2c9   : > { %6231 = vmatpush1.bf16.msra.mxu1 %v14029_v27  ;;  %v14110_v27 = vcombine.high %v1447_v20, %v1451_v21  ;;  %v1311_v28 = vld [vmem:[%s16671_s20 + $0xb10] sm:$0xff]  ;;  %v14109_v34 = vcombine.low %v1447_v20, %v1451_v21 }
 0x2ca   : > { %6232 = vmatprep.subr.bf16.mxu1 %v14022_v29  ;;  %v1315_v29 = vld [vmem:[%s16671_s20 + $0xb30] sm:$0xff] }
 0x2cb   : > { %6192 = vmatpush1.bf16.msra.mxu0 %v13893_v35  ;;  %v1439_v30 = vld [vmem:[%s16671_s20 + $0xf10] sm:$0xff]  ;;  %v13974_v35 = vcombine.high %v1311_v28, %v1315_v29  ;;  %v13973_v45 = vcombine.low %v1311_v28, %v1315_v29 }
 0x2cc   : > { %6193 = vmatprep.subr.bf16.mxu0 %v13886_v42  ;;  %v1443_v31 = vld [vmem:[%s16671_s20 + $0xf30] sm:$0xff] }
 0x2cd   : > { %6233 = vmatpush1.bf16.msra.mxu1 %v14021_v36  ;;  %v14102_v36 = vcombine.high %v1439_v30, %v1443_v31  ;;  %v1303_v42 = vld [vmem:[%s16671_s20 + $0xad0] sm:$0xff]  ;;  %v14101_v48 = vcombine.low %v1439_v30, %v1443_v31 }
 0x2ce   : > { %6234 = vmatprep.subr.bf16.mxu1 %v14014_v38  ;;  %v1307_v38 = vld [vmem:[%s16671_s20 + $0xaf0] sm:$0xff] }
 0x2cf   : > { %6194 = vmatpush1.bf16.msra.mxu0 %v13885_v49  ;;  %v1431_v39 = vld [vmem:[%s16671_s20 + $0xed0] sm:$0xff]  ;;  %v13966_v49 = vcombine.high %v1303_v42, %v1307_v38  ;;  %v13965_v57 = vcombine.low %v1303_v42, %v1307_v38 }
 0x2d0   : > { %6195 = vmatprep.subr.bf16.mxu0 %v13878_v55  ;;  %v1435_v43 = vld [vmem:[%s16671_s20 + $0xef0] sm:$0xff] }
 0x2d1   : > { %6235 = vmatpush1.bf16.msra.mxu1 %v14013_v54  ;;  %v14094_v54 = vcombine.high %v1431_v39, %v1435_v43  ;;  %v1295_v55 = vld [vmem:[%s16671_s20 + $0xa90] sm:$0xff]  ;;  %v14093_v59 = vcombine.low %v1431_v39, %v1435_v43 }
 0x2d2   : > { %6236 = vmatprep.subr.bf16.mxu1 %v14006_v51  ;;  %v1299_v51 = vld [vmem:[%s16671_s20 + $0xab0] sm:$0xff] }
 0x2d3   : > { %6196 = vmatpush1.bf16.msra.mxu0 %v13877_v60  ;;  %v1423_v52 = vld [vmem:[%s16671_s20 + $0xe90] sm:$0xff]  ;;  %v13958_v60 = vcombine.high %v1295_v55, %v1299_v51  ;;  %v13957_v7 = vcombine.low %v1295_v55, %v1299_v51 }
 0x2d4   : > { %6197 = vmatprep.subr.bf16.mxu0 %v13998_v62  ;;  %v1427_v56 = vld [vmem:[%s16671_s20 + $0xeb0] sm:$0xff] }
 0x2d5   : > { %6237 = vmatpush1.bf16.msra.mxu1 %v14005_v61  ;;  %v14086_v61 = vcombine.high %v1423_v52, %v1427_v56  ;;  %v1287_v62 = vld [vmem:[%s16671_s20 + $0xa50] sm:$0xff]  ;;  %v14085_v8 = vcombine.low %v1423_v52, %v1427_v56 }
 0x2d6   : > { %6238 = vmatprep.subr.bf16.mxu1 %v14126_v0  ;;  %v1291_v0 = vld [vmem:[%s16671_s20 + $0xa70] sm:$0xff] }
 0x2d7   : > { %6198 = vmatpush2.bf16.msra.mxu0 %v13997_v22  ;;  %v1415_v1 = vld [vmem:[%s16671_s20 + $0xe50] sm:$0xff]  ;;  %v13950_v22 = vcombine.high %v1287_v62, %v1291_v0  ;;  %v13949_v20 = vcombine.low %v1287_v62, %v1291_v0 }
 0x2d8   : > { %6199 = vmatprep.subr.bf16.mxu0 %v13990_v13  ;;  %v1419_v6 = vld [vmem:[%s16671_s20 + $0xe70] sm:$0xff] }
 0x2d9   : > { %6239 = vmatpush2.bf16.msra.mxu1 %v14125_v12  ;;  %v14078_v12 = vcombine.high %v1415_v1, %v1419_v6  ;;  %v1279_v13 = vld [vmem:[%s16671_s20 + $0xa10] sm:$0xff]  ;;  %v14077_v21 = vcombine.low %v1415_v1, %v1419_v6 }
 0x2da   : > { %6240 = vmatprep.subr.bf16.mxu1 %v14118_v17  ;;  %v1283_v17 = vld [vmem:[%s16671_s20 + $0xa30] sm:$0xff] }
 0x2db   : > { %6200 = vmatpush2.bf16.msra.mxu0 %v13989_v23  ;;  %v1407_v18 = vld [vmem:[%s16671_s20 + $0xe10] sm:$0xff]  ;;  %v13942_v23 = vcombine.high %v1279_v13, %v1283_v17  ;;  %v13941_v30 = vcombine.low %v1279_v13, %v1283_v17 }
 0x2dc   : > { %6201 = vmatprep.subr.bf16.mxu0 %v13982_v26  ;;  %v1411_v19 = vld [vmem:[%s16671_s20 + $0xe30] sm:$0xff] }
 0x2dd   : > { %6241 = vmatpush2.bf16.msra.mxu1 %v14117_v24  ;;  %v14070_v24 = vcombine.high %v1407_v18, %v1411_v19  ;;  %v1527_v26 = vld [vmem:[%s16671_s20 + $0x11d0] sm:$0xff]  ;;  %v14069_v31 = vcombine.low %v1407_v18, %v1411_v19 }
 0x2de   : > { %6242 = vmatprep.subr.bf16.mxu1 %v14110_v27  ;;  %v1531_v27 = vld [vmem:[%s16671_s20 + $0x11f0] sm:$0xff] }
 0x2df   : > { %6202 = vmatpush2.bf16.msra.mxu0 %v13981_v32  ;;  %v1655_v28 = vld [vmem:[%s16671_s20 + $0x15d0] sm:$0xff]  ;;  %v14190_v32 = vcombine.high %v1527_v26, %v1531_v27  ;;  %v14189_v39 = vcombine.low %v1527_v26, %v1531_v27 }
 0x2e0   : > { %6203 = vmatprep.subr.bf16.mxu0 %v13974_v35  ;;  %v1659_v29 = vld [vmem:[%s16671_s20 + $0x15f0] sm:$0xff] }
 0x2e1   : > { %6243 = vmatpush2.bf16.msra.mxu1 %v14109_v34  ;;  %v14318_v34 = vcombine.high %v1655_v28, %v1659_v29  ;;  %v1519_v35 = vld [vmem:[%s16671_s20 + $0x1190] sm:$0xff]  ;;  %v14317_v43 = vcombine.low %v1655_v28, %v1659_v29 }
 0x2e2   : > { %6244 = vmatprep.subr.bf16.mxu1 %v14102_v36  ;;  %v1523_v36 = vld [vmem:[%s16671_s20 + $0x11b0] sm:$0xff] }
 0x2e3   : > { %6204 = vmatpush2.bf16.msra.mxu0 %v13973_v45  ;;  %v1647_v42 = vld [vmem:[%s16671_s20 + $0x1590] sm:$0xff]  ;;  %v14182_v45 = vcombine.high %v1519_v35, %v1523_v36 }
 0x2e4   : > { %6205 = vmatprep.subr.bf16.mxu0 %v13966_v49  ;;  %v1651_v38 = vld [vmem:[%s16671_s20 + $0x15b0] sm:$0xff] }
 0x2e5   : > { %6245 = vmatpush2.bf16.msra.mxu1 %v14101_v48  ;;  %v14310_v48 = vcombine.high %v1647_v42, %v1651_v38  ;;  %v1511_v49 = vld [vmem:[%s16671_s20 + $0x1150] sm:$0xff] }
 0x2e6   : > { %6246 = vmatprep.subr.bf16.mxu1 %v14094_v54  ;;  %v1515_v54 = vld [vmem:[%s16671_s20 + $0x1170] sm:$0xff] }
 0x2e7   : > { %6206 = vmatpush2.bf16.msra.mxu0 %v13965_v57  ;;  %v1639_v51 = vld [vmem:[%s16671_s20 + $0x1550] sm:$0xff]  ;;  %v14174_v62 = vcombine.high %v1511_v49, %v1515_v54 }
 0x2e8   : > { %6207 = vmatprep.subr.bf16.mxu0 %v13958_v60  ;;  %v1643_v52 = vld [vmem:[%s16671_s20 + $0x1570] sm:$0xff] }
 0x2e9   : > { %6247 = vmatpush2.bf16.msra.mxu1 %v14093_v59  ;;  %v14181_v59 = vcombine.low %v1519_v35, %v1523_v36  ;;  %v1635_v13 = vld [vmem:[%s16671_s20 + $0x1530] sm:$0xff] }
 0x2ea   : > { %6248 = vmatprep.subr.bf16.mxu1 %v14086_v61  ;;  %v14309_v61 = vcombine.low %v1647_v42, %v1651_v38  ;;  %v1495_v26 = vld [vmem:[%s16671_s20 + $0x10d0] sm:$0xff] }
 0x2eb   : > { %6208 = vmatpush2.bf16.msra.mxu0 %v13957_v7  ;;  %v1503_v7 = vld [vmem:[%s16671_s20 + $0x1110] sm:$0xff] }
 0x2ec   : > { %6209 = vmatprep.subr.bf16.mxu0 %v13950_v22  ;;  %v1499_v27 = vld [vmem:[%s16671_s20 + $0x10f0] sm:$0xff] }
 0x2ed   : > { %6249 = vmatpush2.bf16.msra.mxu1 %v14085_v8  ;;  %v1507_v8 = vld [vmem:[%s16671_s20 + $0x1130] sm:$0xff] }
 0x2ee   : > { %6250 = vmatprep.subr.bf16.mxu1 %v14078_v12  ;;  %v1631_v12 = vld [vmem:[%s16671_s20 + $0x1510] sm:$0xff] }
 0x2ef   : > { %6210 = vmatpush2.bf16.msra.mxu0 %v13949_v20  ;;  %v14301_v20 = vcombine.low %v1639_v51, %v1643_v52  ;;  %v1623_v28 = vld [vmem:[%s16671_s20 + $0x14d0] sm:$0xff] }
 0x2f0   : > { %6211 = vmatprep.subr.bf16.mxu0 %v13942_v23  ;;  %v1627_v29 = vld [vmem:[%s16671_s20 + $0x14f0] sm:$0xff] }
 0x2f1   : > { %6251 = vmatpush2.bf16.msra.mxu1 %v14077_v21  ;;  %v14166_v21 = vcombine.high %v1503_v7, %v1507_v8  ;;  %v1487_v35 = vld [vmem:[%s16671_s20 + $0x1090] sm:$0xff] }
 0x2f2   : > { %6252 = vmatprep.subr.bf16.mxu1 %v14070_v24  ;;  %v14294_v24 = vcombine.high %v1631_v12, %v1635_v13  ;;  %v1491_v36 = vld [vmem:[%s16671_s20 + $0x10b0] sm:$0xff] }
 0x2f3   : > { %6212 = vmatpush2.bf16.msra.mxu0 %v13941_v30  ;;  %v14165_v30 = vcombine.low %v1503_v7, %v1507_v8  ;;  %v1615_v42 = vld [vmem:[%s16671_s20 + $0x1490] sm:$0xff] }
 0x2f4   : > { %6263 = vmatprep.subr.bf16.mxu0 %v14190_v32  ;;  %v14158_v32 = vcombine.high %v1495_v26, %v1499_v27  ;;  %v1619_v38 = vld [vmem:[%s16671_s20 + $0x14b0] sm:$0xff] }
 0x2f5   : > { %6253 = vmatpush2.bf16.msra.mxu1 %v14069_v31  ;;  %v14293_v31 = vcombine.low %v1631_v12, %v1635_v13  ;;  %v1595_v12 = vld [vmem:[%s16671_s20 + $0x13f0] sm:$0xff] }
 0x2f6   : > { %6304 = vmatprep.subr.bf16.mxu1 %v14318_v34  ;;  %v5969_v55 = vpop.f32.mrf.mxu0  ;;  %6214 = vmatmul.mubr.bf16.vlgmr.msra.gmra.mxu0 %v16912_v2  ;;  %v14286_v34 = vcombine.high %v1623_v28, %v1627_v29  ;;  %v1719_v13 = vld [vmem:[%s16671_s20 + $0x17d0] sm:$0xff] }
 0x2f7   : > { %v5970_v56 = vadd.f32 %v5969_v55, %v17312_v47  ;;  %6264 = vmatpush1.bf16.msra.mxu0 %v14189_v39  ;;  %v14302_v47 = vcombine.high %v1639_v51, %v1643_v52  ;;  %6295 = vmatprep.mubr.bf16.mxu0 %v16924_v14  ;;  %v14157_v39 = vcombine.low %v1495_v26, %v1499_v27  ;;  %v1607_v55 = vld [vmem:[%s16671_s20 + $0x1450] sm:$0xff] }
 0x2f8   : > { %v6010_v57 = vpop.f32.mrf.mxu1  ;;  %6255 = vmatmul.mubr.bf16.vlgmr.msra.gmra.mxu1 %v16918_v4  ;;  %v5971_v60 = vpop.f32.mrf.mxu0  ;;  %6265 = vmatprep.subr.bf16.mxu0 %v14182_v45  ;;  %v14150_v45 = vcombine.high %v1487_v35, %v1491_v36  ;;  %v1611_v51 = vld [vmem:[%s16671_s20 + $0x1470] sm:$0xff]  ;;  %v14149_v52 = vcombine.low %v1487_v35, %v1491_v36 }
 0x2f9   : > { %6305 = vmatpush1.bf16.msra.mxu1 %v14317_v43  ;;  %v17385_v0 = vadd.f32 %v6010_v57, %v5970_v56  ;;  %v5972_v1 = vadd.f32 %v5971_v60, %v17320_v58  ;;  %6336 = vmatprep.mubr.bf16.mxu1 %v16927_v25  ;;  %v14173_v58 = vcombine.low %v1511_v49, %v1515_v54  ;;  %v1479_v49 = vld [vmem:[%s16671_s20 + $0x1050] sm:$0xff] }
 0x2fa   : > { %v6012_v6 = vpop.f32.mrf.mxu1  ;;  %6306 = vmatprep.subr.bf16.mxu1 %v14310_v48  ;;  %v5973_v22 = vpop.f32.mrf.mxu0  ;;  %v14285_v43 = vcombine.low %v1623_v28, %v1627_v29  ;;  %v14278_v48 = vcombine.high %v1615_v42, %v1619_v38  ;;  %v1483_v54 = vld [vmem:[%s16671_s20 + $0x1070] sm:$0xff]  ;;  %v14277_v56 = vcombine.low %v1615_v42, %v1619_v38 }
 0x2fb   : > { %v17394_v17 = vadd.f32 %v6012_v6, %v5972_v1  ;;  %6266 = vmatpush1.bf16.msra.mxu0 %v14181_v59  ;;  %v14142_v57 = vcombine.high %v1479_v49, %v1483_v54  ;;  %v14270_v59 = vcombine.high %v1607_v55, %v1611_v51  ;;  %v1471_v60 = vld [vmem:[%s16671_s20 + $0x1010] sm:$0xff]  ;;  %v14141_v6 = vcombine.low %v1479_v49, %v1483_v54 }
 0x2fc   : > { %v6014_v18 = vpop.f32.mrf.mxu1  ;;  %v5974_v19 = vpop.f32.mrf.mxu0  ;;  %6267 = vmatprep.subr.bf16.mxu0 %v14174_v62  ;;  %v1599_v62 = vld [vmem:[%s16671_s20 + $0x1410] sm:$0xff] }
 0x2fd   : > { %6307 = vmatpush1.bf16.msra.mxu1 %v14309_v61  ;;  %v1475_v61 = vld [vmem:[%s16671_s20 + $0x1030] sm:$0xff] }
 0x2fe   : > { %v6015_v23 = vpop.f32.mrf.mxu1  ;;  %6308 = vmatprep.subr.bf16.mxu1 %v14302_v47  ;;  %v1603_v1 = vld [vmem:[%s16671_s20 + $0x1430] sm:$0xff]  ;;  %v14269_v47 = vcombine.low %v1607_v55, %v1611_v51  ;;  %v14134_v7 = vcombine.high %v1471_v60, %v1475_v61 }
 0x2ff   : > { %6268 = vmatpush1.bf16.msra.mxu0 %v14173_v58  ;;  %v14262_v8 = vcombine.high %v1599_v62, %v1603_v1  ;;  %v1591_v22 = vld [vmem:[%s16671_s20 + $0x13d0] sm:$0xff]  ;;  %v14133_v58 = vcombine.low %v1471_v60, %v1475_v61  ;;  %v14261_v19 = vcombine.low %v1599_v62, %v1603_v1 }
 0x300   : > { %6269 = vmatprep.subr.bf16.mxu0 %v14166_v21  ;;  %v1723_v18 = vld [vmem:[%s16671_s20 + $0x17f0] sm:$0xff]  ;;  %v14253_v28 = vcombine.low %v1591_v22, %v1595_v12 }
 0x301   : > { %6309 = vmatpush1.bf16.msra.mxu1 %v14301_v20  ;;  %v14254_v20 = vcombine.high %v1591_v22, %v1595_v12  ;;  %v14382_v21 = vcombine.high %v1719_v13, %v1723_v18  ;;  %v1583_v23 = vld [vmem:[%s16671_s20 + $0x1390] sm:$0xff]  ;;  %v14381_v29 = vcombine.low %v1719_v13, %v1723_v18 }
 0x302   : > { %6310 = vmatprep.subr.bf16.mxu1 %v14294_v24  ;;  %v1587_v24 = vld [vmem:[%s16671_s20 + $0x13b0] sm:$0xff] }
 0x303   : > { %6270 = vmatpush1.bf16.msra.mxu0 %v14165_v30  ;;  %v1711_v26 = vld [vmem:[%s16671_s20 + $0x1790] sm:$0xff]  ;;  %v14246_v30 = vcombine.high %v1583_v23, %v1587_v24  ;;  %v14245_v42 = vcombine.low %v1583_v23, %v1587_v24 }
 0x304   : > { %6271 = vmatprep.subr.bf16.mxu0 %v14158_v32  ;;  %v1715_v27 = vld [vmem:[%s16671_s20 + $0x17b0] sm:$0xff] }
 0x305   : > { %6311 = vmatpush1.bf16.msra.mxu1 %v14293_v31  ;;  %v14374_v31 = vcombine.high %v1711_v26, %v1715_v27  ;;  %v1575_v32 = vld [vmem:[%s16671_s20 + $0x1350] sm:$0xff]  ;;  %v14373_v38 = vcombine.low %v1711_v26, %v1715_v27 }
 0x306   : > { %6312 = vmatprep.subr.bf16.mxu1 %v14286_v34  ;;  %v1579_v34 = vld [vmem:[%s16671_s20 + $0x1370] sm:$0xff] }
 0x307   : > { %6272 = vmatpush1.bf16.msra.mxu0 %v14157_v39  ;;  %v1703_v35 = vld [vmem:[%s16671_s20 + $0x1750] sm:$0xff]  ;;  %v14238_v39 = vcombine.high %v1575_v32, %v1579_v34  ;;  %v14237_v55 = vcombine.low %v1575_v32, %v1579_v34 }
 0x308   : > { %6273 = vmatprep.subr.bf16.mxu0 %v14150_v45  ;;  %v1707_v36 = vld [vmem:[%s16671_s20 + $0x1770] sm:$0xff] }
 0x309   : > { %6313 = vmatpush1.bf16.msra.mxu1 %v14285_v43  ;;  %v14366_v43 = vcombine.high %v1703_v35, %v1707_v36  ;;  %v1567_v45 = vld [vmem:[%s16671_s20 + $0x1310] sm:$0xff]  ;;  %v14365_v51 = vcombine.low %v1703_v35, %v1707_v36 }
 0x30a   : > { %6314 = vmatprep.subr.bf16.mxu1 %v14278_v48  ;;  %v1571_v48 = vld [vmem:[%s16671_s20 + $0x1330] sm:$0xff] }
 0x30b   : > { %6274 = vmatpush1.bf16.msra.mxu0 %v14149_v52  ;;  %v1695_v49 = vld [vmem:[%s16671_s20 + $0x1710] sm:$0xff]  ;;  %v14230_v52 = vcombine.high %v1567_v45, %v1571_v48  ;;  %v14229_v62 = vcombine.low %v1567_v45, %v1571_v48  ;;  %v1144_v45 = vld [vmem:[%s16671_s20 + $0x5d8] sm:$0xff] }
 0x30c   : > { %6275 = vmatprep.subr.bf16.mxu0 %v14142_v57  ;;  %v1699_v54 = vld [vmem:[%s16671_s20 + $0x1730] sm:$0xff]  ;;  %v1148_v48 = vld [vmem:[%s16671_s20 + $0x5f8] sm:$0xff] }
 0x30d   : > { %6315 = vmatpush1.bf16.msra.mxu1 %v14277_v56  ;;  %v14358_v56 = vcombine.high %v1695_v49, %v1699_v54  ;;  %v1559_v57 = vld [vmem:[%s16671_s20 + $0x12d0] sm:$0xff]  ;;  %v14357_v1 = vcombine.low %v1695_v49, %v1699_v54 }
 0x30e   : > { %6316 = vmatprep.subr.bf16.mxu1 %v14270_v59  ;;  %v1563_v59 = vld [vmem:[%s16671_s20 + $0x12f0] sm:$0xff] }
 0x30f   : > { %6276 = vmatpush1.bf16.msra.mxu0 %v14141_v6  ;;  %v1687_v60 = vld [vmem:[%s16671_s20 + $0x16d0] sm:$0xff]  ;;  %v14222_v6 = vcombine.high %v1559_v57, %v1563_v59  ;;  %v14221_v13 = vcombine.low %v1559_v57, %v1563_v59  ;;  %v1136_v57 = vld [vmem:[%s16671_s20 + $0x598] sm:$0xff] }
 0x310   : > { %6277 = vmatprep.subr.bf16.mxu0 %v14134_v7  ;;  %v1691_v61 = vld [vmem:[%s16671_s20 + $0x16f0] sm:$0xff]  ;;  %v1140_v59 = vld [vmem:[%s16671_s20 + $0x5b8] sm:$0xff] }
 0x311   : > { %6317 = vmatpush1.bf16.msra.mxu1 %v14269_v47  ;;  %v14350_v47 = vcombine.high %v1687_v60, %v1691_v61  ;;  %v1551_v7 = vld [vmem:[%s16671_s20 + $0x1290] sm:$0xff]  ;;  %v14349_v18 = vcombine.low %v1687_v60, %v1691_v61  ;;  %v13807_v61 = vcombine.low %v1144_v45, %v1148_v48 }
 0x312   : > { %6318 = vmatprep.subr.bf16.mxu1 %v14262_v8  ;;  %v1555_v8 = vld [vmem:[%s16671_s20 + $0x12b0] sm:$0xff] }
 0x313   : > { %6278 = vmatpush1.bf16.msra.mxu0 %v14133_v58  ;;  %v1679_v22 = vld [vmem:[%s16671_s20 + $0x1690] sm:$0xff]  ;;  %v14214_v58 = vcombine.high %v1551_v7, %v1555_v8  ;;  %v14213_v26 = vcombine.low %v1551_v7, %v1555_v8  ;;  %v1128_v8 = vld [vmem:[%s16671_s20 + $0x558] sm:$0xff] }
 0x314   : > { %6279 = vmatprep.subr.bf16.mxu0 %v14254_v20  ;;  %v1683_v12 = vld [vmem:[%s16671_s20 + $0x16b0] sm:$0xff] }
 0x315   : > { %6319 = vmatpush1.bf16.msra.mxu1 %v14261_v19  ;;  %v14342_v19 = vcombine.high %v1679_v22, %v1683_v12  ;;  %v1543_v20 = vld [vmem:[%s16671_s20 + $0x1250] sm:$0xff]  ;;  %v14341_v27 = vcombine.low %v1679_v22, %v1683_v12  ;;  %v1132_v22 = vld [vmem:[%s16671_s20 + $0x578] sm:$0xff] }
 0x316   : > { %6320 = vmatprep.subr.bf16.mxu1 %v14382_v21  ;;  %v1547_v21 = vld [vmem:[%s16671_s20 + $0x1270] sm:$0xff] }
 0x317   : > { %6280 = vmatpush2.bf16.msra.mxu0 %v14253_v28  ;;  %v1671_v23 = vld [vmem:[%s16671_s20 + $0x1650] sm:$0xff]  ;;  %v14206_v28 = vcombine.high %v1543_v20, %v1547_v21  ;;  %v14205_v35 = vcombine.low %v1543_v20, %v1547_v21 }
 0x318   : > { %6281 = vmatprep.subr.bf16.mxu0 %v14246_v30  ;;  %v1675_v24 = vld [vmem:[%s16671_s20 + $0x1670] sm:$0xff] }
 0x319   : > { %6321 = vmatpush2.bf16.msra.mxu1 %v14381_v29  ;;  %v14334_v29 = vcombine.high %v1671_v23, %v1675_v24  ;;  %v1535_v30 = vld [vmem:[%s16671_s20 + $0x1210] sm:$0xff]  ;;  %v14333_v36 = vcombine.low %v1671_v23, %v1675_v24 }
 0x31a   : > { %6322 = vmatprep.subr.bf16.mxu1 %v14374_v31  ;;  %v1539_v31 = vld [vmem:[%s16671_s20 + $0x1230] sm:$0xff] }
 0x31b   : > { %6282 = vmatpush2.bf16.msra.mxu0 %v14245_v42  ;;  %v1663_v32 = vld [vmem:[%s16671_s20 + $0x1610] sm:$0xff]  ;;  %v14198_v42 = vcombine.high %v1535_v30, %v1539_v31  ;;  %v14197_v49 = vcombine.low %v1535_v30, %v1539_v31  ;;  %v1124_v30 = vld [vmem:[%s16671_s20 + $0x538] sm:$0xff] }
 0x31c   : > { %6283 = vmatprep.subr.bf16.mxu0 %v14238_v39  ;;  %v1667_v34 = vld [vmem:[%s16671_s20 + $0x1630] sm:$0xff]  ;;  %v1016_v39 = vld [vmem:[%s16671_s20 + $0x1d8] sm:$0xff] }
 0x31d   : > { %6323 = vmatpush2.bf16.msra.mxu1 %v14373_v38  ;;  %v14326_v38 = vcombine.high %v1663_v32, %v1667_v34  ;;  %v14325_v54 = vcombine.low %v1663_v32, %v1667_v34 }
 0x31e   : > { %6324 = vmatprep.subr.bf16.mxu1 %v14366_v43  ;;  %v1020_v43 = vld [vmem:[%s16671_s20 + $0x1f8] sm:$0xff] }
 0x31f   : > { %6284 = vmatpush2.bf16.msra.mxu0 %v14237_v55  ;;  %v13680_v55 = vcombine.high %v1016_v39, %v1020_v43  ;;  %v13679_v60 = vcombine.low %v1016_v39, %v1020_v43  ;;  %v1112_v39 = vld [vmem:[%s16671_s20 + $0x4d8] sm:$0xff] }
 0x320   : > { %6285 = vmatprep.subr.bf16.mxu0 %v14230_v52  ;;  %v1008_v52 = vld [vmem:[%s16671_s20 + $0x198] sm:$0xff] }
 0x321   : > { %6325 = vmatpush2.bf16.msra.mxu1 %v14365_v51  ;;  %v13808_v51 = vcombine.high %v1144_v45, %v1148_v48  ;;  %v1116_v43 = vld [vmem:[%s16671_s20 + $0x4f8] sm:$0xff] }
 0x322   : > { %6326 = vmatprep.subr.bf16.mxu1 %v14358_v56  ;;  %v1012_v56 = vld [vmem:[%s16671_s20 + $0x1b8] sm:$0xff] }
 0x323   : > { %6286 = vmatpush2.bf16.msra.mxu0 %v14229_v62  ;;  %v13672_v62 = vcombine.high %v1008_v52, %v1012_v56 }
 0x324   : > { %6287 = vmatprep.subr.bf16.mxu0 %v14222_v6  ;;  %v1000_v6 = vld [vmem:[%s16671_s20 + $0x158] sm:$0xff] }
 0x325   : > { %6327 = vmatpush2.bf16.msra.mxu1 %v14357_v1  ;;  %v13800_v1 = vcombine.high %v1136_v57, %v1140_v59 }
 0x326   : > { %6328 = vmatprep.subr.bf16.mxu1 %v14350_v47  ;;  %v1004_v47 = vld [vmem:[%s16671_s20 + $0x178] sm:$0xff] }
 0x327   : > { %6288 = vmatpush2.bf16.msra.mxu0 %v14221_v13  ;;  %v13664_v20 = vcombine.high %v1000_v6, %v1004_v47 }
 0x328   : > { %6289 = vmatprep.subr.bf16.mxu0 %v14214_v58 }
 0x329   : > { %6329 = vmatpush2.bf16.msra.mxu1 %v14349_v18  ;;  %v13671_v18 = vcombine.low %v1008_v52, %v1012_v56  ;;  %v1104_v52 = vld [vmem:[%s16671_s20 + $0x498] sm:$0xff] }
 0x32a   : > { %6330 = vmatprep.subr.bf16.mxu1 %v14342_v19  ;;  %v13799_v19 = vcombine.low %v1136_v57, %v1140_v59  ;;  %v1108_v56 = vld [vmem:[%s16671_s20 + $0x4b8] sm:$0xff]  ;;  %v13775_v59 = vcombine.low %v1112_v39, %v1116_v43 }
 0x32b   : > { %6290 = vmatpush2.bf16.msra.mxu0 %v14213_v26  ;;  %v992_v26 = vld [vmem:[%s16671_s20 + $0x118] sm:$0xff] }
 0x32c   : > { %6291 = vmatprep.subr.bf16.mxu0 %v14206_v28 }
 0x32d   : > { %6331 = vmatpush2.bf16.msra.mxu1 %v14341_v27  ;;  %v996_v27 = vld [vmem:[%s16671_s20 + $0x138] sm:$0xff] }
 0x32e   : > { %6332 = vmatprep.subr.bf16.mxu1 %v14334_v29  ;;  %v1120_v29 = vld [vmem:[%s16671_s20 + $0x518] sm:$0xff]  ;;  %v13655_v45 = vcombine.low %v992_v26, %v996_v27 }
 0x32f   : > { %6292 = vmatpush2.bf16.msra.mxu0 %v14205_v35  ;;  %v13791_v35 = vcombine.low %v1128_v8, %v1132_v22  ;;  %v13783_v48 = vcombine.low %v1120_v29, %v1124_v30 }
 0x330   : > { %6293 = vmatprep.subr.bf16.mxu0 %v14198_v42  ;;  %v13784_v42 = vcombine.high %v1120_v29, %v1124_v30  ;;  %v1212_v29 = vld [vmem:[%s16671_s20 + $0x7f8] sm:$0xff] }
 0x331   : > { %6333 = vmatpush2.bf16.msra.mxu1 %v14333_v36  ;;  %v13656_v36 = vcombine.high %v992_v26, %v996_v27  ;;  %v1080_v26 = vld [vmem:[%s16671_s20 + $0x3d8] sm:$0xff] }
 0x332   : > { %6334 = vmatprep.subr.bf16.mxu1 %v14326_v38  ;;  %v984_v38 = vld [vmem:[%s16671_s20 + $0xd8] sm:$0xff] }
 0x333   : > { %6294 = vmatpush2.bf16.msra.mxu0 %v14197_v49  ;;  %v1084_v27 = vld [vmem:[%s16671_s20 + $0x3f8] sm:$0xff] }
 0x334   : > { %6345 = vmatprep.subr.bf16.mxu0 %v13680_v55  ;;  %v976_v55 = vld [vmem:[%s16671_s20 + $0x98] sm:$0xff] }
 0x335   : > { %6335 = vmatpush2.bf16.msra.mxu1 %v14325_v54  ;;  %v13776_v54 = vcombine.high %v1112_v39, %v1116_v43 }
 0x336   : > { %6386 = vmatprep.subr.bf16.mxu1 %v13808_v51  ;;  %v6051_v7 = vpop.f32.mrf.mxu0  ;;  %6296 = vmatmul.mubr.bf16.vlgmr.msra.gmra.mxu0 %v16994_v40  ;;  %v980_v51 = vld [vmem:[%s16671_s20 + $0xb8] sm:$0xff] }
 0x337   : > { %v6052_v12 = vadd.f32 %v6051_v7, %v17385_v0  ;;  %6346 = vmatpush1.bf16.msra.mxu0 %v13679_v60  ;;  %v13792_v0 = vcombine.high %v1128_v8, %v1132_v22  ;;  %6377 = vmatprep.mubr.bf16.mxu0 %v16764_v11  ;;  %v13640_v60 = vcombine.high %v976_v55, %v980_v51 }
 0x338   : > { %v6092_v13 = vpop.f32.mrf.mxu1  ;;  %6337 = vmatmul.mubr.bf16.vlgmr.msra.gmra.mxu1 %v16998_v41  ;;  %v6053_v58 = vpop.f32.mrf.mxu0  ;;  %6347 = vmatprep.subr.bf16.mxu0 %v13672_v62  ;;  %v968_v62 = vld [vmem:[%s16671_s20 + $0x58] sm:$0xff]  ;;  %v13639_v7 = vcombine.low %v976_v55, %v980_v51  ;;  %v13767_v8 = vcombine.low %v1104_v52, %v1108_v56 }
 0x339   : > { %6387 = vmatpush1.bf16.msra.mxu1 %v13807_v61  ;;  %v17459_v21 = vadd.f32 %v6092_v13, %v6052_v12  ;;  %v6054_v23 = vadd.f32 %v6053_v58, %v17394_v17  ;;  %6418 = vmatprep.mubr.bf16.mxu1 %v16771_v16  ;;  %v13663_v17 = vcombine.low %v1000_v6, %v1004_v47  ;;  %v988_v16 = vld [vmem:[%s16671_s20 + $0xf8] sm:$0xff] }
 0x33a   : > { %v6094_v24 = vpop.f32.mrf.mxu1  ;;  %6388 = vmatprep.subr.bf16.mxu1 %v13800_v1  ;;  %v6055_v28 = vpop.f32.mrf.mxu0  ;;  %v13648_v49 = vcombine.high %v984_v38, %v988_v16  ;;  %v13647_v57 = vcombine.low %v984_v38, %v988_v16  ;;  %v13768_v61 = vcombine.high %v1104_v52, %v1108_v56  ;;  %v972_v1 = vld [vmem:[%s16671_s20 + $0x78] sm:$0xff]  ;;  %v13743_v38 = vcombine.low %v1080_v26, %v1084_v27 }
 0x33b   : > { %v17468_v31 = vadd.f32 %v6094_v24, %v6054_v23  ;;  %6348 = vmatpush1.bf16.msra.mxu0 %v13671_v18  ;;  %v1096_v6 = vld [vmem:[%s16671_s20 + $0x458] sm:$0xff]  ;;  %v13632_v22 = vcombine.high %v968_v62, %v972_v1  ;;  %vm6593_vm3 = vcmp.gt.f32.partialorder %v17459_v21, 0.0 }
 0x33c   : > { %v6096_v32 = vpop.f32.mrf.mxu1  ;;  %v6056_v34 = vpop.f32.mrf.mxu0  ;;  %6349 = vmatprep.subr.bf16.mxu0 %v13664_v20  ;;  %v1100_v47 = vld [vmem:[%s16671_s20 + $0x478] sm:$0xff]  ;;  %v13631_v20 = vcombine.low %v968_v62, %v972_v1 }
 0x33d   : > { %6389 = vmatpush1.bf16.msra.mxu1 %v13799_v19  ;;  %v13760_v12 = vcombine.high %v1096_v6, %v1100_v47  ;;  %v960_v13 = vld [vmem:[%s16671_s20 + $0x18] sm:$0xff]  ;;  %v13759_v23 = vcombine.low %v1096_v6, %v1100_v47  ;;  %vm6594_vm1 = vcmp.gt.f32.partialorder %v17468_v31, 0.0 }
 0x33e   : > { %v6097_v11 = vpop.f32.mrf.mxu1  ;;  %6390 = vmatprep.subr.bf16.mxu1 %v13792_v0  ;;  %v964_v18 = vld [vmem:[%s16671_s20 + $0x38] sm:$0xff] }
 0x33f   : > { %6350 = vmatpush1.bf16.msra.mxu0 %v13663_v17  ;;  %v1088_v58 = vld [vmem:[%s16671_s20 + $0x418] sm:$0xff]  ;;  %v13624_v24 = vcombine.high %v960_v13, %v964_v18  ;;  %v13623_v30 = vcombine.low %v960_v13, %v964_v18  ;;  %v13744_v17 = vcombine.high %v1080_v26, %v1084_v27 }
 0x340   : > { %6351 = vmatprep.subr.bf16.mxu0 %v13656_v36  ;;  %v1092_v19 = vld [vmem:[%s16671_s20 + $0x438] sm:$0xff] }
 0x341   : > { %6391 = vmatpush1.bf16.msra.mxu1 %v13791_v35  ;;  %v13752_v0 = vcombine.high %v1088_v58, %v1092_v19  ;;  %v1208_v28 = vld [vmem:[%s16671_s20 + $0x7d8] sm:$0xff]  ;;  %v13751_v32 = vcombine.low %v1088_v58, %v1092_v19 }
 0x342   : > { %6392 = vmatprep.subr.bf16.mxu1 %v13784_v42  ;;  %v13872_v34 = vcombine.high %v1208_v28, %v1212_v29  ;;  %v1072_v35 = vld [vmem:[%s16671_s20 + $0x398] sm:$0xff]  ;;  %v13871_v16 = vcombine.low %v1208_v28, %v1212_v29 }
 0x343   : > { %6352 = vmatpush1.bf16.msra.mxu0 %v13655_v45  ;;  %v1076_v36 = vld [vmem:[%s16671_s20 + $0x3b8] sm:$0xff] }
 0x344   : > { %6353 = vmatprep.subr.bf16.mxu0 %v13648_v49  ;;  %v1200_v11 = vld [vmem:[%s16671_s20 + $0x798] sm:$0xff]  ;;  %v13736_v39 = vcombine.high %v1072_v35, %v1076_v36  ;;  %v13735_v55 = vcombine.low %v1072_v35, %v1076_v36 }
 0x345   : > { %6393 = vmatpush1.bf16.msra.mxu1 %v13783_v48  ;;  %v1204_v42 = vld [vmem:[%s16671_s20 + $0x7b8] sm:$0xff] }
 0x346   : > { %6394 = vmatprep.subr.bf16.mxu1 %v13776_v54  ;;  %v13864_v43 = vcombine.high %v1200_v11, %v1204_v42  ;;  %v1064_v45 = vld [vmem:[%s16671_s20 + $0x358] sm:$0xff]  ;;  %v13863_v51 = vcombine.low %v1200_v11, %v1204_v42 }
 0x347   : > { %6354 = vmatpush1.bf16.msra.mxu0 %v13647_v57  ;;  %v1068_v48 = vld [vmem:[%s16671_s20 + $0x378] sm:$0xff] }
 0x348   : > { %6355 = vmatprep.subr.bf16.mxu0 %v13640_v60  ;;  %v1192_v49 = vld [vmem:[%s16671_s20 + $0x758] sm:$0xff]  ;;  %v13728_v52 = vcombine.high %v1064_v45, %v1068_v48  ;;  %v13727_v62 = vcombine.low %v1064_v45, %v1068_v48 }
 0x349   : > { %6395 = vmatpush1.bf16.msra.mxu1 %v13775_v59  ;;  %v1196_v54 = vld [vmem:[%s16671_s20 + $0x778] sm:$0xff] }
 0x34a   : > { %6396 = vmatprep.subr.bf16.mxu1 %v13768_v61  ;;  %v13856_v56 = vcombine.high %v1192_v49, %v1196_v54  ;;  %v1056_v57 = vld [vmem:[%s16671_s20 + $0x318] sm:$0xff]  ;;  %v13855_v1 = vcombine.low %v1192_v49, %v1196_v54 }
 0x34b   : > { %6356 = vmatpush1.bf16.msra.mxu0 %v13639_v7  ;;  %v1060_v59 = vld [vmem:[%s16671_s20 + $0x338] sm:$0xff] }
 0x34c   : > { %6357 = vmatprep.subr.bf16.mxu0 %v13632_v22  ;;  %v1184_v60 = vld [vmem:[%s16671_s20 + $0x718] sm:$0xff]  ;;  %v13720_v6 = vcombine.high %v1056_v57, %v1060_v59  ;;  %v13719_v13 = vcombine.low %v1056_v57, %v1060_v59  ;;  %v1745_v59 = vsub.s32 4, %v16738_v44 }
 0x34d   : > { %6397 = vmatpush1.bf16.msra.mxu1 %v13767_v8  ;;  %v1188_v61 = vld [vmem:[%s16671_s20 + $0x738] sm:$0xff] }
 0x34e   : > { %6398 = vmatprep.subr.bf16.mxu1 %v13760_v12  ;;  %v13848_v47 = vcombine.high %v1184_v60, %v1188_v61  ;;  %v1048_v7 = vld [vmem:[%s16671_s20 + $0x2d8] sm:$0xff]  ;;  %v13847_v18 = vcombine.low %v1184_v60, %v1188_v61 }
 0x34f   : > { %6358 = vmatpush1.bf16.msra.mxu0 %v13631_v20  ;;  %v1052_v8 = vld [vmem:[%s16671_s20 + $0x2f8] sm:$0xff] }
 0x350   : > { %6359 = vmatprep.subr.bf16.mxu0 %v13624_v24  ;;  %v1176_v22 = vld [vmem:[%s16671_s20 + $0x6d8] sm:$0xff]  ;;  %v13712_v58 = vcombine.high %v1048_v7, %v1052_v8  ;;  %v13711_v26 = vcombine.low %v1048_v7, %v1052_v8 }
 0x351   : > { %6399 = vmatpush1.bf16.msra.mxu1 %v13759_v23  ;;  %v1180_v12 = vld [vmem:[%s16671_s20 + $0x6f8] sm:$0xff] }
 0x352   : > { %6400 = vmatprep.subr.bf16.mxu1 %v13752_v0  ;;  %v13840_v19 = vcombine.high %v1176_v22, %v1180_v12  ;;  %v1040_v20 = vld [vmem:[%s16671_s20 + $0x298] sm:$0xff]  ;;  %v13839_v27 = vcombine.low %v1176_v22, %v1180_v12  ;;  %v15884_v22 = vld [vmem:[%s16679_s28] sm:$0xff] }
 0x353   : > { %6360 = vmatpush1.bf16.msra.mxu0 %v13623_v30  ;;  %v1044_v23 = vld [vmem:[%s16671_s20 + $0x2b8] sm:$0xff]  ;;  %v1746_v12 = vrot.slane %v15884_v22, %v1745_v59 }
 0x354   : > { %6361 = vmatprep.subr.bf16.mxu0 %v13744_v17  ;;  %v1168_v24 = vld [vmem:[%s16671_s20 + $0x698] sm:$0xff]  ;;  %v13704_v28 = vcombine.high %v1040_v20, %v1044_v23  ;;  %v13703_v35 = vcombine.low %v1040_v20, %v1044_v23 }
 0x355   : > { %6401 = vmatpush1.bf16.msra.mxu1 %v13751_v32  ;;  %v1172_v0 = vld [vmem:[%s16671_s20 + $0x6b8] sm:$0xff] }
 0x356   : > { %6402 = vmatprep.subr.bf16.mxu1 %v13872_v34  ;;  %v13832_v29 = vcombine.high %v1168_v24, %v1172_v0  ;;  %v1032_v30 = vld [vmem:[%s16671_s20 + $0x258] sm:$0xff]  ;;  %v13831_v36 = vcombine.low %v1168_v24, %v1172_v0 }
 0x357   : > { %6362 = vmatpush2.bf16.msra.mxu0 %v13743_v38  ;;  %v1036_v32 = vld [vmem:[%s16671_s20 + $0x278] sm:$0xff] }
 0x358   : > { %6363 = vmatprep.subr.bf16.mxu0 %v13736_v39  ;;  %v1160_v17 = vld [vmem:[%s16671_s20 + $0x658] sm:$0xff]  ;;  %v13696_v11 = vcombine.high %v1032_v30, %v1036_v32  ;;  %v13695_v45 = vcombine.low %v1032_v30, %v1036_v32 }
 0x359   : > { %6403 = vmatpush2.bf16.msra.mxu1 %v13871_v16  ;;  %v1164_v34 = vld [vmem:[%s16671_s20 + $0x678] sm:$0xff] }
 0x35a   : > { %6404 = vmatprep.subr.bf16.mxu1 %v13864_v43  ;;  %v13824_v42 = vcombine.high %v1160_v17, %v1164_v34  ;;  %v1024_v38 = vld [vmem:[%s16671_s20 + $0x218] sm:$0xff]  ;;  %v13823_v48 = vcombine.low %v1160_v17, %v1164_v34 }
 0x35b   : > { %6364 = vmatpush2.bf16.msra.mxu0 %v13735_v55  ;;  %v1028_v16 = vld [vmem:[%s16671_s20 + $0x238] sm:$0xff] }
 0x35c   : > { %6365 = vmatprep.subr.bf16.mxu0 %v13728_v52  ;;  %v1152_v39 = vld [vmem:[%s16671_s20 + $0x618] sm:$0xff]  ;;  %v13688_v49 = vcombine.high %v1024_v38, %v1028_v16  ;;  %v13687_v57 = vcombine.low %v1024_v38, %v1028_v16 }
 0x35d   : > { %6405 = vmatpush2.bf16.msra.mxu1 %v13863_v51  ;;  %v1156_v43 = vld [vmem:[%s16671_s20 + $0x638] sm:$0xff] }
 0x35e   : > { %6406 = vmatprep.subr.bf16.mxu1 %v13856_v56  ;;  %v13816_v54 = vcombine.high %v1152_v39, %v1156_v43  ;;  %v1272_v55 = vld [vmem:[%s16671_s20 + $0x9d8] sm:$0xff]  ;;  %v13815_v60 = vcombine.low %v1152_v39, %v1156_v43 }
 0x35f   : > { %6366 = vmatpush2.bf16.msra.mxu0 %v13727_v62  ;;  %v1276_v51 = vld [vmem:[%s16671_s20 + $0x9f8] sm:$0xff] }
 0x360   : > { %6367 = vmatprep.subr.bf16.mxu0 %v13720_v6  ;;  %v1400_v52 = vld [vmem:[%s16671_s20 + $0xdd8] sm:$0xff]  ;;  %v13936_v61 = vcombine.high %v1272_v55, %v1276_v51 }
 0x361   : > { %6407 = vmatpush2.bf16.msra.mxu1 %v13855_v1  ;;  %v1404_v56 = vld [vmem:[%s16671_s20 + $0xdf8] sm:$0xff]  ;;  %v1749_v1 = vsub.s32 5, %v16738_v44 }
 0x362   : > { %6408 = vmatprep.subr.bf16.mxu1 %v13848_v47  ;;  %v14064_v62 = vcombine.high %v1400_v52, %v1404_v56  ;;  %v1264_v6 = vld [vmem:[%s16671_s20 + $0x998] sm:$0xff] }
 0x363   : > { %6368 = vmatpush2.bf16.msra.mxu0 %v13719_v13  ;;  %v1268_v47 = vld [vmem:[%s16671_s20 + $0x9b8] sm:$0xff]  ;;  %v13935_v13 = vcombine.low %v1272_v55, %v1276_v51 }
 0x364   : > { %6369 = vmatprep.subr.bf16.mxu0 %v13712_v58  ;;  %v1392_v7 = vld [vmem:[%s16671_s20 + $0xd98] sm:$0xff]  ;;  %v13928_v58 = vcombine.high %v1264_v6, %v1268_v47  ;;  %v13927_v30 = vcombine.low %v1264_v6, %v1268_v47 }
 0x365   : > { %6409 = vmatpush2.bf16.msra.mxu1 %v13847_v18  ;;  %v1396_v8 = vld [vmem:[%s16671_s20 + $0xdb8] sm:$0xff]  ;;  %v14063_v18 = vcombine.low %v1400_v52, %v1404_v56 }
 0x366   : > { %6410 = vmatprep.subr.bf16.mxu1 %v13840_v19  ;;  %v1750_v19 = vrot.slane %v15884_v22, %v1749_v1  ;;  %v14056_v20 = vcombine.high %v1392_v7, %v1396_v8  ;;  %v1256_v23 = vld [vmem:[%s16671_s20 + $0x958] sm:$0xff]  ;;  %v14055_v17 = vcombine.low %v1392_v7, %v1396_v8 }
 0x367   : > { %6370 = vmatpush2.bf16.msra.mxu0 %v13711_v26  ;;  %v1260_v24 = vld [vmem:[%s16671_s20 + $0x978] sm:$0xff] }
 0x368   : > { %6371 = vmatprep.subr.bf16.mxu0 %v13704_v28  ;;  %v1384_v26 = vld [vmem:[%s16671_s20 + $0xd58] sm:$0xff]  ;;  %v13920_v34 = vcombine.high %v1256_v23, %v1260_v24 }
 0x369   : > { %6411 = vmatpush2.bf16.msra.mxu1 %v13839_v27  ;;  %v1388_v27 = vld [vmem:[%s16671_s20 + $0xd78] sm:$0xff] }
 0x36a   : > { %6412 = vmatprep.subr.bf16.mxu1 %v13832_v29  ;;  %v1252_v38 = vld [vmem:[%s16671_s20 + $0x938] sm:$0xff] }
 0x36b   : > { %6372 = vmatpush2.bf16.msra.mxu0 %v13703_v35  ;;  %v1376_v16 = vld [vmem:[%s16671_s20 + $0xd18] sm:$0xff] }
 0x36c   : > { %6373 = vmatprep.subr.bf16.mxu0 %v13696_v11  ;;  %v14048_v11 = vcombine.high %v1384_v26, %v1388_v27  ;;  %v1380_v39 = vld [vmem:[%s16671_s20 + $0xd38] sm:$0xff] }
 0x36d   : > { %6413 = vmatpush2.bf16.msra.mxu1 %v13831_v36  ;;  %v14040_v51 = vcombine.high %v1376_v16, %v1380_v39  ;;  %v1240_v52 = vld [vmem:[%s16671_s20 + $0x8d8] sm:$0xff] }
 0x36e   : > { %6414 = vmatprep.subr.bf16.mxu1 %v13824_v42  ;;  %v1248_v42 = vld [vmem:[%s16671_s20 + $0x918] sm:$0xff] }
 0x36f   : > { %6374 = vmatpush2.bf16.msra.mxu0 %v13695_v45  ;;  %v13912_v55 = vcombine.high %v1248_v42, %v1252_v38  ;;  %v1368_v56 = vld [vmem:[%s16671_s20 + $0xcd8] sm:$0xff] }
 0x370   : > { %6375 = vmatprep.subr.bf16.mxu0 %v13688_v49  ;;  %v1232_v47 = vld [vmem:[%s16671_s20 + $0x898] sm:$0xff] }
 0x371   : > { %6415 = vmatpush2.bf16.msra.mxu1 %v13823_v48  ;;  %v13919_v48 = vcombine.low %v1256_v23, %v1260_v24  ;;  %v1236_v7 = vld [vmem:[%s16671_s20 + $0x8b8] sm:$0xff] }
 0x372   : > { %6416 = vmatprep.subr.bf16.mxu1 %v13816_v54  ;;  %v14047_v54 = vcombine.low %v1384_v26, %v1388_v27  ;;  %v1360_v8 = vld [vmem:[%s16671_s20 + $0xc98] sm:$0xff] }
 0x373   : > { %6376 = vmatpush2.bf16.msra.mxu0 %v13687_v57  ;;  %v1372_v57 = vld [vmem:[%s16671_s20 + $0xcf8] sm:$0xff] }
 0x374   : > { %6427 = vmatprep.subr.bf16.mxu0 %v13936_v61  ;;  %v14039_v61 = vcombine.low %v1376_v16, %v1380_v39  ;;  %v14032_v6 = vcombine.high %v1368_v56, %v1372_v57  ;;  %v1364_v22 = vld [vmem:[%s16671_s20 + $0xcb8] sm:$0xff] }
 0x375   : > { %6417 = vmatpush2.bf16.msra.mxu1 %v13815_v60  ;;  %v13911_v60 = vcombine.low %v1248_v42, %v1252_v38  ;;  %v1352_v23 = vld [vmem:[%s16671_s20 + $0xc58] sm:$0xff]  ;;  %v14023_v26 = vcombine.low %v1360_v8, %v1364_v22 }
 0x376   : > { %6468 = vmatprep.subr.bf16.mxu1 %v14064_v62  ;;  %v6133_v0 = vpop.f32.mrf.mxu0  ;;  %6378 = vmatmul.mubr.bf16.vlgmr.msra.gmra.mxu0 %v16819_v33  ;;  %v1356_v24 = vld [vmem:[%s16671_s20 + $0xc78] sm:$0xff] }
 0x377   : > { %v6134_v28 = vadd.f32 %v6133_v0, %v1746_v12  ;;  %6428 = vmatpush1.bf16.msra.mxu0 %v13935_v13  ;;  %6459 = vmatprep.mubr.bf16.mxu0 %v16833_v46  ;;  %v14031_v13 = vcombine.low %v1368_v56, %v1372_v57  ;;  %v13895_v0 = vcombine.low %v1232_v47, %v1236_v7  ;;  %v1336_v42 = vld [vmem:[%s16671_s20 + $0xbd8] sm:$0xff] }
 0x378   : > { %v6174_v29 = vpop.f32.mrf.mxu1  ;;  %6419 = vmatmul.mubr.bf16.vlgmr.msra.gmra.mxu1 %v16827_v37  ;;  %v6135_v32 = vpop.f32.mrf.mxu0  ;;  %6429 = vmatprep.subr.bf16.mxu0 %v13928_v58  ;;  %v14024_v58 = vcombine.high %v1360_v8, %v1364_v22  ;;  %v1340_v38 = vld [vmem:[%s16671_s20 + $0xbf8] sm:$0xff] }
 0x379   : > { %6469 = vmatpush1.bf16.msra.mxu1 %v14063_v18  ;;  %v17539_v35 = vadd.f32 %v6174_v29, %v6134_v28  ;;  %v6136_v33 = vadd.f32 %v6135_v32, %v1750_v19  ;;  %6500 = vmatprep.mubr.bf16.mxu1 %v16836_v5  ;;  %v1244_v5 = vld [vmem:[%s16671_s20 + $0x8f8] sm:$0xff]  ;;  %v13896_v18 = vcombine.high %v1232_v47, %v1236_v7 }
 0x37a   : > { %v6176_v36 = vpop.f32.mrf.mxu1  ;;  %6470 = vmatprep.subr.bf16.mxu1 %v14056_v20  ;;  %v6137_v37 = vpop.f32.mrf.mxu0  ;;  %v13904_v62 = vcombine.high %v1240_v52, %v1244_v5  ;;  %v13903_v12 = vcombine.low %v1240_v52, %v1244_v5  ;;  %v1224_v19 = vld [vmem:[%s16671_s20 + $0x858] sm:$0xff]  ;;  %v14016_v28 = vcombine.high %v1352_v23, %v1356_v24  ;;  %v13999_v52 = vcombine.low %v1336_v42, %v1340_v38 }
 0x37b   : > { %v17547_v43 = vadd.f32 %v6176_v36, %v6136_v33  ;;  %6430 = vmatpush1.bf16.msra.mxu0 %v13927_v30  ;;  %v1228_v20 = vld [vmem:[%s16671_s20 + $0x878] sm:$0xff]  ;;  %v14015_v33 = vcombine.low %v1352_v23, %v1356_v24 }
 0x37c   : > { %v6178_v45 = vpop.f32.mrf.mxu1  ;;  %v6138_v49 = vpop.f32.mrf.mxu0  ;;  %6431 = vmatprep.subr.bf16.mxu0 %v13920_v34  ;;  %v13888_v27 = vcombine.high %v1224_v19, %v1228_v20  ;;  %v1216_v29 = vld [vmem:[%s16671_s20 + $0x818] sm:$0xff]  ;;  %v13887_v34 = vcombine.low %v1224_v19, %v1228_v20 }
 0x37d   : > { %6471 = vmatpush1.bf16.msra.mxu1 %v14055_v17  ;;  %v1220_v30 = vld [vmem:[%s16671_s20 + $0x838] sm:$0xff] }
 0x37e   : > { %v6179_v46 = vpop.f32.mrf.mxu1  ;;  %6472 = vmatprep.subr.bf16.mxu1 %v14048_v11  ;;  %v1344_v32 = vld [vmem:[%s16671_s20 + $0xc18] sm:$0xff]  ;;  %v13880_v36 = vcombine.high %v1216_v29, %v1220_v30  ;;  %v13879_v39 = vcombine.low %v1216_v29, %v1220_v30 }
 0x37f   : > { %6432 = vmatpush1.bf16.msra.mxu0 %v13919_v48  ;;  %v1348_v17 = vld [vmem:[%s16671_s20 + $0xc38] sm:$0xff]  ;;  %v14000_v48 = vcombine.high %v1336_v42, %v1340_v38 }
 0x380   : > { %6433 = vmatprep.subr.bf16.mxu0 %v13912_v55  ;;  %v14008_v11 = vcombine.high %v1344_v32, %v1348_v17  ;;  %v1464_v37 = vld [vmem:[%s16671_s20 + $0xfd8] sm:$0xff]  ;;  %v14007_v45 = vcombine.low %v1344_v32, %v1348_v17 }
 0x381   : > { %6473 = vmatpush1.bf16.msra.mxu1 %v14047_v54  ;;  %v1468_v16 = vld [vmem:[%s16671_s20 + $0xff8] sm:$0xff] }
 0x382   : > { %6474 = vmatprep.subr.bf16.mxu1 %v14040_v51  ;;  %v14128_v49 = vcombine.high %v1464_v37, %v1468_v16  ;;  %v1328_v54 = vld [vmem:[%s16671_s20 + $0xb98] sm:$0xff]  ;;  %v14127_v5 = vcombine.low %v1464_v37, %v1468_v16 }
 0x383   : > { %6434 = vmatpush1.bf16.msra.mxu0 %v13911_v60  ;;  %v1332_v55 = vld [vmem:[%s16671_s20 + $0xbb8] sm:$0xff] }
 0x384   : > { %6435 = vmatprep.subr.bf16.mxu0 %v13904_v62  ;;  %v1456_v46 = vld [vmem:[%s16671_s20 + $0xf98] sm:$0xff]  ;;  %v13992_v56 = vcombine.high %v1328_v54, %v1332_v55  ;;  %v13991_v47 = vcombine.low %v1328_v54, %v1332_v55 }
 0x385   : > { %6475 = vmatpush1.bf16.msra.mxu1 %v14039_v61  ;;  %v1460_v51 = vld [vmem:[%s16671_s20 + $0xfb8] sm:$0xff] }
 0x386   : > { %6476 = vmatprep.subr.bf16.mxu1 %v14032_v6  ;;  %v14120_v57 = vcombine.high %v1456_v46, %v1460_v51  ;;  %v1320_v60 = vld [vmem:[%s16671_s20 + $0xb58] sm:$0xff]  ;;  %v14119_v7 = vcombine.low %v1456_v46, %v1460_v51 }
 0x387   : > { %6436 = vmatpush1.bf16.msra.mxu0 %v13903_v12  ;;  %v1324_v61 = vld [vmem:[%s16671_s20 + $0xb78] sm:$0xff] }
 0x388   : > { %6437 = vmatprep.subr.bf16.mxu0 %v13896_v18  ;;  %v1448_v62 = vld [vmem:[%s16671_s20 + $0xf58] sm:$0xff]  ;;  %v13984_v8 = vcombine.high %v1320_v60, %v1324_v61  ;;  %v13983_v19 = vcombine.low %v1320_v60, %v1324_v61 }
 0x389   : > { %6477 = vmatpush1.bf16.msra.mxu1 %v14031_v13  ;;  %v1452_v6 = vld [vmem:[%s16671_s20 + $0xf78] sm:$0xff] }
 0x38a   : > { %6478 = vmatprep.subr.bf16.mxu1 %v14024_v58  ;;  %v14112_v22 = vcombine.high %v1448_v62, %v1452_v6  ;;  %v1312_v12 = vld [vmem:[%s16671_s20 + $0xb18] sm:$0xff]  ;;  %v14111_v20 = vcombine.low %v1448_v62, %v1452_v6 }
 0x38b   : > { %6438 = vmatpush1.bf16.msra.mxu0 %v13895_v0  ;;  %v1316_v13 = vld [vmem:[%s16671_s20 + $0xb38] sm:$0xff] }
 0x38c   : > { %6439 = vmatprep.subr.bf16.mxu0 %v13888_v27  ;;  %v1440_v18 = vld [vmem:[%s16671_s20 + $0xf18] sm:$0xff]  ;;  %v13976_v23 = vcombine.high %v1312_v12, %v1316_v13  ;;  %v13975_v29 = vcombine.low %v1312_v12, %v1316_v13 }
 0x38d   : > { %6479 = vmatpush1.bf16.msra.mxu1 %v14023_v26  ;;  %v1444_v58 = vld [vmem:[%s16671_s20 + $0xf38] sm:$0xff] }
 0x38e   : > { %6480 = vmatprep.subr.bf16.mxu1 %v14016_v28  ;;  %v14104_v24 = vcombine.high %v1440_v18, %v1444_v58  ;;  %v1304_v0 = vld [vmem:[%s16671_s20 + $0xad8] sm:$0xff]  ;;  %v14103_v30 = vcombine.low %v1440_v18, %v1444_v58 }
 0x38f   : > { %6440 = vmatpush1.bf16.msra.mxu0 %v13887_v34  ;;  %v1308_v26 = vld [vmem:[%s16671_s20 + $0xaf8] sm:$0xff] }
 0x390   : > { %6441 = vmatprep.subr.bf16.mxu0 %v13880_v36  ;;  %v1432_v27 = vld [vmem:[%s16671_s20 + $0xed8] sm:$0xff]  ;;  %v13968_v32 = vcombine.high %v1304_v0, %v1308_v26  ;;  %v13967_v42 = vcombine.low %v1304_v0, %v1308_v26 }
 0x391   : > { %6481 = vmatpush1.bf16.msra.mxu1 %v14015_v33  ;;  %v1436_v28 = vld [vmem:[%s16671_s20 + $0xef8] sm:$0xff] }
 0x392   : > { %6482 = vmatprep.subr.bf16.mxu1 %v14008_v11  ;;  %v14096_v17 = vcombine.high %v1432_v27, %v1436_v28  ;;  %v1296_v34 = vld [vmem:[%s16671_s20 + $0xa98] sm:$0xff]  ;;  %v14095_v38 = vcombine.low %v1432_v27, %v1436_v28 }
 0x393   : > { %6442 = vmatpush1.bf16.msra.mxu0 %v13879_v39  ;;  %v1300_v33 = vld [vmem:[%s16671_s20 + $0xab8] sm:$0xff] }
 0x394   : > { %6443 = vmatprep.subr.bf16.mxu0 %v14000_v48  ;;  %v1424_v36 = vld [vmem:[%s16671_s20 + $0xe98] sm:$0xff]  ;;  %v13960_v37 = vcombine.high %v1296_v34, %v1300_v33  ;;  %v13959_v54 = vcombine.low %v1296_v34, %v1300_v33 }
 0x395   : > { %6483 = vmatpush1.bf16.msra.mxu1 %v14007_v45  ;;  %v1428_v11 = vld [vmem:[%s16671_s20 + $0xeb8] sm:$0xff] }
 0x396   : > { %6484 = vmatprep.subr.bf16.mxu1 %v14128_v49  ;;  %v14088_v16 = vcombine.high %v1424_v36, %v1428_v11  ;;  %v1288_v39 = vld [vmem:[%s16671_s20 + $0xa58] sm:$0xff]  ;;  %v14087_v55 = vcombine.low %v1424_v36, %v1428_v11 }
 0x397   : > { %6444 = vmatpush2.bf16.msra.mxu0 %v13999_v52  ;;  %v1292_v45 = vld [vmem:[%s16671_s20 + $0xa78] sm:$0xff] }
 0x398   : > { %6445 = vmatprep.subr.bf16.mxu0 %v13992_v56  ;;  %v1416_v48 = vld [vmem:[%s16671_s20 + $0xe58] sm:$0xff]  ;;  %v13952_v46 = vcombine.high %v1288_v39, %v1292_v45  ;;  %v13951_v60 = vcombine.low %v1288_v39, %v1292_v45 }
 0x399   : > { %6485 = vmatpush2.bf16.msra.mxu1 %v14127_v5  ;;  %v1420_v49 = vld [vmem:[%s16671_s20 + $0xe78] sm:$0xff] }
 0x39a   : > { %6486 = vmatprep.subr.bf16.mxu1 %v14120_v57  ;;  %v14080_v51 = vcombine.high %v1416_v48, %v1420_v49  ;;  %v1280_v52 = vld [vmem:[%s16671_s20 + $0xa18] sm:$0xff]  ;;  %v14079_v61 = vcombine.low %v1416_v48, %v1420_v49 }
 0x39b   : > { %6446 = vmatpush2.bf16.msra.mxu0 %v13991_v47  ;;  %v1284_v5 = vld [vmem:[%s16671_s20 + $0xa38] sm:$0xff] }
 0x39c   : > { %6447 = vmatprep.subr.bf16.mxu0 %v13984_v8  ;;  %v1408_v56 = vld [vmem:[%s16671_s20 + $0xe18] sm:$0xff]  ;;  %v13944_v62 = vcombine.high %v1280_v52, %v1284_v5  ;;  %v13943_v12 = vcombine.low %v1280_v52, %v1284_v5 }
 0x39d   : > { %6487 = vmatpush2.bf16.msra.mxu1 %v14119_v7  ;;  %v1412_v57 = vld [vmem:[%s16671_s20 + $0xe38] sm:$0xff] }
 0x39e   : > { %6488 = vmatprep.subr.bf16.mxu1 %v14112_v22  ;;  %v14072_v6 = vcombine.high %v1408_v56, %v1412_v57  ;;  %v1528_v47 = vld [vmem:[%s16671_s20 + $0x11d8] sm:$0xff]  ;;  %v14071_v13 = vcombine.low %v1408_v56, %v1412_v57 }
 0x39f   : > { %6448 = vmatpush2.bf16.msra.mxu0 %v13983_v19  ;;  %v1532_v7 = vld [vmem:[%s16671_s20 + $0x11f8] sm:$0xff] }
 0x3a0   : > { %6449 = vmatprep.subr.bf16.mxu0 %v13976_v23  ;;  %v1656_v8 = vld [vmem:[%s16671_s20 + $0x15d8] sm:$0xff]  ;;  %v14192_v18 = vcombine.high %v1528_v47, %v1532_v7  ;;  %v14191_v0 = vcombine.low %v1528_v47, %v1532_v7 }
 0x3a1   : > { %6489 = vmatpush2.bf16.msra.mxu1 %v14111_v20  ;;  %v1660_v22 = vld [vmem:[%s16671_s20 + $0x15f8] sm:$0xff] }
 0x3a2   : > { %6490 = vmatprep.subr.bf16.mxu1 %v14104_v24  ;;  %v14320_v58 = vcombine.high %v1656_v8, %v1660_v22  ;;  %v1520_v19 = vld [vmem:[%s16671_s20 + $0x1198] sm:$0xff]  ;;  %v14319_v26 = vcombine.low %v1656_v8, %v1660_v22 }
 0x3a3   : > { %6450 = vmatpush2.bf16.msra.mxu0 %v13975_v29  ;;  %v1524_v20 = vld [vmem:[%s16671_s20 + $0x11b8] sm:$0xff] }
 0x3a4   : > { %6451 = vmatprep.subr.bf16.mxu0 %v13968_v32  ;;  %v1648_v23 = vld [vmem:[%s16671_s20 + $0x1598] sm:$0xff]  ;;  %v14184_v27 = vcombine.high %v1520_v19, %v1524_v20  ;;  %v14183_v11 = vcombine.low %v1520_v19, %v1524_v20 }
 0x3a5   : > { %6491 = vmatpush2.bf16.msra.mxu1 %v14103_v30  ;;  %v1652_v24 = vld [vmem:[%s16671_s20 + $0x15b8] sm:$0xff] }
 0x3a6   : > { %6492 = vmatprep.subr.bf16.mxu1 %v14096_v17  ;;  %v14312_v28 = vcombine.high %v1648_v23, %v1652_v24  ;;  %v1512_v29 = vld [vmem:[%s16671_s20 + $0x1158] sm:$0xff] }
 0x3a7   : > { %6452 = vmatpush2.bf16.msra.mxu0 %v13967_v42  ;;  %v1516_v30 = vld [vmem:[%s16671_s20 + $0x1178] sm:$0xff] }
 0x3a8   : > { %6453 = vmatprep.subr.bf16.mxu0 %v13960_v37  ;;  %v1640_v17 = vld [vmem:[%s16671_s20 + $0x1558] sm:$0xff]  ;;  %v14176_v37 = vcombine.high %v1512_v29, %v1516_v30 }
 0x3a9   : > { %6493 = vmatpush2.bf16.msra.mxu1 %v14095_v38  ;;  %v1644_v34 = vld [vmem:[%s16671_s20 + $0x1578] sm:$0xff]  ;;  %v14311_v38 = vcombine.low %v1648_v23, %v1652_v24 }
 0x3aa   : > { %6494 = vmatprep.subr.bf16.mxu1 %v14088_v16  ;;  %v1504_v45 = vld [vmem:[%s16671_s20 + $0x1118] sm:$0xff]  ;;  %v14303_v52 = vcombine.low %v1640_v17, %v1644_v34 }
 0x3ab   : > { %6454 = vmatpush2.bf16.msra.mxu0 %v13959_v54  ;;  %v1508_v48 = vld [vmem:[%s16671_s20 + $0x1138] sm:$0xff] }
 0x3ac   : > { %6455 = vmatprep.subr.bf16.mxu0 %v13952_v46  ;;  %v1632_v49 = vld [vmem:[%s16671_s20 + $0x1518] sm:$0xff]  ;;  %v14168_v5 = vcombine.high %v1504_v45, %v1508_v48 }
 0x3ad   : > { %6495 = vmatpush2.bf16.msra.mxu1 %v14087_v55  ;;  %v1636_v54 = vld [vmem:[%s16671_s20 + $0x1538] sm:$0xff] }
 0x3ae   : > { %6496 = vmatprep.subr.bf16.mxu1 %v14080_v51  ;;  %v14296_v56 = vcombine.high %v1632_v49, %v1636_v54  ;;  %v1496_v57 = vld [vmem:[%s16671_s20 + $0x10d8] sm:$0xff] }
 0x3af   : > { %6456 = vmatpush2.bf16.msra.mxu0 %v13951_v60  ;;  %v1624_v60 = vld [vmem:[%s16671_s20 + $0x14d8] sm:$0xff] }
 0x3b0   : > { %6457 = vmatprep.subr.bf16.mxu0 %v13944_v62  ;;  %v14167_v62 = vcombine.low %v1504_v45, %v1508_v48  ;;  %v1488_v8 = vld [vmem:[%s16671_s20 + $0x1098] sm:$0xff] }
 0x3b1   : > { %6497 = vmatpush2.bf16.msra.mxu1 %v14079_v61  ;;  %v1628_v61 = vld [vmem:[%s16671_s20 + $0x14f8] sm:$0xff] }
 0x3b2   : > { %6498 = vmatprep.subr.bf16.mxu1 %v14072_v6  ;;  %v14295_v6 = vcombine.low %v1632_v49, %v1636_v54  ;;  %v14288_v7 = vcombine.high %v1624_v60, %v1628_v61  ;;  %v1492_v22 = vld [vmem:[%s16671_s20 + $0x10b8] sm:$0xff] }
 0x3b3   : > { %6458 = vmatpush2.bf16.msra.mxu0 %v13943_v12  ;;  %v1616_v12 = vld [vmem:[%s16671_s20 + $0x1498] sm:$0xff]  ;;  %v14152_v19 = vcombine.high %v1488_v8, %v1492_v22 }
 0x3b4   : > { %6509 = vmatprep.subr.bf16.mxu0 %v14192_v18  ;;  %v1480_v23 = vld [vmem:[%s16671_s20 + $0x1058] sm:$0xff] }
 0x3b5   : > { %6499 = vmatpush2.bf16.msra.mxu1 %v14071_v13  ;;  %v1620_v13 = vld [vmem:[%s16671_s20 + $0x14b8] sm:$0xff] }
 0x3b6   : > { %6550 = vmatprep.subr.bf16.mxu1 %v14320_v58  ;;  %v6215_v32 = vpop.f32.mrf.mxu0  ;;  %6460 = vmatmul.mubr.bf16.vlgmr.msra.gmra.mxu0 %v16912_v2  ;;  %v14287_v58 = vcombine.low %v1624_v60, %v1628_v61  ;;  %v14280_v20 = vcombine.high %v1616_v12, %v1620_v13  ;;  %v1484_v24 = vld [vmem:[%s16671_s20 + $0x1078] sm:$0xff] }
 0x3b7   : > { %v6216_v33 = vadd.f32 %v6215_v32, %v17539_v35  ;;  %6510 = vmatpush1.bf16.msra.mxu0 %v14191_v0  ;;  %v14304_v35 = vcombine.high %v1640_v17, %v1644_v34  ;;  %6541 = vmatprep.mubr.bf16.mxu0 %v16924_v14  ;;  %v1608_v0 = vld [vmem:[%s16671_s20 + $0x1458] sm:$0xff] }
 0x3b8   : > { %v6256_v36 = vpop.f32.mrf.mxu1  ;;  %6501 = vmatmul.mubr.bf16.vlgmr.msra.gmra.mxu1 %v16918_v4  ;;  %v6217_v42 = vpop.f32.mrf.mxu0  ;;  %6511 = vmatprep.subr.bf16.mxu0 %v14184_v27  ;;  %v14151_v27 = vcombine.low %v1488_v8, %v1492_v22  ;;  %v1472_v32 = vld [vmem:[%s16671_s20 + $0x1018] sm:$0xff] }
 0x3b9   : > { %6551 = vmatpush1.bf16.msra.mxu1 %v14319_v26  ;;  %v17612_v16 = vadd.f32 %v6256_v36, %v6216_v33  ;;  %v6218_v2 = vadd.f32 %v6217_v42, %v17547_v43  ;;  %6582 = vmatprep.mubr.bf16.mxu1 %v16927_v25  ;;  %v14175_v43 = vcombine.low %v1512_v29, %v1516_v30  ;;  %v1500_v25 = vld [vmem:[%s16671_s20 + $0x10f8] sm:$0xff] }
 0x3ba   : > { %v6258_v39 = vpop.f32.mrf.mxu1  ;;  %6552 = vmatprep.subr.bf16.mxu1 %v14312_v28  ;;  %v6219_v4 = vpop.f32.mrf.mxu0  ;;  %v14160_v47 = vcombine.high %v1496_v57, %v1500_v25  ;;  %v14159_v18 = vcombine.low %v1496_v57, %v1500_v25  ;;  %v1612_v26 = vld [vmem:[%s16671_s20 + $0x1478] sm:$0xff]  ;;  %v14279_v28 = vcombine.low %v1616_v12, %v1620_v13  ;;  %v14144_v29 = vcombine.high %v1480_v23, %v1484_v24 }
 0x3bb   : > { %v17621_v55 = vadd.f32 %v6258_v39, %v6218_v2  ;;  %6512 = vmatpush1.bf16.msra.mxu0 %v14183_v11  ;;  %v14272_v30 = vcombine.high %v1608_v0, %v1612_v26  ;;  %v1476_v17 = vld [vmem:[%s16671_s20 + $0x1038] sm:$0xff]  ;;  %v14143_v36 = vcombine.low %v1480_v23, %v1484_v24  ;;  %v14271_v11 = vcombine.low %v1608_v0, %v1612_v26 }
 0x3bc   : > { %v6260_v46 = vpop.f32.mrf.mxu1  ;;  %v6220_v51 = vpop.f32.mrf.mxu0  ;;  %6513 = vmatprep.subr.bf16.mxu0 %v14176_v37  ;;  %v1600_v34 = vld [vmem:[%s16671_s20 + $0x1418] sm:$0xff]  ;;  %v14136_v42 = vcombine.high %v1472_v32, %v1476_v17  ;;  %v14135_v45 = vcombine.low %v1472_v32, %v1476_v17 }
 0x3bd   : > { %6553 = vmatpush1.bf16.msra.mxu1 %v14311_v38  ;;  %v1604_v33 = vld [vmem:[%s16671_s20 + $0x1438] sm:$0xff] }
 0x3be   : > { %v6261_v14 = vpop.f32.mrf.mxu1  ;;  %6554 = vmatprep.subr.bf16.mxu1 %v14304_v35  ;;  %v14264_v38 = vcombine.high %v1600_v34, %v1604_v33  ;;  %v1592_v37 = vld [vmem:[%s16671_s20 + $0x13d8] sm:$0xff]  ;;  %v14263_v48 = vcombine.low %v1600_v34, %v1604_v33 }
 0x3bf   : > { %6514 = vmatpush1.bf16.msra.mxu0 %v14175_v43  ;;  %v1596_v2 = vld [vmem:[%s16671_s20 + $0x13f8] sm:$0xff] }
 0x3c0   : > { %6515 = vmatprep.subr.bf16.mxu0 %v14168_v5  ;;  %v1720_v39 = vld [vmem:[%s16671_s20 + $0x17d8] sm:$0xff]  ;;  %v14256_v4 = vcombine.high %v1592_v37, %v1596_v2 }
 0x3c1   : > { %6555 = vmatpush1.bf16.msra.mxu1 %v14303_v52  ;;  %v1724_v35 = vld [vmem:[%s16671_s20 + $0x17f8] sm:$0xff]  ;;  %v14255_v52 = vcombine.low %v1592_v37, %v1596_v2 }
 0x3c2   : > { %6556 = vmatprep.subr.bf16.mxu1 %v14296_v56  ;;  %v14384_v49 = vcombine.high %v1720_v39, %v1724_v35  ;;  %v1584_v54 = vld [vmem:[%s16671_s20 + $0x1398] sm:$0xff]  ;;  %v14383_v5 = vcombine.low %v1720_v39, %v1724_v35 }
 0x3c3   : > { %6516 = vmatpush1.bf16.msra.mxu0 %v14167_v62  ;;  %v1588_v46 = vld [vmem:[%s16671_s20 + $0x13b8] sm:$0xff] }
 0x3c4   : > { %6517 = vmatprep.subr.bf16.mxu0 %v14160_v47  ;;  %v1712_v43 = vld [vmem:[%s16671_s20 + $0x1798] sm:$0xff]  ;;  %v14248_v14 = vcombine.high %v1584_v54, %v1588_v46  ;;  %v14247_v62 = vcombine.low %v1584_v54, %v1588_v46 }
 0x3c5   : > { %6557 = vmatpush1.bf16.msra.mxu1 %v14295_v6  ;;  %v1716_v51 = vld [vmem:[%s16671_s20 + $0x17b8] sm:$0xff] }
 0x3c6   : > { %6558 = vmatprep.subr.bf16.mxu1 %v14288_v7  ;;  %v14376_v56 = vcombine.high %v1712_v43, %v1716_v51  ;;  %v1576_v57 = vld [vmem:[%s16671_s20 + $0x1358] sm:$0xff]  ;;  %v14375_v6 = vcombine.low %v1712_v43, %v1716_v51 }
 0x3c7   : > { %6518 = vmatpush1.bf16.msra.mxu0 %v14159_v18  ;;  %v1580_v25 = vld [vmem:[%s16671_s20 + $0x1378] sm:$0xff] }
 0x3c8   : > { %6519 = vmatprep.subr.bf16.mxu0 %v14152_v19  ;;  %v1704_v60 = vld [vmem:[%s16671_s20 + $0x1758] sm:$0xff]  ;;  %v14240_v47 = vcombine.high %v1576_v57, %v1580_v25  ;;  %v14239_v18 = vcombine.low %v1576_v57, %v1580_v25  ;;  %v6679_v57 = vld [vmem:[%s16682_s16 + $0x1c0] sm:$0xff] }
 0x3c9   : > { %6559 = vmatpush1.bf16.msra.mxu1 %v14287_v58  ;;  %v1708_v61 = vld [vmem:[%s16671_s20 + $0x1778] sm:$0xff]  ;;  %v6683_v25 = vld [vmem:[%s16682_s16 + $0x1e0] sm:$0xff] }
 0x3ca   : > { %6560 = vmatprep.subr.bf16.mxu1 %v14280_v20  ;;  %v14368_v7 = vcombine.high %v1704_v60, %v1708_v61  ;;  %v1568_v8 = vld [vmem:[%s16671_s20 + $0x1318] sm:$0xff]  ;;  %v14367_v58 = vcombine.low %v1704_v60, %v1708_v61  ;;  %v6807_v60 = vld [vmem:[%s16682_s16 + $0x5c0] sm:$0xff] }
 0x3cb   : > { %6520 = vmatpush1.bf16.msra.mxu0 %v14151_v27  ;;  %v1572_v22 = vld [vmem:[%s16671_s20 + $0x1338] sm:$0xff]  ;;  %v6811_v61 = vld [vmem:[%s16682_s16 + $0x5e0] sm:$0xff] }
 0x3cc   : > { %6521 = vmatprep.subr.bf16.mxu0 %v14144_v29  ;;  %v1696_v12 = vld [vmem:[%s16671_s20 + $0x1718] sm:$0xff]  ;;  %v14232_v19 = vcombine.high %v1568_v8, %v1572_v22  ;;  %v14231_v27 = vcombine.low %v1568_v8, %v1572_v22  ;;  %v14442_v8 = vcombine.high %v6679_v57, %v6683_v25  ;;  %v14570_v22 = vcombine.high %v6807_v60, %v6811_v61 }
 0x3cd   : > { %6561 = vmatpush1.bf16.msra.mxu1 %v14279_v28  ;;  %v1700_v13 = vld [vmem:[%s16671_s20 + $0x1738] sm:$0xff] }
 0x3ce   : > { %6562 = vmatprep.subr.bf16.mxu1 %v14272_v30  ;;  %v14360_v20 = vcombine.high %v1696_v12, %v1700_v13  ;;  %v1560_v23 = vld [vmem:[%s16671_s20 + $0x12d8] sm:$0xff]  ;;  %v14359_v28 = vcombine.low %v1696_v12, %v1700_v13  ;;  %v6671_v12 = vld [vmem:[%s16682_s16 + $0x180] sm:$0xff] }
 0x3cf   : > { %6522 = vmatpush1.bf16.msra.mxu0 %v14143_v36  ;;  %v1564_v24 = vld [vmem:[%s16671_s20 + $0x12f8] sm:$0xff]  ;;  %v6675_v13 = vld [vmem:[%s16682_s16 + $0x1a0] sm:$0xff] }
 0x3d0   : > { %6523 = vmatprep.subr.bf16.mxu0 %v14136_v42  ;;  %v1688_v0 = vld [vmem:[%s16671_s20 + $0x16d8] sm:$0xff]  ;;  %v14224_v29 = vcombine.high %v1560_v23, %v1564_v24  ;;  %v14223_v36 = vcombine.low %v1560_v23, %v1564_v24  ;;  %v14569_v24 = vcombine.low %v6807_v60, %v6811_v61  ;;  %v6639_v61 = vld [vmem:[%s16682_s16 + $0x80] sm:$0xff] }
 0x3d1   : > { %6563 = vmatpush1.bf16.msra.mxu1 %v14271_v11  ;;  %v1692_v26 = vld [vmem:[%s16671_s20 + $0x16f8] sm:$0xff] }
 0x3d2   : > { %6564 = vmatprep.subr.bf16.mxu1 %v14264_v38  ;;  %v14352_v30 = vcombine.high %v1688_v0, %v1692_v26  ;;  %v1552_v32 = vld [vmem:[%s16671_s20 + $0x1298] sm:$0xff]  ;;  %v14351_v11 = vcombine.low %v1688_v0, %v1692_v26  ;;  %v14434_v0 = vcombine.high %v6671_v12, %v6675_v13  ;;  %v6663_v26 = vld [vmem:[%s16682_s16 + $0x140] sm:$0xff] }
 0x3d3   : > { %6524 = vmatpush1.bf16.msra.mxu0 %v14135_v45  ;;  %v1556_v17 = vld [vmem:[%s16671_s20 + $0x12b8] sm:$0xff] }
 0x3d4   : > { %6525 = vmatprep.subr.bf16.mxu0 %v14256_v4  ;;  %v1680_v34 = vld [vmem:[%s16671_s20 + $0x1698] sm:$0xff]  ;;  %v14216_v42 = vcombine.high %v1552_v32, %v1556_v17  ;;  %v14215_v45 = vcombine.low %v1552_v32, %v1556_v17  ;;  %v6795_v32 = vld [vmem:[%s16682_s16 + $0x560] sm:$0xff] }
 0x3d5   : > { %6565 = vmatpush1.bf16.msra.mxu1 %v14263_v48  ;;  %v1684_v33 = vld [vmem:[%s16671_s20 + $0x16b8] sm:$0xff] }
 0x3d6   : > { %6566 = vmatprep.subr.bf16.mxu1 %v14384_v49  ;;  %v14344_v38 = vcombine.high %v1680_v34, %v1684_v33  ;;  %v1544_v37 = vld [vmem:[%s16671_s20 + $0x1258] sm:$0xff]  ;;  %v14343_v48 = vcombine.low %v1680_v34, %v1684_v33  ;;  %v14433_v33 = vcombine.low %v6671_v12, %v6675_v13  ;;  %v6631_v13 = vld [vmem:[%s16682_s16 + $0x40] sm:$0xff] }
 0x3d7   : > { %6526 = vmatpush2.bf16.msra.mxu0 %v14255_v52  ;;  %v1548_v2 = vld [vmem:[%s16671_s20 + $0x1278] sm:$0xff] }
 0x3d8   : > { %6527 = vmatprep.subr.bf16.mxu0 %v14248_v14  ;;  %v1672_v39 = vld [vmem:[%s16671_s20 + $0x1658] sm:$0xff]  ;;  %v14208_v4 = vcombine.high %v1544_v37, %v1548_v2  ;;  %v14207_v52 = vcombine.low %v1544_v37, %v1548_v2  ;;  %v6659_v37 = vld [vmem:[%s16682_s16 + $0x120] sm:$0xff] }
 0x3d9   : > { %6567 = vmatpush2.bf16.msra.mxu1 %v14383_v5  ;;  %v1676_v35 = vld [vmem:[%s16671_s20 + $0x1678] sm:$0xff] }
 0x3da   : > { %6568 = vmatprep.subr.bf16.mxu1 %v14376_v56  ;;  %v14336_v49 = vcombine.high %v1672_v39, %v1676_v35  ;;  %v1536_v54 = vld [vmem:[%s16671_s20 + $0x1218] sm:$0xff]  ;;  %v14335_v5 = vcombine.low %v1672_v39, %v1676_v35  ;;  %v6783_v39 = vld [vmem:[%s16682_s16 + $0x500] sm:$0xff] }
 0x3db   : > { %6528 = vmatpush2.bf16.msra.mxu0 %v14247_v62  ;;  %v1540_v46 = vld [vmem:[%s16671_s20 + $0x1238] sm:$0xff]  ;;  %v6600_v62 = vmul.f32 0.2, %v17239_v50  ;;  %v6787_v35 = vld [vmem:[%s16682_s16 + $0x520] sm:$0xff] }
 0x3dc   : > { %6529 = vmatprep.subr.bf16.mxu0 %v14240_v47  ;;  %v1664_v43 = vld [vmem:[%s16671_s20 + $0x1618] sm:$0xff]  ;;  %v14200_v14 = vcombine.high %v1536_v54, %v1540_v46  ;;  %v6602_v47 = vmul.f32 0.2, %v17468_v31 }
 0x3dd   : > { %6569 = vmatpush2.bf16.msra.mxu1 %v14375_v6  ;;  %v1668_v51 = vld [vmem:[%s16671_s20 + $0x1638] sm:$0xff]  ;;  %v14199_v6 = vcombine.low %v1536_v54, %v1540_v46 }
 0x3de   : > { %6570 = vmatprep.subr.bf16.mxu1 %v14368_v7  ;;  %v14328_v56 = vcombine.high %v1664_v43, %v1668_v51  ;;  %v14327_v7 = vcombine.low %v1664_v43, %v1668_v51  ;;  %v6610_v23 = vsel %vm6594_vm1, %v17468_v31, %v6602_v47  ;;  %v14546_v43 = vcombine.high %v6783_v39, %v6787_v35  ;;  %v6647_v51 = vld [vmem:[%s16682_s16 + $0xc0] sm:$0xff] }
 0x3df   : > { %6530 = vmatpush2.bf16.msra.mxu0 %v14239_v18  ;;  %v6608_v18 = vsel %vm6592_vm0, %v17239_v50, %v6600_v62  ;;  %v17692_v17 = vpack.c.bf16 %v6610_v23, %v6610_v23  ;;  %v6643_v62 = vld [vmem:[%s16682_s16 + $0xa0] sm:$0xff] }
 0x3e0   : > { %6531 = vmatprep.subr.bf16.mxu0 %v14232_v19  ;;  %v6799_v19 = vld [vmem:[%s16682_s16 + $0x580] sm:$0xff] }
 0x3e1   : > { %6571 = vmatpush2.bf16.msra.mxu1 %v14367_v58  ;;  %v14441_v58 = vcombine.low %v6679_v57, %v6683_v25  ;;  %v14545_v57 = vcombine.low %v6783_v39, %v6787_v35  ;;  %v6771_v47 = vld [vmem:[%s16682_s16 + $0x4a0] sm:$0xff] }
 0x3e2   : > { %6572 = vmatprep.subr.bf16.mxu1 %v14360_v20  ;;  %v6803_v20 = vld [vmem:[%s16682_s16 + $0x5a0] sm:$0xff] }
 0x3e3   : > { %6532 = vmatpush2.bf16.msra.mxu0 %v14231_v27  ;;  %v6667_v27 = vld [vmem:[%s16682_s16 + $0x160] sm:$0xff]  ;;  %v14562_v50 = vcombine.high %v6799_v19, %v6803_v20 }
 0x3e4   : > { %6533 = vmatprep.subr.bf16.mxu0 %v14224_v29  ;;  %v6735_v35 = vld [vmem:[%s16682_s16 + $0x380] sm:$0xff] }
 0x3e5   : > { %6573 = vmatpush2.bf16.msra.mxu1 %v14359_v28  ;;  %v17687_v28 = vpack.c.bf16 %v6608_v18, %v6608_v18  ;;  %v6635_v18 = vld [vmem:[%s16682_s16 + $0x60] sm:$0xff] }
 0x3e6   : > { %6574 = vmatprep.subr.bf16.mxu1 %v14352_v30  ;;  %v6791_v30 = vld [vmem:[%s16682_s16 + $0x540] sm:$0xff] }
 0x3e7   : > { %6534 = vmatpush2.bf16.msra.mxu0 %v14223_v36  ;;  %v14561_v36 = vcombine.low %v6799_v19, %v6803_v20  ;;  %v6763_v19 = vld [vmem:[%s16682_s16 + $0x460] sm:$0xff]  ;;  %v14401_v20 = vcombine.low %v6639_v61, %v6643_v62 }
 0x3e8   : > { %6535 = vmatprep.subr.bf16.mxu0 %v14216_v42 }
 0x3e9   : > { %6575 = vmatpush2.bf16.msra.mxu1 %v14351_v11  ;;  %v14426_v11 = vcombine.high %v6663_v26, %v6667_v27 }
 0x3ea   : > { %6576 = vmatprep.subr.bf16.mxu1 %v14344_v38  ;;  %v14554_v38 = vcombine.high %v6791_v30, %v6795_v32 }
 0x3eb   : > { %6536 = vmatpush2.bf16.msra.mxu0 %v14215_v45 }
 0x3ec   : > { %6537 = vmatprep.subr.bf16.mxu0 %v14208_v4 }
 0x3ed   : > { %6577 = vmatpush2.bf16.msra.mxu1 %v14343_v48  ;;  %v14425_v48 = vcombine.low %v6663_v26, %v6667_v27  ;;  %v6623_v26 = vld [vmem:[%s16682_s16] sm:$0xff] }
 0x3ee   : > { %6578 = vmatprep.subr.bf16.mxu1 %v14336_v49  ;;  %v14553_v49 = vcombine.low %v6791_v30, %v6795_v32  ;;  %v6627_v27 = vld [vmem:[%s16682_s16 + $0x20] sm:$0xff]  ;;  %v14393_v30 = vcombine.low %v6631_v13, %v6635_v18 }
 0x3ef   : > { %6538 = vmatpush2.bf16.msra.mxu0 %v14207_v52  ;;  %v6651_v52 = vld [vmem:[%s16682_s16 + $0xe0] sm:$0xff] }
 0x3f0   : > { %6539 = vmatprep.subr.bf16.mxu0 %v14200_v14  ;;  %v6779_v14 = vld [vmem:[%s16682_s16 + $0x4e0] sm:$0xff]  ;;  %v14410_v25 = vcombine.high %v6647_v51, %v6651_v52 }
 0x3f1   : > { %6579 = vmatpush2.bf16.msra.mxu1 %v14335_v5  ;;  %v6775_v5 = vld [vmem:[%s16682_s16 + $0x4c0] sm:$0xff] }
 0x3f2   : > { %6580 = vmatprep.subr.bf16.mxu1 %v14328_v56  ;;  %v14538_v60 = vcombine.high %v6775_v5, %v6779_v14 }
 0x3f3   : > { %6540 = vmatpush2.bf16.msra.mxu0 %v14199_v6  ;;  %v6767_v6 = vld [vmem:[%s16682_s16 + $0x480] sm:$0xff] }
 0x3f4   : > { %9737 = vmatprep.subr.bf16.mxu0 %v14442_v8  ;;  %v14537_v8 = vcombine.low %v6775_v5, %v6779_v14  ;;  %v14530_v12 = vcombine.high %v6767_v6, %v6771_v47  ;;  %v14529_v23 = vcombine.low %v6767_v6, %v6771_v47  ;;  %v6855_v5 = vld [vmem:[%s16682_s16 + $0x740] sm:$0xff] }
 0x3f5   : > { %6581 = vmatpush2.bf16.msra.mxu1 %v14327_v7  ;;  %v14409_v7 = vcombine.low %v6647_v51, %v6651_v52  ;;  %v6727_v51 = vld [vmem:[%s16682_s16 + $0x340] sm:$0xff] }
 0x3f6   : > { %9778 = vmatprep.subr.bf16.mxu1 %v14570_v22  ;;  %v6297_v29 = vpop.f32.mrf.mxu0  ;;  %6542 = vmatmul.mubr.bf16.vlgmr.msra.gmra.mxu0 %v16994_v40  ;;  %v14402_v22 = vcombine.high %v6639_v61, %v6643_v62  ;;  %v6731_v52 = vld [vmem:[%s16682_s16 + $0x360] sm:$0xff] }
 0x3f7   : > { %v6298_v31 = vadd.f32 %v6297_v29, %v17612_v16  ;;  %9738 = vmatpush1.bf16.msra.mxu0 %v14441_v58  ;;  %9769 = vmatprep.mubr.bf16.mxu0 %v17687_v28  ;;  %v6759_v58 = vld [vmem:[%s16682_s16 + $0x440] sm:$0xff] }
 0x3f8   : > { %v6338_v34 = vpop.f32.mrf.mxu1  ;;  %6583 = vmatmul.mubr.bf16.vlgmr.msra.gmra.mxu1 %v16998_v41  ;;  %v17697_v40 = vpop.f32.mrf.mxu0  ;;  %9739 = vmatprep.subr.bf16.mxu0 %v14434_v0  ;;  %v6655_v41 = vld [vmem:[%s16682_s16 + $0x100] sm:$0xff]  ;;  %v14522_v0 = vcombine.high %v6759_v58, %v6763_v19  ;;  %v14521_v32 = vcombine.low %v6759_v58, %v6763_v19 }
 0x3f9   : > { %9779 = vmatpush1.bf16.msra.mxu1 %v14569_v24  ;;  %v17699_v42 = vadd.f32 %v6338_v34, %v6298_v31  ;;  %9810 = vmatprep.mubr.bf16.mxu1 %v17692_v17  ;;  %v14418_v54 = vcombine.high %v6655_v41, %v6659_v37  ;;  %v14417_v56 = vcombine.low %v6655_v41, %v6659_v37  ;;  %v6751_v29 = vld [vmem:[%s16682_s16 + $0x400] sm:$0xff] }
 0x3fa   : > { %v17702_v16 = vpop.f32.mrf.mxu1  ;;  %v6301_v2 = vpop.f32.mrf.mxu0  ;;  %9780 = vmatprep.subr.bf16.mxu1 %v14562_v50  ;;  %v14394_v24 = vcombine.high %v6631_v13, %v6635_v18  ;;  %v6755_v50 = vld [vmem:[%s16682_s16 + $0x420] sm:$0xff]  ;;  %v14386_v31 = vcombine.high %v6623_v26, %v6627_v27  ;;  %v14385_v41 = vcombine.low %v6623_v26, %v6627_v27 }
 0x3fb   : > { %9740 = vmatpush1.bf16.msra.mxu0 %v14433_v33  ;;  %v14514_v34 = vcombine.high %v6751_v29, %v6755_v50  ;;  %v6743_v33 = vld [vmem:[%s16682_s16 + $0x3c0] sm:$0xff]  ;;  %v14513_v37 = vcombine.low %v6751_v29, %v6755_v50  ;;  %vm6595_vm5 = vcmp.gt.f32.partialorder %v17699_v42, 0.0 }
 0x3fc   : > { %v6342_v45 = vpop.f32.mrf.mxu1  ;;  %v6302_v4 = vpop.f32.mrf.mxu0  ;;  %9741 = vmatprep.subr.bf16.mxu0 %v14426_v11  ;;  %v6871_v11 = vld [vmem:[%s16682_s16 + $0x7c0] sm:$0xff] }
 0x3fd   : > { %9781 = vmatpush1.bf16.msra.mxu1 %v14561_v36  ;;  %v6747_v36 = vld [vmem:[%s16682_s16 + $0x3e0] sm:$0xff] }
 0x3fe   : > { %v6343_v46 = vpop.f32.mrf.mxu1  ;;  %9782 = vmatprep.subr.bf16.mxu1 %v14554_v38  ;;  %v6875_v38 = vld [vmem:[%s16682_s16 + $0x7e0] sm:$0xff]  ;;  %v14506_v2 = vcombine.high %v6743_v33, %v6747_v36 }
 0x3ff   : > { %9742 = vmatpush1.bf16.msra.mxu0 %v14425_v48  ;;  %v14634_v39 = vcombine.high %v6871_v11, %v6875_v38  ;;  %v6739_v45 = vld [vmem:[%s16682_s16 + $0x3a0] sm:$0xff] }
 0x400   : > { %9743 = vmatprep.subr.bf16.mxu0 %v14418_v54  ;;  %v6863_v48 = vld [vmem:[%s16682_s16 + $0x780] sm:$0xff]  ;;  %v14633_v54 = vcombine.low %v6871_v11, %v6875_v38  ;;  %v14498_v46 = vcombine.high %v6735_v35, %v6739_v45 }
 0x401   : > { %9783 = vmatpush1.bf16.msra.mxu1 %v14553_v49  ;;  %v6867_v4 = vld [vmem:[%s16682_s16 + $0x7a0] sm:$0xff]  ;;  %v14505_v49 = vcombine.low %v6743_v33, %v6747_v36 }
 0x402   : > { %9784 = vmatprep.subr.bf16.mxu1 %v14546_v43  ;;  %v14626_v43 = vcombine.high %v6863_v48, %v6867_v4  ;;  %v6859_v14 = vld [vmem:[%s16682_s16 + $0x760] sm:$0xff] }
 0x403   : > { %9744 = vmatpush1.bf16.msra.mxu0 %v14417_v56  ;;  %v14497_v56 = vcombine.low %v6735_v35, %v6739_v45  ;;  %v6719_v61 = vld [vmem:[%s16682_s16 + $0x300] sm:$0xff] }
 0x404   : > { %9745 = vmatprep.subr.bf16.mxu0 %v14410_v25  ;;  %v14490_v25 = vcombine.high %v6727_v51, %v6731_v52  ;;  %v6723_v62 = vld [vmem:[%s16682_s16 + $0x320] sm:$0xff] }
 0x405   : > { %9785 = vmatpush1.bf16.msra.mxu1 %v14545_v57  ;;  %v14625_v57 = vcombine.low %v6863_v48, %v6867_v4  ;;  %v6847_v6 = vld [vmem:[%s16682_s16 + $0x700] sm:$0xff] }
 0x406   : > { %9786 = vmatprep.subr.bf16.mxu1 %v14538_v60  ;;  %v14618_v60 = vcombine.high %v6855_v5, %v6859_v14  ;;  %v6851_v47 = vld [vmem:[%s16682_s16 + $0x720] sm:$0xff] }
 0x407   : > { %9746 = vmatpush1.bf16.msra.mxu0 %v14409_v7  ;;  %v14489_v7 = vcombine.low %v6727_v51, %v6731_v52  ;;  %v6711_v13 = vld [vmem:[%s16682_s16 + $0x2c0] sm:$0xff] }
 0x408   : > { %9747 = vmatprep.subr.bf16.mxu0 %v14402_v22  ;;  %v14482_v22 = vcombine.high %v6719_v61, %v6723_v62  ;;  %v6715_v18 = vld [vmem:[%s16682_s16 + $0x2e0] sm:$0xff] }
 0x409   : > { %9787 = vmatpush1.bf16.msra.mxu1 %v14537_v8  ;;  %v14617_v8 = vcombine.low %v6855_v5, %v6859_v14  ;;  %v6839_v58 = vld [vmem:[%s16682_s16 + $0x6c0] sm:$0xff]  ;;  %v6601_v14 = vmul.f32 0.2, %v17459_v21 }
 0x40a   : > { %9788 = vmatprep.subr.bf16.mxu1 %v14530_v12  ;;  %v14610_v12 = vcombine.high %v6847_v6, %v6851_v47  ;;  %v6843_v19 = vld [vmem:[%s16682_s16 + $0x6e0] sm:$0xff] }
 0x40b   : > { %9748 = vmatpush1.bf16.msra.mxu0 %v14401_v20  ;;  %v14481_v20 = vcombine.low %v6719_v61, %v6723_v62  ;;  %v6703_v26 = vld [vmem:[%s16682_s16 + $0x280] sm:$0xff] }
 0x40c   : > { %9749 = vmatprep.subr.bf16.mxu0 %v14394_v24  ;;  %v14474_v24 = vcombine.high %v6711_v13, %v6715_v18  ;;  %v6707_v27 = vld [vmem:[%s16682_s16 + $0x2a0] sm:$0xff] }
 0x40d   : > { %9789 = vmatpush1.bf16.msra.mxu1 %v14529_v23  ;;  %v14609_v23 = vcombine.low %v6847_v6, %v6851_v47  ;;  %v6831_v29 = vld [vmem:[%s16682_s16 + $0x680] sm:$0xff]  ;;  %v1757_v47 = vsub.s32 7, %v16738_v44 }
 0x40e   : > { %9790 = vmatprep.subr.bf16.mxu1 %v14522_v0  ;;  %v14602_v0 = vcombine.high %v6839_v58, %v6843_v19  ;;  %v6835_v50 = vld [vmem:[%s16682_s16 + $0x6a0] sm:$0xff] }
 0x40f   : > { %9750 = vmatpush1.bf16.msra.mxu0 %v14393_v30  ;;  %v14473_v30 = vcombine.low %v6711_v13, %v6715_v18  ;;  %v6695_v33 = vld [vmem:[%s16682_s16 + $0x240] sm:$0xff]  ;;  %v15885_v18 = vld [vmem:[%s16679_s28] sm:$0xff] }
 0x410   : > { %9751 = vmatprep.subr.bf16.mxu0 %v14386_v31  ;;  %v14466_v31 = vcombine.high %v6703_v26, %v6707_v27  ;;  %v6699_v36 = vld [vmem:[%s16682_s16 + $0x260] sm:$0xff] }
 0x411   : > { %9791 = vmatpush1.bf16.msra.mxu1 %v14521_v32  ;;  %v14601_v32 = vcombine.low %v6839_v58, %v6843_v19  ;;  %v6823_v11 = vld [vmem:[%s16682_s16 + $0x640] sm:$0xff] }
 0x412   : > { %9792 = vmatprep.subr.bf16.mxu1 %v14514_v34  ;;  %v14594_v34 = vcombine.high %v6831_v29, %v6835_v50  ;;  %v6827_v38 = vld [vmem:[%s16682_s16 + $0x660] sm:$0xff] }
 0x413   : > { %9752 = vmatpush1.bf16.msra.mxu0 %v14385_v41  ;;  %v6300_v41 = vadd.f32 %v17697_v40, %v17621_v55  ;;  %v14586_v35 = vcombine.high %v6823_v11, %v6827_v38  ;;  %v6687_v45 = vld [vmem:[%s16682_s16 + $0x200] sm:$0xff]  ;;  %v14457_v55 = vcombine.low %v6695_v33, %v6699_v36  ;;  %v14585_v40 = vcombine.low %v6823_v11, %v6827_v38 }
 0x414   : > { %9753 = vmatprep.subr.bf16.mxu0 %v14506_v2  ;;  %v14593_v2 = vcombine.low %v6831_v29, %v6835_v50  ;;  %v6691_v48 = vld [vmem:[%s16682_s16 + $0x220] sm:$0xff] }
 0x415   : > { %9793 = vmatpush1.bf16.msra.mxu1 %v14513_v37  ;;  %v14465_v37 = vcombine.low %v6703_v26, %v6707_v27  ;;  %v6815_v4 = vld [vmem:[%s16682_s16 + $0x600] sm:$0xff] }
 0x416   : > { %9794 = vmatprep.subr.bf16.mxu1 %v14634_v39  ;;  %v14458_v39 = vcombine.high %v6695_v33, %v6699_v36  ;;  %v6935_v52 = vld [vmem:[%s16682_s16 + $0x9c0] sm:$0xff] }
 0x417   : > { %9754 = vmatpush2.bf16.msra.mxu0 %v14505_v49  ;;  %v6819_v49 = vld [vmem:[%s16682_s16 + $0x620] sm:$0xff] }
 0x418   : > { %9755 = vmatprep.subr.bf16.mxu0 %v14498_v46  ;;  %v14450_v46 = vcombine.high %v6687_v45, %v6691_v48  ;;  %v14578_v51 = vcombine.high %v6815_v4, %v6819_v49  ;;  %v6939_v5 = vld [vmem:[%s16682_s16 + $0x9e0] sm:$0xff]  ;;  %v14577_v61 = vcombine.low %v6815_v4, %v6819_v49 }
 0x419   : > { %9795 = vmatpush2.bf16.msra.mxu1 %v14633_v54  ;;  %v6341_v54 = vadd.f32 %v17702_v16, %v6300_v41  ;;  %v7067_v16 = vld [vmem:[%s16682_s16 + $0xde0] sm:$0xff]  ;;  %v14698_v62 = vcombine.high %v6935_v52, %v6939_v5  ;;  %v14697_v19 = vcombine.low %v6935_v52, %v6939_v5 }
 0x41a   : > { %9796 = vmatprep.subr.bf16.mxu1 %v14626_v43  ;;  %v6599_v43 = vmul.f32 0.2, %v17230_v63  ;;  %v6919_v26 = vld [vmem:[%s16682_s16 + $0x940] sm:$0xff] }
 0x41b   : > { %9756 = vmatpush2.bf16.msra.mxu0 %v14497_v56  ;;  %v7063_v56 = vld [vmem:[%s16682_s16 + $0xdc0] sm:$0xff]  ;;  %vm6596_vm4 = vcmp.gt.f32.partialorder %v6341_v54, 0.0 }
 0x41c   : > { %9757 = vmatprep.subr.bf16.mxu0 %v14490_v25  ;;  %v14449_v25 = vcombine.low %v6687_v45, %v6691_v48  ;;  %v6607_v6 = vsel %vm6591_vm2, %v17230_v63, %v6599_v43  ;;  %v7055_v63 = vld [vmem:[%s16682_s16 + $0xd80] sm:$0xff]  ;;  %v14825_v29 = vcombine.low %v7063_v56, %v7067_v16 }
 0x41d   : > { %9797 = vmatpush2.bf16.msra.mxu1 %v14625_v57  ;;  %v6604_v57 = vmul.f32 0.2, %v6341_v54  ;;  %v6923_v27 = vld [vmem:[%s16682_s16 + $0x960] sm:$0xff] }
 0x41e   : > { %9798 = vmatprep.subr.bf16.mxu1 %v14618_v60  ;;  %v1753_v60 = vsub.s32 6, %v16738_v44  ;;  %v7047_v36 = vld [vmem:[%s16682_s16 + $0xd40] sm:$0xff]  ;;  %v14682_v41 = vcombine.high %v6919_v26, %v6923_v27 }
 0x41f   : > { %9758 = vmatpush2.bf16.msra.mxu0 %v14489_v7  ;;  %v6927_v7 = vld [vmem:[%s16682_s16 + $0x980] sm:$0xff]  ;;  %v6612_v13 = vsel %vm6596_vm4, %v6341_v54, %v6604_v57  ;;  %vm16349_vm4 = vmmov 0  }
 0x420   : > { %9759 = vmatprep.subr.bf16.mxu0 %v14482_v22  ;;  %v14826_v22 = vcombine.high %v7063_v56, %v7067_v16  ;;  %v1754_v58 = vrot.slane %v15885_v18, %v1753_v60  ;;  %v17788_v50 = vpack.c.bf16 %v6612_v13, %v6612_v13  ;;  %v7051_v11 = vld [vmem:[%s16682_s16 + $0xd60] sm:$0xff]  ;;  %v17813_v13 = vld [vmem:[%s16682_s16 + $0x5e8] sm:$0xff] }
 0x421   : > { %9799 = vmatpush2.bf16.msra.mxu1 %v14617_v8  ;;  %v6931_v8 = vld [vmem:[%s16682_s16 + $0x9a0] sm:$0xff]  ;;  %v14810_v49 = vcombine.high %v7047_v36, %v7051_v11  ;;  %v14809_v16 = vcombine.low %v7047_v36, %v7051_v11 }
 0x422   : > { %9800 = vmatprep.subr.bf16.mxu1 %v14610_v12  ;;  %v6609_v12 = vsel %vm6593_vm3, %v17459_v21, %v6601_v14  ;;  %v1758_v21 = vrot.slane %v15885_v18, %v1757_v47  ;;  %v14689_v33 = vcombine.low %v6927_v7, %v6931_v8  ;;  %v6915_v45 = vld [vmem:[%s16682_s16 + $0x920] sm:$0xff] }
 0x423   : > { %9760 = vmatpush2.bf16.msra.mxu0 %v14481_v20  ;;  %v7059_v20 = vld [vmem:[%s16682_s16 + $0xda0] sm:$0xff] }
 0x424   : > { %9761 = vmatprep.subr.bf16.mxu0 %v14474_v24  ;;  %v14690_v24 = vcombine.high %v6927_v7, %v6931_v8  ;;  %v14817_v48 = vcombine.low %v7055_v63, %v7059_v20  ;;  %v7043_v43 = vld [vmem:[%s16682_s16 + $0xd20] sm:$0xff] }
 0x425   : > { %9801 = vmatpush2.bf16.msra.mxu1 %v14609_v23  ;;  %v17780_v23 = vpack.c.bf16 %v6607_v6, %v6607_v6  ;;  %v6903_v14 = vld [vmem:[%s16682_s16 + $0x8c0] sm:$0xff] }
 0x426   : > { %9802 = vmatprep.subr.bf16.mxu1 %v14602_v0  ;;  %v17782_v0 = vpack.c.bf16 %v6609_v12, %v6609_v12  ;;  %v6907_v56 = vld [vmem:[%s16682_s16 + $0x8e0] sm:$0xff]  ;;  %v17810_v12 = vld [vmem:[%s16682_s16 + $0x5c8] sm:$0xff] }
 0x427   : > { %9762 = vmatpush2.bf16.msra.mxu0 %v14473_v30  ;;  %v14666_v6 = vcombine.high %v6903_v14, %v6907_v56  ;;  %v6895_v7 = vld [vmem:[%s16682_s16 + $0x880] sm:$0xff] }
 0x428   : > { %9763 = vmatprep.subr.bf16.mxu0 %v14466_v31  ;;  %v6899_v8 = vld [vmem:[%s16682_s16 + $0x8a0] sm:$0xff] }
 0x429   : > { %9803 = vmatpush2.bf16.msra.mxu1 %v14601_v32  ;;  %v14818_v32 = vcombine.high %v7055_v63, %v7059_v20  ;;  %v7023_v63 = vld [vmem:[%s16682_s16 + $0xc80] sm:$0xff] }
 0x42a   : > { %9804 = vmatprep.subr.bf16.mxu1 %v14594_v34  ;;  %v7027_v20 = vld [vmem:[%s16682_s16 + $0xca0] sm:$0xff] }
 0x42b   : > { %9764 = vmatpush2.bf16.msra.mxu0 %v14465_v37  ;;  %v6883_v36 = vld [vmem:[%s16682_s16 + $0x820] sm:$0xff]  ;;  %v14785_v11 = vcombine.low %v7023_v63, %v7027_v20 }
 0x42c   : > { %9765 = vmatprep.subr.bf16.mxu0 %v14458_v39 }
 0x42d   : > { %9805 = vmatpush2.bf16.msra.mxu1 %v14593_v2 }
 0x42e   : > { %9806 = vmatprep.subr.bf16.mxu1 %v14586_v35  ;;  %v6911_v35 = vld [vmem:[%s16682_s16 + $0x900] sm:$0xff] }
 0x42f   : > { %9766 = vmatpush2.bf16.msra.mxu0 %v14457_v55  ;;  %v14674_v52 = vcombine.high %v6911_v35, %v6915_v45 }
 0x430   : > { %9767 = vmatprep.subr.bf16.mxu0 %v14450_v46  ;;  %v7039_v46 = vld [vmem:[%s16682_s16 + $0xd00] sm:$0xff] }
 0x431   : > { %9807 = vmatpush2.bf16.msra.mxu1 %v14585_v40  ;;  %v14681_v40 = vcombine.low %v6919_v26, %v6923_v27  ;;  %v14802_v57 = vcombine.high %v7039_v46, %v7043_v43  ;;  %v6891_v26 = vld [vmem:[%s16682_s16 + $0x860] sm:$0xff] }
 0x432   : > { %9808 = vmatprep.subr.bf16.mxu1 %v14578_v51 }
 0x433   : > { %9768 = vmatpush2.bf16.msra.mxu0 %v14449_v25  ;;  %v14673_v25 = vcombine.low %v6911_v35, %v6915_v45  ;;  %v6999_v45 = vld [vmem:[%s16682_s16 + $0xbc0] sm:$0xff] }
 0x434   : > { %9819 = vmatprep.subr.bf16.mxu0 %v14698_v62  ;;  %v7035_v62 = vld [vmem:[%s16682_s16 + $0xce0] sm:$0xff] }
 0x435   : > { %9809 = vmatpush2.bf16.msra.mxu1 %v14577_v61  ;;  %v7031_v61 = vld [vmem:[%s16682_s16 + $0xcc0] sm:$0xff] }
 0x436   : > { %9860 = vmatprep.subr.bf16.mxu1 %v14826_v22  ;;  %v6379_v30 = vpop.f32.mrf.mxu0  ;;  %9770 = vmatmul.mubr.bf16.vlgmr.msra.gmra.mxu0 %v17780_v23  ;;  %v14801_v22 = vcombine.low %v7039_v46, %v7043_v43  ;;  %v14794_v18 = vcombine.high %v7031_v61, %v7035_v62  ;;  %v14793_v27 = vcombine.low %v7031_v61, %v7035_v62  ;;  %v7131_v46 = vld [vmem:[%s16682_s16 + $0xfe0] sm:$0xff] }
 0x437   : > { %v6380_v31 = vadd.f32 %v6379_v30, %v1754_v58  ;;  %9820 = vmatpush1.bf16.msra.mxu0 %v14697_v19  ;;  %9851 = vmatprep.mubr.bf16.mxu0 %v17788_v50  ;;  %v14571_v58 = vcombine.low %v17810_v12, %v17813_v13  ;;  %v14665_v19 = vcombine.low %v6903_v14, %v6907_v56  ;;  %v6983_v61 = vld [vmem:[%s16682_s16 + $0xb40] sm:$0xff] }
 0x438   : > { %v6420_v34 = vpop.f32.mrf.mxu1  ;;  %9811 = vmatmul.mubr.bf16.vlgmr.msra.gmra.mxu1 %v17782_v0  ;;  %v6381_v38 = vpop.f32.mrf.mxu0  ;;  %9821 = vmatprep.subr.bf16.mxu0 %v14690_v24  ;;  %v14658_v24 = vcombine.high %v6895_v7, %v6899_v8  ;;  %v14657_v30 = vcombine.low %v6895_v7, %v6899_v8  ;;  %v6987_v62 = vld [vmem:[%s16682_s16 + $0xb60] sm:$0xff] }
 0x439   : > { %v17795_v37 = vadd.f32 %v6420_v34, %v6380_v31  ;;  %v6382_v2 = vadd.f32 %v6381_v38, %v1758_v21  ;;  %9861 = vmatpush1.bf16.msra.mxu1 %v14825_v29  ;;  %v6887_v21 = vld [vmem:[%s16682_s16 + $0x840] sm:$0xff]  ;;  %v14786_v29 = vcombine.high %v7023_v63, %v7027_v20 }
 0x43a   : > { %v6422_v39 = vpop.f32.mrf.mxu1  ;;  %v6383_v4 = vpop.f32.mrf.mxu0  ;;  %9862 = vmatprep.subr.bf16.mxu1 %v14818_v32  ;;  %v7015_v32 = vld [vmem:[%s16682_s16 + $0xc40] sm:$0xff]  ;;  %v14650_v34 = vcombine.high %v6887_v21, %v6891_v26 }
 0x43b   : > { %v17799_v54 = vadd.f32 %v6422_v39, %v6382_v2  ;;  %9822 = vmatpush1.bf16.msra.mxu0 %v14689_v33  ;;  %v7019_v31 = vld [vmem:[%s16682_s16 + $0xc60] sm:$0xff] }
 0x43c   : > { %v6424_v55 = vpop.f32.mrf.mxu1  ;;  %v6384_v51 = vpop.f32.mrf.mxu0  ;;  %9823 = vmatprep.subr.bf16.mxu0 %v14682_v41  ;;  %v6879_v33 = vld [vmem:[%s16682_s16 + $0x800] sm:$0xff]  ;;  %v14778_v38 = vcombine.high %v7015_v32, %v7019_v31  ;;  %v14649_v41 = vcombine.low %v6887_v21, %v6891_v26  ;;  %v14777_v4 = vcombine.low %v7015_v32, %v7019_v31  ;;  %v14745_v26 = vcombine.low %v6983_v61, %v6987_v62 }
 0x43d   : > { %9863 = vmatpush1.bf16.msra.mxu1 %v14817_v48  ;;  %v7007_v2 = vld [vmem:[%s16682_s16 + $0xc00] sm:$0xff]  ;;  %v14642_v35 = vcombine.high %v6879_v33, %v6883_v36  ;;  %v14641_v55 = vcombine.low %v6879_v33, %v6883_v36 }
 0x43e   : > { %v6425_v5 = vpop.f32.mrf.mxu1  ;;  %9864 = vmatprep.subr.bf16.mxu1 %v14810_v49  ;;  %v7011_v39 = vld [vmem:[%s16682_s16 + $0xc20] sm:$0xff] }
 0x43f   : > { %9824 = vmatpush1.bf16.msra.mxu0 %v14681_v40  ;;  %v7003_v48 = vld [vmem:[%s16682_s16 + $0xbe0] sm:$0xff]  ;;  %v14770_v49 = vcombine.high %v7007_v2, %v7011_v39  ;;  %v14769_v5 = vcombine.low %v7007_v2, %v7011_v39 }
 0x440   : > { %9825 = vmatprep.subr.bf16.mxu0 %v14674_v52  ;;  %v7127_v40 = vld [vmem:[%s16682_s16 + $0xfc0] sm:$0xff]  ;;  %v14762_v43 = vcombine.high %v6999_v45, %v7003_v48  ;;  %v14761_v56 = vcombine.low %v6999_v45, %v7003_v48 }
 0x441   : > { %9865 = vmatpush1.bf16.msra.mxu1 %v14809_v16  ;;  %v6991_v51 = vld [vmem:[%s16682_s16 + $0xb80] sm:$0xff]  ;;  %v14890_v14 = vcombine.high %v7127_v40, %v7131_v46 }
 0x442   : > { %9866 = vmatprep.subr.bf16.mxu1 %v14802_v57  ;;  %v6995_v52 = vld [vmem:[%s16682_s16 + $0xba0] sm:$0xff] }
 0x443   : > { %9826 = vmatpush1.bf16.msra.mxu0 %v14673_v25  ;;  %v7119_v16 = vld [vmem:[%s16682_s16 + $0xf80] sm:$0xff]  ;;  %v14754_v25 = vcombine.high %v6991_v51, %v6995_v52  ;;  %v14753_v8 = vcombine.low %v6991_v51, %v6995_v52 }
 0x444   : > { %9827 = vmatprep.subr.bf16.mxu0 %v14666_v6  ;;  %v7123_v57 = vld [vmem:[%s16682_s16 + $0xfa0] sm:$0xff]  ;;  %v14889_v6 = vcombine.low %v7127_v40, %v7131_v46 }
 0x445   : > { %9867 = vmatpush1.bf16.msra.mxu1 %v14801_v22  ;;  %v14882_v7 = vcombine.high %v7119_v16, %v7123_v57  ;;  %v7111_v22 = vld [vmem:[%s16682_s16 + $0xf40] sm:$0xff] }
 0x446   : > { %9868 = vmatprep.subr.bf16.mxu1 %v14794_v18  ;;  %v7115_v18 = vld [vmem:[%s16682_s16 + $0xf60] sm:$0xff] }
 0x447   : > { %9828 = vmatpush1.bf16.msra.mxu0 %v14665_v19  ;;  %v14746_v19 = vcombine.high %v6983_v61, %v6987_v62  ;;  %v6975_v63 = vld [vmem:[%s16682_s16 + $0xb00] sm:$0xff]  ;;  %v14874_v21 = vcombine.high %v7111_v22, %v7115_v18 }
 0x448   : > { %9829 = vmatprep.subr.bf16.mxu0 %v14658_v24  ;;  %v6979_v20 = vld [vmem:[%s16682_s16 + $0xb20] sm:$0xff]  ;;  %v14881_v24 = vcombine.low %v7119_v16, %v7123_v57 }
 0x449   : > { %9869 = vmatpush1.bf16.msra.mxu1 %v14793_v27  ;;  %v7103_v27 = vld [vmem:[%s16682_s16 + $0xf00] sm:$0xff]  ;;  %v14737_v36 = vcombine.low %v6975_v63, %v6979_v20 }
 0x44a   : > { %9870 = vmatprep.subr.bf16.mxu1 %v14786_v29  ;;  %v7107_v29 = vld [vmem:[%s16682_s16 + $0xf20] sm:$0xff] }
 0x44b   : > { %9830 = vmatpush1.bf16.msra.mxu0 %v14657_v30  ;;  %v14738_v30 = vcombine.high %v6975_v63, %v6979_v20  ;;  %v6967_v32 = vld [vmem:[%s16682_s16 + $0xac0] sm:$0xff]  ;;  %v14866_v33 = vcombine.high %v7103_v27, %v7107_v29 }
 0x44c   : > { %9831 = vmatprep.subr.bf16.mxu0 %v14650_v34  ;;  %v6971_v31 = vld [vmem:[%s16682_s16 + $0xae0] sm:$0xff]  ;;  %v14873_v34 = vcombine.low %v7111_v22, %v7115_v18  ;;  %v6603_v22 = vmul.f32 0.2, %v17699_v42  ;;  %v6680_v18 = vld [vmem:[%s16682_s16 + $0x1c8] sm:$0xff] }
 0x44d   : > { %9871 = vmatpush1.bf16.msra.mxu1 %v14785_v11  ;;  %v7095_v11 = vld [vmem:[%s16682_s16 + $0xec0] sm:$0xff]  ;;  %v14729_v48 = vcombine.low %v6967_v32, %v6971_v31 }
 0x44e   : > { %9872 = vmatprep.subr.bf16.mxu1 %v14778_v38  ;;  %v7099_v38 = vld [vmem:[%s16682_s16 + $0xee0] sm:$0xff] }
 0x44f   : > { %9832 = vmatpush1.bf16.msra.mxu0 %v14649_v41  ;;  %v14730_v41 = vcombine.high %v6967_v32, %v6971_v31  ;;  %v6959_v2 = vld [vmem:[%s16682_s16 + $0xa80] sm:$0xff]  ;;  %v14858_v45 = vcombine.high %v7095_v11, %v7099_v38  ;;  %v14572_v32 = vcombine.high %v17810_v12, %v17813_v13 }
 0x450   : > { %9833 = vmatprep.subr.bf16.mxu0 %v14642_v35  ;;  %v6963_v39 = vld [vmem:[%s16682_s16 + $0xaa0] sm:$0xff]  ;;  %v14865_v35 = vcombine.low %v7103_v27, %v7107_v29  ;;  %v6672_v27 = vld [vmem:[%s16682_s16 + $0x188] sm:$0xff] }
 0x451   : > { %9873 = vmatpush1.bf16.msra.mxu1 %v14777_v4  ;;  %v7087_v4 = vld [vmem:[%s16682_s16 + $0xe80] sm:$0xff]  ;;  %v14721_v52 = vcombine.low %v6959_v2, %v6963_v39  ;;  %v6676_v29 = vld [vmem:[%s16682_s16 + $0x1a8] sm:$0xff] }
 0x452   : > { %9874 = vmatprep.subr.bf16.mxu1 %v14770_v49  ;;  %v7091_v49 = vld [vmem:[%s16682_s16 + $0xea0] sm:$0xff] }
 0x453   : > { %9834 = vmatpush1.bf16.msra.mxu0 %v14641_v55  ;;  %v14722_v55 = vcombine.high %v6959_v2, %v6963_v39  ;;  %v6951_v40 = vld [vmem:[%s16682_s16 + $0xa40] sm:$0xff]  ;;  %v14850_v51 = vcombine.high %v7087_v4, %v7091_v49  ;;  %v14435_v2 = vcombine.low %v6672_v27, %v6676_v29 }
 0x454   : > { %9835 = vmatprep.subr.bf16.mxu0 %v14762_v43  ;;  %v6955_v46 = vld [vmem:[%s16682_s16 + $0xa60] sm:$0xff]  ;;  %v14857_v43 = vcombine.low %v7095_v11, %v7099_v38  ;;  %v6668_v11 = vld [vmem:[%s16682_s16 + $0x168] sm:$0xff] }
 0x455   : > { %9875 = vmatpush1.bf16.msra.mxu1 %v14769_v5  ;;  %v7079_v5 = vld [vmem:[%s16682_s16 + $0xe40] sm:$0xff]  ;;  %v14713_v62 = vcombine.low %v6951_v40, %v6955_v46 }
 0x456   : > { %9876 = vmatprep.subr.bf16.mxu1 %v14890_v14  ;;  %v7083_v14 = vld [vmem:[%s16682_s16 + $0xe60] sm:$0xff] }
 0x457   : > { %9836 = vmatpush2.bf16.msra.mxu0 %v14761_v56  ;;  %v14714_v56 = vcombine.high %v6951_v40, %v6955_v46  ;;  %v6943_v16 = vld [vmem:[%s16682_s16 + $0xa00] sm:$0xff]  ;;  %v14842_v61 = vcombine.high %v7079_v5, %v7083_v14  ;;  %v14841_v63 = vcombine.low %v7079_v5, %v7083_v14  ;;  %v6652_v5 = vld [vmem:[%s16682_s16 + $0xe8] sm:$0xff] }
 0x458   : > { %9837 = vmatprep.subr.bf16.mxu0 %v14754_v25  ;;  %v6947_v57 = vld [vmem:[%s16682_s16 + $0xa20] sm:$0xff]  ;;  %v14849_v25 = vcombine.low %v7087_v4, %v7091_v49  ;;  %v6656_v4 = vld [vmem:[%s16682_s16 + $0x108] sm:$0xff] }
 0x459   : > { %9877 = vmatpush2.bf16.msra.mxu1 %v14889_v6  ;;  %v7071_v6 = vld [vmem:[%s16682_s16 + $0xe00] sm:$0xff]  ;;  %v6660_v49 = vld [vmem:[%s16682_s16 + $0x128] sm:$0xff] }
 0x45a   : > { %9878 = vmatprep.subr.bf16.mxu1 %v14882_v7  ;;  %v7075_v7 = vld [vmem:[%s16682_s16 + $0xe20] sm:$0xff]  ;;  %v14419_v14 = vcombine.low %v6656_v4, %v6660_v49 }
 0x45b   : > { %9838 = vmatpush2.bf16.msra.mxu0 %v14753_v8  ;;  %v14706_v8 = vcombine.high %v6943_v16, %v6947_v57  ;;  %v14834_v20 = vcombine.high %v7071_v6, %v7075_v7 }
 0x45c   : > { %9839 = vmatprep.subr.bf16.mxu0 %v14746_v19  ;;  %v6684_v19 = vld [vmem:[%s16682_s16 + $0x1e8] sm:$0xff] }
 0x45d   : > { %9879 = vmatpush2.bf16.msra.mxu1 %v14881_v24  ;;  %v14705_v24 = vcombine.low %v6943_v16, %v6947_v57  ;;  %v14443_v31 = vcombine.low %v6680_v18, %v6684_v19  ;;  %v6640_v16 = vld [vmem:[%s16682_s16 + $0x88] sm:$0xff] }
 0x45e   : > { %9880 = vmatprep.subr.bf16.mxu1 %v14874_v21  ;;  %v14444_v21 = vcombine.high %v6680_v18, %v6684_v19  ;;  %v6644_v57 = vld [vmem:[%s16682_s16 + $0xa8] sm:$0xff] }
 0x45f   : > { %9840 = vmatpush2.bf16.msra.mxu0 %v14745_v26  ;;  %v6611_v26 = vsel %vm6595_vm5, %v17699_v42, %v6603_v22  ;;  %v6624_v22 = vld [vmem:[%s16682_s16 + $0x8] sm:$0xff] }
 0x460   : > { %9841 = vmatprep.subr.bf16.mxu0 %v14738_v30  ;;  %v14833_v30 = vcombine.low %v7071_v6, %v7075_v7  ;;  %v6636_v6 = vld [vmem:[%s16682_s16 + $0x68] sm:$0xff]  ;;  %v14403_v7 = vcombine.low %v6640_v16, %v6644_v57 }
 0x461   : > { %9881 = vmatpush2.bf16.msra.mxu1 %v14873_v34  ;;  %v17868_v34 = vpack.c.bf16 %v6611_v26, %v6611_v26  ;;  %v6628_v18 = vld [vmem:[%s16682_s16 + $0x28] sm:$0xff] }
 0x462   : > { %9882 = vmatprep.subr.bf16.mxu1 %v14866_v33  ;;  %v14436_v33 = vcombine.high %v6672_v27, %v6676_v29  ;;  %v6736_v27 = vld [vmem:[%s16682_s16 + $0x388] sm:$0xff] }
 0x463   : > { %9842 = vmatpush2.bf16.msra.mxu0 %v14737_v36  ;;  %v6664_v36 = vld [vmem:[%s16682_s16 + $0x148] sm:$0xff] }
 0x464   : > { %9843 = vmatprep.subr.bf16.mxu0 %v14730_v41  ;;  %v14427_v40 = vcombine.low %v6664_v36, %v6668_v11  ;;  %v6740_v29 = vld [vmem:[%s16682_s16 + $0x3a8] sm:$0xff] }
 0x465   : > { %9883 = vmatpush2.bf16.msra.mxu1 %v14865_v35  ;;  %v14428_v35 = vcombine.high %v6664_v36, %v6668_v11  ;;  %v14499_v36 = vcombine.low %v6736_v27, %v6740_v29 }
 0x466   : > { %9884 = vmatprep.subr.bf16.mxu1 %v14858_v45 }
 0x467   : > { %9844 = vmatpush2.bf16.msra.mxu0 %v14729_v48 }
 0x468   : > { %9845 = vmatprep.subr.bf16.mxu0 %v14722_v55 }
 0x469   : > { %9885 = vmatpush2.bf16.msra.mxu1 %v14857_v43  ;;  %v14420_v43 = vcombine.high %v6656_v4, %v6660_v49  ;;  %v6716_v4 = vld [vmem:[%s16682_s16 + $0x2e8] sm:$0xff] }
 0x46a   : > { %9886 = vmatprep.subr.bf16.mxu1 %v14850_v51 }
 0x46b   : > { %9846 = vmatpush2.bf16.msra.mxu0 %v14721_v52  ;;  %v6648_v52 = vld [vmem:[%s16682_s16 + $0xc8] sm:$0xff] }
 0x46c   : > { %9847 = vmatprep.subr.bf16.mxu0 %v14714_v56  ;;  %v14412_v56 = vcombine.high %v6648_v52, %v6652_v5 }
 0x46d   : > { %9887 = vmatpush2.bf16.msra.mxu1 %v14849_v25  ;;  %v14411_v25 = vcombine.low %v6648_v52, %v6652_v5  ;;  %v6700_v52 = vld [vmem:[%s16682_s16 + $0x268] sm:$0xff] }
 0x46e   : > { %9888 = vmatprep.subr.bf16.mxu1 %v14842_v61  ;;  %v14404_v61 = vcombine.high %v6640_v16, %v6644_v57  ;;  %v6692_v16 = vld [vmem:[%s16682_s16 + $0x228] sm:$0xff] }
 0x46f   : > { %9848 = vmatpush2.bf16.msra.mxu0 %v14713_v62  ;;  %v6632_v62 = vld [vmem:[%s16682_s16 + $0x48] sm:$0xff] }
 0x470   : > { %9849 = vmatprep.subr.bf16.mxu0 %v14706_v8  ;;  %v14396_v8 = vcombine.high %v6632_v62, %v6636_v6  ;;  %v14395_v19 = vcombine.low %v6632_v62, %v6636_v6  ;;  %v6940_v62 = vld [vmem:[%s16682_s16 + $0x9e8] sm:$0xff] }
 0x471   : > { %9889 = vmatpush2.bf16.msra.mxu1 %v14841_v63  ;;  %v14388_v63 = vcombine.high %v6624_v22, %v6628_v18 }
 0x472   : > { %9890 = vmatprep.subr.bf16.mxu1 %v14834_v20  ;;  %v6744_v20 = vld [vmem:[%s16682_s16 + $0x3c8] sm:$0xff] }
 0x473   : > { %9850 = vmatpush2.bf16.msra.mxu0 %v14705_v24  ;;  %v6748_v24 = vld [vmem:[%s16682_s16 + $0x3e8] sm:$0xff] }
 0x474   : > { %9901 = vmatprep.subr.bf16.mxu0 %v14444_v21  ;;  %v14387_v21 = vcombine.low %v6624_v22, %v6628_v18  ;;  %v14508_v26 = vcombine.high %v6744_v20, %v6748_v24  ;;  %v6932_v22 = vld [vmem:[%s16682_s16 + $0x9a8] sm:$0xff] }
 0x475   : > { %9891 = vmatpush2.bf16.msra.mxu1 %v14833_v30  ;;  %v14507_v30 = vcombine.low %v6744_v20, %v6748_v24  ;;  %v6920_v20 = vld [vmem:[%s16682_s16 + $0x948] sm:$0xff] }
 0x476   : > { %v6461_v42 = vpop.f32.mrf.mxu0  ;;  %9852 = vmatmul.mubr.bf16.vlgmr.msra.gmra.mxu0 %v17868_v34  ;;  %9942 = vmatprep.subr.bf16.mxu1 %v14572_v32  ;;  %v14500_v32 = vcombine.high %v6736_v27, %v6740_v29  ;;  %v6924_v24 = vld [vmem:[%s16682_s16 + $0x968] sm:$0xff] }
 0x477   : > { %v6462_v38 = vadd.f32 %v6461_v42, %v17795_v37  ;;  %9902 = vmatpush1.bf16.msra.mxu0 %v14443_v31  ;;  %9933 = vmatprep.mubr.bf16.mxu0 %v17687_v28  ;;  %v6728_v31 = vld [vmem:[%s16682_s16 + $0x348] sm:$0xff] }
 0x478   : > { %v6502_v41 = vpop.f32.mrf.mxu1  ;;  %v17875_v39 = vpop.f32.mrf.mxu0  ;;  %9903 = vmatprep.subr.bf16.mxu0 %v14436_v33  ;;  %v6732_v33 = vld [vmem:[%s16682_s16 + $0x368] sm:$0xff] }
 0x479   : > { %v17877_v45 = vadd.f32 %v6502_v41, %v6462_v38  ;;  %v14492_v11 = vcombine.high %v6728_v31, %v6732_v33  ;;  %v6720_v42 = vld [vmem:[%s16682_s16 + $0x308] sm:$0xff]  ;;  %v14491_v41 = vcombine.low %v6728_v31, %v6732_v33  ;;  %v6464_v18 = vadd.f32 %v17875_v39, %v17799_v54 }
 0x47a   : > { %v17879_v48 = vpop.f32.mrf.mxu1  ;;  %v6465_v37 = vpop.f32.mrf.mxu0  ;;  %v6724_v38 = vld [vmem:[%s16682_s16 + $0x328] sm:$0xff] }
 0x47b   : > { %9904 = vmatpush1.bf16.msra.mxu0 %v14435_v2  ;;  %v14484_v2 = vcombine.high %v6720_v42, %v6724_v38  ;;  %v14483_v49 = vcombine.low %v6720_v42, %v6724_v38 }
 0x47c   : > { %v6506_v55 = vpop.f32.mrf.mxu1  ;;  %v6466_v46 = vpop.f32.mrf.mxu0  ;;  %9905 = vmatprep.subr.bf16.mxu0 %v14428_v35  ;;  %v6712_v35 = vld [vmem:[%s16682_s16 + $0x2c8] sm:$0xff] }
 0x47d   : > { %v14476_v37 = vcombine.high %v6712_v35, %v6716_v4  ;;  %v6704_v55 = vld [vmem:[%s16682_s16 + $0x288] sm:$0xff]  ;;  %v14475_v46 = vcombine.low %v6712_v35, %v6716_v4 }
 0x47e   : > { %v6507_v51 = vpop.f32.mrf.mxu1 }
 0x47f   : > { %9906 = vmatpush1.bf16.msra.mxu0 %v14427_v40  ;;  %v6708_v40 = vld [vmem:[%s16682_s16 + $0x2a8] sm:$0xff] }
 0x480   : > { %9907 = vmatprep.subr.bf16.mxu0 %v14420_v43  ;;  %v14468_v43 = vcombine.high %v6704_v55, %v6708_v40  ;;  %v6696_v51 = vld [vmem:[%s16682_s16 + $0x248] sm:$0xff]  ;;  %v14467_v5 = vcombine.low %v6704_v55, %v6708_v40 }
 0x481   : > { %v14459_v57 = vcombine.low %v6696_v51, %v6700_v52  ;;  %v6804_v40 = vld [vmem:[%s16682_s16 + $0x5a8] sm:$0xff] }
 0x483   : > { %9908 = vmatpush1.bf16.msra.mxu0 %v14419_v14  ;;  %v14460_v14 = vcombine.high %v6696_v51, %v6700_v52 }
 0x484   : > { %9909 = vmatprep.subr.bf16.mxu0 %v14412_v56  ;;  %v6688_v56 = vld [vmem:[%s16682_s16 + $0x208] sm:$0xff] }
 0x485   : > { %v14451_v6 = vcombine.low %v6688_v56, %v6692_v16 }
 0x487   : > { %9910 = vmatpush1.bf16.msra.mxu0 %v14411_v25  ;;  %v14452_v25 = vcombine.high %v6688_v56, %v6692_v16 }
 0x488   : > { %9911 = vmatprep.subr.bf16.mxu0 %v14404_v61  ;;  %v6936_v61 = vld [vmem:[%s16682_s16 + $0x9c8] sm:$0xff] }
 0x48b   : > { %9912 = vmatpush1.bf16.msra.mxu0 %v14403_v7  ;;  %v14700_v7 = vcombine.high %v6936_v61, %v6940_v62 }
 0x48c   : > { %9913 = vmatprep.subr.bf16.mxu0 %v14396_v8  ;;  %v6928_v8 = vld [vmem:[%s16682_s16 + $0x988] sm:$0xff] }
 0x48d   : > { %v14691_v54 = vcombine.low %v6928_v8, %v6932_v22 }
 0x48f   : > { %9914 = vmatpush1.bf16.msra.mxu0 %v14395_v19  ;;  %v14699_v19 = vcombine.low %v6936_v61, %v6940_v62  ;;  %v6792_v61 = vld [vmem:[%s16682_s16 + $0x548] sm:$0xff] }
 0x490   : > { %9915 = vmatprep.subr.bf16.mxu0 %v14388_v63  ;;  %v14692_v63 = vcombine.high %v6928_v8, %v6932_v22  ;;  %v6796_v62 = vld [vmem:[%s16682_s16 + $0x568] sm:$0xff] }
 0x491   : > { %v14556_v22 = vcombine.high %v6792_v61, %v6796_v62  ;;  %v14555_v12 = vcombine.low %v6792_v61, %v6796_v62  ;;  %v6976_v61 = vld [vmem:[%s16682_s16 + $0xb08] sm:$0xff] }
 0x492   : > { %v6980_v62 = vld [vmem:[%s16682_s16 + $0xb28] sm:$0xff] }
 0x493   : > { %9916 = vmatpush1.bf16.msra.mxu0 %v14387_v21 }
 0x494   : > { %9917 = vmatprep.subr.bf16.mxu0 %v14508_v26  ;;  %v6505_v26 = vadd.f32 %v17879_v48, %v6464_v18  ;;  %v6888_v18 = vld [vmem:[%s16682_s16 + $0x848] sm:$0xff] }
 0x497   : > { %9918 = vmatpush2.bf16.msra.mxu0 %v14507_v30  ;;  %v14684_v30 = vcombine.high %v6920_v20, %v6924_v24 }
 0x498   : > { %9919 = vmatprep.subr.bf16.mxu0 %v14500_v32 }
 0x49b   : > { %9920 = vmatpush2.bf16.msra.mxu0 %v14499_v36  ;;  %v6912_v36 = vld [vmem:[%s16682_s16 + $0x908] sm:$0xff] }
 0x49c   : > { %9921 = vmatprep.subr.bf16.mxu0 %v14492_v11  ;;  %v6916_v11 = vld [vmem:[%s16682_s16 + $0x928] sm:$0xff] }
 0x49d   : > { %v14676_v35 = vcombine.high %v6912_v36, %v6916_v11  ;;  %v14675_v52 = vcombine.low %v6912_v36, %v6916_v11  ;;  %v6768_v36 = vld [vmem:[%s16682_s16 + $0x488] sm:$0xff] }
 0x49e   : > { %v6772_v11 = vld [vmem:[%s16682_s16 + $0x4a8] sm:$0xff] }
 0x49f   : > { %9922 = vmatpush2.bf16.msra.mxu0 %v14491_v41  ;;  %v14683_v41 = vcombine.low %v6920_v20, %v6924_v24  ;;  %v6788_v20 = vld [vmem:[%s16682_s16 + $0x528] sm:$0xff] }
 0x4a0   : > { %9923 = vmatprep.subr.bf16.mxu0 %v14484_v2 }
 0x4a3   : > { %9924 = vmatpush2.bf16.msra.mxu0 %v14483_v49 }
 0x4a4   : > { %9925 = vmatprep.subr.bf16.mxu0 %v14476_v37  ;;  %v6800_v37 = vld [vmem:[%s16682_s16 + $0x588] sm:$0xff] }
 0x4a5   : > { %v14564_v56 = vcombine.high %v6800_v37, %v6804_v40 }
 0x4a7   : > { %9926 = vmatpush2.bf16.msra.mxu0 %v14475_v46  ;;  %v6904_v46 = vld [vmem:[%s16682_s16 + $0x8c8] sm:$0xff] }
 0x4a8   : > { %9927 = vmatprep.subr.bf16.mxu0 %v14468_v43  ;;  %v6908_v43 = vld [vmem:[%s16682_s16 + $0x8e8] sm:$0xff] }
 0x4a9   : > { %v14668_v16 = vcombine.high %v6904_v46, %v6908_v43 }
 0x4ab   : > { %9928 = vmatpush2.bf16.msra.mxu0 %v14467_v5 }
 0x4ac   : > { %9929 = vmatprep.subr.bf16.mxu0 %v14460_v14 }
 0x4af   : > { %9930 = vmatpush2.bf16.msra.mxu0 %v14459_v57  ;;  %v6896_v57 = vld [vmem:[%s16682_s16 + $0x888] sm:$0xff] }
 0x4b0   : > { %9931 = vmatprep.subr.bf16.mxu0 %v14452_v25  ;;  %v6900_v25 = vld [vmem:[%s16682_s16 + $0x8a8] sm:$0xff] }
 0x4b1   : > { %v14660_v8 = vcombine.high %v6896_v57, %v6900_v25  ;;  %v14659_v24 = vcombine.low %v6896_v57, %v6900_v25 }
 0x4b3   : > { %9932 = vmatpush2.bf16.msra.mxu0 %v14451_v6  ;;  %v14667_v6 = vcombine.low %v6904_v46, %v6908_v43  ;;  %v6984_v46 = vld [vmem:[%s16682_s16 + $0xb48] sm:$0xff] }
 0x4b4   : > { %9983 = vmatprep.subr.bf16.mxu0 %v14700_v7  ;;  %v14563_v7 = vcombine.low %v6800_v37, %v6804_v40  ;;  %v14531_v37 = vcombine.low %v6768_v36, %v6772_v11  ;;  %v6988_v43 = vld [vmem:[%s16682_s16 + $0xb68] sm:$0xff] }
 0x4b5   : > { %v14748_v57 = vcombine.high %v6984_v46, %v6988_v43 }
 0x4b6   : > { %v6543_v21 = vpop.f32.mrf.mxu0  ;;  %9934 = vmatmul.mubr.bf16.vlgmr.msra.gmra.mxu0 %v17780_v23 }
 0x4b7   : > { %v6544_v27 = vadd.f32 %v6543_v21, %v17877_v45  ;;  %9984 = vmatpush1.bf16.msra.mxu0 %v14699_v19  ;;  %10015 = vmatprep.mubr.bf16.mxu0 %v17788_v50  ;;  %v6892_v19 = vld [vmem:[%s16682_s16 + $0x868] sm:$0xff] }
 0x4b8   : > { %v6584_v29 = vpop.f32.mrf.mxu1  ;;  %v6545_v39 = vpop.f32.mrf.mxu0  ;;  %9985 = vmatprep.subr.bf16.mxu0 %v14692_v63  ;;  %v6784_v63 = vld [vmem:[%s16682_s16 + $0x508] sm:$0xff]  ;;  %v14652_v13 = vcombine.high %v6888_v18, %v6892_v19 }
 0x4b9   : > { %v6585_v32 = vadd.f32 %v6584_v29, %v6544_v27  ;;  %v6546_v31 = vadd.f32 %v6545_v39, %v6505_v26  ;;  %v6880_v21 = vld [vmem:[%s16682_s16 + $0x808] sm:$0xff]  ;;  %v14547_v39 = vcombine.low %v6784_v63, %v6788_v20 }
 0x4ba   : > { %v6586_v33 = vpop.f32.mrf.mxu1  ;;  %v6547_v42 = vpop.f32.mrf.mxu0  ;;  %v6884_v26 = vld [vmem:[%s16682_s16 + $0x828] sm:$0xff] }
 0x4bb   : > { %vm6597_vm6 = vcmp.gt.f32.partialorder %v6585_v32, 0.0  ;;  %v6605_v45 = vmul.f32 0.2, %v6585_v32  ;;  %v6587_v48 = vadd.f32 %v6586_v33, %v6546_v31  ;;  %9986 = vmatpush1.bf16.msra.mxu0 %v14691_v54  ;;  %v6776_v27 = vld [vmem:[%s16682_s16 + $0x4c8] sm:$0xff]  ;;  %v14651_v54 = vcombine.low %v6888_v18, %v6892_v19 }
 0x4bc   : > { %v6588_v38 = vpop.f32.mrf.mxu1  ;;  %v6548_v2 = vpop.f32.mrf.mxu0  ;;  %9987 = vmatprep.subr.bf16.mxu0 %v14684_v30  ;;  %v6780_v29 = vld [vmem:[%s16682_s16 + $0x4e8] sm:$0xff]  ;;  %v14644_v30 = vcombine.high %v6880_v21, %v6884_v26  ;;  %v14643_v42 = vcombine.low %v6880_v21, %v6884_v26  ;;  %v14740_v18 = vcombine.high %v6976_v61, %v6980_v62 }
 0x4bd   : > { %vm6598_vm7 = vcmp.gt.f32.partialorder %v6587_v48, 0.0  ;;  %v6606_v4 = vmul.f32 0.2, %v6587_v48  ;;  %v6613_v55 = vsel %vm6597_vm6, %v6585_v32, %v6605_v45  ;;  %v14540_v32 = vcombine.high %v6776_v27, %v6780_v29  ;;  %v7000_v31 = vld [vmem:[%s16682_s16 + $0xbc8] sm:$0xff] }
 0x4be   : > { %v6589_v49 = vpop.f32.mrf.mxu1  ;;  %v17927_v14 = vpack.c.bf16 %v6613_v55, %v6613_v55  ;;  %v7004_v33 = vld [vmem:[%s16682_s16 + $0xbe8] sm:$0xff]  ;;  %v14539_v45 = vcombine.low %v6776_v27, %v6780_v29  ;;  %v14532_v38 = vcombine.high %v6768_v36, %v6772_v11  ;;  %vm12697_vm6 = vcmask 261120  }
 0x4bf   : > { %v6614_v51 = vsel %vm6598_vm7, %v6587_v48, %v6606_v4  ;;  %9988 = vmatpush1.bf16.msra.mxu0 %v14683_v41  ;;  %v14764_v48 = vcombine.high %v7000_v31, %v7004_v33  ;;  %v6992_v41 = vld [vmem:[%s16682_s16 + $0xb88] sm:$0xff]  ;;  %v14763_v49 = vcombine.low %v7000_v31, %v7004_v33  ;;  %vm12741_vm7 = vcmask 254976  }
 0x4c0   : > { %v17925_v5 = vpack.c.bf16 %v6614_v51, %v6614_v51  ;;  %9989 = vmatprep.subr.bf16.mxu0 %v14676_v35  ;;  %v6996_v2 = vld [vmem:[%s16682_s16 + $0xba8] sm:$0xff] }
 0x4c1   : > { %v6760_v35 = vld [vmem:[%s16682_s16 + $0x448] sm:$0xff]  ;;  %v14756_v55 = vcombine.high %v6992_v41, %v6996_v2 }
 0x4c2   : > { %9892 = vmatprep.mubr.bf16.mxu1 %v17925_v5  ;;  %v6764_v4 = vld [vmem:[%s16682_s16 + $0x468] sm:$0xff] }
 0x4c3   : > { %9893 = vmatmul.mubr.bf16.vlgmr.msra.gmra.mxu1 %v17927_v14  ;;  %9990 = vmatpush1.bf16.msra.mxu0 %v14675_v52  ;;  %v14524_v40 = vcombine.high %v6760_v35, %v6764_v4  ;;  %v6752_v51 = vld [vmem:[%s16682_s16 + $0x408] sm:$0xff] }
 0x4c4   : > { %9943 = vmatpush1.bf16.msra.mxu1 %v14571_v58  ;;  %9974 = vmatprep.mubr.bf16.mxu1 %v17692_v17  ;;  %v14548_v58 = vcombine.high %v6784_v63, %v6788_v20  ;;  %v6756_v52 = vld [vmem:[%s16682_s16 + $0x428] sm:$0xff] }
 0x4c5   : > { %9944 = vmatprep.subr.bf16.mxu1 %v14564_v56  ;;  %9991 = vmatprep.subr.bf16.mxu0 %v14668_v16  ;;  %v14755_v56 = vcombine.low %v6992_v41, %v6996_v2  ;;  %v14523_v16 = vcombine.low %v6760_v35, %v6764_v4  ;;  %v14516_v25 = vcombine.high %v6752_v51, %v6756_v52  ;;  %v6968_v63 = vld [vmem:[%s16682_s16 + $0xac8] sm:$0xff] }
 0x4c6   : > { %v6972_v20 = vld [vmem:[%s16682_s16 + $0xae8] sm:$0xff] }
 0x4c7   : > { %9992 = vmatpush1.bf16.msra.mxu0 %v14667_v6  ;;  %v6872_v6 = vld [vmem:[%s16682_s16 + $0x7c8] sm:$0xff]  ;;  %v14732_v21 = vcombine.high %v6968_v63, %v6972_v20 }
 0x4c8   : > { %9945 = vmatpush1.bf16.msra.mxu1 %v14563_v7  ;;  %9993 = vmatprep.subr.bf16.mxu0 %v14660_v8  ;;  %v6876_v7 = vld [vmem:[%s16682_s16 + $0x7e8] sm:$0xff]  ;;  %v14747_v8 = vcombine.low %v6984_v46, %v6988_v43 }
 0x4c9   : > { %9946 = vmatprep.subr.bf16.mxu1 %v14556_v22  ;;  %v14515_v22 = vcombine.low %v6752_v51, %v6756_v52  ;;  %v14636_v19 = vcombine.high %v6872_v6, %v6876_v7  ;;  %v6960_v27 = vld [vmem:[%s16682_s16 + $0xa88] sm:$0xff]  ;;  %v6681_v51 = vld [vmem:[%s16682_s16 + $0x1d0] sm:$0xff] }
 0x4ca   : > { %v6964_v29 = vld [vmem:[%s16682_s16 + $0xaa8] sm:$0xff]  ;;  %v6685_v52 = vld [vmem:[%s16682_s16 + $0x1f0] sm:$0xff] }
 0x4cb   : > { %9994 = vmatpush1.bf16.msra.mxu0 %v14659_v24  ;;  %v6864_v24 = vld [vmem:[%s16682_s16 + $0x788] sm:$0xff]  ;;  %v14724_v31 = vcombine.high %v6960_v27, %v6964_v29 }
 0x4cc   : > { %9947 = vmatpush1.bf16.msra.mxu1 %v14555_v12  ;;  %9995 = vmatprep.subr.bf16.mxu0 %v14652_v13  ;;  %v6868_v12 = vld [vmem:[%s16682_s16 + $0x7a8] sm:$0xff]  ;;  %v14739_v13 = vcombine.low %v6976_v61, %v6980_v62  ;;  %v14446_v62 = vcombine.high %v6681_v51, %v6685_v52 }
 0x4cd   : > { %9948 = vmatprep.subr.bf16.mxu1 %v14548_v58  ;;  %v14635_v58 = vcombine.low %v6872_v6, %v6876_v7  ;;  %v14628_v26 = vcombine.high %v6864_v24, %v6868_v12  ;;  %v6952_v36 = vld [vmem:[%s16682_s16 + $0xa48] sm:$0xff]  ;;  %v6673_v7 = vld [vmem:[%s16682_s16 + $0x190] sm:$0xff] }
 0x4ce   : > { %v6956_v11 = vld [vmem:[%s16682_s16 + $0xa68] sm:$0xff] }
 0x4cf   : > { %9996 = vmatpush1.bf16.msra.mxu0 %v14651_v54  ;;  %v6856_v54 = vld [vmem:[%s16682_s16 + $0x748] sm:$0xff]  ;;  %v14716_v41 = vcombine.high %v6952_v36, %v6956_v11 }
 0x4d0   : > { %9949 = vmatpush1.bf16.msra.mxu1 %v14547_v39  ;;  %9997 = vmatprep.subr.bf16.mxu0 %v14644_v30  ;;  %v6860_v39 = vld [vmem:[%s16682_s16 + $0x768] sm:$0xff]  ;;  %v14731_v30 = vcombine.low %v6968_v63, %v6972_v20  ;;  %v14445_v63 = vcombine.low %v6681_v51, %v6685_v52 }
 0x4d1   : > { %9950 = vmatprep.subr.bf16.mxu1 %v14540_v32  ;;  %v14627_v32 = vcombine.low %v6864_v24, %v6868_v12  ;;  %v14620_v33 = vcombine.high %v6856_v54, %v6860_v39  ;;  %v6944_v35 = vld [vmem:[%s16682_s16 + $0xa08] sm:$0xff] }
 0x4d2   : > { %v6948_v4 = vld [vmem:[%s16682_s16 + $0xa28] sm:$0xff] }
 0x4d3   : > { %9998 = vmatpush1.bf16.msra.mxu0 %v14643_v42  ;;  %v6848_v42 = vld [vmem:[%s16682_s16 + $0x708] sm:$0xff]  ;;  %v14708_v46 = vcombine.high %v6944_v35, %v6948_v4 }
 0x4d4   : > { %9951 = vmatpush1.bf16.msra.mxu1 %v14539_v45  ;;  %9999 = vmatprep.subr.bf16.mxu0 %v14764_v48  ;;  %v6852_v45 = vld [vmem:[%s16682_s16 + $0x728] sm:$0xff]  ;;  %v14723_v48 = vcombine.low %v6960_v27, %v6964_v29 }
 0x4d5   : > { %9952 = vmatprep.subr.bf16.mxu1 %v14532_v38  ;;  %v14619_v38 = vcombine.low %v6856_v54, %v6860_v39  ;;  %v14612_v2 = vcombine.high %v6848_v42, %v6852_v45  ;;  %v7135_v61 = vld [vmem:[%s16689_s13] sm:$0xff] }
 0x4d6   : > { %v7144_v12 = vrot.slane %v7135_v61, %v17069_v10  ;;  %v6816_v27 = vld [vmem:[%s16682_s16 + $0x608] sm:$0xff] }
 0x4d7   : > { %10000 = vmatpush2.bf16.msra.mxu0 %v14763_v49  ;;  %v6840_v49 = vld [vmem:[%s16682_s16 + $0x6c8] sm:$0xff] }
 0x4d8   : > { %9953 = vmatpush1.bf16.msra.mxu1 %v14531_v37  ;;  %10001 = vmatprep.subr.bf16.mxu0 %v14756_v55  ;;  %v6844_v37 = vld [vmem:[%s16682_s16 + $0x6e8] sm:$0xff]  ;;  %v14715_v55 = vcombine.low %v6952_v36, %v6956_v11 }
 0x4d9   : > { %9954 = vmatprep.subr.bf16.mxu1 %v14524_v40  ;;  %v14611_v40 = vcombine.low %v6848_v42, %v6852_v45  ;;  %v14604_v43 = vcombine.high %v6840_v49, %v6844_v37  ;;  %v6820_v29 = vld [vmem:[%s16682_s16 + $0x628] sm:$0xff] }
 0x4da   : > { %v14580_v45 = vcombine.high %v6816_v27, %v6820_v29  ;;  %v7056_v52 = vld [vmem:[%s16682_s16 + $0xd88] sm:$0xff] }
 0x4db   : > { %10002 = vmatpush2.bf16.msra.mxu0 %v14755_v56  ;;  %v6832_v56 = vld [vmem:[%s16682_s16 + $0x688] sm:$0xff] }
 0x4dc   : > { %9955 = vmatpush1.bf16.msra.mxu1 %v14523_v16  ;;  %10003 = vmatprep.subr.bf16.mxu0 %v14748_v57  ;;  %v6836_v16 = vld [vmem:[%s16682_s16 + $0x6a8] sm:$0xff]  ;;  %v14707_v57 = vcombine.low %v6944_v35, %v6948_v4 }
 0x4dd   : > { %9956 = vmatprep.subr.bf16.mxu1 %v14516_v25  ;;  %v14603_v25 = vcombine.low %v6840_v49, %v6844_v37  ;;  %v14596_v6 = vcombine.high %v6832_v56, %v6836_v16  ;;  %v14595_v20 = vcombine.low %v6832_v56, %v6836_v16  ;;  %v7068_v35 = vld [vmem:[%s16682_s16 + $0xde8] sm:$0xff]  ;;  %v6649_v16 = vld [vmem:[%s16682_s16 + $0xd0] sm:$0xff] }
 0x4de   : > { %v7060_v56 = vld [vmem:[%s16682_s16 + $0xda8] sm:$0xff] }
 0x4df   : > { %10004 = vmatpush2.bf16.msra.mxu0 %v14747_v8  ;;  %v6677_v8 = vld [vmem:[%s16682_s16 + $0x1b0] sm:$0xff] }
 0x4e0   : > { %9957 = vmatpush1.bf16.msra.mxu1 %v14515_v22  ;;  %10005 = vmatprep.subr.bf16.mxu0 %v14740_v18  ;;  %v6824_v22 = vld [vmem:[%s16682_s16 + $0x648] sm:$0xff]  ;;  %v14438_v24 = vcombine.high %v6673_v7, %v6677_v8 }
 0x4e1   : > { %9958 = vmatprep.subr.bf16.mxu1 %v14636_v19  ;;  %v6828_v18 = vld [vmem:[%s16682_s16 + $0x668] sm:$0xff]  ;;  %v7140_v19 = vrot.slane %v7135_v61, %v17065_v3 }
 0x4e3   : > { %10006 = vmatpush2.bf16.msra.mxu0 %v14739_v13  ;;  %v14588_v13 = vcombine.high %v6824_v22, %v6828_v18 }
 0x4e4   : > { %9959 = vmatpush2.bf16.msra.mxu1 %v14635_v58  ;;  %10007 = vmatprep.subr.bf16.mxu0 %v14732_v21  ;;  %v6665_v58 = vld [vmem:[%s16682_s16 + $0x150] sm:$0xff] }
 0x4e5   : > { %9960 = vmatprep.subr.bf16.mxu1 %v14628_v26  ;;  %v6669_v21 = vld [vmem:[%s16682_s16 + $0x170] sm:$0xff] }
 0x4e6   : > { %v14429_v37 = vcombine.low %v6665_v58, %v6669_v21 }
 0x4e7   : > { %10008 = vmatpush2.bf16.msra.mxu0 %v14731_v30  ;;  %v14437_v30 = vcombine.low %v6673_v7, %v6677_v8  ;;  %v6641_v7 = vld [vmem:[%s16682_s16 + $0x90] sm:$0xff] }
 0x4e8   : > { %9961 = vmatpush2.bf16.msra.mxu1 %v14627_v32  ;;  %10009 = vmatprep.subr.bf16.mxu0 %v14724_v31  ;;  %v14587_v31 = vcombine.low %v6824_v22, %v6828_v18  ;;  %v6645_v8 = vld [vmem:[%s16682_s16 + $0xb0] sm:$0xff]  ;;  %v7048_v22 = vld [vmem:[%s16682_s16 + $0xd48] sm:$0xff] }
 0x4e9   : > { %9962 = vmatprep.subr.bf16.mxu1 %v14620_v33  ;;  %v14430_v33 = vcombine.high %v6665_v58, %v6669_v21  ;;  %v7052_v18 = vld [vmem:[%s16682_s16 + $0xd68] sm:$0xff] }
 0x4ea   : > { %v7040_v58 = vld [vmem:[%s16682_s16 + $0xd08] sm:$0xff] }
 0x4eb   : > { %10010 = vmatpush2.bf16.msra.mxu0 %v14723_v48  ;;  %v6657_v48 = vld [vmem:[%s16682_s16 + $0x110] sm:$0xff]  ;;  %v7044_v21 = vld [vmem:[%s16682_s16 + $0xd28] sm:$0xff] }
 0x4ec   : > { %9963 = vmatpush2.bf16.msra.mxu1 %v14619_v38  ;;  %10011 = vmatprep.subr.bf16.mxu0 %v14716_v41  ;;  %v6661_v38 = vld [vmem:[%s16682_s16 + $0x130] sm:$0xff] }
 0x4ed   : > { %9964 = vmatprep.subr.bf16.mxu1 %v14612_v2  ;;  %v7064_v2 = vld [vmem:[%s16682_s16 + $0xdc8] sm:$0xff] }
 0x4ee   : > { %v14828_v51 = vcombine.high %v7064_v2, %v7068_v35  ;;  %v14827_v61 = vcombine.low %v7064_v2, %v7068_v35  ;;  %v7028_v2 = vld [vmem:[%s16682_s16 + $0xca8] sm:$0xff] }
 0x4ef   : > { %10012 = vmatpush2.bf16.msra.mxu0 %v14715_v55 }
 0x4f0   : > { %9965 = vmatpush2.bf16.msra.mxu1 %v14611_v40  ;;  %10013 = vmatprep.subr.bf16.mxu0 %v14708_v46  ;;  %v14579_v40 = vcombine.low %v6816_v27, %v6820_v29  ;;  %v14422_v46 = vcombine.high %v6657_v48, %v6661_v38  ;;  %v14811_v27 = vcombine.low %v7048_v22, %v7052_v18 }
 0x4f1   : > { %9966 = vmatprep.subr.bf16.mxu1 %v14604_v43 }
 0x4f3   : > { %10014 = vmatpush2.bf16.msra.mxu0 %v14707_v57  ;;  %v6653_v57 = vld [vmem:[%s16682_s16 + $0xf0] sm:$0xff] }
 0x4f4   : > { %9967 = vmatpush2.bf16.msra.mxu1 %v14603_v25  ;;  %10065 = vmatprep.subr.bf16.mxu0 %v14446_v62  ;;  %v14421_v25 = vcombine.low %v6657_v48, %v6661_v38  ;;  %v14820_v62 = vcombine.high %v7056_v52, %v7060_v56  ;;  %v6745_v48 = vld [vmem:[%s16682_s16 + $0x3d0] sm:$0xff] }
 0x4f5   : > { %9968 = vmatprep.subr.bf16.mxu1 %v14596_v6  ;;  %v14414_v6 = vcombine.high %v6649_v16, %v6653_v57  ;;  %v6749_v38 = vld [vmem:[%s16682_s16 + $0x3f0] sm:$0xff] }
 0x4f6   : > { %v9771_v26 = vpop.f32.mrf.mxu0  ;;  %10016 = vmatmul.mubr.bf16.vlgmr.msra.gmra.mxu0 %v17868_v34 }
 0x4f7   : > { %v9772_v54 = vadd.f32 %v9771_v26, %v7140_v19  ;;  %10066 = vmatpush1.bf16.msra.mxu0 %v14445_v63  ;;  %10097 = vmatprep.mubr.bf16.mxu0 %v17687_v28  ;;  %v14413_v19 = vcombine.low %v6649_v16, %v6653_v57  ;;  %v14819_v63 = vcombine.low %v7056_v52, %v7060_v56 }
 0x4f8   : > { %v9812_v39 = vpop.f32.mrf.mxu1  ;;  %9969 = vmatpush2.bf16.msra.mxu1 %v14595_v20  ;;  %v9773_v32 = vpop.f32.mrf.mxu0  ;;  %10067 = vmatprep.subr.bf16.mxu0 %v14438_v24  ;;  %v14406_v20 = vcombine.high %v6641_v7, %v6645_v8  ;;  %v14812_v24 = vcombine.high %v7048_v22, %v7052_v18  ;;  %v14405_v26 = vcombine.low %v6641_v7, %v6645_v8 }
 0x4f9   : > { %v17996_v36 = vadd.f32 %v9812_v39, %v9772_v54  ;;  %v9774_v11 = vadd.f32 %v9773_v32, %v7144_v12  ;;  %9970 = vmatprep.subr.bf16.mxu1 %v14588_v13  ;;  %v6633_v12 = vld [vmem:[%s16682_s16 + $0x50] sm:$0xff]  ;;  %v14804_v54 = vcombine.high %v7040_v58, %v7044_v21  ;;  %v7032_v32 = vld [vmem:[%s16682_s16 + $0xcc8] sm:$0xff]  ;;  %v14509_v52 = vcombine.low %v6745_v48, %v6749_v38 }
 0x4fa   : > { %v9814_v42 = vpop.f32.mrf.mxu1  ;;  %v9775_v41 = vpop.f32.mrf.mxu0  ;;  %v6637_v13 = vld [vmem:[%s16682_s16 + $0x70] sm:$0xff] }
 0x4fb   : > { %v18002_v4 = vadd.f32 %v9814_v42, %v9774_v11  ;;  %10068 = vmatpush1.bf16.msra.mxu0 %v14437_v30  ;;  %v14398_v29 = vcombine.high %v6633_v12, %v6637_v13  ;;  %v6625_v39 = vld [vmem:[%s16682_s16 + $0x10] sm:$0xff]  ;;  %v14803_v11 = vcombine.low %v7040_v58, %v7044_v21  ;;  %v7024_v41 = vld [vmem:[%s16682_s16 + $0xc88] sm:$0xff] }
 0x4fc   : > { %v9816_v49 = vpop.f32.mrf.mxu1  ;;  %9971 = vmatpush2.bf16.msra.mxu1 %v14587_v31  ;;  %v9776_v55 = vpop.f32.mrf.mxu0  ;;  %10069 = vmatprep.subr.bf16.mxu0 %v14430_v33  ;;  %v6629_v30 = vld [vmem:[%s16682_s16 + $0x30] sm:$0xff]  ;;  %v7036_v31 = vld [vmem:[%s16682_s16 + $0xce8] sm:$0xff]  ;;  %v14397_v33 = vcombine.low %v6633_v12, %v6637_v13  ;;  %v14787_v56 = vcombine.low %v7024_v41, %v7028_v2 }
 0x4fd   : > { %9972 = vmatprep.subr.bf16.mxu1 %v14580_v45  ;;  %v14390_v42 = vcombine.high %v6625_v39, %v6629_v30  ;;  %v14796_v45 = vcombine.high %v7032_v32, %v7036_v31  ;;  %v14389_v35 = vcombine.low %v6625_v39, %v6629_v30  ;;  %v14795_v49 = vcombine.low %v7032_v32, %v7036_v31 }
 0x4fe   : > { %v9817_v43 = vpop.f32.mrf.mxu1  ;;  %v14788_v55 = vcombine.high %v7024_v41, %v7028_v2 }
 0x4ff   : > { %10070 = vmatpush1.bf16.msra.mxu0 %v14429_v37  ;;  %v14510_v37 = vcombine.high %v6745_v48, %v6749_v38  ;;  %v7016_v43 = vld [vmem:[%s16682_s16 + $0xc48] sm:$0xff] }
 0x500   : > { %9973 = vmatpush2.bf16.msra.mxu1 %v14579_v40  ;;  %10071 = vmatprep.subr.bf16.mxu0 %v14422_v46  ;;  %v6737_v40 = vld [vmem:[%s16682_s16 + $0x390] sm:$0xff] }
 0x501   : > { %10024 = vmatprep.subr.bf16.mxu1 %v14828_v51  ;;  %v6741_v46 = vld [vmem:[%s16682_s16 + $0x3b0] sm:$0xff]  ;;  %v7020_v51 = vld [vmem:[%s16682_s16 + $0xc68] sm:$0xff] }
 0x502   : > { %v14502_v16 = vcombine.high %v6737_v40, %v6741_v46  ;;  %v14780_v57 = vcombine.high %v7016_v43, %v7020_v51  ;;  %v14501_v7 = vcombine.low %v6737_v40, %v6741_v46  ;;  %v14779_v8 = vcombine.low %v7016_v43, %v7020_v51 }
 0x503   : > { %9975 = vmatmul.mubr.bf16.vlgmr.msra.gmra.mxu1 %v17782_v0  ;;  %10072 = vmatpush1.bf16.msra.mxu0 %v14421_v25  ;;  %v6729_v25 = vld [vmem:[%s16682_s16 + $0x350] sm:$0xff] }
 0x504   : > { %10025 = vmatpush1.bf16.msra.mxu1 %v14827_v61  ;;  %10056 = vmatprep.mubr.bf16.mxu1 %v17925_v5  ;;  %v6733_v61 = vld [vmem:[%s16682_s16 + $0x370] sm:$0xff] }
 0x505   : > { %10026 = vmatprep.subr.bf16.mxu1 %v14820_v62  ;;  %10073 = vmatprep.subr.bf16.mxu0 %v14414_v6  ;;  %v7008_v62 = vld [vmem:[%s16682_s16 + $0xc08] sm:$0xff]  ;;  %v14494_v22 = vcombine.high %v6729_v25, %v6733_v61  ;;  %v14493_v12 = vcombine.low %v6729_v25, %v6733_v61 }
 0x506   : > { %v7012_v6 = vld [vmem:[%s16682_s16 + $0xc28] sm:$0xff] }
 0x507   : > { %10074 = vmatpush1.bf16.msra.mxu0 %v14413_v19  ;;  %v14772_v18 = vcombine.high %v7008_v62, %v7012_v6  ;;  %v6721_v19 = vld [vmem:[%s16682_s16 + $0x310] sm:$0xff]  ;;  %v14771_v13 = vcombine.low %v7008_v62, %v7012_v6 }
 0x508   : > { %10027 = vmatpush1.bf16.msra.mxu1 %v14819_v63  ;;  %10075 = vmatprep.subr.bf16.mxu0 %v14406_v20  ;;  %v6725_v63 = vld [vmem:[%s16682_s16 + $0x330] sm:$0xff]  ;;  %v7128_v20 = vld [vmem:[%s16682_s16 + $0xfc8] sm:$0xff] }
 0x509   : > { %10028 = vmatprep.subr.bf16.mxu1 %v14812_v24  ;;  %v7132_v24 = vld [vmem:[%s16682_s16 + $0xfe8] sm:$0xff]  ;;  %v14486_v58 = vcombine.high %v6721_v19, %v6725_v63  ;;  %v14485_v39 = vcombine.low %v6721_v19, %v6725_v63 }
 0x50a   : > { %v14892_v21 = vcombine.high %v7128_v20, %v7132_v24  ;;  %v14891_v30 = vcombine.low %v7128_v20, %v7132_v24 }
 0x50b   : > { %10076 = vmatpush1.bf16.msra.mxu0 %v14405_v26  ;;  %v6713_v26 = vld [vmem:[%s16682_s16 + $0x2d0] sm:$0xff] }
 0x50c   : > { %10029 = vmatpush1.bf16.msra.mxu1 %v14811_v27  ;;  %10077 = vmatprep.subr.bf16.mxu0 %v14398_v29  ;;  %v6717_v27 = vld [vmem:[%s16682_s16 + $0x2f0] sm:$0xff]  ;;  %v7120_v29 = vld [vmem:[%s16682_s16 + $0xf88] sm:$0xff] }
 0x50d   : > { %10030 = vmatprep.subr.bf16.mxu1 %v14804_v54  ;;  %v7124_v54 = vld [vmem:[%s16682_s16 + $0xfa8] sm:$0xff]  ;;  %v14478_v32 = vcombine.high %v6713_v26, %v6717_v27  ;;  %v14477_v48 = vcombine.low %v6713_v26, %v6717_v27 }
 0x50e   : > { %v14884_v31 = vcombine.high %v7120_v29, %v7124_v54  ;;  %v14883_v38 = vcombine.low %v7120_v29, %v7124_v54 }
 0x50f   : > { %10078 = vmatpush1.bf16.msra.mxu0 %v14397_v33  ;;  %v6705_v33 = vld [vmem:[%s16682_s16 + $0x290] sm:$0xff] }
 0x510   : > { %10031 = vmatpush1.bf16.msra.mxu1 %v14803_v11  ;;  %10079 = vmatprep.subr.bf16.mxu0 %v14390_v42  ;;  %v6709_v11 = vld [vmem:[%s16682_s16 + $0x2b0] sm:$0xff]  ;;  %v7112_v42 = vld [vmem:[%s16682_s16 + $0xf48] sm:$0xff] }
 0x511   : > { %10032 = vmatprep.subr.bf16.mxu1 %v14796_v45  ;;  %v7116_v45 = vld [vmem:[%s16682_s16 + $0xf68] sm:$0xff]  ;;  %v14470_v41 = vcombine.high %v6705_v33, %v6709_v11  ;;  %v14469_v40 = vcombine.low %v6705_v33, %v6709_v11 }
 0x512   : > { %v14876_v2 = vcombine.high %v7112_v42, %v7116_v45  ;;  %v14875_v46 = vcombine.low %v7112_v42, %v7116_v45  ;;  %v7076_v33 = vld [vmem:[%s16682_s16 + $0xe28] sm:$0xff] }
 0x513   : > { %10080 = vmatpush1.bf16.msra.mxu0 %v14389_v35  ;;  %v6697_v35 = vld [vmem:[%s16682_s16 + $0x250] sm:$0xff] }
 0x514   : > { %10033 = vmatpush1.bf16.msra.mxu1 %v14795_v49  ;;  %10081 = vmatprep.subr.bf16.mxu0 %v14510_v37  ;;  %v6701_v49 = vld [vmem:[%s16682_s16 + $0x270] sm:$0xff]  ;;  %v7104_v37 = vld [vmem:[%s16682_s16 + $0xf08] sm:$0xff] }
 0x515   : > { %10034 = vmatprep.subr.bf16.mxu1 %v14788_v55  ;;  %v7108_v55 = vld [vmem:[%s16682_s16 + $0xf28] sm:$0xff]  ;;  %v14462_v43 = vcombine.high %v6697_v35, %v6701_v49  ;;  %v14461_v25 = vcombine.low %v6697_v35, %v6701_v49  ;;  %v6913_v35 = vld [vmem:[%s16682_s16 + $0x910] sm:$0xff] }
 0x516   : > { %v14868_v51 = vcombine.high %v7104_v37, %v7108_v55  ;;  %v14867_v61 = vcombine.low %v7104_v37, %v7108_v55  ;;  %v6809_v37 = vld [vmem:[%s16682_s16 + $0x5d0] sm:$0xff] }
 0x517   : > { %10082 = vmatpush2.bf16.msra.mxu0 %v14509_v52  ;;  %v6689_v52 = vld [vmem:[%s16682_s16 + $0x210] sm:$0xff] }
 0x518   : > { %10035 = vmatpush1.bf16.msra.mxu1 %v14787_v56  ;;  %10083 = vmatprep.subr.bf16.mxu0 %v14502_v16  ;;  %v6693_v56 = vld [vmem:[%s16682_s16 + $0x230] sm:$0xff]  ;;  %v7096_v16 = vld [vmem:[%s16682_s16 + $0xec8] sm:$0xff] }
 0x519   : > { %10036 = vmatprep.subr.bf16.mxu1 %v14780_v57  ;;  %v7100_v57 = vld [vmem:[%s16682_s16 + $0xee8] sm:$0xff]  ;;  %v14454_v62 = vcombine.high %v6689_v52, %v6693_v56  ;;  %v14453_v19 = vcombine.low %v6689_v52, %v6693_v56  ;;  %v6813_v55 = vld [vmem:[%s16682_s16 + $0x5f0] sm:$0xff] }
 0x51a   : > { %v14860_v6 = vcombine.high %v7096_v16, %v7100_v57  ;;  %v14859_v63 = vcombine.low %v7096_v16, %v7100_v57  ;;  %v6801_v52 = vld [vmem:[%s16682_s16 + $0x590] sm:$0xff] }
 0x51b   : > { %10084 = vmatpush2.bf16.msra.mxu0 %v14501_v7  ;;  %v6937_v7 = vld [vmem:[%s16682_s16 + $0x9d0] sm:$0xff] }
 0x51c   : > { %10037 = vmatpush1.bf16.msra.mxu1 %v14779_v8  ;;  %10085 = vmatprep.subr.bf16.mxu0 %v14494_v22  ;;  %v6941_v8 = vld [vmem:[%s16682_s16 + $0x9f0] sm:$0xff]  ;;  %v7088_v22 = vld [vmem:[%s16682_s16 + $0xe88] sm:$0xff] }
 0x51d   : > { %10038 = vmatprep.subr.bf16.mxu1 %v14772_v18  ;;  %v7092_v18 = vld [vmem:[%s16682_s16 + $0xea8] sm:$0xff]  ;;  %v14702_v20 = vcombine.high %v6937_v7, %v6941_v8  ;;  %v14701_v26 = vcombine.low %v6937_v7, %v6941_v8  ;;  %v6805_v56 = vld [vmem:[%s16682_s16 + $0x5b0] sm:$0xff] }
 0x51e   : > { %v14852_v24 = vcombine.high %v7088_v22, %v7092_v18  ;;  %v14851_v27 = vcombine.low %v7088_v22, %v7092_v18  ;;  %v6905_v16 = vld [vmem:[%s16682_s16 + $0x8d0] sm:$0xff] }
 0x51f   : > { %10086 = vmatpush2.bf16.msra.mxu0 %v14493_v12  ;;  %v6929_v12 = vld [vmem:[%s16682_s16 + $0x990] sm:$0xff] }
 0x520   : > { %10039 = vmatpush1.bf16.msra.mxu1 %v14771_v13  ;;  %10087 = vmatprep.subr.bf16.mxu0 %v14486_v58  ;;  %v6933_v13 = vld [vmem:[%s16682_s16 + $0x9b0] sm:$0xff]  ;;  %v7080_v58 = vld [vmem:[%s16682_s16 + $0xe48] sm:$0xff] }
 0x521   : > { %10040 = vmatprep.subr.bf16.mxu1 %v14892_v21  ;;  %v7084_v21 = vld [vmem:[%s16682_s16 + $0xe68] sm:$0xff]  ;;  %v14694_v29 = vcombine.high %v6929_v12, %v6933_v13  ;;  %v14693_v42 = vcombine.low %v6929_v12, %v6933_v13  ;;  %v6909_v57 = vld [vmem:[%s16682_s16 + $0x8f0] sm:$0xff] }
 0x522   : > { %v14844_v54 = vcombine.high %v7080_v58, %v7084_v21  ;;  %v6897_v7 = vld [vmem:[%s16682_s16 + $0x890] sm:$0xff] }
 0x523   : > { %10088 = vmatpush2.bf16.msra.mxu0 %v14485_v39  ;;  %v6921_v39 = vld [vmem:[%s16682_s16 + $0x950] sm:$0xff] }
 0x524   : > { %10041 = vmatpush2.bf16.msra.mxu1 %v14891_v30  ;;  %10089 = vmatprep.subr.bf16.mxu0 %v14478_v32  ;;  %v6925_v30 = vld [vmem:[%s16682_s16 + $0x970] sm:$0xff] }
 0x525   : > { %10042 = vmatprep.subr.bf16.mxu1 %v14884_v31  ;;  %v7072_v31 = vld [vmem:[%s16682_s16 + $0xe08] sm:$0xff]  ;;  %v6901_v8 = vld [vmem:[%s16682_s16 + $0x8b0] sm:$0xff] }
 0x526   : > { %v6793_v22 = vld [vmem:[%s16682_s16 + $0x550] sm:$0xff] }
 0x527   : > { %10090 = vmatpush2.bf16.msra.mxu0 %v14477_v48  ;;  %v14843_v48 = vcombine.low %v7080_v58, %v7084_v21  ;;  %v6797_v18 = vld [vmem:[%s16682_s16 + $0x570] sm:$0xff] }
 0x528   : > { %10043 = vmatpush2.bf16.msra.mxu1 %v14883_v38  ;;  %10091 = vmatprep.subr.bf16.mxu0 %v14470_v41  ;;  %v14686_v38 = vcombine.high %v6921_v39, %v6925_v30  ;;  %v6889_v12 = vld [vmem:[%s16682_s16 + $0x850] sm:$0xff] }
 0x529   : > { %10044 = vmatprep.subr.bf16.mxu1 %v14876_v2  ;;  %v14836_v2 = vcombine.high %v7072_v31, %v7076_v33  ;;  %v6893_v13 = vld [vmem:[%s16682_s16 + $0x870] sm:$0xff] }
 0x52a   : > { %v6785_v58 = vld [vmem:[%s16682_s16 + $0x510] sm:$0xff] }
 0x52b   : > { %10092 = vmatpush2.bf16.msra.mxu0 %v14469_v40  ;;  %v14685_v40 = vcombine.low %v6921_v39, %v6925_v30  ;;  %v6789_v21 = vld [vmem:[%s16682_s16 + $0x530] sm:$0xff] }
 0x52c   : > { %10045 = vmatpush2.bf16.msra.mxu1 %v14875_v46  ;;  %10093 = vmatprep.subr.bf16.mxu0 %v14462_v43  ;;  %v14835_v43 = vcombine.low %v7072_v31, %v7076_v33  ;;  %v6881_v39 = vld [vmem:[%s16682_s16 + $0x810] sm:$0xff]  ;;  %v14653_v33 = vcombine.low %v6889_v12, %v6893_v13 }
 0x52d   : > { %10046 = vmatprep.subr.bf16.mxu1 %v14868_v51  ;;  %v14574_v51 = vcombine.high %v6809_v37, %v6813_v55  ;;  %v6885_v30 = vld [vmem:[%s16682_s16 + $0x830] sm:$0xff] }
 0x52e   : > { %v6781_v31 = vld [vmem:[%s16682_s16 + $0x4f0] sm:$0xff] }
 0x52f   : > { %10094 = vmatpush2.bf16.msra.mxu0 %v14461_v25 }
 0x530   : > { %10047 = vmatpush2.bf16.msra.mxu1 %v14867_v61  ;;  %10095 = vmatprep.subr.bf16.mxu0 %v14454_v62  ;;  %v14573_v61 = vcombine.low %v6809_v37, %v6813_v55  ;;  %v14566_v62 = vcombine.high %v6801_v52, %v6805_v56 }
 0x531   : > { %10048 = vmatprep.subr.bf16.mxu1 %v14860_v6  ;;  %v14670_v6 = vcombine.high %v6905_v16, %v6909_v57 }
 0x533   : > { %10096 = vmatpush2.bf16.msra.mxu0 %v14453_v19  ;;  %v14669_v19 = vcombine.low %v6905_v16, %v6909_v57 }
 0x534   : > { %10049 = vmatpush2.bf16.msra.mxu1 %v14859_v63  ;;  %10147 = vmatprep.subr.bf16.mxu0 %v14702_v20  ;;  %v14565_v63 = vcombine.low %v6801_v52, %v6805_v56  ;;  %v14662_v20 = vcombine.high %v6897_v7, %v6901_v8 }
 0x535   : > { %10050 = vmatprep.subr.bf16.mxu1 %v14852_v24  ;;  %v14558_v24 = vcombine.high %v6793_v22, %v6797_v18 }
 0x536   : > { %v9853_v32 = vpop.f32.mrf.mxu0  ;;  %10098 = vmatmul.mubr.bf16.vlgmr.msra.gmra.mxu0 %v17780_v23 }
 0x537   : > { %v18068_v11 = vadd.f32 %v9853_v32, %v17996_v36  ;;  %10148 = vmatpush1.bf16.msra.mxu0 %v14701_v26  ;;  %10179 = vmatprep.mubr.bf16.mxu0 %v17788_v50  ;;  %v6917_v36 = vld [vmem:[%s16682_s16 + $0x930] sm:$0xff]  ;;  %v14661_v26 = vcombine.low %v6897_v7, %v6901_v8 }
 0x538   : > { %10051 = vmatpush2.bf16.msra.mxu1 %v14851_v27  ;;  %v9855_v45 = vpop.f32.mrf.mxu0  ;;  %10149 = vmatprep.subr.bf16.mxu0 %v14694_v29  ;;  %v14677_v25 = vcombine.low %v6913_v35, %v6917_v36  ;;  %v14557_v27 = vcombine.low %v6793_v22, %v6797_v18  ;;  %v14654_v29 = vcombine.high %v6889_v12, %v6893_v13  ;;  %v6777_v32 = vld [vmem:[%s16682_s16 + $0x4d0] sm:$0xff] }
 0x539   : > { %v18072_v41 = vadd.f32 %v9855_v45, %v18002_v4  ;;  %10052 = vmatprep.subr.bf16.mxu1 %v14844_v54  ;;  %v14678_v4 = vcombine.high %v6913_v35, %v6917_v36  ;;  %v14550_v54 = vcombine.high %v6785_v58, %v6789_v21  ;;  %v14646_v45 = vcombine.high %v6881_v39, %v6885_v30  ;;  %v6769_v35 = vld [vmem:[%s16682_s16 + $0x490] sm:$0xff] }
 0x53a   : > { %v9857_v49 = vpop.f32.mrf.mxu0  ;;  %v6773_v36 = vld [vmem:[%s16682_s16 + $0x4b0] sm:$0xff]  ;;  %v14541_v37 = vcombine.low %v6777_v32, %v6781_v31 }
 0x53b   : > { %10150 = vmatpush1.bf16.msra.mxu0 %v14693_v42  ;;  %v14549_v42 = vcombine.low %v6785_v58, %v6789_v21  ;;  %v14645_v49 = vcombine.low %v6881_v39, %v6885_v30  ;;  %v14533_v56 = vcombine.low %v6769_v35, %v6773_v36 }
 0x53c   : > { %10053 = vmatpush2.bf16.msra.mxu1 %v14843_v48  ;;  %v9858_v46 = vpop.f32.mrf.mxu0  ;;  %10151 = vmatprep.subr.bf16.mxu0 %v14686_v38  ;;  %v14542_v48 = vcombine.high %v6777_v32, %v6781_v31  ;;  %v7001_v38 = vld [vmem:[%s16682_s16 + $0xbd0] sm:$0xff] }
 0x53d   : > { %10054 = vmatprep.subr.bf16.mxu1 %v14836_v2  ;;  %v7005_v2 = vld [vmem:[%s16682_s16 + $0xbf0] sm:$0xff] }
 0x53e   : > { %v14766_v55 = vcombine.high %v7001_v38, %v7005_v2  ;;  %v6993_v46 = vld [vmem:[%s16682_s16 + $0xb90] sm:$0xff]  ;;  %v14765_v52 = vcombine.low %v7001_v38, %v7005_v2 }
 0x53f   : > { %10152 = vmatpush1.bf16.msra.mxu0 %v14685_v40  ;;  %v14534_v40 = vcombine.high %v6769_v35, %v6773_v36 }
 0x540   : > { %10055 = vmatpush2.bf16.msra.mxu1 %v14835_v43  ;;  %10153 = vmatprep.subr.bf16.mxu0 %v14678_v4  ;;  %v6997_v43 = vld [vmem:[%s16682_s16 + $0xbb0] sm:$0xff] }
 0x541   : > { %10106 = vmatprep.subr.bf16.mxu1 %v14574_v51  ;;  %v6761_v4 = vld [vmem:[%s16682_s16 + $0x450] sm:$0xff]  ;;  %v14758_v16 = vcombine.high %v6993_v46, %v6997_v43  ;;  %v14757_v7 = vcombine.low %v6993_v46, %v6997_v43 }
 0x542   : > { %v6765_v51 = vld [vmem:[%s16682_s16 + $0x470] sm:$0xff] }
 0x543   : > { %10057 = vmatmul.mubr.bf16.vlgmr.msra.gmra.mxu1 %v17927_v14  ;;  %10154 = vmatpush1.bf16.msra.mxu0 %v14677_v25  ;;  %v14526_v57 = vcombine.high %v6761_v4, %v6765_v51  ;;  %v6985_v25 = vld [vmem:[%s16682_s16 + $0xb50] sm:$0xff]  ;;  %v14525_v8 = vcombine.low %v6761_v4, %v6765_v51 }
 0x544   : > { %10107 = vmatpush1.bf16.msra.mxu1 %v14573_v61  ;;  %10138 = vmatprep.mubr.bf16.mxu1 %v17692_v17  ;;  %v6989_v61 = vld [vmem:[%s16682_s16 + $0xb70] sm:$0xff] }
 0x545   : > { %10108 = vmatprep.subr.bf16.mxu1 %v14566_v62  ;;  %10155 = vmatprep.subr.bf16.mxu0 %v14670_v6  ;;  %v6753_v62 = vld [vmem:[%s16682_s16 + $0x410] sm:$0xff]  ;;  %v14750_v22 = vcombine.high %v6985_v25, %v6989_v61  ;;  %v14749_v12 = vcombine.low %v6985_v25, %v6989_v61 }
 0x546   : > { %v6757_v6 = vld [vmem:[%s16682_s16 + $0x430] sm:$0xff] }
 0x547   : > { %10156 = vmatpush1.bf16.msra.mxu0 %v14669_v19  ;;  %v14518_v18 = vcombine.high %v6753_v62, %v6757_v6  ;;  %v6977_v19 = vld [vmem:[%s16682_s16 + $0xb10] sm:$0xff]  ;;  %v14517_v13 = vcombine.low %v6753_v62, %v6757_v6 }
 0x548   : > { %10109 = vmatpush1.bf16.msra.mxu1 %v14565_v63  ;;  %10157 = vmatprep.subr.bf16.mxu0 %v14662_v20  ;;  %v6981_v63 = vld [vmem:[%s16682_s16 + $0xb30] sm:$0xff] }
 0x549   : > { %10110 = vmatprep.subr.bf16.mxu1 %v14558_v24  ;;  %v6873_v20 = vld [vmem:[%s16682_s16 + $0x7d0] sm:$0xff]  ;;  %v14742_v58 = vcombine.high %v6977_v19, %v6981_v63  ;;  %v14741_v39 = vcombine.low %v6977_v19, %v6981_v63 }
 0x54a   : > { %v6877_v24 = vld [vmem:[%s16682_s16 + $0x7f0] sm:$0xff] }
 0x54b   : > { %10158 = vmatpush1.bf16.msra.mxu0 %v14661_v26  ;;  %v14638_v21 = vcombine.high %v6873_v20, %v6877_v24  ;;  %v6969_v26 = vld [vmem:[%s16682_s16 + $0xad0] sm:$0xff]  ;;  %v14637_v30 = vcombine.low %v6873_v20, %v6877_v24 }
 0x54c   : > { %10111 = vmatpush1.bf16.msra.mxu1 %v14557_v27  ;;  %10159 = vmatprep.subr.bf16.mxu0 %v14654_v29  ;;  %v6973_v27 = vld [vmem:[%s16682_s16 + $0xaf0] sm:$0xff] }
 0x54d   : > { %10112 = vmatprep.subr.bf16.mxu1 %v14550_v54  ;;  %v6865_v29 = vld [vmem:[%s16682_s16 + $0x790] sm:$0xff]  ;;  %v14734_v32 = vcombine.high %v6969_v26, %v6973_v27  ;;  %v14733_v38 = vcombine.low %v6969_v26, %v6973_v27 }
 0x54e   : > { %v6869_v54 = vld [vmem:[%s16682_s16 + $0x7b0] sm:$0xff] }
 0x54f   : > { %10160 = vmatpush1.bf16.msra.mxu0 %v14653_v33  ;;  %v14630_v31 = vcombine.high %v6865_v29, %v6869_v54  ;;  %v6961_v33 = vld [vmem:[%s16682_s16 + $0xa90] sm:$0xff]  ;;  %v14629_v2 = vcombine.low %v6865_v29, %v6869_v54 }
 0x550   : > { %10113 = vmatpush1.bf16.msra.mxu1 %v14549_v42  ;;  %10161 = vmatprep.subr.bf16.mxu0 %v14646_v45  ;;  %v6965_v42 = vld [vmem:[%s16682_s16 + $0xab0] sm:$0xff] }
 0x551   : > { %10114 = vmatprep.subr.bf16.mxu1 %v14542_v48  ;;  %v6857_v45 = vld [vmem:[%s16682_s16 + $0x750] sm:$0xff]  ;;  %v14726_v35 = vcombine.high %v6961_v33, %v6965_v42  ;;  %v14725_v46 = vcombine.low %v6961_v33, %v6965_v42 }
 0x552   : > { %v6861_v48 = vld [vmem:[%s16682_s16 + $0x770] sm:$0xff] }
 0x553   : > { %10162 = vmatpush1.bf16.msra.mxu0 %v14645_v49  ;;  %v14622_v36 = vcombine.high %v6857_v45, %v6861_v48  ;;  %v6953_v49 = vld [vmem:[%s16682_s16 + $0xa50] sm:$0xff]  ;;  %v14621_v43 = vcombine.low %v6857_v45, %v6861_v48 }
 0x554   : > { %10115 = vmatpush1.bf16.msra.mxu1 %v14541_v37  ;;  %10163 = vmatprep.subr.bf16.mxu0 %v14766_v55  ;;  %v6957_v37 = vld [vmem:[%s16682_s16 + $0xa70] sm:$0xff] }
 0x555   : > { %10116 = vmatprep.subr.bf16.mxu1 %v14534_v40  ;;  %v6849_v55 = vld [vmem:[%s16682_s16 + $0x710] sm:$0xff]  ;;  %v14718_v4 = vcombine.high %v6953_v49, %v6957_v37  ;;  %v14717_v25 = vcombine.low %v6953_v49, %v6957_v37 }
 0x556   : > { %v6853_v40 = vld [vmem:[%s16682_s16 + $0x730] sm:$0xff] }
 0x557   : > { %10164 = vmatpush2.bf16.msra.mxu0 %v14765_v52  ;;  %v14614_v51 = vcombine.high %v6849_v55, %v6853_v40  ;;  %v6945_v52 = vld [vmem:[%s16682_s16 + $0xa10] sm:$0xff]  ;;  %v14613_v61 = vcombine.low %v6849_v55, %v6853_v40 }
 0x558   : > { %10117 = vmatpush1.bf16.msra.mxu1 %v14533_v56  ;;  %10165 = vmatprep.subr.bf16.mxu0 %v14758_v16  ;;  %v6949_v56 = vld [vmem:[%s16682_s16 + $0xa30] sm:$0xff] }
 0x559   : > { %10118 = vmatprep.subr.bf16.mxu1 %v14526_v57  ;;  %v6841_v16 = vld [vmem:[%s16682_s16 + $0x6d0] sm:$0xff]  ;;  %v14710_v62 = vcombine.high %v6945_v52, %v6949_v56  ;;  %v14709_v19 = vcombine.low %v6945_v52, %v6949_v56  ;;  %v6650_v56 = vld [vmem:[%s16682_s16 + $0xd8] sm:$0xff] }
 0x55a   : > { %v6845_v57 = vld [vmem:[%s16682_s16 + $0x6f0] sm:$0xff] }
 0x55b   : > { %10166 = vmatpush2.bf16.msra.mxu0 %v14757_v7  ;;  %v14606_v6 = vcombine.high %v6841_v16, %v6845_v57  ;;  %v6682_v7 = vld [vmem:[%s16682_s16 + $0x1d8] sm:$0xff]  ;;  %v14605_v63 = vcombine.low %v6841_v16, %v6845_v57  ;;  %v6821_v33 = vld [vmem:[%s16682_s16 + $0x630] sm:$0xff] }
 0x55c   : > { %10119 = vmatpush1.bf16.msra.mxu1 %v14525_v8  ;;  %10167 = vmatprep.subr.bf16.mxu0 %v14750_v22  ;;  %v6686_v8 = vld [vmem:[%s16682_s16 + $0x1f8] sm:$0xff]  ;;  %v6833_v22 = vld [vmem:[%s16682_s16 + $0x690] sm:$0xff] }
 0x55d   : > { %10120 = vmatprep.subr.bf16.mxu1 %v14518_v18  ;;  %v6837_v18 = vld [vmem:[%s16682_s16 + $0x6b0] sm:$0xff]  ;;  %v14448_v20 = vcombine.high %v6682_v7, %v6686_v8  ;;  %v14447_v26 = vcombine.low %v6682_v7, %v6686_v8  ;;  %v6654_v16 = vld [vmem:[%s16682_s16 + $0xf8] sm:$0xff] }
 0x55e   : > { %v14598_v24 = vcombine.high %v6833_v22, %v6837_v18  ;;  %v14597_v27 = vcombine.low %v6833_v22, %v6837_v18  ;;  %v7065_v37 = vld [vmem:[%s16682_s16 + $0xdd0] sm:$0xff]  ;;  %v6646_v7 = vld [vmem:[%s16682_s16 + $0xb8] sm:$0xff] }
 0x55f   : > { %10168 = vmatpush2.bf16.msra.mxu0 %v14749_v12  ;;  %v6674_v12 = vld [vmem:[%s16682_s16 + $0x198] sm:$0xff]  ;;  %v7069_v55 = vld [vmem:[%s16682_s16 + $0xdf0] sm:$0xff] }
 0x560   : > { %10121 = vmatpush1.bf16.msra.mxu1 %v14517_v13  ;;  %10169 = vmatprep.subr.bf16.mxu0 %v14742_v58  ;;  %v6678_v13 = vld [vmem:[%s16682_s16 + $0x1b8] sm:$0xff]  ;;  %v6825_v58 = vld [vmem:[%s16682_s16 + $0x650] sm:$0xff] }
 0x561   : > { %10122 = vmatprep.subr.bf16.mxu1 %v14638_v21  ;;  %v6829_v21 = vld [vmem:[%s16682_s16 + $0x670] sm:$0xff]  ;;  %v14440_v29 = vcombine.high %v6674_v12, %v6678_v13  ;;  %v14439_v42 = vcombine.low %v6674_v12, %v6678_v13 }
 0x562   : > { %v14590_v54 = vcombine.high %v6825_v58, %v6829_v21  ;;  %v14589_v48 = vcombine.low %v6825_v58, %v6829_v21  ;;  %v7061_v52 = vld [vmem:[%s16682_s16 + $0xdb0] sm:$0xff]  ;;  %v6634_v58 = vld [vmem:[%s16682_s16 + $0x58] sm:$0xff] }
 0x563   : > { %10170 = vmatpush2.bf16.msra.mxu0 %v14741_v39  ;;  %v6666_v39 = vld [vmem:[%s16682_s16 + $0x158] sm:$0xff]  ;;  %v7049_v8 = vld [vmem:[%s16682_s16 + $0xd50] sm:$0xff] }
 0x564   : > { %10123 = vmatpush2.bf16.msra.mxu1 %v14637_v30  ;;  %10171 = vmatprep.subr.bf16.mxu0 %v14734_v32  ;;  %v6670_v30 = vld [vmem:[%s16682_s16 + $0x178] sm:$0xff]  ;;  %v7053_v22 = vld [vmem:[%s16682_s16 + $0xd70] sm:$0xff] }
 0x565   : > { %10124 = vmatprep.subr.bf16.mxu1 %v14630_v31  ;;  %v6817_v31 = vld [vmem:[%s16682_s16 + $0x610] sm:$0xff]  ;;  %v14814_v13 = vcombine.high %v7049_v8, %v7053_v22  ;;  %v6638_v21 = vld [vmem:[%s16682_s16 + $0x78] sm:$0xff] }
 0x567   : > { %10172 = vmatpush2.bf16.msra.mxu0 %v14733_v38  ;;  %v14432_v38 = vcombine.high %v6666_v39, %v6670_v30 }
 0x568   : > { %10125 = vmatpush2.bf16.msra.mxu1 %v14629_v2  ;;  %10173 = vmatprep.subr.bf16.mxu0 %v14726_v35  ;;  %v14582_v2 = vcombine.high %v6817_v31, %v6821_v33  ;;  %v6658_v35 = vld [vmem:[%s16682_s16 + $0x118] sm:$0xff] }
 0x569   : > { %10126 = vmatprep.subr.bf16.mxu1 %v14622_v36  ;;  %v6662_v36 = vld [vmem:[%s16682_s16 + $0x138] sm:$0xff] }
 0x56a   : > { %v14423_v57 = vcombine.low %v6658_v35, %v6662_v36 }
 0x56b   : > { %10174 = vmatpush2.bf16.msra.mxu0 %v14725_v46  ;;  %v14581_v46 = vcombine.low %v6817_v31, %v6821_v33 }
 0x56c   : > { %10127 = vmatpush2.bf16.msra.mxu1 %v14621_v43  ;;  %10175 = vmatprep.subr.bf16.mxu0 %v14718_v4  ;;  %v14424_v43 = vcombine.high %v6658_v35, %v6662_v36  ;;  %v14830_v4 = vcombine.high %v7065_v37, %v7069_v55 }
 0x56d   : > { %10128 = vmatprep.subr.bf16.mxu1 %v14614_v51  ;;  %v7057_v51 = vld [vmem:[%s16682_s16 + $0xd90] sm:$0xff] }
 0x56f   : > { %10176 = vmatpush2.bf16.msra.mxu0 %v14717_v25  ;;  %v14829_v25 = vcombine.low %v7065_v37, %v7069_v55  ;;  %v6746_v37 = vld [vmem:[%s16682_s16 + $0x3d8] sm:$0xff] }
 0x570   : > { %10129 = vmatpush2.bf16.msra.mxu1 %v14613_v61  ;;  %10177 = vmatprep.subr.bf16.mxu0 %v14710_v62  ;;  %v14822_v61 = vcombine.high %v7057_v51, %v7061_v52  ;;  %v14416_v62 = vcombine.high %v6650_v56, %v6654_v16  ;;  %v6750_v55 = vld [vmem:[%s16682_s16 + $0x3f8] sm:$0xff] }
 0x571   : > { %10130 = vmatprep.subr.bf16.mxu1 %v14606_v6  ;;  %v6642_v6 = vld [vmem:[%s16682_s16 + $0x98] sm:$0xff] }
 0x573   : > { %10178 = vmatpush2.bf16.msra.mxu0 %v14709_v19  ;;  %v14415_v19 = vcombine.low %v6650_v56, %v6654_v16  ;;  %v6742_v56 = vld [vmem:[%s16682_s16 + $0x3b8] sm:$0xff]  ;;  %v7017_v16 = vld [vmem:[%s16682_s16 + $0xc50] sm:$0xff] }
 0x574   : > { %10131 = vmatpush2.bf16.msra.mxu1 %v14605_v63  ;;  %10229 = vmatprep.subr.bf16.mxu0 %v14448_v20  ;;  %v14821_v20 = vcombine.low %v7057_v51, %v7061_v52  ;;  %v6738_v52 = vld [vmem:[%s16682_s16 + $0x398] sm:$0xff] }
 0x575   : > { %10132 = vmatprep.subr.bf16.mxu1 %v14598_v24  ;;  %v14408_v24 = vcombine.high %v6642_v6, %v6646_v7 }
 0x576   : > { %v18138_v32 = vpop.f32.mrf.mxu0  ;;  %10180 = vmatmul.mubr.bf16.vlgmr.msra.gmra.mxu0 %v17868_v34 }
 0x577   : > { %10230 = vmatpush1.bf16.msra.mxu0 %v14447_v26  ;;  %10261 = vmatprep.mubr.bf16.mxu0 %v17687_v28  ;;  %v14431_v28 = vcombine.low %v6666_v39, %v6670_v30  ;;  %v14813_v39 = vcombine.low %v7049_v8, %v7053_v22  ;;  %v14400_v30 = vcombine.high %v6634_v58, %v6638_v21  ;;  %v6734_v8 = vld [vmem:[%s16682_s16 + $0x378] sm:$0xff]  ;;  %v7009_v22 = vld [vmem:[%s16682_s16 + $0xc10] sm:$0xff] }
 0x578   : > { %10133 = vmatpush2.bf16.msra.mxu1 %v14597_v27  ;;  %v18144_v45 = vpop.f32.mrf.mxu0  ;;  %10231 = vmatprep.subr.bf16.mxu0 %v14440_v29  ;;  %v7045_v27 = vld [vmem:[%s16682_s16 + $0xd30] sm:$0xff] }
 0x579   : > { %10134 = vmatprep.subr.bf16.mxu1 %v14590_v54  ;;  %v14407_v54 = vcombine.low %v6642_v6, %v6646_v7  ;;  %v6730_v7 = vld [vmem:[%s16682_s16 + $0x358] sm:$0xff] }
 0x57a   : > { %v9939_v49 = vpop.f32.mrf.mxu0 }
 0x57b   : > { %10232 = vmatpush1.bf16.msra.mxu0 %v14439_v42  ;;  %v6626_v42 = vld [vmem:[%s16682_s16 + $0x18] sm:$0xff] }
 0x57c   : > { %10135 = vmatpush2.bf16.msra.mxu1 %v14589_v48  ;;  %v9940_v40 = vpop.f32.mrf.mxu0  ;;  %10233 = vmatprep.subr.bf16.mxu0 %v14432_v38  ;;  %v7033_v48 = vld [vmem:[%s16682_s16 + $0xcd0] sm:$0xff] }
 0x57d   : > { %10136 = vmatprep.subr.bf16.mxu1 %v14582_v2  ;;  %v7037_v38 = vld [vmem:[%s16682_s16 + $0xcf0] sm:$0xff]  ;;  %v14399_v2 = vcombine.low %v6634_v58, %v6638_v21  ;;  %v6726_v58 = vld [vmem:[%s16682_s16 + $0x338] sm:$0xff] }
 0x57e   : > { %v14798_v49 = vcombine.high %v7033_v48, %v7037_v38  ;;  %v7029_v40 = vld [vmem:[%s16682_s16 + $0xcb0] sm:$0xff] }
 0x57f   : > { %10234 = vmatpush1.bf16.msra.mxu0 %v14431_v28  ;;  %v7025_v28 = vld [vmem:[%s16682_s16 + $0xc90] sm:$0xff] }
 0x580   : > { %10137 = vmatpush2.bf16.msra.mxu1 %v14581_v46  ;;  %10235 = vmatprep.subr.bf16.mxu0 %v14424_v43  ;;  %v14797_v43 = vcombine.low %v7033_v48, %v7037_v38  ;;  %v14790_v51 = vcombine.high %v7025_v28, %v7029_v40  ;;  %v7129_v21 = vld [vmem:[%s16682_s16 + $0xfd0] sm:$0xff] }
 0x581   : > { %10188 = vmatprep.subr.bf16.mxu1 %v14830_v4  ;;  %v14512_v4 = vcombine.high %v6746_v37, %v6750_v55 }
 0x583   : > { %10139 = vmatmul.mubr.bf16.vlgmr.msra.gmra.mxu1 %v17782_v0  ;;  %v9894_v18 = vpop.f32.mrf.mxu1  ;;  %10236 = vmatpush1.bf16.msra.mxu0 %v14423_v57  ;;  %v7021_v57 = vld [vmem:[%s16682_s16 + $0xc70] sm:$0xff] }
 0x584   : > { %v18160_v63 = vadd.f32 %v9894_v18, %v18068_v11  ;;  %10189 = vmatpush1.bf16.msra.mxu1 %v14829_v25  ;;  %10220 = vmatprep.mubr.bf16.mxu1 %v17925_v5  ;;  %v7041_v11 = vld [vmem:[%s16682_s16 + $0xd10] sm:$0xff]  ;;  %v14511_v25 = vcombine.low %v6746_v37, %v6750_v55  ;;  %v14782_v6 = vcombine.high %v7017_v16, %v7021_v57 }
 0x585   : > { %v9896_v12 = vpop.f32.mrf.mxu1  ;;  %10190 = vmatprep.subr.bf16.mxu1 %v14822_v61  ;;  %10237 = vmatprep.subr.bf16.mxu0 %v14416_v62  ;;  %v14806_v33 = vcombine.high %v7041_v11, %v7045_v27  ;;  %v14805_v35 = vcombine.low %v7041_v11, %v7045_v27  ;;  %v14789_v61 = vcombine.low %v7025_v28, %v7029_v40  ;;  %v7013_v18 = vld [vmem:[%s16682_s16 + $0xc30] sm:$0xff] }
 0x586   : > { %v18166_v26 = vadd.f32 %v9896_v12, %v18072_v41  ;;  %v6630_v41 = vld [vmem:[%s16682_s16 + $0x38] sm:$0xff]  ;;  %v14504_v62 = vcombine.high %v6738_v52, %v6742_v56  ;;  %v14774_v12 = vcombine.high %v7009_v22, %v7013_v18  ;;  %v7133_v11 = vld [vmem:[%s16682_s16 + $0xff0] sm:$0xff]  ;;  %v14495_v27 = vcombine.low %v6730_v7, %v6734_v8 }
 0x587   : > { %v9898_v29 = vpop.f32.mrf.mxu1  ;;  %10238 = vmatpush1.bf16.msra.mxu0 %v14415_v19  ;;  %v14392_v36 = vcombine.high %v6626_v42, %v6630_v41  ;;  %v14391_v46 = vcombine.low %v6626_v42, %v6630_v41  ;;  %v14503_v19 = vcombine.low %v6738_v52, %v6742_v56  ;;  %v7125_v42 = vld [vmem:[%s16682_s16 + $0xfb0] sm:$0xff]  ;;  %v14893_v48 = vcombine.low %v7129_v21, %v7133_v11 }
 0x588   : > { %10191 = vmatpush1.bf16.msra.mxu1 %v14821_v20  ;;  %10239 = vmatprep.subr.bf16.mxu0 %v14408_v24  ;;  %v14781_v20 = vcombine.low %v7017_v16, %v7021_v57  ;;  %v14496_v24 = vcombine.high %v6730_v7, %v6734_v8  ;;  %v14773_v29 = vcombine.low %v7009_v22, %v7013_v18  ;;  %v7117_v37 = vld [vmem:[%s16682_s16 + $0xf70] sm:$0xff]  ;;  %vm10394_vm8 = vcmp.gt.f32.partialorder %v18166_v26, 0.0 }
 0x589   : > { %v9899_v31 = vpop.f32.mrf.mxu1  ;;  %10192 = vmatprep.subr.bf16.mxu1 %v14814_v13  ;;  %v6722_v13 = vld [vmem:[%s16682_s16 + $0x318] sm:$0xff]  ;;  %v7109_v52 = vld [vmem:[%s16682_s16 + $0xf30] sm:$0xff]  ;;  %vm10393_vm9 = vcmp.gt.f32.partialorder %v18160_v63, 0.0 }
 0x58a   : > { %v6718_v31 = vld [vmem:[%s16682_s16 + $0x2f8] sm:$0xff]  ;;  %v14487_v41 = vcombine.low %v6722_v13, %v6726_v58  ;;  %v7101_v7 = vld [vmem:[%s16682_s16 + $0xef0] sm:$0xff] }
 0x58b   : > { %10240 = vmatpush1.bf16.msra.mxu0 %v14407_v54  ;;  %v14488_v54 = vcombine.high %v6722_v13, %v6726_v58  ;;  %v7093_v13 = vld [vmem:[%s16682_s16 + $0xeb0] sm:$0xff] }
 0x58c   : > { %10193 = vmatpush1.bf16.msra.mxu1 %v14813_v39  ;;  %10241 = vmatprep.subr.bf16.mxu0 %v14400_v30  ;;  %v14894_v39 = vcombine.high %v7129_v21, %v7133_v11  ;;  %v6714_v30 = vld [vmem:[%s16682_s16 + $0x2d8] sm:$0xff] }
 0x58d   : > { %10194 = vmatprep.subr.bf16.mxu1 %v14806_v33  ;;  %v7121_v33 = vld [vmem:[%s16682_s16 + $0xf90] sm:$0xff]  ;;  %v14480_v38 = vcombine.high %v6714_v30, %v6718_v31  ;;  %v14479_v55 = vcombine.low %v6714_v30, %v6718_v31 }
 0x58e   : > { %v14885_v28 = vcombine.low %v7121_v33, %v7125_v42  ;;  %v7085_v30 = vld [vmem:[%s16682_s16 + $0xe70] sm:$0xff] }
 0x58f   : > { %10242 = vmatpush1.bf16.msra.mxu0 %v14399_v2  ;;  %v14886_v2 = vcombine.high %v7121_v33, %v7125_v42 }
 0x590   : > { %10195 = vmatpush1.bf16.msra.mxu1 %v14805_v35  ;;  %10243 = vmatprep.subr.bf16.mxu0 %v14392_v36  ;;  %v6706_v35 = vld [vmem:[%s16682_s16 + $0x298] sm:$0xff] }
 0x591   : > { %10196 = vmatprep.subr.bf16.mxu1 %v14798_v49  ;;  %v6710_v36 = vld [vmem:[%s16682_s16 + $0x2b8] sm:$0xff]  ;;  %v7113_v49 = vld [vmem:[%s16682_s16 + $0xf50] sm:$0xff] }
 0x592   : > { %v14472_v40 = vcombine.high %v6706_v35, %v6710_v36  ;;  %v14471_v56 = vcombine.low %v6706_v35, %v6710_v36  ;;  %v14877_v16 = vcombine.low %v7113_v49, %v7117_v37  ;;  %v7073_v35 = vld [vmem:[%s16682_s16 + $0xe10] sm:$0xff] }
 0x593   : > { %10244 = vmatpush1.bf16.msra.mxu0 %v14391_v46  ;;  %v14878_v46 = vcombine.high %v7113_v49, %v7117_v37  ;;  %v7077_v36 = vld [vmem:[%s16682_s16 + $0xe30] sm:$0xff] }
 0x594   : > { %10197 = vmatpush1.bf16.msra.mxu1 %v14797_v43  ;;  %10245 = vmatprep.subr.bf16.mxu0 %v14512_v4  ;;  %v6698_v43 = vld [vmem:[%s16682_s16 + $0x258] sm:$0xff] }
 0x595   : > { %10198 = vmatprep.subr.bf16.mxu1 %v14790_v51  ;;  %v6702_v4 = vld [vmem:[%s16682_s16 + $0x278] sm:$0xff]  ;;  %v7105_v51 = vld [vmem:[%s16682_s16 + $0xf10] sm:$0xff] }
 0x596   : > { %v14464_v57 = vcombine.high %v6698_v43, %v6702_v4  ;;  %v14463_v8 = vcombine.low %v6698_v43, %v6702_v4  ;;  %v14869_v22 = vcombine.low %v7105_v51, %v7109_v52  ;;  %v6810_v4 = vld [vmem:[%s16682_s16 + $0x5d8] sm:$0xff] }
 0x597   : > { %10246 = vmatpush2.bf16.msra.mxu0 %v14511_v25  ;;  %v14870_v25 = vcombine.high %v7105_v51, %v7109_v52  ;;  %v6814_v51 = vld [vmem:[%s16682_s16 + $0x5f8] sm:$0xff] }
 0x598   : > { %10199 = vmatpush1.bf16.msra.mxu1 %v14789_v61  ;;  %10247 = vmatprep.subr.bf16.mxu0 %v14504_v62  ;;  %v6690_v61 = vld [vmem:[%s16682_s16 + $0x218] sm:$0xff] }
 0x599   : > { %10200 = vmatprep.subr.bf16.mxu1 %v14782_v6  ;;  %v6694_v62 = vld [vmem:[%s16682_s16 + $0x238] sm:$0xff]  ;;  %v7097_v6 = vld [vmem:[%s16682_s16 + $0xed0] sm:$0xff] }
 0x59a   : > { %v14456_v18 = vcombine.high %v6690_v61, %v6694_v62  ;;  %v14455_v58 = vcombine.low %v6690_v61, %v6694_v62  ;;  %v14861_v21 = vcombine.low %v7097_v6, %v7101_v7  ;;  %v18230_v61 = vld [vmem:[%s16689_s13] sm:$0xff] }
 0x59b   : > { %10248 = vmatpush2.bf16.msra.mxu0 %v14503_v19  ;;  %v14862_v19 = vcombine.high %v7097_v6, %v7101_v7  ;;  %v7148_v62 = vrot.slane %v18230_v61, %v17294_v9  ;;  %v6806_v6 = vld [vmem:[%s16682_s16 + $0x5b8] sm:$0xff] }
 0x59c   : > { %10201 = vmatpush1.bf16.msra.mxu1 %v14781_v20  ;;  %10249 = vmatprep.subr.bf16.mxu0 %v14496_v24  ;;  %v6938_v20 = vld [vmem:[%s16682_s16 + $0x9d8] sm:$0xff] }
 0x59d   : > { %10202 = vmatprep.subr.bf16.mxu1 %v14774_v12  ;;  %v6942_v24 = vld [vmem:[%s16682_s16 + $0x9f8] sm:$0xff]  ;;  %v7089_v12 = vld [vmem:[%s16682_s16 + $0xe90] sm:$0xff] }
 0x59e   : > { %v14704_v11 = vcombine.high %v6938_v20, %v6942_v24  ;;  %v14703_v31 = vcombine.low %v6938_v20, %v6942_v24  ;;  %v14853_v33 = vcombine.low %v7089_v12, %v7093_v13  ;;  %v6906_v7 = vld [vmem:[%s16682_s16 + $0x8d8] sm:$0xff] }
 0x59f   : > { %10250 = vmatpush2.bf16.msra.mxu0 %v14495_v27  ;;  %v14854_v27 = vcombine.high %v7089_v12, %v7093_v13  ;;  %v6898_v12 = vld [vmem:[%s16682_s16 + $0x898] sm:$0xff] }
 0x5a0   : > { %10203 = vmatpush1.bf16.msra.mxu1 %v14773_v29  ;;  %10251 = vmatprep.subr.bf16.mxu0 %v14488_v54  ;;  %v6930_v29 = vld [vmem:[%s16682_s16 + $0x998] sm:$0xff] }
 0x5a1   : > { %10204 = vmatprep.subr.bf16.mxu1 %v14894_v39  ;;  %v6934_v54 = vld [vmem:[%s16682_s16 + $0x9b8] sm:$0xff]  ;;  %v7081_v39 = vld [vmem:[%s16682_s16 + $0xe50] sm:$0xff] }
 0x5a2   : > { %v14696_v42 = vcombine.high %v6930_v29, %v6934_v54  ;;  %v14695_v49 = vcombine.low %v6930_v29, %v6934_v54  ;;  %v6902_v13 = vld [vmem:[%s16682_s16 + $0x8b8] sm:$0xff] }
 0x5a3   : > { %10252 = vmatpush2.bf16.msra.mxu0 %v14487_v41  ;;  %v14846_v41 = vcombine.high %v7081_v39, %v7085_v30 }
 0x5a4   : > { %10205 = vmatpush2.bf16.msra.mxu1 %v14893_v48  ;;  %10253 = vmatprep.subr.bf16.mxu0 %v14480_v38  ;;  %v6922_v48 = vld [vmem:[%s16682_s16 + $0x958] sm:$0xff] }
 0x5a5   : > { %10206 = vmatprep.subr.bf16.mxu1 %v14886_v2  ;;  %v6926_v38 = vld [vmem:[%s16682_s16 + $0x978] sm:$0xff] }
 0x5a7   : > { %10254 = vmatpush2.bf16.msra.mxu0 %v14479_v55  ;;  %v14845_v55 = vcombine.low %v7081_v39, %v7085_v30 }
 0x5a8   : > { %10207 = vmatpush2.bf16.msra.mxu1 %v14885_v28  ;;  %10255 = vmatprep.subr.bf16.mxu0 %v14472_v40  ;;  %v14688_v28 = vcombine.high %v6922_v48, %v6926_v38  ;;  %v14838_v40 = vcombine.high %v7073_v35, %v7077_v36 }
 0x5a9   : > { %10208 = vmatprep.subr.bf16.mxu1 %v14878_v46  ;;  %v6914_v46 = vld [vmem:[%s16682_s16 + $0x918] sm:$0xff] }
 0x5ab   : > { %10256 = vmatpush2.bf16.msra.mxu0 %v14471_v56  ;;  %v14837_v56 = vcombine.low %v7073_v35, %v7077_v36  ;;  %v6790_v35 = vld [vmem:[%s16682_s16 + $0x538] sm:$0xff] }
 0x5ac   : > { %10209 = vmatpush2.bf16.msra.mxu1 %v14877_v16  ;;  %10257 = vmatprep.subr.bf16.mxu0 %v14464_v57  ;;  %v14576_v57 = vcombine.high %v6810_v4, %v6814_v51 }
 0x5ad   : > { %10210 = vmatprep.subr.bf16.mxu1 %v14870_v25  ;;  %v6802_v25 = vld [vmem:[%s16682_s16 + $0x598] sm:$0xff] }
 0x5ae   : > { %v14568_v20 = vcombine.high %v6802_v25, %v6806_v6  ;;  %v14567_v29 = vcombine.low %v6802_v25, %v6806_v6  ;;  %v6774_v25 = vld [vmem:[%s16682_s16 + $0x4b8] sm:$0xff] }
 0x5af   : > { %10258 = vmatpush2.bf16.msra.mxu0 %v14463_v8  ;;  %v6910_v8 = vld [vmem:[%s16682_s16 + $0x8f8] sm:$0xff] }
 0x5b0   : > { %10211 = vmatpush2.bf16.msra.mxu1 %v14869_v22  ;;  %10259 = vmatprep.subr.bf16.mxu0 %v14456_v18  ;;  %v7152_v18 = vrot.slane %v18230_v61, %v17297_v15  ;;  %v14672_v24 = vcombine.high %v6906_v7, %v6910_v8  ;;  %v14671_v54 = vcombine.low %v6906_v7, %v6910_v8 }
 0x5b1   : > { %10212 = vmatprep.subr.bf16.mxu1 %v14862_v19  ;;  %v14575_v19 = vcombine.low %v6810_v4, %v6814_v51  ;;  %v6782_v4 = vld [vmem:[%s16682_s16 + $0x4f8] sm:$0xff] }
 0x5b2   : > { %v9938_v39 = vadd.f32 %v18144_v45, %v7152_v18  ;;  %v6998_v18 = vld [vmem:[%s16682_s16 + $0xbb8] sm:$0xff] }
 0x5b3   : > { %10260 = vmatpush2.bf16.msra.mxu0 %v14455_v58  ;;  %v9936_v58 = vadd.f32 %v18138_v32, %v7148_v62 }
 0x5b4   : > { %10213 = vmatpush2.bf16.msra.mxu1 %v14861_v21  ;;  %10311 = vmatprep.subr.bf16.mxu0 %v14704_v11  ;;  %v6794_v21 = vld [vmem:[%s16682_s16 + $0x558] sm:$0xff] }
 0x5b5   : > { %10214 = vmatprep.subr.bf16.mxu1 %v14854_v27  ;;  %v6798_v11 = vld [vmem:[%s16682_s16 + $0x578] sm:$0xff] }
 0x5b6   : > { %v18216_v2 = vpop.f32.mrf.mxu0  ;;  %10262 = vmatmul.mubr.bf16.vlgmr.msra.gmra.mxu0 %v17780_v23  ;;  %v6918_v23 = vld [vmem:[%s16682_s16 + $0x938] sm:$0xff] }
 0x5b7   : > { %10312 = vmatpush1.bf16.msra.mxu0 %v14703_v31  ;;  %10343 = vmatprep.mubr.bf16.mxu0 %v17788_v50  ;;  %v14687_v50 = vcombine.low %v6922_v48, %v6926_v38  ;;  %v14680_v16 = vcombine.high %v6914_v46, %v6918_v23  ;;  %v14679_v22 = vcombine.low %v6914_v46, %v6918_v23  ;;  %v6786_v38 = vld [vmem:[%s16682_s16 + $0x518] sm:$0xff] }
 0x5b8   : > { %10215 = vmatpush2.bf16.msra.mxu1 %v14853_v33  ;;  %v18222_v37 = vpop.f32.mrf.mxu0  ;;  %10313 = vmatprep.subr.bf16.mxu0 %v14696_v42  ;;  %v14664_v31 = vcombine.high %v6898_v12, %v6902_v13  ;;  %v14560_v33 = vcombine.high %v6794_v21, %v6798_v11  ;;  %v6890_v42 = vld [vmem:[%s16682_s16 + $0x858] sm:$0xff]  ;;  %v14552_v46 = vcombine.high %v6786_v38, %v6790_v35 }
 0x5b9   : > { %10216 = vmatprep.subr.bf16.mxu1 %v14846_v41  ;;  %v6894_v41 = vld [vmem:[%s16682_s16 + $0x878] sm:$0xff] }
 0x5ba   : > { %v10021_v43 = vpop.f32.mrf.mxu0  ;;  %v6882_v23 = vld [vmem:[%s16682_s16 + $0x818] sm:$0xff]  ;;  %v14655_v51 = vcombine.low %v6890_v42, %v6894_v41 }
 0x5bb   : > { %10314 = vmatpush1.bf16.msra.mxu0 %v14695_v49  ;;  %v14559_v49 = vcombine.low %v6794_v21, %v6798_v11  ;;  %v6778_v43 = vld [vmem:[%s16682_s16 + $0x4d8] sm:$0xff] }
 0x5bc   : > { %10217 = vmatpush2.bf16.msra.mxu1 %v14845_v55  ;;  %v10022_v52 = vpop.f32.mrf.mxu0  ;;  %10315 = vmatprep.subr.bf16.mxu0 %v14688_v28  ;;  %v14656_v55 = vcombine.high %v6890_v42, %v6894_v41  ;;  %v14543_v6 = vcombine.low %v6778_v43, %v6782_v4  ;;  %v6986_v21 = vld [vmem:[%s16682_s16 + $0xb58] sm:$0xff] }
 0x5bd   : > { %10218 = vmatprep.subr.bf16.mxu1 %v14838_v40  ;;  %v6990_v11 = vld [vmem:[%s16682_s16 + $0xb78] sm:$0xff] }
 0x5be   : > { %v6874_v42 = vld [vmem:[%s16682_s16 + $0x7d8] sm:$0xff] }
 0x5bf   : > { %10316 = vmatpush1.bf16.msra.mxu0 %v14687_v50  ;;  %v14551_v50 = vcombine.low %v6786_v38, %v6790_v35  ;;  %v6878_v41 = vld [vmem:[%s16682_s16 + $0x7f8] sm:$0xff] }
 0x5c0   : > { %10219 = vmatpush2.bf16.msra.mxu1 %v14837_v56  ;;  %10317 = vmatprep.subr.bf16.mxu0 %v14680_v16  ;;  %v7002_v56 = vld [vmem:[%s16682_s16 + $0xbd8] sm:$0xff] }
 0x5c1   : > { %10270 = vmatprep.subr.bf16.mxu1 %v14576_v57  ;;  %v7006_v16 = vld [vmem:[%s16682_s16 + $0xbf8] sm:$0xff] }
 0x5c2   : > { %v6770_v57 = vld [vmem:[%s16682_s16 + $0x498] sm:$0xff]  ;;  %v14768_v7 = vcombine.high %v7002_v56, %v7006_v16 }
 0x5c3   : > { %v9976_v27 = vpop.f32.mrf.mxu1  ;;  %10221 = vmatmul.mubr.bf16.vlgmr.msra.gmra.mxu1 %v17927_v14  ;;  %10318 = vmatpush1.bf16.msra.mxu0 %v14679_v22  ;;  %v14536_v8 = vcombine.high %v6770_v57, %v6774_v25  ;;  %v6994_v22 = vld [vmem:[%s16682_s16 + $0xb98] sm:$0xff] }
 0x5c4   : > { %v9977_v30 = vadd.f32 %v9976_v27, %v9936_v58  ;;  %10271 = vmatpush1.bf16.msra.mxu1 %v14575_v19  ;;  %10302 = vmatprep.mubr.bf16.mxu1 %v17692_v17  ;;  %v14663_v17 = vcombine.low %v6898_v12, %v6902_v13  ;;  %v6762_v19 = vld [vmem:[%s16682_s16 + $0x458] sm:$0xff]  ;;  %v14535_v12 = vcombine.low %v6770_v57, %v6774_v25 }
 0x5c5   : > { %v9978_v32 = vpop.f32.mrf.mxu1  ;;  %10272 = vmatprep.subr.bf16.mxu1 %v14568_v20  ;;  %10319 = vmatprep.subr.bf16.mxu0 %v14672_v24  ;;  %v6766_v20 = vld [vmem:[%s16682_s16 + $0x478] sm:$0xff]  ;;  %v14767_v24 = vcombine.low %v7002_v56, %v7006_v16  ;;  %v14760_v13 = vcombine.high %v6994_v22, %v6998_v18 }
 0x5c6   : > { %v9979_v48 = vadd.f32 %v9978_v32, %v9938_v39  ;;  %v18252_v45 = vadd.f32 %v18216_v2, %v9977_v30  ;;  %v6886_v2 = vld [vmem:[%s16682_s16 + $0x838] sm:$0xff]  ;;  %v14528_v58 = vcombine.high %v6762_v19, %v6766_v20  ;;  %v14527_v39 = vcombine.low %v6762_v19, %v6766_v20 }
 0x5c7   : > { %v9980_v36 = vpop.f32.mrf.mxu1  ;;  %10320 = vmatpush1.bf16.msra.mxu0 %v14671_v54  ;;  %v14648_v52 = vcombine.high %v6882_v23, %v6886_v2  ;;  %v14647_v62 = vcombine.low %v6882_v23, %v6886_v2  ;;  %v6754_v27 = vld [vmem:[%s16682_s16 + $0x418] sm:$0xff]  ;;  %v14759_v54 = vcombine.low %v6994_v22, %v6998_v18  ;;  %v14752_v30 = vcombine.high %v6986_v21, %v6990_v11 }
 0x5c8   : > { %10273 = vmatpush1.bf16.msra.mxu1 %v14567_v29  ;;  %10321 = vmatprep.subr.bf16.mxu0 %v14664_v31  ;;  %v18255_v28 = vadd.f32 %v18222_v37, %v9979_v48  ;;  %v14544_v37 = vcombine.high %v6778_v43, %v6782_v4  ;;  %v6758_v29 = vld [vmem:[%s16682_s16 + $0x438] sm:$0xff]  ;;  %v14751_v48 = vcombine.low %v6986_v21, %v6990_v11 }
 0x5c9   : > { %v9981_v40 = vpop.f32.mrf.mxu1  ;;  %10274 = vmatprep.subr.bf16.mxu1 %v14560_v33  ;;  %v14520_v31 = vcombine.high %v6754_v27, %v6758_v29  ;;  %v6978_v32 = vld [vmem:[%s16682_s16 + $0xb18] sm:$0xff]  ;;  %v14519_v38 = vcombine.low %v6754_v27, %v6758_v29  ;;  %v14640_v36 = vcombine.high %v6874_v42, %v6878_v41  ;;  %v14639_v23 = vcombine.low %v6874_v42, %v6878_v41 }
 0x5ca   : > { %v6982_v33 = vld [vmem:[%s16682_s16 + $0xb38] sm:$0xff]  ;;  %v10402_v29 = vmul.f32 0.2, %v18166_v26 }
 0x5cb   : > { %10322 = vmatpush1.bf16.msra.mxu0 %v14663_v17  ;;  %v14744_v35 = vcombine.high %v6978_v32, %v6982_v33  ;;  %v6970_v17 = vld [vmem:[%s16682_s16 + $0xad8] sm:$0xff] }
 0x5cc   : > { %10275 = vmatpush1.bf16.msra.mxu1 %v14559_v49  ;;  %10323 = vmatprep.subr.bf16.mxu0 %v14656_v55  ;;  %v6974_v49 = vld [vmem:[%s16682_s16 + $0xaf8] sm:$0xff]  ;;  %v10410_v42 = vsel %vm10394_vm8, %v18166_v26, %v10402_v29 }
 0x5cd   : > { %10276 = vmatprep.subr.bf16.mxu1 %v14552_v46  ;;  %v6866_v55 = vld [vmem:[%s16682_s16 + $0x798] sm:$0xff]  ;;  %v14743_v46 = vcombine.low %v6978_v32, %v6982_v33  ;;  %v14736_v2 = vcombine.high %v6970_v17, %v6974_v49  ;;  %v15431_v32 = vld [vmem:[%s16692_s7 + $0xe4] ss:$16 sps:$4 sm:$0xff]  }
 0x5ce   : > { %v6870_v40 = vld [vmem:[%s16682_s16 + $0x7b8] sm:$0xff] }
 0x5cf   : > { %10324 = vmatpush1.bf16.msra.mxu0 %v14655_v51  ;;  %v14632_v43 = vcombine.high %v6866_v55, %v6870_v40  ;;  %v6962_v4 = vld [vmem:[%s16682_s16 + $0xa98] sm:$0xff]  ;;  %v14631_v56 = vcombine.low %v6866_v55, %v6870_v40 }
 0x5d0   : > { %10277 = vmatpush1.bf16.msra.mxu1 %v14551_v50  ;;  %10325 = vmatprep.subr.bf16.mxu0 %v14648_v52  ;;  %v6966_v51 = vld [vmem:[%s16682_s16 + $0xab8] sm:$0xff] }
 0x5d1   : > { %10278 = vmatprep.subr.bf16.mxu1 %v14544_v37  ;;  %v6858_v50 = vld [vmem:[%s16682_s16 + $0x758] sm:$0xff]  ;;  %v14735_v37 = vcombine.low %v6970_v17, %v6974_v49  ;;  %v14728_v16 = vcombine.high %v6962_v4, %v6966_v51  ;;  %v18303_v17 = vpack.c.bf16 %v10410_v42, %v10410_v42 }
 0x5d2   : > { %v6862_v52 = vld [vmem:[%s16682_s16 + $0x778] sm:$0xff] }
 0x5d3   : > { %10326 = vmatpush1.bf16.msra.mxu0 %v14647_v62  ;;  %v14624_v57 = vcombine.high %v6858_v50, %v6862_v52  ;;  %v6954_v25 = vld [vmem:[%s16682_s16 + $0xa58] sm:$0xff]  ;;  %v14623_v22 = vcombine.low %v6858_v50, %v6862_v52  ;;  %v15435_v52 = vld [vmem:[%s16692_s7 + $0xa0] ss:$16 sps:$4 sm:$0xff]  }
 0x5d4   : > { %10279 = vmatpush1.bf16.msra.mxu1 %v14543_v6  ;;  %10327 = vmatprep.subr.bf16.mxu0 %v14768_v7  ;;  %v6958_v62 = vld [vmem:[%s16682_s16 + $0xa78] sm:$0xff] }
 0x5d5   : > { %10280 = vmatprep.subr.bf16.mxu1 %v14536_v8  ;;  %v6850_v6 = vld [vmem:[%s16682_s16 + $0x718] sm:$0xff]  ;;  %v14727_v8 = vcombine.low %v6962_v4, %v6966_v51  ;;  %v14720_v18 = vcombine.high %v6954_v25, %v6958_v62 }
 0x5d6   : > { %v6854_v7 = vld [vmem:[%s16682_s16 + $0x738] sm:$0xff] }
 0x5d7   : > { %10328 = vmatpush2.bf16.msra.mxu0 %v14767_v24  ;;  %v14616_v19 = vcombine.high %v6850_v6, %v6854_v7  ;;  %v6946_v20 = vld [vmem:[%s16682_s16 + $0xa18] sm:$0xff]  ;;  %v14615_v21 = vcombine.low %v6850_v6, %v6854_v7  ;;  %v15438_v6 = vld [vmem:[%s16692_s7 + $0x80] ss:$16 sps:$4 sm:$0xff]  }
 0x5d8   : > { %10281 = vmatpush1.bf16.msra.mxu1 %v14535_v12  ;;  %10329 = vmatprep.subr.bf16.mxu0 %v14760_v13  ;;  %v6950_v24 = vld [vmem:[%s16682_s16 + $0xa38] sm:$0xff] }
 0x5d9   : > { %10282 = vmatprep.subr.bf16.mxu1 %v14528_v58  ;;  %v6842_v12 = vld [vmem:[%s16682_s16 + $0x6d8] sm:$0xff]  ;;  %v14719_v58 = vcombine.low %v6954_v25, %v6958_v62  ;;  %v14712_v11 = vcombine.high %v6946_v20, %v6950_v24 }
 0x5da   : > { %v6846_v13 = vld [vmem:[%s16682_s16 + $0x6f8] sm:$0xff] }
 0x5db   : > { %10330 = vmatpush2.bf16.msra.mxu0 %v14759_v54  ;;  %v14608_v27 = vcombine.high %v6842_v12, %v6846_v13  ;;  %v6834_v54 = vld [vmem:[%s16682_s16 + $0x698] sm:$0xff] }
 0x5dc   : > { %10283 = vmatpush1.bf16.msra.mxu1 %v14527_v39  ;;  %10331 = vmatprep.subr.bf16.mxu0 %v14752_v30  ;;  %v6838_v39 = vld [vmem:[%s16682_s16 + $0x6b8] sm:$0xff]  ;;  %v14711_v30 = vcombine.low %v6946_v20, %v6950_v24  ;;  %v15441_v24 = vld [vmem:[%s16692_s7 + $0x60] ss:$16 sps:$4 sm:$0xff]  }
 0x5dd   : > { %10284 = vmatprep.subr.bf16.mxu1 %v14520_v31  ;;  %v14607_v31 = vcombine.low %v6842_v12, %v6846_v13  ;;  %v14600_v33 = vcombine.high %v6834_v54, %v6838_v39  ;;  %v6826_v41 = vld [vmem:[%s16682_s16 + $0x658] sm:$0xff] }
 0x5de   : > { %v6818_v26 = vld [vmem:[%s16682_s16 + $0x618] sm:$0xff] }
 0x5df   : > { %10332 = vmatpush2.bf16.msra.mxu0 %v14751_v48  ;;  %v6830_v48 = vld [vmem:[%s16682_s16 + $0x678] sm:$0xff] }
 0x5e0   : > { %10285 = vmatpush1.bf16.msra.mxu1 %v14519_v38  ;;  %10333 = vmatprep.subr.bf16.mxu0 %v14744_v35  ;;  %v15429_v38 = vld [vmem:[%s16692_s7 + $0xe0] ss:$16 sps:$4 sm:$0xff]   ;;  %v14599_v35 = vcombine.low %v6834_v54, %v6838_v39  ;;  %v14592_v49 = vcombine.high %v6826_v41, %v6830_v48  ;;  %v6822_v40 = vld [vmem:[%s16682_s16 + $0x638] sm:$0xff] }
 0x5e1   : > { %10286 = vmatprep.subr.bf16.mxu1 %v14640_v36  ;;  %v15434_v36 = vld [vmem:[%s16692_s7 + $0xc4] ss:$16 sps:$4 sm:$0xff]   ;;  %v14584_v4 = vcombine.high %v6818_v26, %v6822_v40  ;;  %v7066_v51 = vld [vmem:[%s16682_s16 + $0xdd8] sm:$0xff] }
 0x5e2   : > { %v7070_v50 = vld [vmem:[%s16682_s16 + $0xdf8] sm:$0xff] }
 0x5e3   : > { %10334 = vmatpush2.bf16.msra.mxu0 %v14743_v46  ;;  %v15432_v46 = vld [vmem:[%s16692_s7 + $0xc0] ss:$16 sps:$4 sm:$0xff]   ;;  %v7058_v25 = vld [vmem:[%s16682_s16 + $0xd98] sm:$0xff]  ;;  %v14831_v7 = vcombine.low %v7066_v51, %v7070_v50 }
 0x5e4   : > { %10287 = vmatpush2.bf16.msra.mxu1 %v14639_v23  ;;  %10335 = vmatprep.subr.bf16.mxu0 %v14736_v2  ;;  %v14591_v2 = vcombine.low %v6826_v41, %v6830_v48  ;;  %v7062_v62 = vld [vmem:[%s16682_s16 + $0xdb8] sm:$0xff]  ;;  %v15452_v41 = vld [vmem:[%s16692_s7 + $0x4] ss:$16 sps:$4 sm:$0xff]  }
 0x5e5   : > { %10288 = vmatprep.subr.bf16.mxu1 %v14632_v43  ;;  %v15437_v43 = vld [vmem:[%s16692_s7 + $0xa4] ss:$16 sps:$4 sm:$0xff]   ;;  %v14823_v13 = vcombine.low %v7058_v25, %v7062_v62 }
 0x5e7   : > { %10336 = vmatpush2.bf16.msra.mxu0 %v14735_v37 }
 0x5e8   : > { %10289 = vmatpush2.bf16.msra.mxu1 %v14631_v56  ;;  %10337 = vmatprep.subr.bf16.mxu0 %v14728_v16  ;;  %v14583_v56 = vcombine.low %v6818_v26, %v6822_v40  ;;  %v15440_v16 = vld [vmem:[%s16692_s7 + $0x84] ss:$16 sps:$4 sm:$0xff]  }
 0x5e9   : > { %10290 = vmatprep.subr.bf16.mxu1 %v14624_v57  ;;  %v14832_v57 = vcombine.high %v7066_v51, %v7070_v50  ;;  %v15455_v26 = vld [vmem:[%s16692_s7 + $0x1e4] ss:$16 sps:$4 sm:$0xff]   ;;  %v7010_v50 = vld [vmem:[%s16682_s16 + $0xc18] sm:$0xff] }
 0x5eb   : > { %10338 = vmatpush2.bf16.msra.mxu0 %v14727_v8  ;;  %v14824_v8 = vcombine.high %v7058_v25, %v7062_v62  ;;  %v7130_v25 = vld [vmem:[%s16682_s16 + $0xfd8] sm:$0xff] }
 0x5ec   : > { %10291 = vmatpush2.bf16.msra.mxu1 %v14623_v22  ;;  %10339 = vmatprep.subr.bf16.mxu0 %v14720_v18  ;;  %v15443_v22 = vld [vmem:[%s16692_s7 + $0x64] ss:$16 sps:$4 sm:$0xff]   ;;  %v7050_v18 = vld [vmem:[%s16682_s16 + $0xd58] sm:$0xff] }
 0x5ed   : > { %10292 = vmatprep.subr.bf16.mxu1 %v14616_v19  ;;  %v7054_v19 = vld [vmem:[%s16682_s16 + $0xd78] sm:$0xff] }
 0x5ee   : > { %v14815_v54 = vcombine.low %v7050_v18, %v7054_v19  ;;  %v7134_v62 = vld [vmem:[%s16682_s16 + $0xff8] sm:$0xff] }
 0x5ef   : > { %10340 = vmatpush2.bf16.msra.mxu0 %v14719_v58  ;;  %v15446_v58 = vld [vmem:[%s16692_s7 + $0x44] ss:$16 sps:$4 sm:$0xff]  }
 0x5f0   : > { %10293 = vmatpush2.bf16.msra.mxu1 %v14615_v21  ;;  %10341 = vmatprep.subr.bf16.mxu0 %v14712_v11  ;;  %v14816_v11 = vcombine.high %v7050_v18, %v7054_v19  ;;  %v7122_v18 = vld [vmem:[%s16682_s16 + $0xf98] sm:$0xff] }
 0x5f1   : > { %10294 = vmatprep.subr.bf16.mxu1 %v14608_v27  ;;  %v7046_v27 = vld [vmem:[%s16682_s16 + $0xd38] sm:$0xff] }
 0x5f2   : > { %v7126_v19 = vld [vmem:[%s16682_s16 + $0xfb8] sm:$0xff] }
 0x5f3   : > { %10342 = vmatpush2.bf16.msra.mxu0 %v14711_v30 }
 0x5f4   : > { %10295 = vmatpush2.bf16.msra.mxu1 %v14607_v31  ;;  %11983 = vmatprep.subr.bf16.mxu0 %v15431_v32  ;;  %v7034_v31 = vld [vmem:[%s16682_s16 + $0xcd8] sm:$0xff] }
 0x5f5   : > { %10296 = vmatprep.subr.bf16.mxu1 %v14600_v33  ;;  %v7038_v32 = vld [vmem:[%s16682_s16 + $0xcf8] sm:$0xff]  ;;  %v15447_v33 = vld [vmem:[%s16692_s7 + $0x20] ss:$16 sps:$4 sm:$0xff]  }
 0x5f6   : > { %v18305_v55 = vpop.f32.mrf.mxu0  ;;  %10344 = vmatmul.mubr.bf16.vlgmr.msra.gmra.mxu0 %v17868_v34  ;;  %v14800_v48 = vcombine.high %v7034_v31, %v7038_v32 }
 0x5f7   : > { %11984 = vmatpush1.bf16.msra.mxu0 %v15429_v38  ;;  %12015 = vmatprep.mubr.bf16.mxu0 %v18303_v17  ;;  %v7026_v38 = vld [vmem:[%s16682_s16 + $0xc98] sm:$0xff] }
 0x5f8   : > { %10297 = vmatpush2.bf16.msra.mxu1 %v14599_v35  ;;  %v18312_v23 = vpop.f32.mrf.mxu0  ;;  %11985 = vmatprep.subr.bf16.mxu0 %v15434_v36  ;;  %v7030_v35 = vld [vmem:[%s16682_s16 + $0xcb8] sm:$0xff]  ;;  %v15450_v36 = vld [vmem:[%s16692_s7] ss:$16 sps:$4 sm:$0xff]  }
 0x5f9   : > { %10298 = vmatprep.subr.bf16.mxu1 %v14592_v49  ;;  %v14799_v49 = vcombine.low %v7034_v31, %v7038_v32  ;;  %v14792_v40 = vcombine.high %v7026_v38, %v7030_v35  ;;  %v15473_v32 = vld [vmem:[%s16692_s7 + $0x124] ss:$16 sps:$4 sm:$0xff]  }
 0x5fa   : > { %v10103_v34 = vpop.f32.mrf.mxu0 }
 0x5fb   : > { %11986 = vmatpush1.bf16.msra.mxu0 %v15432_v46  ;;  %v7018_v46 = vld [vmem:[%s16682_s16 + $0xc58] sm:$0xff]  ;;  %v15458_v34 = vld [vmem:[%s16692_s7 + $0x1c4] ss:$16 sps:$4 sm:$0xff]  }
 0x5fc   : > { %10299 = vmatpush2.bf16.msra.mxu1 %v14591_v2  ;;  %v10104_v37 = vpop.f32.mrf.mxu0  ;;  %11987 = vmatprep.subr.bf16.mxu0 %v15437_v43  ;;  %v7022_v2 = vld [vmem:[%s16682_s16 + $0xc78] sm:$0xff]  ;;  %v15453_v43 = vld [vmem:[%s16692_s7 + $0x1e0] ss:$16 sps:$4 sm:$0xff]  }
 0x5fd   : > { %10300 = vmatprep.subr.bf16.mxu1 %v14584_v4  ;;  %v14791_v4 = vcombine.low %v7026_v38, %v7030_v35  ;;  %v14784_v51 = vcombine.high %v7018_v46, %v7022_v2  ;;  %v15456_v37 = vld [vmem:[%s16692_s7 + $0x1c0] ss:$16 sps:$4 sm:$0xff]   ;;  %v15476_v35 = vld [vmem:[%s16692_s7 + $0x104] ss:$16 sps:$4 sm:$0xff]  }
 0x5ff   : > { %11988 = vmatpush1.bf16.msra.mxu0 %v15435_v52  ;;  %v7014_v52 = vld [vmem:[%s16682_s16 + $0xc38] sm:$0xff] }
 0x600   : > { %10301 = vmatpush2.bf16.msra.mxu1 %v14583_v56  ;;  %11989 = vmatprep.subr.bf16.mxu0 %v15440_v16  ;;  %v14783_v56 = vcombine.low %v7018_v46, %v7022_v2  ;;  %v15461_v16 = vld [vmem:[%s16692_s7 + $0x1a4] ss:$16 sps:$4 sm:$0xff]   ;;  %v15474_v46 = vld [vmem:[%s16692_s7 + $0x100] ss:$16 sps:$4 sm:$0xff]  }
 0x601   : > { %10352 = vmatprep.subr.bf16.mxu1 %v14832_v57  ;;  %v14776_v57 = vcombine.high %v7010_v50, %v7014_v52 }
 0x603   : > { %v10058_v20 = vpop.f32.mrf.mxu1  ;;  %10303 = vmatmul.mubr.bf16.vlgmr.msra.gmra.mxu1 %v17782_v0  ;;  %11990 = vmatpush1.bf16.msra.mxu0 %v15438_v6  ;;  %v7042_v0 = vld [vmem:[%s16682_s16 + $0xd18] sm:$0xff]  ;;  %v15459_v6 = vld [vmem:[%s16692_s7 + $0x1a0] ss:$16 sps:$4 sm:$0xff]  }
 0x604   : > { %v18328_v12 = vadd.f32 %v10058_v20, %v18252_v45  ;;  %10353 = vmatpush1.bf16.msra.mxu1 %v14831_v7  ;;  %10384 = vmatprep.mubr.bf16.mxu1 %v17925_v5  ;;  %v15444_v45 = vld [vmem:[%s16692_s7 + $0x40] ss:$16 sps:$4 sm:$0xff]   ;;  %v15449_v5 = vld [vmem:[%s16692_s7 + $0x24] ss:$16 sps:$4 sm:$0xff]   ;;  %v14808_v30 = vcombine.high %v7042_v0, %v7046_v27  ;;  %v14807_v42 = vcombine.low %v7042_v0, %v7046_v27  ;;  %v7118_v0 = vld [vmem:[%s16682_s16 + $0xf78] sm:$0xff] }
 0x605   : > { %v18332_v21 = vpop.f32.mrf.mxu1  ;;  %10354 = vmatprep.subr.bf16.mxu1 %v14824_v8  ;;  %11991 = vmatprep.subr.bf16.mxu0 %v15443_v22  ;;  %v14775_v7 = vcombine.low %v7010_v50, %v7014_v52  ;;  %v15464_v8 = vld [vmem:[%s16692_s7 + $0x184] ss:$16 sps:$4 sm:$0xff]   ;;  %v14896_v22 = vcombine.high %v7130_v25, %v7134_v62  ;;  %v15462_v20 = vld [vmem:[%s16692_s7 + $0x180] ss:$16 sps:$4 sm:$0xff]   ;;  %v7086_v50 = vld [vmem:[%s16682_s16 + $0xe78] sm:$0xff] }
 0x606   : > { %v15465_v27 = vld [vmem:[%s16692_s7 + $0x160] ss:$16 sps:$4 sm:$0xff]   ;;  %vm10395_vm11 = vcmp.gt.f32.partialorder %v18328_v12, 0.0 }
 0x607   : > { %v10062_v29 = vpop.f32.mrf.mxu1  ;;  %11992 = vmatpush1.bf16.msra.mxu0 %v15441_v24  ;;  %v14895_v24 = vcombine.low %v7130_v25, %v7134_v62  ;;  %v15486_v52 = vld [vmem:[%s16692_s7 + $0x4e0] ss:$16 sps:$4 sm:$0xff]   ;;  %v7078_v62 = vld [vmem:[%s16682_s16 + $0xe38] sm:$0xff] }
 0x608   : > { %10355 = vmatpush1.bf16.msra.mxu1 %v14823_v13  ;;  %11993 = vmatprep.subr.bf16.mxu0 %v15446_v58  ;;  %v15467_v13 = vld [vmem:[%s16692_s7 + $0x164] ss:$16 sps:$4 sm:$0xff]   ;;  %v14888_v58 = vcombine.high %v7122_v18, %v7126_v19  ;;  %v14887_v29 = vcombine.low %v7122_v18, %v7126_v19 }
 0x609   : > { %v10063_v39 = vpop.f32.mrf.mxu1  ;;  %10356 = vmatprep.subr.bf16.mxu1 %v14816_v11  ;;  %v7114_v11 = vld [vmem:[%s16682_s16 + $0xf58] sm:$0xff]  ;;  %v15500_v18 = vld [vmem:[%s16692_s7 + $0x4a4] ss:$16 sps:$4 sm:$0xff]  }
 0x60a   : > { %v7110_v39 = vld [vmem:[%s16682_s16 + $0xf38] sm:$0xff]  ;;  %v14879_v31 = vcombine.low %v7114_v11, %v7118_v0 }
 0x60b   : > { %11994 = vmatpush1.bf16.msra.mxu0 %v15444_v45  ;;  %v15470_v45 = vld [vmem:[%s16692_s7 + $0x144] ss:$16 sps:$4 sm:$0xff]  }
 0x60c   : > { %10357 = vmatpush1.bf16.msra.mxu1 %v14815_v54  ;;  %11995 = vmatprep.subr.bf16.mxu0 %v15449_v5  ;;  %v14880_v54 = vcombine.high %v7114_v11, %v7118_v0  ;;  %v7106_v5 = vld [vmem:[%s16682_s16 + $0xf18] sm:$0xff]  ;;  %v15479_v11 = vld [vmem:[%s16692_s7 + $0x2e4] ss:$16 sps:$4 sm:$0xff]   ;;  %v7156_v0 = vrot.slane %v18230_v61, %v1745_v59 }
 0x60d   : > { %10358 = vmatprep.subr.bf16.mxu1 %v14808_v30  ;;  %v15468_v30 = vld [vmem:[%s16692_s7 + $0x140] ss:$16 sps:$4 sm:$0xff]   ;;  %v14871_v38 = vcombine.low %v7106_v5, %v7110_v39 }
 0x60f   : > { %11996 = vmatpush1.bf16.msra.mxu0 %v15447_v33  ;;  %v14872_v33 = vcombine.high %v7106_v5, %v7110_v39  ;;  %v15482_v5 = vld [vmem:[%s16692_s7 + $0x2c4] ss:$16 sps:$4 sm:$0xff]  }
 0x610   : > { %10359 = vmatpush1.bf16.msra.mxu1 %v14807_v42  ;;  %11997 = vmatprep.subr.bf16.mxu0 %v15452_v41  ;;  %v7098_v42 = vld [vmem:[%s16682_s16 + $0xed8] sm:$0xff]  ;;  %v15512_v39 = vld [vmem:[%s16692_s7 + $0x464] ss:$16 sps:$4 sm:$0xff]  }
 0x611   : > { %10360 = vmatprep.subr.bf16.mxu1 %v14800_v48  ;;  %v7102_v41 = vld [vmem:[%s16682_s16 + $0xef8] sm:$0xff]  ;;  %v15471_v48 = vld [vmem:[%s16692_s7 + $0x120] ss:$16 sps:$4 sm:$0xff]  }
 0x612   : > { %v14863_v2 = vcombine.low %v7098_v42, %v7102_v41 }
 0x613   : > { %11998 = vmatpush1.bf16.msra.mxu0 %v15450_v36  ;;  %v10401_v36 = vmul.f32 0.2, %v18160_v63 }
 0x614   : > { %10361 = vmatpush1.bf16.msra.mxu1 %v14799_v49  ;;  %11999 = vmatprep.subr.bf16.mxu0 %v15455_v26  ;;  %v14864_v49 = vcombine.high %v7098_v42, %v7102_v41  ;;  %v7090_v26 = vld [vmem:[%s16682_s16 + $0xe98] sm:$0xff]  ;;  %v15518_v42 = vld [vmem:[%s16692_s7 + $0x444] ss:$16 sps:$4 sm:$0xff]  }
 0x615   : > { %10362 = vmatprep.subr.bf16.mxu1 %v14792_v40  ;;  %v7094_v40 = vld [vmem:[%s16682_s16 + $0xeb8] sm:$0xff] }
 0x617   : > { %12000 = vmatpush2.bf16.msra.mxu0 %v15453_v43  ;;  %v15488_v43 = vld [vmem:[%s16692_s7 + $0x4e4] ss:$16 sps:$4 sm:$0xff]  }
 0x618   : > { %10363 = vmatpush1.bf16.msra.mxu1 %v14791_v4  ;;  %12001 = vmatprep.subr.bf16.mxu0 %v15458_v34  ;;  %v10409_v4 = vsel %vm10393_vm9, %v18160_v63, %v10401_v36  ;;  %v14856_v34 = vcombine.high %v7090_v26, %v7094_v40  ;;  %v7074_v63 = vld [vmem:[%s16682_s16 + $0xe18] sm:$0xff]  ;;  %v15524_v36 = vld [vmem:[%s16692_s7 + $0x424] ss:$16 sps:$4 sm:$0xff]  }
 0x619   : > { %10364 = vmatprep.subr.bf16.mxu1 %v14784_v51  ;;  %v7082_v51 = vld [vmem:[%s16682_s16 + $0xe58] sm:$0xff]  ;;  %v14840_v19 = vcombine.high %v7074_v63, %v7078_v62  ;;  %s18626_s16 = scalar_lea.vmem %s18922_s1, %s15231_s19  ;;  %s16351_s19 = smov [#allocation21]  }
 0x61a   : > { %s16200_s20 = sshll.u32 %s16351_s19, 4  ;;  %s16201_s20 = int_to_ptr.vmem [resolvable:$false] %s16200_s20 }
 0x61b   : > { %12002 = vmatpush2.bf16.msra.mxu0 %v15456_v37  ;;  %v18384_v37 = vpack.c.bf16 %v10409_v4, %v10409_v4  ;;  %v15497_v4 = vld [vmem:[%s16692_s7 + $0x264] ss:$16 sps:$4 sm:$0xff]   ;;  %s16202_s28 = scalar_lea.vmem %s16201_s20, 64 }
 0x61c   : > { %10365 = vmatpush1.bf16.msra.mxu1 %v14783_v56  ;;  %12003 = vmatprep.subr.bf16.mxu0 %v15461_v16  ;;  %v14855_v56 = vcombine.low %v7090_v26, %v7094_v40  ;;  %v15494_v16 = vld [vmem:[%s16692_s7 + $0x4c4] ss:$16 sps:$4 sm:$0xff]  }
 0x61d   : > { %10366 = vmatprep.subr.bf16.mxu1 %v14776_v57  ;;  %v14848_v57 = vcombine.high %v7082_v51, %v7086_v50  ;;  %v15491_v40 = vld [vmem:[%s16692_s7 + $0x284] ss:$16 sps:$4 sm:$0xff]  }
 0x61f   : > { %12004 = vmatpush2.bf16.msra.mxu0 %v15459_v6  ;;  %v10061_v6 = vadd.f32 %v18332_v21, %v18255_v28  ;;  %v14839_v21 = vcombine.low %v7074_v63, %v7078_v62  ;;  %v15540_v63 = vld [vmem:[%s16692_s7 + $0x5c0] ss:$16 sps:$4 sm:$0xff]  }
 0x620   : > { %10367 = vmatpush1.bf16.msra.mxu1 %v14775_v7  ;;  %12005 = vmatprep.subr.bf16.mxu0 %v15464_v8  ;;  %v15492_v7 = vld [vmem:[%s16692_s7 + $0x4c0] ss:$16 sps:$4 sm:$0xff]  }
 0x621   : > { %10368 = vmatprep.subr.bf16.mxu1 %v14896_v22  ;;  %v14847_v22 = vcombine.low %v7082_v51, %v7086_v50  ;;  %vm10396_vm10 = vcmp.gt.f32.partialorder %v10061_v6, 0.0  ;;  %v15495_v51 = vld [vmem:[%s16692_s7 + $0x260] ss:$16 sps:$4 sm:$0xff]   ;;  %v15536_v50 = vld [vmem:[%s16692_s7 + $0x5e4] ss:$16 sps:$4 sm:$0xff]  }
 0x622   : > { %v15507_v62 = vld [vmem:[%s16692_s7 + $0x220] ss:$16 sps:$4 sm:$0xff]  }
 0x623   : > { %12006 = vmatpush2.bf16.msra.mxu0 %v15462_v20 }
 0x624   : > { %10369 = vmatpush2.bf16.msra.mxu1 %v14895_v24  ;;  %12007 = vmatprep.subr.bf16.mxu0 %v15467_v13  ;;  %v10404_v24 = vmul.f32 0.2, %v10061_v6  ;;  %v15498_v13 = vld [vmem:[%s16692_s7 + $0x4a0] ss:$16 sps:$4 sm:$0xff]  }
 0x625   : > { %10370 = vmatprep.subr.bf16.mxu1 %v14888_v58  ;;  %v15506_v58 = vld [vmem:[%s16692_s7 + $0x484] ss:$16 sps:$4 sm:$0xff]  }
 0x627   : > { %12008 = vmatpush2.bf16.msra.mxu0 %v15465_v27  ;;  %v10412_v27 = vsel %vm10396_vm10, %v10061_v6, %v10404_v24  ;;  %v15548_v6 = vld [vmem:[%s16692_s7 + $0x5a4] ss:$16 sps:$4 sm:$0xff]   ;;  %v15519_v24 = vld [vmem:[%s16692_s7 + $0x3e0] ss:$16 sps:$4 sm:$0xff]  }
 0x628   : > { %10371 = vmatpush2.bf16.msra.mxu1 %v14887_v29  ;;  %12009 = vmatprep.subr.bf16.mxu0 %v15470_v45  ;;  %v15504_v29 = vld [vmem:[%s16692_s7 + $0x480] ss:$16 sps:$4 sm:$0xff]   ;;  %v7160_v45 = vrot.slane %v18230_v61, %v1749_v1  ;;  %v18408_v59 = vpack.c.bf16 %v10412_v27, %v10412_v27 }
 0x629   : > { %10372 = vmatprep.subr.bf16.mxu1 %v14880_v54  ;;  %v15477_v54 = vld [vmem:[%s16692_s7 + $0x2e0] ss:$16 sps:$4 sm:$0xff]  }
 0x62a   : > { %v10102_v1 = vadd.f32 %v18312_v23, %v7160_v45  ;;  %v15516_v23 = vld [vmem:[%s16692_s7 + $0x440] ss:$16 sps:$4 sm:$0xff]   ;;  %v15569_v45 = vld [vmem:[%s16692_s7 + $0x524] ss:$16 sps:$4 sm:$0xff]  }
 0x62b   : > { %12010 = vmatpush2.bf16.msra.mxu0 %v15468_v30  ;;  %v10100_v30 = vadd.f32 %v18305_v55, %v7156_v0  ;;  %v15485_v55 = vld [vmem:[%s16692_s7 + $0x2a4] ss:$16 sps:$4 sm:$0xff]   ;;  %v15564_v27 = vld [vmem:[%s16692_s7 + $0x540] ss:$16 sps:$4 sm:$0xff]  }
 0x62c   : > { %10373 = vmatpush2.bf16.msra.mxu1 %v14879_v31  ;;  %12011 = vmatprep.subr.bf16.mxu0 %v15473_v32  ;;  %v15510_v32 = vld [vmem:[%s16692_s7 + $0x460] ss:$16 sps:$4 sm:$0xff]   ;;  %v15533_v0 = vld [vmem:[%s16692_s7 + $0x3a4] ss:$16 sps:$4 sm:$0xff]  }
 0x62d   : > { %10374 = vmatprep.subr.bf16.mxu1 %v14872_v33  ;;  %v15480_v33 = vld [vmem:[%s16692_s7 + $0x2c0] ss:$16 sps:$4 sm:$0xff]  }
 0x62f   : > { %12012 = vmatpush2.bf16.msra.mxu0 %v15471_v48 }
 0x630   : > { %10375 = vmatpush2.bf16.msra.mxu1 %v14871_v38  ;;  %12013 = vmatprep.subr.bf16.mxu0 %v15476_v35  ;;  %v15483_v35 = vld [vmem:[%s16692_s7 + $0x2a0] ss:$16 sps:$4 sm:$0xff]  }
 0x631   : > { %10376 = vmatprep.subr.bf16.mxu1 %v14864_v49 }
 0x633   : > { %12014 = vmatpush2.bf16.msra.mxu0 %v15474_v46  ;;  %v15522_v46 = vld [vmem:[%s16692_s7 + $0x420] ss:$16 sps:$4 sm:$0xff]  }
 0x634   : > { %10377 = vmatpush2.bf16.msra.mxu1 %v14863_v2  ;;  %12065 = vmatprep.subr.bf16.mxu0 %v15488_v43  ;;  %v15489_v2 = vld [vmem:[%s16692_s7 + $0x280] ss:$16 sps:$4 sm:$0xff]   ;;  %v15530_v43 = vld [vmem:[%s16692_s7 + $0x404] ss:$16 sps:$4 sm:$0xff]  }
 0x635   : > { %10378 = vmatprep.subr.bf16.mxu1 %v14856_v34  ;;  %v15528_v34 = vld [vmem:[%s16692_s7 + $0x400] ss:$16 sps:$4 sm:$0xff]  }
 0x636   : > { %v10181_v25 = vpop.f32.mrf.mxu0  ;;  %12016 = vmatmul.mubr.bf16.vlgmr.msra.gmra.mxu0 %v18384_v37 }
 0x637   : > { %12066 = vmatpush1.bf16.msra.mxu0 %v15486_v52  ;;  %v15503_v52 = vld [vmem:[%s16692_s7 + $0x244] ss:$16 sps:$4 sm:$0xff]  }
 0x638   : > { %10379 = vmatpush2.bf16.msra.mxu1 %v14855_v56  ;;  %v10183_v8 = vpop.f32.mrf.mxu0  ;;  %12067 = vmatprep.subr.bf16.mxu0 %v15494_v16  ;;  %v15534_v56 = vld [vmem:[%s16692_s7 + $0x5e0] ss:$16 sps:$4 sm:$0xff]  }
 0x639   : > { %10380 = vmatprep.subr.bf16.mxu1 %v14848_v57  ;;  %v15501_v16 = vld [vmem:[%s16692_s7 + $0x240] ss:$16 sps:$4 sm:$0xff]   ;;  %v15542_v57 = vld [vmem:[%s16692_s7 + $0x5c4] ss:$16 sps:$4 sm:$0xff]  }
 0x63a   : > { %v10185_v20 = vpop.f32.mrf.mxu0 }
 0x63b   : > { %12068 = vmatpush1.bf16.msra.mxu0 %v15492_v7  ;;  %v15515_v7 = vld [vmem:[%s16692_s7 + $0x204] ss:$16 sps:$4 sm:$0xff]   ;;  %v15552_v20 = vld [vmem:[%s16692_s7 + $0x580] ss:$16 sps:$4 sm:$0xff]  }
 0x63c   : > { %10381 = vmatpush2.bf16.msra.mxu1 %v14847_v22  ;;  %v10186_v28 = vpop.f32.mrf.mxu0  ;;  %12069 = vmatprep.subr.bf16.mxu0 %v15500_v18  ;;  %v15513_v22 = vld [vmem:[%s16692_s7 + $0x200] ss:$16 sps:$4 sm:$0xff]   ;;  %v15554_v18 = vld [vmem:[%s16692_s7 + $0x584] ss:$16 sps:$4 sm:$0xff]  }
 0x63d   : > { %10382 = vmatprep.subr.bf16.mxu1 %v14840_v19  ;;  %v15521_v19 = vld [vmem:[%s16692_s7 + $0x3e4] ss:$16 sps:$4 sm:$0xff]  }
 0x63e   : > { %v15527_v28 = vld [vmem:[%s16692_s7 + $0x3c4] ss:$16 sps:$4 sm:$0xff]  }
 0x63f   : > { %12070 = vmatpush1.bf16.msra.mxu0 %v15498_v13  ;;  %v15560_v13 = vld [vmem:[%s16692_s7 + $0x564] ss:$16 sps:$4 sm:$0xff]  }
 0x640   : > { %10383 = vmatpush2.bf16.msra.mxu1 %v14839_v21  ;;  %12071 = vmatprep.subr.bf16.mxu0 %v15506_v58  ;;  %v15558_v21 = vld [vmem:[%s16692_s7 + $0x560] ss:$16 sps:$4 sm:$0xff]  }
 0x641   : > { %12024 = vmatprep.subr.bf16.mxu1 %v15479_v11  ;;  %v15525_v58 = vld [vmem:[%s16692_s7 + $0x3c0] ss:$16 sps:$4 sm:$0xff]   ;;  %v15566_v11 = vld [vmem:[%s16692_s7 + $0x544] ss:$16 sps:$4 sm:$0xff]  }
 0x643   : > { %v10140_v31 = vpop.f32.mrf.mxu1  ;;  %10385 = vmatmul.mubr.bf16.vlgmr.msra.gmra.mxu1 %v17927_v14  ;;  %12072 = vmatpush1.bf16.msra.mxu0 %v15504_v29  ;;  %v15531_v29 = vld [vmem:[%s16692_s7 + $0x3a0] ss:$16 sps:$4 sm:$0xff]  }
 0x644   : > { %v10141_v61 = vadd.f32 %v10140_v31, %v10100_v30  ;;  %12025 = vmatpush1.bf16.msra.mxu1 %v15477_v54  ;;  %12056 = vmatprep.mubr.bf16.mxu1 %v18408_v59  ;;  %v15539_v54 = vld [vmem:[%s16692_s7 + $0x384] ss:$16 sps:$4 sm:$0xff]  }
 0x645   : > { %v10142_v41 = vpop.f32.mrf.mxu1  ;;  %12026 = vmatprep.subr.bf16.mxu1 %v15482_v5  ;;  %12073 = vmatprep.subr.bf16.mxu0 %v15512_v39  ;;  %v15567_v5 = vld [vmem:[%s16692_s7 + $0x520] ss:$16 sps:$4 sm:$0xff]   ;;  %v15572_v30 = vld [vmem:[%s16692_s7 + $0x504] ss:$16 sps:$4 sm:$0xff]  }
 0x646   : > { %v10143_v14 = vadd.f32 %v10142_v41, %v10102_v1  ;;  %v18417_v48 = vadd.f32 %v10181_v25, %v10141_v61  ;;  %v15509_v25 = vld [vmem:[%s16692_s7 + $0x224] ss:$16 sps:$4 sm:$0xff]   ;;  %v15537_v39 = vld [vmem:[%s16692_s7 + $0x380] ss:$16 sps:$4 sm:$0xff]   ;;  %v15575_v61 = vld [vmem:[%s16692_s7 + $0xec] ss:$16 sps:$4 sm:$0xff]  }
 0x647   : > { %v10144_v38 = vpop.f32.mrf.mxu1  ;;  %12074 = vmatpush1.bf16.msra.mxu0 %v15510_v32  ;;  %v15545_v31 = vld [vmem:[%s16692_s7 + $0x364] ss:$16 sps:$4 sm:$0xff]   ;;  %v15570_v32 = vld [vmem:[%s16692_s7 + $0x500] ss:$16 sps:$4 sm:$0xff]  }
 0x648   : > { %12027 = vmatpush1.bf16.msra.mxu1 %v15480_v33  ;;  %12075 = vmatprep.subr.bf16.mxu0 %v15518_v42  ;;  %v18422_v49 = vadd.f32 %v10183_v8, %v10143_v14  ;;  %v15546_v8 = vld [vmem:[%s16692_s7 + $0x5a0] ss:$16 sps:$4 sm:$0xff]   ;;  %v15551_v33 = vld [vmem:[%s16692_s7 + $0x344] ss:$16 sps:$4 sm:$0xff]  }
 0x649   : > { %v10145_v26 = vpop.f32.mrf.mxu1  ;;  %12028 = vmatprep.subr.bf16.mxu1 %v15485_v55  ;;  %v15543_v1 = vld [vmem:[%s16692_s7 + $0x360] ss:$16 sps:$4 sm:$0xff]   ;;  %v15557_v41 = vld [vmem:[%s16692_s7 + $0x324] ss:$16 sps:$4 sm:$0xff]  }
 0x64a   : > { %v15549_v42 = vld [vmem:[%s16692_s7 + $0x340] ss:$16 sps:$4 sm:$0xff]  }
 0x64b   : > { %12076 = vmatpush1.bf16.msra.mxu0 %v15516_v23  ;;  %v15555_v38 = vld [vmem:[%s16692_s7 + $0x320] ss:$16 sps:$4 sm:$0xff]   ;;  %v15563_v23 = vld [vmem:[%s16692_s7 + $0x304] ss:$16 sps:$4 sm:$0xff]  }
 0x64c   : > { %12029 = vmatpush1.bf16.msra.mxu1 %v15483_v35  ;;  %12077 = vmatprep.subr.bf16.mxu0 %v15524_v36  ;;  %v10403_v35 = vmul.f32 0.2, %v18328_v12 }
 0x64d   : > { %12030 = vmatprep.subr.bf16.mxu1 %v15491_v40  ;;  %v15561_v40 = vld [vmem:[%s16692_s7 + $0x300] ss:$16 sps:$4 sm:$0xff]  }
 0x64f   : > { %12078 = vmatpush1.bf16.msra.mxu0 %v15522_v46  ;;  %v15623_v46 = vld [vmem:[%s16692_s7 + $0x6e4] ss:$16 sps:$4 sm:$0xff]  }
 0x650   : > { %12031 = vmatpush1.bf16.msra.mxu1 %v15489_v2  ;;  %12079 = vmatprep.subr.bf16.mxu0 %v15530_v43  ;;  %v10411_v2 = vsel %vm10395_vm11, %v18328_v12, %v10403_v35  ;;  %v15621_v43 = vld [vmem:[%s16692_s7 + $0x6e0] ss:$16 sps:$4 sm:$0xff]   ;;  %v15683_v35 = vld [vmem:[%s16692_s7 + $0x7a4] ss:$16 sps:$4 sm:$0xff]  }
 0x651   : > { %12032 = vmatprep.subr.bf16.mxu1 %v15497_v4  ;;  %v18479_v4 = vpack.c.bf16 %v10411_v2, %v10411_v2  ;;  %v15597_v2 = vld [vmem:[%s16692_s7 + $0x1e8] ss:$16 sps:$4 sm:$0xff]  }
 0x653   : > { %12080 = vmatpush1.bf16.msra.mxu0 %v15528_v34  ;;  %v15629_v34 = vld [vmem:[%s16692_s7 + $0x6c4] ss:$16 sps:$4 sm:$0xff]  }
 0x654   : > { %12033 = vmatpush1.bf16.msra.mxu1 %v15495_v51  ;;  %12081 = vmatprep.subr.bf16.mxu0 %v15536_v50 }
 0x655   : > { %12034 = vmatprep.subr.bf16.mxu1 %v15503_v52  ;;  %v15627_v52 = vld [vmem:[%s16692_s7 + $0x6c0] ss:$16 sps:$4 sm:$0xff]  }
 0x657   : > { %12082 = vmatpush2.bf16.msra.mxu0 %v15534_v56 }
 0x658   : > { %12035 = vmatpush1.bf16.msra.mxu1 %v15501_v16  ;;  %12083 = vmatprep.subr.bf16.mxu0 %v15542_v57  ;;  %v15635_v16 = vld [vmem:[%s16692_s7 + $0x6a4] ss:$16 sps:$4 sm:$0xff]  }
 0x659   : > { %12036 = vmatprep.subr.bf16.mxu1 %v15509_v25 }
 0x65b   : > { %12084 = vmatpush2.bf16.msra.mxu0 %v15540_v63 }
 0x65c   : > { %12037 = vmatpush1.bf16.msra.mxu1 %v15507_v62  ;;  %12085 = vmatprep.subr.bf16.mxu0 %v15548_v6  ;;  %v15633_v62 = vld [vmem:[%s16692_s7 + $0x6a0] ss:$16 sps:$4 sm:$0xff]  }
 0x65d   : > { %12038 = vmatprep.subr.bf16.mxu1 %v15515_v7  ;;  %v15641_v7 = vld [vmem:[%s16692_s7 + $0x684] ss:$16 sps:$4 sm:$0xff]  }
 0x65f   : > { %12086 = vmatpush2.bf16.msra.mxu0 %v15546_v8 }
 0x660   : > { %12039 = vmatpush1.bf16.msra.mxu1 %v15513_v22  ;;  %12087 = vmatprep.subr.bf16.mxu0 %v15554_v18  ;;  %v15573_v18 = vld [vmem:[%s16692_s7 + $0xe8] ss:$16 sps:$4 sm:$0xff]  }
 0x661   : > { %12040 = vmatprep.subr.bf16.mxu1 %v15521_v19 }
 0x663   : > { %12088 = vmatpush2.bf16.msra.mxu0 %v15552_v20  ;;  %v15639_v20 = vld [vmem:[%s16692_s7 + $0x680] ss:$16 sps:$4 sm:$0xff]  }
 0x664   : > { %12041 = vmatpush2.bf16.msra.mxu1 %v15519_v24  ;;  %12089 = vmatprep.subr.bf16.mxu0 %v15560_v13  ;;  %v15647_v24 = vld [vmem:[%s16692_s7 + $0x664] ss:$16 sps:$4 sm:$0xff]   ;;  %v15576_v13 = vld [vmem:[%s16692_s7 + $0xc8] ss:$16 sps:$4 sm:$0xff]  }
 0x665   : > { %12042 = vmatprep.subr.bf16.mxu1 %v15527_v28  ;;  %v15581_v28 = vld [vmem:[%s16692_s7 + $0xac] ss:$16 sps:$4 sm:$0xff]  }
 0x667   : > { %12090 = vmatpush2.bf16.msra.mxu0 %v15558_v21  ;;  %v15645_v21 = vld [vmem:[%s16692_s7 + $0x660] ss:$16 sps:$4 sm:$0xff]  }
 0x668   : > { %12043 = vmatpush2.bf16.msra.mxu1 %v15525_v58  ;;  %12091 = vmatprep.subr.bf16.mxu0 %v15566_v11  ;;  %v15653_v58 = vld [vmem:[%s16692_s7 + $0x644] ss:$16 sps:$4 sm:$0xff]   ;;  %v15579_v11 = vld [vmem:[%s16692_s7 + $0xa8] ss:$16 sps:$4 sm:$0xff]  }
 0x669   : > { %12044 = vmatprep.subr.bf16.mxu1 %v15533_v0  ;;  %v15584_v0 = vld [vmem:[%s16692_s7 + $0x8c] ss:$16 sps:$4 sm:$0xff]  }
 0x66b   : > { %12092 = vmatpush2.bf16.msra.mxu0 %v15564_v27  ;;  %v15651_v27 = vld [vmem:[%s16692_s7 + $0x640] ss:$16 sps:$4 sm:$0xff]  }
 0x66c   : > { %12045 = vmatpush2.bf16.msra.mxu1 %v15531_v29  ;;  %12093 = vmatprep.subr.bf16.mxu0 %v15569_v45  ;;  %v15582_v29 = vld [vmem:[%s16692_s7 + $0x88] ss:$16 sps:$4 sm:$0xff]   ;;  %v15587_v45 = vld [vmem:[%s16692_s7 + $0x6c] ss:$16 sps:$4 sm:$0xff]  }
 0x66d   : > { %12046 = vmatprep.subr.bf16.mxu1 %v15539_v54  ;;  %v15657_v54 = vld [vmem:[%s16692_s7 + $0x620] ss:$16 sps:$4 sm:$0xff]  }
 0x66f   : > { %12094 = vmatpush2.bf16.msra.mxu0 %v15567_v5  ;;  %v15665_v5 = vld [vmem:[%s16692_s7 + $0x604] ss:$16 sps:$4 sm:$0xff]  }
 0x670   : > { %12047 = vmatpush2.bf16.msra.mxu1 %v15537_v39  ;;  %12095 = vmatprep.subr.bf16.mxu0 %v15572_v30  ;;  %v15585_v39 = vld [vmem:[%s16692_s7 + $0x68] ss:$16 sps:$4 sm:$0xff]   ;;  %v15590_v30 = vld [vmem:[%s16692_s7 + $0x4c] ss:$16 sps:$4 sm:$0xff]  }
 0x671   : > { %12048 = vmatprep.subr.bf16.mxu1 %v15545_v31  ;;  %v15663_v31 = vld [vmem:[%s16692_s7 + $0x600] ss:$16 sps:$4 sm:$0xff]  }
 0x673   : > { %12096 = vmatpush2.bf16.msra.mxu0 %v15570_v32  ;;  %v15671_v32 = vld [vmem:[%s16692_s7 + $0x7e4] ss:$16 sps:$4 sm:$0xff]  }
 0x674   : > { %12049 = vmatpush2.bf16.msra.mxu1 %v15543_v1  ;;  %12147 = vmatprep.subr.bf16.mxu0 %v15575_v61  ;;  %v15588_v1 = vld [vmem:[%s16692_s7 + $0x48] ss:$16 sps:$4 sm:$0xff]   ;;  %v15593_v61 = vld [vmem:[%s16692_s7 + $0x2c] ss:$16 sps:$4 sm:$0xff]  }
 0x675   : > { %12050 = vmatprep.subr.bf16.mxu1 %v15551_v33  ;;  %v15669_v33 = vld [vmem:[%s16692_s7 + $0x7e0] ss:$16 sps:$4 sm:$0xff]  }
 0x676   : > { %v18467_v55 = vpop.f32.mrf.mxu0 }
 0x678   : > { %12051 = vmatpush2.bf16.msra.mxu1 %v15549_v42  ;;  %v18469_v14 = vpop.f32.mrf.mxu0  ;;  %v15677_v42 = vld [vmem:[%s16692_s7 + $0x7c4] ss:$16 sps:$4 sm:$0xff]  }
 0x679   : > { %12052 = vmatprep.subr.bf16.mxu1 %v15557_v41  ;;  %v15591_v41 = vld [vmem:[%s16692_s7 + $0x28] ss:$16 sps:$4 sm:$0xff]  }
 0x67a   : > { %v10267_v36 = vpop.f32.mrf.mxu0 }
 0x67b   : > { %v15594_v36 = vld [vmem:[%s16692_s7 + $0x8] ss:$16 sps:$4 sm:$0xff]  }
 0x67c   : > { %12053 = vmatpush2.bf16.msra.mxu1 %v15555_v38  ;;  %v10268_v26 = vpop.f32.mrf.mxu0  ;;  %v15596_v38 = vld [vmem:[%s16692_s7 + $0xc] ss:$16 sps:$4 sm:$0xff]  }
 0x67d   : > { %12054 = vmatprep.subr.bf16.mxu1 %v15563_v23  ;;  %v15675_v23 = vld [vmem:[%s16692_s7 + $0x7c0] ss:$16 sps:$4 sm:$0xff]   ;;  %v15599_v26 = vld [vmem:[%s16692_s7 + $0x1ec] ss:$16 sps:$4 sm:$0xff]  }
 0x680   : > { %12055 = vmatpush2.bf16.msra.mxu1 %v15561_v40  ;;  %v15681_v40 = vld [vmem:[%s16692_s7 + $0x7a0] ss:$16 sps:$4 sm:$0xff]  }
 0x681   : > { %12106 = vmatprep.subr.bf16.mxu1 %v15623_v46  ;;  %v15689_v46 = vld [vmem:[%s16692_s7 + $0x784] ss:$16 sps:$4 sm:$0xff]  }
 0x683   : > { %v10222_v51 = vpop.f32.mrf.mxu1  ;;  %12057 = vmatmul.mubr.bf16.vlgmr.msra.gmra.mxu1 %v18479_v4 }
 0x684   : > { %v10223_v50 = vadd.f32 %v10222_v51, %v18417_v48  ;;  %12107 = vmatpush1.bf16.msra.mxu1 %v15621_v43  ;;  %v15602_v43 = vld [vmem:[%s16692_s7 + $0x1cc] ss:$16 sps:$4 sm:$0xff]   ;;  %v15695_v51 = vld [vmem:[%s16692_s7 + $0x764] ss:$16 sps:$4 sm:$0xff]  }
 0x685   : > { %v10224_v56 = vpop.f32.mrf.mxu1  ;;  %12108 = vmatprep.subr.bf16.mxu1 %v15629_v34  ;;  %v15687_v34 = vld [vmem:[%s16692_s7 + $0x780] ss:$16 sps:$4 sm:$0xff]  }
 0x686   : > { %vm10397_vm12 = vcmp.gt.f32.partialorder %v10223_v50, 0.0  ;;  %v10405_v12 = vmul.f32 0.2, %v10223_v50  ;;  %v10225_v57 = vadd.f32 %v10224_v56, %v18422_v49  ;;  %v15578_v49 = vld [vmem:[%s16692_s7 + $0xcc] ss:$16 sps:$4 sm:$0xff]  }
 0x687   : > { %v10226_v25 = vpop.f32.mrf.mxu1  ;;  %v15693_v56 = vld [vmem:[%s16692_s7 + $0x760] ss:$16 sps:$4 sm:$0xff]  }
 0x688   : > { %vm10398_vm13 = vcmp.gt.f32.partialorder %v10225_v57, 0.0  ;;  %v10406_v63 = vmul.f32 0.2, %v10225_v57  ;;  %12109 = vmatpush1.bf16.msra.mxu1 %v15627_v52  ;;  %v10413_v48 = vsel %vm10397_vm12, %v10223_v50, %v10405_v12  ;;  %v15600_v50 = vld [vmem:[%s16692_s7 + $0x1c8] ss:$16 sps:$4 sm:$0xff]  }
 0x689   : > { %v10227_v6 = vpop.f32.mrf.mxu1  ;;  %12110 = vmatprep.subr.bf16.mxu1 %v15635_v16  ;;  %v18492_v19 = vpack.c.bf16 %v10413_v48, %v10413_v48  ;;  %v15605_v52 = vld [vmem:[%s16692_s7 + $0x1ac] ss:$16 sps:$4 sm:$0xff]   ;;  %v15701_v16 = vld [vmem:[%s16692_s7 + $0x744] ss:$16 sps:$4 sm:$0xff]   ;;  %v15603_v12 = vld [vmem:[%s16692_s7 + $0x1a8] ss:$16 sps:$4 sm:$0xff]  }
 0x68a   : > { %v10414_v8 = vsel %vm10398_vm13, %v10225_v57, %v10406_v63  ;;  %v15608_v57 = vld [vmem:[%s16692_s7 + $0x18c] ss:$16 sps:$4 sm:$0xff]   ;;  %v15699_v25 = vld [vmem:[%s16692_s7 + $0x740] ss:$16 sps:$4 sm:$0xff]   ;;  %v15707_v63 = vld [vmem:[%s16692_s7 + $0x724] ss:$16 sps:$4 sm:$0xff]  }
 0x68b   : > { %v18489_v22 = vpack.c.bf16 %v10414_v8, %v10414_v8  ;;  %v15606_v48 = vld [vmem:[%s16692_s7 + $0x188] ss:$16 sps:$4 sm:$0xff]   ;;  %v15705_v8 = vld [vmem:[%s16692_s7 + $0x720] ss:$16 sps:$4 sm:$0xff]  }
 0x68c   : > { %12111 = vmatpush1.bf16.msra.mxu1 %v15633_v62 }
 0x68d   : > { %12097 = vmatprep.mubr.bf16.mxu0 %v18489_v22  ;;  %12112 = vmatprep.subr.bf16.mxu1 %v15641_v7  ;;  %v15611_v7 = vld [vmem:[%s16692_s7 + $0x16c] ss:$16 sps:$4 sm:$0xff]  }
 0x68e   : > { %12098 = vmatmul.mubr.bf16.vlgmr.msra.gmra.mxu0 %v18492_v19 }
 0x68f   : > { %12148 = vmatpush1.bf16.msra.mxu0 %v15573_v18  ;;  %12179 = vmatprep.mubr.bf16.mxu0 %v18303_v17  ;;  %v15659_v17 = vld [vmem:[%s16692_s7 + $0x624] ss:$16 sps:$4 sm:$0xff]  }
 0x690   : > { %12149 = vmatprep.subr.bf16.mxu0 %v15578_v49  ;;  %12113 = vmatpush1.bf16.msra.mxu1 %v15639_v20  ;;  %v15713_v18 = vld [vmem:[%s16692_s7 + $0x704] ss:$16 sps:$4 sm:$0xff]   ;;  %v15609_v20 = vld [vmem:[%s16692_s7 + $0x168] ss:$16 sps:$4 sm:$0xff]  }
 0x691   : > { %12114 = vmatprep.subr.bf16.mxu1 %v15647_v24 }
 0x693   : > { %12150 = vmatpush1.bf16.msra.mxu0 %v15576_v13  ;;  %v15614_v13 = vld [vmem:[%s16692_s7 + $0x14c] ss:$16 sps:$4 sm:$0xff]  }
 0x694   : > { %12151 = vmatprep.subr.bf16.mxu0 %v15581_v28  ;;  %12115 = vmatpush1.bf16.msra.mxu1 %v15645_v21  ;;  %v15711_v28 = vld [vmem:[%s16692_s7 + $0x700] ss:$16 sps:$4 sm:$0xff]   ;;  %v15719_v21 = vld [vmem:[%s16692_s7 + $0x2ec] ss:$16 sps:$4 sm:$0xff]  }
 0x695   : > { %12116 = vmatprep.subr.bf16.mxu1 %v15653_v58  ;;  %v15887_v58 = vld [vmem:[%s16689_s13] sm:$0xff]  ;;  %s18742_s13 = scalar_lea.vmem [#allocation19], %s15295_s3 }
 0x697   : > { %12152 = vmatpush1.bf16.msra.mxu0 %v15579_v11  ;;  %v7164_v11 = vrot.slane %v15887_v58, %v1753_v60 }
 0x698   : > { %12153 = vmatprep.subr.bf16.mxu0 %v15584_v0  ;;  %12117 = vmatpush1.bf16.msra.mxu1 %v15651_v27  ;;  %v15612_v0 = vld [vmem:[%s16692_s7 + $0x148] ss:$16 sps:$4 sm:$0xff]   ;;  %v7168_v27 = vrot.slane %v15887_v58, %v1757_v47 }
 0x699   : > { %12118 = vmatprep.subr.bf16.mxu1 %v15659_v17  ;;  %v15617_v17 = vld [vmem:[%s16692_s7 + $0x12c] ss:$16 sps:$4 sm:$0xff]  }
 0x69b   : > { %12154 = vmatpush1.bf16.msra.mxu0 %v15582_v29  ;;  %v10264_v29 = vadd.f32 %v18467_v55, %v7164_v11  ;;  %v15626_v55 = vld [vmem:[%s16692_s7 + $0x4ec] ss:$16 sps:$4 sm:$0xff]  }
 0x69c   : > { %12155 = vmatprep.subr.bf16.mxu0 %v15587_v45  ;;  %12119 = vmatpush1.bf16.msra.mxu1 %v15657_v54  ;;  %v15615_v54 = vld [vmem:[%s16692_s7 + $0x128] ss:$16 sps:$4 sm:$0xff]  }
 0x69d   : > { %12120 = vmatprep.subr.bf16.mxu1 %v15665_v5  ;;  %v10266_v5 = vadd.f32 %v18469_v14, %v7168_v27  ;;  %v15714_v27 = vld [vmem:[%s16692_s7 + $0x508] ss:$16 sps:$4 sm:$0xff]  }
 0x69f   : > { %12156 = vmatpush1.bf16.msra.mxu0 %v15585_v39  ;;  %v15620_v39 = vld [vmem:[%s16692_s7 + $0x10c] ss:$16 sps:$4 sm:$0xff]  }
 0x6a0   : > { %12157 = vmatprep.subr.bf16.mxu0 %v15590_v30  ;;  %12121 = vmatpush1.bf16.msra.mxu1 %v15663_v31 }
 0x6a1   : > { %12122 = vmatprep.subr.bf16.mxu1 %v15671_v32  ;;  %v15618_v32 = vld [vmem:[%s16692_s7 + $0x108] ss:$16 sps:$4 sm:$0xff]  }
 0x6a3   : > { %12158 = vmatpush1.bf16.msra.mxu0 %v15588_v1 }
 0x6a4   : > { %12159 = vmatprep.subr.bf16.mxu0 %v15593_v61  ;;  %12123 = vmatpush2.bf16.msra.mxu1 %v15669_v33  ;;  %v15624_v61 = vld [vmem:[%s16692_s7 + $0x4e8] ss:$16 sps:$4 sm:$0xff]   ;;  %v15632_v33 = vld [vmem:[%s16692_s7 + $0x4cc] ss:$16 sps:$4 sm:$0xff]  }
 0x6a5   : > { %12124 = vmatprep.subr.bf16.mxu1 %v15677_v42  ;;  %v15630_v42 = vld [vmem:[%s16692_s7 + $0x4c8] ss:$16 sps:$4 sm:$0xff]  }
 0x6a7   : > { %12160 = vmatpush1.bf16.msra.mxu0 %v15591_v41  ;;  %v15638_v41 = vld [vmem:[%s16692_s7 + $0x4ac] ss:$16 sps:$4 sm:$0xff]  }
 0x6a8   : > { %12161 = vmatprep.subr.bf16.mxu0 %v15596_v38  ;;  %12125 = vmatpush2.bf16.msra.mxu1 %v15675_v23  ;;  %v15636_v38 = vld [vmem:[%s16692_s7 + $0x4a8] ss:$16 sps:$4 sm:$0xff]   ;;  %v15644_v23 = vld [vmem:[%s16692_s7 + $0x48c] ss:$16 sps:$4 sm:$0xff]  }
 0x6a9   : > { %12126 = vmatprep.subr.bf16.mxu1 %v15683_v35  ;;  %v15642_v35 = vld [vmem:[%s16692_s7 + $0x488] ss:$16 sps:$4 sm:$0xff]  }
 0x6ab   : > { %12162 = vmatpush1.bf16.msra.mxu0 %v15594_v36  ;;  %v15648_v36 = vld [vmem:[%s16692_s7 + $0x468] ss:$16 sps:$4 sm:$0xff]  }
 0x6ac   : > { %12163 = vmatprep.subr.bf16.mxu0 %v15599_v26  ;;  %12127 = vmatpush2.bf16.msra.mxu1 %v15681_v40  ;;  %v15654_v26 = vld [vmem:[%s16692_s7 + $0x448] ss:$16 sps:$4 sm:$0xff]   ;;  %v15662_v40 = vld [vmem:[%s16692_s7 + $0x42c] ss:$16 sps:$4 sm:$0xff]  }
 0x6ad   : > { %12128 = vmatprep.subr.bf16.mxu1 %v15689_v46  ;;  %v15660_v46 = vld [vmem:[%s16692_s7 + $0x428] ss:$16 sps:$4 sm:$0xff]  }
 0x6af   : > { %12164 = vmatpush2.bf16.msra.mxu0 %v15597_v2  ;;  %v15668_v2 = vld [vmem:[%s16692_s7 + $0x40c] ss:$16 sps:$4 sm:$0xff]  }
 0x6b0   : > { %12165 = vmatprep.subr.bf16.mxu0 %v15602_v43  ;;  %12129 = vmatpush2.bf16.msra.mxu1 %v15687_v34  ;;  %v15666_v43 = vld [vmem:[%s16692_s7 + $0x408] ss:$16 sps:$4 sm:$0xff]   ;;  %v15674_v34 = vld [vmem:[%s16692_s7 + $0x5ec] ss:$16 sps:$4 sm:$0xff]  }
 0x6b1   : > { %12130 = vmatprep.subr.bf16.mxu1 %v15695_v51  ;;  %v15672_v51 = vld [vmem:[%s16692_s7 + $0x5e8] ss:$16 sps:$4 sm:$0xff]  }
 0x6b3   : > { %12166 = vmatpush2.bf16.msra.mxu0 %v15600_v50  ;;  %v15680_v50 = vld [vmem:[%s16692_s7 + $0x5cc] ss:$16 sps:$4 sm:$0xff]  }
 0x6b4   : > { %12167 = vmatprep.subr.bf16.mxu0 %v15605_v52  ;;  %12131 = vmatpush2.bf16.msra.mxu1 %v15693_v56  ;;  %v15678_v52 = vld [vmem:[%s16692_s7 + $0x5c8] ss:$16 sps:$4 sm:$0xff]   ;;  %v15686_v56 = vld [vmem:[%s16692_s7 + $0x5ac] ss:$16 sps:$4 sm:$0xff]  }
 0x6b5   : > { %12132 = vmatprep.subr.bf16.mxu1 %v15701_v16  ;;  %v15684_v16 = vld [vmem:[%s16692_s7 + $0x5a8] ss:$16 sps:$4 sm:$0xff]  }
 0x6b6   : > { %v10345_v62 = vpop.f32.mrf.mxu0 }
 0x6b7   : > { %12168 = vmatpush2.bf16.msra.mxu0 %v15603_v12  ;;  %v15692_v12 = vld [vmem:[%s16692_s7 + $0x58c] ss:$16 sps:$4 sm:$0xff]  }
 0x6b8   : > { %v10347_v6 = vpop.f32.mrf.mxu0  ;;  %12169 = vmatprep.subr.bf16.mxu0 %v15608_v57  ;;  %12133 = vmatpush2.bf16.msra.mxu1 %v15699_v25  ;;  %v15690_v25 = vld [vmem:[%s16692_s7 + $0x588] ss:$16 sps:$4 sm:$0xff]  }
 0x6b9   : > { %12134 = vmatprep.subr.bf16.mxu1 %v15707_v63 }
 0x6ba   : > { %v10349_v49 = vpop.f32.mrf.mxu0 }
 0x6bb   : > { %12170 = vmatpush2.bf16.msra.mxu0 %v15606_v48  ;;  %v15710_v49 = vld [vmem:[%s16692_s7 + $0x52c] ss:$16 sps:$4 sm:$0xff]  }
 0x6bc   : > { %v10350_v24 = vpop.f32.mrf.mxu0  ;;  %12171 = vmatprep.subr.bf16.mxu0 %v15611_v7  ;;  %12135 = vmatpush2.bf16.msra.mxu1 %v15705_v8  ;;  %v15704_v8 = vld [vmem:[%s16692_s7 + $0x54c] ss:$16 sps:$4 sm:$0xff]  }
 0x6bd   : > { %12136 = vmatprep.subr.bf16.mxu1 %v15713_v18  ;;  %v15702_v18 = vld [vmem:[%s16692_s7 + $0x548] ss:$16 sps:$4 sm:$0xff]  }
 0x6be   : > { %v15708_v24 = vld [vmem:[%s16692_s7 + $0x528] ss:$16 sps:$4 sm:$0xff]  }
 0x6bf   : > { %12172 = vmatpush2.bf16.msra.mxu0 %v15609_v20 }
 0x6c0   : > { %12173 = vmatprep.subr.bf16.mxu0 %v15614_v13  ;;  %12137 = vmatpush2.bf16.msra.mxu1 %v15711_v28  ;;  %v15716_v28 = vld [vmem:[%s16692_s7 + $0x50c] ss:$16 sps:$4 sm:$0xff]  }
 0x6c1   : > { %12188 = vmatprep.subr.bf16.mxu1 %v15719_v21 }
 0x6c3   : > { %12174 = vmatpush2.bf16.msra.mxu0 %v15612_v0  ;;  %v10304_v45 = vpop.f32.mrf.mxu1 }
 0x6c4   : > { %v10305_v60 = vadd.f32 %v10304_v45, %v10264_v29  ;;  %12175 = vmatprep.subr.bf16.mxu0 %v15617_v17 }
 0x6c5   : > { %v10306_v44 = vpop.f32.mrf.mxu1 }
 0x6c6   : > { %v10307_v47 = vadd.f32 %v10306_v44, %v10266_v5  ;;  %v18559_v30 = vadd.f32 %v10345_v62, %v10305_v60  ;;  %v15698_v62 = vld [vmem:[%s16692_s7 + $0x56c] ss:$16 sps:$4 sm:$0xff]   ;;  %v15717_v60 = vld [vmem:[%s16692_s7 + $0x2e8] ss:$16 sps:$4 sm:$0xff]  }
 0x6c7   : > { %12176 = vmatpush2.bf16.msra.mxu0 %v15615_v54  ;;  %v10308_v31 = vpop.f32.mrf.mxu1  ;;  %v15722_v44 = vld [vmem:[%s16692_s7 + $0x2cc] ss:$16 sps:$4 sm:$0xff]  }
 0x6c8   : > { %12177 = vmatprep.subr.bf16.mxu0 %v15620_v39  ;;  %v18563_v1 = vadd.f32 %v10347_v6, %v10307_v47  ;;  %v15696_v6 = vld [vmem:[%s16692_s7 + $0x568] ss:$16 sps:$4 sm:$0xff]  }
 0x6c9   : > { %v10309_v14 = vpop.f32.mrf.mxu1  ;;  %v15720_v47 = vld [vmem:[%s16692_s7 + $0x2c8] ss:$16 sps:$4 sm:$0xff]  }
 0x6ca   : > { %v15723_v31 = vld [vmem:[%s16692_s7 + $0x2a8] ss:$16 sps:$4 sm:$0xff]  }
 0x6cb   : > { %12178 = vmatpush2.bf16.msra.mxu0 %v15618_v32  ;;  %v15728_v32 = vld [vmem:[%s16692_s7 + $0x28c] ss:$16 sps:$4 sm:$0xff]  }
 0x6cc   : > { %12229 = vmatprep.subr.bf16.mxu0 %v15626_v55  ;;  %v15726_v55 = vld [vmem:[%s16692_s7 + $0x288] ss:$16 sps:$4 sm:$0xff]  }
 0x6cd   : > { %v15813_v14 = vld [vmem:[%s18626_s16 + $0x78] sm:$0xff]  }
 0x6ce   : > { %12180 = vmatmul.mubr.bf16.vlgmr.msra.gmra.mxu0 %v18384_v37  ;;  %v15650_v37 = vld [vmem:[%s16692_s7 + $0x46c] ss:$16 sps:$4 sm:$0xff]  }
 0x6cf   : > { %12230 = vmatpush1.bf16.msra.mxu0 %v15624_v61  ;;  %12261 = vmatprep.mubr.bf16.mxu0 %v18489_v22  ;;  %v15656_v22 = vld [vmem:[%s16692_s7 + $0x44c] ss:$16 sps:$4 sm:$0xff]  }
 0x6d0   : > { %12231 = vmatprep.subr.bf16.mxu0 %v15632_v33  ;;  %v15814_v61 = vld [vmem:[%s18626_s16 + $0x38] sm:$0xff]   ;;  %v15815_v33 = vld [vmem:[%s18626_s16 + $0x70] sm:$0xff]  }
 0x6d3   : > { %12232 = vmatpush1.bf16.msra.mxu0 %v15630_v42  ;;  %v15816_v42 = vld [vmem:[%s18626_s16 + $0x30] sm:$0xff]  }
 0x6d4   : > { %12233 = vmatprep.subr.bf16.mxu0 %v15638_v41  ;;  %v15817_v41 = vld [vmem:[%s18626_s16 + $0x68] sm:$0xff]  }
 0x6d7   : > { %12234 = vmatpush1.bf16.msra.mxu0 %v15636_v38  ;;  %v15732_v38 = vld [vmem:[%s16692_s7 + $0x248] ss:$16 sps:$4 sm:$0xff]  }
 0x6d8   : > { %12235 = vmatprep.subr.bf16.mxu0 %v15644_v23  ;;  %v15737_v23 = vld [vmem:[%s16692_s7 + $0x22c] ss:$16 sps:$4 sm:$0xff]  }
 0x6db   : > { %12236 = vmatpush1.bf16.msra.mxu0 %v15642_v35  ;;  %v15735_v35 = vld [vmem:[%s16692_s7 + $0x228] ss:$16 sps:$4 sm:$0xff]  }
 0x6dc   : > { %12237 = vmatprep.subr.bf16.mxu0 %v15650_v37  ;;  %v15818_v37 = vld [vmem:[%s18626_s16 + $0x28] sm:$0xff]  }
 0x6df   : > { %12238 = vmatpush1.bf16.msra.mxu0 %v15648_v36  ;;  %v15740_v36 = vld [vmem:[%s16692_s7 + $0x20c] ss:$16 sps:$4 sm:$0xff]  }
 0x6e0   : > { %12239 = vmatprep.subr.bf16.mxu0 %v15656_v22  ;;  %v15819_v22 = vld [vmem:[%s18626_s16 + $0x60] sm:$0xff]  }
 0x6e3   : > { %12240 = vmatpush1.bf16.msra.mxu0 %v15654_v26  ;;  %v15820_v26 = vld [vmem:[%s18626_s16 + $0x20] sm:$0xff]  }
 0x6e4   : > { %12241 = vmatprep.subr.bf16.mxu0 %v15662_v40  ;;  %v15821_v40 = vld [vmem:[%s18626_s16 + $0x58] sm:$0xff]  }
 0x6e7   : > { %12242 = vmatpush1.bf16.msra.mxu0 %v15660_v46  ;;  %v15738_v46 = vld [vmem:[%s16692_s7 + $0x208] ss:$16 sps:$4 sm:$0xff]  }
 0x6e8   : > { %12243 = vmatprep.subr.bf16.mxu0 %v15668_v2  ;;  %v15743_v2 = vld [vmem:[%s16692_s7 + $0x3ec] ss:$16 sps:$4 sm:$0xff]  }
 0x6eb   : > { %12244 = vmatpush1.bf16.msra.mxu0 %v15666_v43  ;;  %v15822_v43 = vld [vmem:[%s18626_s16 + $0x18] sm:$0xff]  }
 0x6ec   : > { %12245 = vmatprep.subr.bf16.mxu0 %v15674_v34  ;;  %v15741_v34 = vld [vmem:[%s16692_s7 + $0x3e8] ss:$16 sps:$4 sm:$0xff]  }
 0x6ef   : > { %12246 = vmatpush2.bf16.msra.mxu0 %v15672_v51  ;;  %v15746_v51 = vld [vmem:[%s16692_s7 + $0x3cc] ss:$16 sps:$4 sm:$0xff]  }
 0x6f0   : > { %12247 = vmatprep.subr.bf16.mxu0 %v15680_v50  ;;  %v15744_v50 = vld [vmem:[%s16692_s7 + $0x3c8] ss:$16 sps:$4 sm:$0xff]  }
 0x6f3   : > { %12248 = vmatpush2.bf16.msra.mxu0 %v15678_v52  ;;  %v15749_v52 = vld [vmem:[%s16692_s7 + $0x3ac] ss:$16 sps:$4 sm:$0xff]  }
 0x6f4   : > { %12249 = vmatprep.subr.bf16.mxu0 %v15686_v56  ;;  %v15747_v56 = vld [vmem:[%s16692_s7 + $0x3a8] ss:$16 sps:$4 sm:$0xff]  }
 0x6f6   : > { %v18589_v57 = vpop.f32.mrf.mxu0 }
 0x6f7   : > { %12250 = vmatpush2.bf16.msra.mxu0 %v15684_v16  ;;  %v15752_v16 = vld [vmem:[%s16692_s7 + $0x38c] ss:$16 sps:$4 sm:$0xff]  }
 0x6f8   : > { %v18592_v63 = vpop.f32.mrf.mxu0  ;;  %12251 = vmatprep.subr.bf16.mxu0 %v15692_v12  ;;  %v15750_v12 = vld [vmem:[%s16692_s7 + $0x388] ss:$16 sps:$4 sm:$0xff]  }
 0x6fa   : > { %v12021_v48 = vpop.f32.mrf.mxu0 }
 0x6fb   : > { %12252 = vmatpush2.bf16.msra.mxu0 %v15690_v25  ;;  %v15755_v25 = vld [vmem:[%s16692_s7 + $0x36c] ss:$16 sps:$4 sm:$0xff]   ;;  %v15753_v48 = vld [vmem:[%s16692_s7 + $0x368] ss:$16 sps:$4 sm:$0xff]  }
 0x6fc   : > { %v12022_v7 = vpop.f32.mrf.mxu0  ;;  %12253 = vmatprep.subr.bf16.mxu0 %v15698_v62  ;;  %v18654_v62 = vld [vmem:[%s16699_s21] sm:$0xf]  ;;  %s15222_s21 = sshll.u32 %s18921_s26, 5 }
 0x6fd   : > { %v10686_v7 = vrot.slane %v18654_v62, %v17065_v3 }
 0x6ff   : > { %12254 = vmatpush2.bf16.msra.mxu0 %v15696_v6  ;;  %v15758_v6 = vld [vmem:[%s16692_s7 + $0x34c] ss:$16 sps:$4 sm:$0xff]  }
 0x700   : > { %12255 = vmatprep.subr.bf16.mxu0 %v15704_v8  ;;  %v15756_v8 = vld [vmem:[%s16692_s7 + $0x348] ss:$16 sps:$4 sm:$0xff]  }
 0x703   : > { %12256 = vmatpush2.bf16.msra.mxu0 %v15702_v18  ;;  %v10386_v20 = vpop.f32.mrf.mxu1  ;;  %v10690_v18 = vrot.slane %v18654_v62, %v17069_v10 }
 0x704   : > { %v10387_v13 = vadd.f32 %v10386_v20, %v18559_v30  ;;  %12257 = vmatprep.subr.bf16.mxu0 %v15710_v49  ;;  %v15725_v30 = vld [vmem:[%s16692_s7 + $0x2ac] ss:$16 sps:$4 sm:$0xff]   ;;  %v12018_v20 = vadd.f32 %v18589_v57, %v10686_v7 }
 0x705   : > { %v10388_v21 = vpop.f32.mrf.mxu1  ;;  %v15761_v49 = vld [vmem:[%s16692_s7 + $0x32c] ss:$16 sps:$4 sm:$0xff]  }
 0x706   : > { %vm10399_vm14 = vcmp.gt.f32.partialorder %v10387_v13, 0.0  ;;  %v10407_v58 = vmul.f32 0.2, %v10387_v13  ;;  %v10389_v11 = vadd.f32 %v10388_v21, %v18563_v1  ;;  %v15729_v1 = vld [vmem:[%s16692_s7 + $0x268] ss:$16 sps:$4 sm:$0xff]  }
 0x707   : > { %12258 = vmatpush2.bf16.msra.mxu0 %v15708_v24  ;;  %v10390_v0 = vpop.f32.mrf.mxu1  ;;  %v15764_v21 = vld [vmem:[%s16692_s7 + $0x30c] ss:$16 sps:$4 sm:$0xff]  }
 0x708   : > { %vm10400_vm15 = vcmp.gt.f32.partialorder %v10389_v11, 0.0  ;;  %v10408_v17 = vmul.f32 0.2, %v10389_v11  ;;  %12259 = vmatprep.subr.bf16.mxu0 %v15716_v28  ;;  %v10415_v29 = vsel %vm10399_vm14, %v10387_v13, %v10407_v58  ;;  %v15759_v13 = vld [vmem:[%s16692_s7 + $0x328] ss:$16 sps:$4 sm:$0xff]   ;;  %v12020_v28 = vadd.f32 %v18592_v63, %v10690_v18 }
 0x709   : > { %v10391_v45 = vpop.f32.mrf.mxu1  ;;  %v18607_v39 = vpack.c.bf16 %v10415_v29, %v10415_v29  ;;  %v15762_v0 = vld [vmem:[%s16692_s7 + $0x308] ss:$16 sps:$4 sm:$0xff]   ;;  %v15767_v57 = vld [vmem:[%s16692_s7 + $0x6ec] ss:$16 sps:$4 sm:$0xff]   ;;  %v15823_v29 = vld [vmem:[%s18626_s16 + $0x50] sm:$0xff]  }
 0x70a   : > { %v10416_v54 = vsel %vm10400_vm15, %v10389_v11, %v10408_v17  ;;  %v15765_v17 = vld [vmem:[%s16692_s7 + $0x6e8] ss:$16 sps:$4 sm:$0xff]   ;;  %v15770_v63 = vld [vmem:[%s16692_s7 + $0x6cc] ss:$16 sps:$4 sm:$0xff]   ;;  %v15824_v45 = vld [vmem:[%s18626_s16 + $0x10] sm:$0xff]  }
 0x70b   : > { %12260 = vmatpush2.bf16.msra.mxu0 %v15714_v27  ;;  %v18604_v5 = vpack.c.bf16 %v10416_v54, %v10416_v54 }
 0x70c   : > { %15232 = vmatprep.subr.bf16.mxu0 %v15813_v14  ;;  %v15828_v14 = vld [vmem:[%s18626_s16] sm:$0xff]  }
 0x70d   : > { %12138 = vmatprep.mubr.bf16.mxu1 %v18604_v5 }
 0x70e   : > { %12262 = vmatmul.mubr.bf16.vlgmr.msra.gmra.mxu0 %v18492_v19  ;;  %12139 = vmatmul.mubr.bf16.vlgmr.msra.gmra.mxu1 %v18607_v39  ;;  %v15731_v19 = vld [vmem:[%s16692_s7 + $0x26c] ss:$16 sps:$4 sm:$0xff]  }
 0x70f   : > { %12189 = vmatpush1.bf16.msra.mxu1 %v15717_v60  ;;  %12220 = vmatprep.mubr.bf16.mxu1 %v18408_v59  ;;  %v15734_v59 = vld [vmem:[%s16692_s7 + $0x24c] ss:$16 sps:$4 sm:$0xff]  }
 0x710   : > { %12190 = vmatprep.subr.bf16.mxu1 %v15722_v44  ;;  %15233 = vmatpush3.bf16.msra.mxu0 %v15814_v61  ;;  %v15768_v44 = vld [vmem:[%s16692_s7 + $0x6c8] ss:$16 sps:$4 sm:$0xff]  }
 0x711   : > { %15234 = vmatprep.subr.bf16.mxu0 %v15815_v33  ;;  %v15774_v61 = vld [vmem:[%s16692_s7 + $0x688] ss:$16 sps:$4 sm:$0xff]   ;;  %v15779_v33 = vld [vmem:[%s16692_s7 + $0x66c] ss:$16 sps:$4 sm:$0xff]  }
 0x713   : > { %12191 = vmatpush1.bf16.msra.mxu1 %v15720_v47 }
 0x714   : > { %12192 = vmatprep.subr.bf16.mxu1 %v15725_v30  ;;  %15235 = vmatpush3.bf16.msra.mxu0 %v15816_v42  ;;  %v15773_v30 = vld [vmem:[%s16692_s7 + $0x6ac] ss:$16 sps:$4 sm:$0xff]   ;;  %v15777_v42 = vld [vmem:[%s16692_s7 + $0x668] ss:$16 sps:$4 sm:$0xff]  }
 0x715   : > { %15236 = vmatprep.subr.bf16.mxu0 %v15817_v41  ;;  %v15782_v41 = vld [vmem:[%s16692_s7 + $0x64c] ss:$16 sps:$4 sm:$0xff]  }
 0x717   : > { %12193 = vmatpush1.bf16.msra.mxu1 %v15723_v31  ;;  %v15825_v31 = vld [vmem:[%s18626_s16 + $0x48] sm:$0xff]  }
 0x718   : > { %12194 = vmatprep.subr.bf16.mxu1 %v15728_v32  ;;  %15237 = vmatpush3.bf16.msra.mxu0 %v15818_v37  ;;  %v15788_v37 = vld [vmem:[%s16692_s7 + $0x60c] ss:$16 sps:$4 sm:$0xff]  }
 0x719   : > { %15238 = vmatprep.subr.bf16.mxu0 %v15819_v22  ;;  %v15791_v22 = vld [vmem:[%s16692_s7 + $0x7ec] ss:$16 sps:$4 sm:$0xff]  }
 0x71b   : > { %12195 = vmatpush1.bf16.msra.mxu1 %v15726_v55 }
 0x71c   : > { %12196 = vmatprep.subr.bf16.mxu1 %v15731_v19  ;;  %15239 = vmatpush3.bf16.msra.mxu0 %v15820_v26  ;;  %v15771_v19 = vld [vmem:[%s16692_s7 + $0x6a8] ss:$16 sps:$4 sm:$0xff]  }
 0x71d   : > { %15240 = vmatprep.subr.bf16.mxu0 %v15821_v40  ;;  %v15789_v26 = vld [vmem:[%s16692_s7 + $0x7e8] ss:$16 sps:$4 sm:$0xff]   ;;  %v15794_v40 = vld [vmem:[%s16692_s7 + $0x7cc] ss:$16 sps:$4 sm:$0xff]  }
 0x71f   : > { %12197 = vmatpush1.bf16.msra.mxu1 %v15729_v1  ;;  %v15776_v1 = vld [vmem:[%s16692_s7 + $0x68c] ss:$16 sps:$4 sm:$0xff]  }
 0x720   : > { %12198 = vmatprep.subr.bf16.mxu1 %v15734_v59  ;;  %15241 = vmatpush3.bf16.msra.mxu0 %v15822_v43  ;;  %v15827_v59 = vld [vmem:[%s18626_s16 + $0x40] sm:$0xff]   ;;  %v15795_v43 = vld [vmem:[%s16692_s7 + $0x7a8] ss:$16 sps:$4 sm:$0xff]  }
 0x721   : > { %15242 = vmatprep.subr.bf16.mxu0 %v15823_v29  ;;  %v15841_v29 = vld [vmem:[%s18626_s16 + $0xc8] sm:$0xff]  }
 0x723   : > { %12199 = vmatpush1.bf16.msra.mxu1 %v15732_v38  ;;  %v15780_v38 = vld [vmem:[%s16692_s7 + $0x648] ss:$16 sps:$4 sm:$0xff]  }
 0x724   : > { %12200 = vmatprep.subr.bf16.mxu1 %v15737_v23  ;;  %15243 = vmatpush3.bf16.msra.mxu0 %v15824_v45  ;;  %v15785_v23 = vld [vmem:[%s16692_s7 + $0x62c] ss:$16 sps:$4 sm:$0xff]  }
 0x725   : > { %15244 = vmatprep.subr.bf16.mxu0 %v15825_v31 }
 0x727   : > { %12201 = vmatpush1.bf16.msra.mxu1 %v15735_v35  ;;  %v15783_v35 = vld [vmem:[%s16692_s7 + $0x628] ss:$16 sps:$4 sm:$0xff]  }
 0x728   : > { %12202 = vmatprep.subr.bf16.mxu1 %v15740_v36  ;;  %v15786_v36 = vld [vmem:[%s16692_s7 + $0x608] ss:$16 sps:$4 sm:$0xff]  }
 0x72b   : > { %12203 = vmatpush1.bf16.msra.mxu1 %v15738_v46  ;;  %v15792_v46 = vld [vmem:[%s16692_s7 + $0x7c8] ss:$16 sps:$4 sm:$0xff]  }
 0x72c   : > { %12204 = vmatprep.subr.bf16.mxu1 %v15743_v2  ;;  %v15797_v2 = vld [vmem:[%s16692_s7 + $0x7ac] ss:$16 sps:$4 sm:$0xff]  }
 0x72f   : > { %12205 = vmatpush2.bf16.msra.mxu1 %v15741_v34  ;;  %v15800_v34 = vld [vmem:[%s16692_s7 + $0x78c] ss:$16 sps:$4 sm:$0xff]  }
 0x730   : > { %12206 = vmatprep.subr.bf16.mxu1 %v15746_v51  ;;  %v15798_v51 = vld [vmem:[%s16692_s7 + $0x788] ss:$16 sps:$4 sm:$0xff]  }
 0x733   : > { %12207 = vmatpush2.bf16.msra.mxu1 %v15744_v50  ;;  %v15803_v50 = vld [vmem:[%s16692_s7 + $0x76c] ss:$16 sps:$4 sm:$0xff]  }
 0x734   : > { %12208 = vmatprep.subr.bf16.mxu1 %v15749_v52  ;;  %v15801_v52 = vld [vmem:[%s16692_s7 + $0x768] ss:$16 sps:$4 sm:$0xff]  }
 0x737   : > { %12209 = vmatpush2.bf16.msra.mxu1 %v15747_v56  ;;  %v15806_v56 = vld [vmem:[%s16692_s7 + $0x74c] ss:$16 sps:$4 sm:$0xff]  }
 0x738   : > { %12210 = vmatprep.subr.bf16.mxu1 %v15752_v16  ;;  %v15804_v16 = vld [vmem:[%s16692_s7 + $0x748] ss:$16 sps:$4 sm:$0xff]  }
 0x73b   : > { %12211 = vmatpush2.bf16.msra.mxu1 %v15750_v12  ;;  %v15809_v12 = vld [vmem:[%s16692_s7 + $0x72c] ss:$16 sps:$4 sm:$0xff]  }
 0x73c   : > { %12212 = vmatprep.subr.bf16.mxu1 %v15755_v25  ;;  %v15807_v25 = vld [vmem:[%s16692_s7 + $0x728] ss:$16 sps:$4 sm:$0xff]  }
 0x73f   : > { %12213 = vmatpush2.bf16.msra.mxu1 %v15753_v48  ;;  %v15812_v48 = vld [vmem:[%s16692_s7 + $0x70c] ss:$16 sps:$4 sm:$0xff]  }
 0x740   : > { %12214 = vmatprep.subr.bf16.mxu1 %v15758_v6  ;;  %v15810_v6 = vld [vmem:[%s16692_s7 + $0x708] ss:$16 sps:$4 sm:$0xff]   ;;  %s18764_s7 = scalar_lea.vmem [#allocation21], %s13614_s27 }
 0x741   : > { %s13242_s14 = sshll.u32 %s18764_s7, 4  ;;  %s13243_s14 = int_to_ptr.vmem [resolvable:$true] %s13242_s14 }
 0x742   : > { %s16196_s18 = scalar_lea.vmem %s13243_s14, 32  ;;  %p16203_p4 = scmp.lt.s32.totalorder %s13243_s14, %s16201_s20 }
 0x743   : > { %12215 = vmatpush2.bf16.msra.mxu1 %v15756_v8  ;;  %v12058_v24 = vpop.f32.mrf.mxu1  ;;  %p16197_p0 = scmp.ne.s32.totalorder %s13243_s14, %s16196_s18  ;;  %p16204_p5 = scmp.lt.s32.totalorder %s16202_s28, %s16196_s18 }
 0x744   : > { %v12059_v3 = vadd.f32 %v12058_v24, %v12018_v20  ;;  %12216 = vmatprep.subr.bf16.mxu1 %v15761_v49  ;;  %v15829_v20 = vld [vmem:[%s18626_s16 + $0xf8] sm:$0xff]  }
 0x745   : > { %v12060_v58 = vpop.f32.mrf.mxu1  ;;  %v15830_v24 = vld [vmem:[%s18626_s16 + $0xb8] sm:$0xff]   ;;  %p16198_p1 = pnand %p16197_p0, %p16478_p9  ;;  %p16205_p6 = por %p16204_p5, %p16203_p4 }
 0x746   : > { %v12061_v11 = vadd.f32 %v12060_v58, %v12020_v28  ;;  %v15832_v28 = vld [vmem:[%s18626_s16 + $0xb0] sm:$0xff]   ;;  %v15836_v58 = vld [vmem:[%s18626_s16 + $0xa0] sm:$0xff]  }
 0x747   : > { %12217 = vmatpush2.bf16.msra.mxu1 %v15759_v13  ;;  %v12062_v10 = vpop.f32.mrf.mxu1  ;;  %v15831_v13 = vld [vmem:[%s18626_s16 + $0xf0] sm:$0xff]   ;;  %p16199_p3 = pneg %p16198_p1 }
 0x748   : > { %12218 = vmatprep.subr.bf16.mxu1 %v15764_v21  ;;  %v15834_v21 = vld [vmem:[%s18626_s16 + $0xa8] sm:$0xff]   ;;  %v15838_v10 = vld [vmem:[%s18626_s16 + $0x98] sm:$0xff]  }
 0x749   : > { %v12063_v27 = vpop.f32.mrf.mxu1  ;;  %p16206_p7 = pnand %p16205_p6, %p16199_p3 }
 0x74b   : > { %12219 = vmatpush2.bf16.msra.mxu1 %v15762_v0  ;;  %v15839_v0 = vld [vmem:[%s18626_s16 + $0xd0] sm:$0xff]  }
 0x74c   : > { %12270 = vmatprep.subr.bf16.mxu1 %v15767_v57  ;;  %v15840_v57 = vld [vmem:[%s18626_s16 + $0x90] sm:$0xff]  }
 0x74e   : > { %12221 = vmatmul.mubr.bf16.vlgmr.msra.gmra.mxu1 %v18479_v4  ;;  %v12099_v54 = vpop.f32.mrf.mxu0  ;;  %v15826_v4 = vld [vmem:[%s18626_s16 + $0x8] sm:$0xff]  }
 0x74f   : > { %v18675_v60 = vadd.f32 %v12099_v54, %v12059_v3  ;;  %12271 = vmatpush1.bf16.msra.mxu1 %v15765_v17  ;;  %12302 = vmatprep.mubr.bf16.mxu1 %v18604_v5  ;;  %v15833_v3 = vld [vmem:[%s18626_s16 + $0xe8] sm:$0xff]  }
 0x750   : > { %v12101_v47 = vpop.f32.mrf.mxu0  ;;  %12272 = vmatprep.subr.bf16.mxu1 %v15770_v63  ;;  %15245 = vmatpush3.bf16.msra.mxu0 %v15826_v4 }
 0x751   : > { %v18681_v32 = vadd.f32 %v12101_v47, %v12061_v11  ;;  %15246 = vmatprep.subr.bf16.mxu0 %v15827_v59  ;;  %v15837_v11 = vld [vmem:[%s18626_s16 + $0xd8] sm:$0xff]  }
 0x752   : > { %v12103_v55 = vpop.f32.mrf.mxu0 }
 0x753   : > { %12273 = vmatpush1.bf16.msra.mxu1 %v15768_v44  ;;  %v15842_v44 = vld [vmem:[%s18626_s16 + $0x88] sm:$0xff]  }
 0x754   : > { %v12104_v5 = vpop.f32.mrf.mxu0  ;;  %12274 = vmatprep.subr.bf16.mxu1 %v15773_v30  ;;  %15247 = vmatpush3.bf16.msra.mxu0 %v15828_v14 }
 0x757   : > { %12275 = vmatpush1.bf16.msra.mxu1 %v15771_v19  ;;  %v15843_v19 = vld [vmem:[%s18626_s16 + $0xc0] sm:$0xff]  }
 0x758   : > { %12276 = vmatprep.subr.bf16.mxu1 %v15776_v1 }
 0x75b   : > { %12277 = vmatpush1.bf16.msra.mxu1 %v15774_v61 }
 0x75c   : > { %12278 = vmatprep.subr.bf16.mxu1 %v15779_v33 }
 0x75f   : > { %12279 = vmatpush1.bf16.msra.mxu1 %v15777_v42 }
 0x760   : > { %12280 = vmatprep.subr.bf16.mxu1 %v15782_v41 }
 0x763   : > { %12281 = vmatpush1.bf16.msra.mxu1 %v15780_v38 }
 0x764   : > { %12282 = vmatprep.subr.bf16.mxu1 %v15785_v23  ;;  %v10694_v23 = vrot.slane %v18654_v62, %v17294_v9 }
 0x767   : > { %12283 = vmatpush1.bf16.msra.mxu1 %v15783_v35  ;;  %v10698_v35 = vrot.slane %v18654_v62, %v17297_v15 }
 0x768   : > { %12284 = vmatprep.subr.bf16.mxu1 %v15788_v37 }
 0x76b   : > { %12285 = vmatpush1.bf16.msra.mxu1 %v15786_v36 }
 0x76c   : > { %12286 = vmatprep.subr.bf16.mxu1 %v15791_v22 }
 0x76f   : > { %12287 = vmatpush2.bf16.msra.mxu1 %v15789_v26 }
 0x770   : > { %12288 = vmatprep.subr.bf16.mxu1 %v15794_v40 }
 0x773   : > { %12289 = vmatpush2.bf16.msra.mxu1 %v15792_v46 }
 0x774   : > { %12290 = vmatprep.subr.bf16.mxu1 %v15797_v2 }
 0x777   : > { %12291 = vmatpush2.bf16.msra.mxu1 %v15795_v43 }
 0x778   : > { %12292 = vmatprep.subr.bf16.mxu1 %v15800_v34 }
 0x77b   : > { %12293 = vmatpush2.bf16.msra.mxu1 %v15798_v51 }
 0x77c   : > { %12294 = vmatprep.subr.bf16.mxu1 %v15803_v50 }
 0x77f   : > { %12295 = vmatpush2.bf16.msra.mxu1 %v15801_v52 }
 0x780   : > { %12296 = vmatprep.subr.bf16.mxu1 %v15806_v56 }
 0x783   : > { %12297 = vmatpush2.bf16.msra.mxu1 %v15804_v16 }
 0x784   : > { %12298 = vmatprep.subr.bf16.mxu1 %v15809_v12 }
 0x787   : > { %12299 = vmatpush2.bf16.msra.mxu1 %v15807_v25 }
 0x788   : > { %12300 = vmatprep.subr.bf16.mxu1 %v15812_v48 }
 0x78b   : > { %12301 = vmatpush2.bf16.msra.mxu1 %v15810_v6 }
 0x78c   : > { %15254 = vmatprep.subr.bf16.mxu1 %v15829_v20  ;;  %v15846_v20 = vld [vmem:[%s16708_s12] sm:$0xff]  }
 0x78e   : > { %v18713_v7 = vpop.f32.mrf.mxu0  ;;  %12303 = vmatmul.mubr.bf16.vlgmr.msra.gmra.mxu1 %v18607_v39  ;;  %v15835_v39 = vld [vmem:[%s18626_s16 + $0xe0] sm:$0xff]  }
 0x78f   : > { %15255 = vmatpush3.bf16.msra.mxu1 %v15830_v24  ;;  %v12182_v37 = vadd.f32 %v18713_v7, %v10694_v23  ;;  %v15845_v7 = vld [vmem:[%s16708_s12 + $0x8] sm:$0xff]   ;;  %v15847_v24 = vld [vmem:[%s18742_s13 + $0x60] ss:$48 sps:$4 sm:$0xff]   ;;  %s13240_s12 = scalar_lea.hbm %s18924_s17, %s15222_s21 }
 0x790   : > { %v12183_v8 = vpop.f32.mrf.mxu0  ;;  %15256 = vmatprep.subr.bf16.mxu1 %v15831_v13  ;;  %v15849_v13 = vld [vmem:[%s18742_s13 + $0x64] ss:$48 sps:$4 sm:$0xff]  }
 0x791   : > { %v12184_v36 = vadd.f32 %v12183_v8, %v10698_v35  ;;  %v15873_v23 = vld [vmem:[%s18742_s13 + $0x84] ss:$48 sps:$4 sm:$0xff]   ;;  %v15876_v35 = vld [vmem:[%s18742_s13 + $0x8c] ss:$48 sps:$4 sm:$0xff]  }
 0x792   : > { %v12185_v18 = vpop.f32.mrf.mxu0 }
 0x793   : > { %15257 = vmatpush3.bf16.msra.mxu1 %v15832_v28  ;;  %v16348_v18 = vmov 0.0   ;;  %v15852_v28 = vld [vmem:[%s18742_s13 + $0x6c] ss:$48 sps:$4 sm:$0xff]  }
 0x794   : > { %v12186_v49 = vpop.f32.mrf.mxu0  ;;  %15258 = vmatprep.subr.bf16.mxu1 %v15833_v3  ;;  %15279 = vmatprep.subr.bf16.mxu0 %v16348_v18  ;;  %v15153_v3 = vld [vmem:[%s743_s25] ss:$0 sm:$0xff] }
 0x797   : > { %15259 = vmatpush3.bf16.msra.mxu1 %v15834_v21 }
 0x798   : > { %15260 = vmatprep.subr.bf16.mxu1 %v15835_v39 }
 0x79b   : > { %15261 = vmatpush3.bf16.msra.mxu1 %v15836_v58 }
 0x79c   : > { %15262 = vmatprep.subr.bf16.mxu1 %v15837_v11 }
 0x79f   : > { %15263 = vmatpush3.bf16.msra.mxu1 %v15838_v10 }
 0x7a0   : > { %15264 = vmatprep.subr.bf16.mxu1 %v15839_v0 }
 0x7a3   : > { %15265 = vmatpush3.bf16.msra.mxu1 %v15840_v57 }
 0x7a4   : > { %15266 = vmatprep.subr.bf16.mxu1 %v15841_v29 }
 0x7a7   : > { %15267 = vmatpush3.bf16.msra.mxu1 %v15842_v44  ;;  %v15853_v44 = vld [vmem:[%s18742_s13] ss:$48 sps:$4 sm:$0xff]  }
 0x7a8   : > { %15268 = vmatprep.subr.bf16.mxu1 %v15843_v19 }
 0x7ce   : > { %v12263_v27 = vpop.f32.mrf.mxu0  ;;  %v12140_v17 = vpop.f32.mrf.mxu1 }
 0x7cf   : > { %v12141_v63 = vadd.f32 %v12140_v17, %v18675_v60  ;;  %v15844_v60 = vld [vmem:[%s18626_s16 + $0x80] sm:$0xff]  }
 0x7d0   : > { %v12265_v45 = vpop.f32.mrf.mxu0  ;;  %v12142_v54 = vpop.f32.mrf.mxu1  ;;  %15269 = vmatpush3.bf16.msra.mxu1 %v15844_v60  ;;  %v15862_v60 = vld [vmem:[%s18742_s13 + $0x78] ss:$48 sps:$4 sm:$0xff]  }
 0x7d1   : > { %vm12311_vm0 = vcmp.gt.f32.partialorder %v12141_v63, 0.0  ;;  %v12315_v47 = vmul.f32 0.2, %v12141_v63  ;;  %v12143_v30 = vadd.f32 %v12142_v54, %v18681_v32  ;;  %12903 = vmatprep.subr.bf16.mxu1 %v15849_v13  ;;  %v15858_v54 = vld [vmem:[%s18742_s13 + $0xc] ss:$48 sps:$4 sm:$0xff]  }
 0x7d2   : > { %v12267_v31 = vpop.f32.mrf.mxu0  ;;  %v12144_v4 = vpop.f32.mrf.mxu1 }
 0x7d3   : > { %vm12312_vm1 = vcmp.gt.f32.partialorder %v12143_v30, 0.0  ;;  %v12316_v55 = vmul.f32 0.2, %v12143_v30  ;;  %v12319_v5 = vsel %vm12311_vm0, %v12141_v63, %v12315_v47  ;;  %v15850_v63 = vld [vmem:[%s18742_s13 + $0x68] ss:$48 sps:$4 sm:$0xff]   ;;  %v16350_v4 = vmov 0  }
 0x7d4   : > { %v12268_v1 = vpop.f32.mrf.mxu0  ;;  %v12145_v59 = vpop.f32.mrf.mxu1  ;;  %v12323_v33 = vpack.c.bf16 %v12319_v5, %v12319_v5  ;;  %v15856_v47 = vld [vmem:[%s18742_s13 + $0x8] ss:$48 sps:$4 sm:$0xff]   ;;  %v15864_v31 = vld [vmem:[%s18742_s13 + $0x7c] ss:$48 sps:$4 sm:$0xff]  }
 0x7d5   : > { %v12320_v14 = vsel %vm12312_vm1, %v12143_v30, %v12316_v55  ;;  %v15861_v30 = vld [vmem:[%s18742_s13 + $0x74] ss:$48 sps:$4 sm:$0xff]   ;;  %v15859_v59 = vld [vmem:[%s18742_s13 + $0x70] ss:$48 sps:$4 sm:$0xff]  }
 0x7d6   : > { %v12324_v61 = vpack.c.bf16 %v12320_v14, %v12320_v14  ;;  %v15186_v55 = vld [vmem:[%s760_s23] ss:$0 sm:$0xff]  ;;  %s13212_s23 = scalar_lea.sflag [#allocation22], %s16654_s22 }
 0x7d8   : > { %12622 = vmatprep.mubr.bf16.mxu0 %v12324_v61  ;;  %v15867_v61 = vld [vmem:[%s18742_s13 + $0x14] ss:$48 sps:$4 sm:$0xff]  }
 0x7d9   : > { %12623 = vmatmul.mubr.bf16.vlgmr.msra.gmra.mxu0 %v12323_v33  ;;  %v15870_v33 = vld [vmem:[%s18742_s13 + $0x1c] ss:$48 sps:$4 sm:$0xff]  }
 0x7da   : > { %15280 = vmatpush3.bf16.msra.mxu0 %v15845_v7  ;;  %15283 = vmatprep.mubr.msk.bf16.mxu0 %vm16349_vm4, %v16348_v18 }
 0x7db   : > { %15281 = vmatprep.subr.bf16.mxu0 %v16348_v18 }
 0x7de   : > { %15282 = vmatpush3.bf16.msra.mxu0 %v15846_v20 }
 0x7df   : > { %12944 = vmatprep.subr.bf16.mxu0 %v15852_v28 }
 0x80e   : > { %v12222_v42 = vpop.f32.mrf.mxu1 }
 0x80f   : > { %v12223_v22 = vadd.f32 %v12222_v42, %v12182_v37  ;;  %v15871_v37 = vld [vmem:[%s18742_s13 + $0x80] ss:$48 sps:$4 sm:$0xff]  }
 0x810   : > { %v12224_v32 = vpop.f32.mrf.mxu1 }
 0x811   : > { %v12225_v26 = vadd.f32 %v12224_v32, %v12184_v36  ;;  %v12264_v40 = vadd.f32 %v12263_v27, %v12223_v22  ;;  %v15874_v36 = vld [vmem:[%s18742_s13 + $0x88] ss:$48 sps:$4 sm:$0xff]   ;;  %v15879_v22 = vld [vmem:[%s18742_s13 + $0x24] ss:$48 sps:$4 sm:$0xff]  }
 0x812   : > { %v12226_v41 = vpop.f32.mrf.mxu1 }
 0x813   : > { %v12266_v43 = vadd.f32 %v12265_v45, %v12225_v26  ;;  %v15855_v45 = vld [vmem:[%s18742_s13 + $0x4] ss:$48 sps:$4 sm:$0xff]   ;;  %v15865_v41 = vld [vmem:[%s18742_s13 + $0x10] ss:$48 sps:$4 sm:$0xff]   ;;  %v15882_v26 = vld [vmem:[%s18742_s13 + $0x2c] ss:$48 sps:$4 sm:$0xff]  }
 0x814   : > { %v12227_v38 = vpop.f32.mrf.mxu1 }
 0x815   : > { %v15868_v38 = vld [vmem:[%s18742_s13 + $0x18] ss:$48 sps:$4 sm:$0xff]  }
 0x84e   : > { %v12304_v46 = vpop.f32.mrf.mxu1 }
 0x84f   : > { %v12305_v2 = vadd.f32 %v12304_v46, %v12264_v40  ;;  %v15877_v40 = vld [vmem:[%s18742_s13 + $0x20] ss:$48 sps:$4 sm:$0xff]   ;;  %v15880_v46 = vld [vmem:[%s18742_s13 + $0x28] ss:$48 sps:$4 sm:$0xff]  }
 0x850   : > { %v12306_v34 = vpop.f32.mrf.mxu1 }
 0x851   : > { %vm12313_vm2 = vcmp.gt.f32.partialorder %v12305_v2, 0.0  ;;  %v12317_v51 = vmul.f32 0.2, %v12305_v2  ;;  %v12307_v50 = vadd.f32 %v12306_v34, %v12266_v43 }
 0x852   : > { %v12308_v52 = vpop.f32.mrf.mxu1 }
 0x853   : > { %vm12314_vm3 = vcmp.gt.f32.partialorder %v12307_v50, 0.0  ;;  %v12318_v9 = vmul.f32 0.2, %v12307_v50  ;;  %v12321_v56 = vsel %vm12313_vm2, %v12305_v2, %v12317_v51 }
 0x854   : > { %v12309_v16 = vpop.f32.mrf.mxu1  ;;  %v12325_v12 = vpack.c.bf16 %v12321_v56, %v12321_v56 }
 0x855   : > { %v12322_v15 = vsel %vm12314_vm3, %v12307_v50, %v12318_v9 }
 0x856   : > { %v12326_v62 = vpack.c.bf16 %v12322_v15, %v12322_v15 }
 0x858   : > { %12662 = vmatprep.mubr.bf16.mxu1 %v12326_v62 }
 0x859   : > { %12663 = vmatmul.mubr.bf16.vlgmr.msra.gmra.mxu1 %v12325_v12 }
 0x85a   : > { %12904 = vmatpush1.bf16.msra.mxu1 %v15847_v24  ;;  %12923 = vmatprep.mubr.bf16.mxu1 %v16350_v4 }
 0x85b   : > { %12905 = vmatprep.subr.bf16.mxu1 %v15855_v45 }
 0x85e   : > { %12906 = vmatpush1.bf16.msra.mxu1 %v15853_v44 }
 0x85f   : > { %12985 = vmatprep.subr.bf16.mxu1 %v15861_v30 }
 0x899   : > { %v15248_v25 = vpop.f32.mrf.mxu0 }
 0x89b   : > { %v15249_v48 = vpop.f32.mrf.mxu0 }
 0x89c   : > { %v15250_v6 = vadd.f32 %v15249_v48, %v15248_v25 }
 0x89d   : > { %v15251_v8 = vpop.f32.mrf.mxu0 }
 0x89e   : > { %v12625_v58 = vadd.f32 %v15250_v6, %v15153_v3 }
 0x89f   : > { %v15252_v49 = vpop.f32.mrf.mxu0 }
 0x919   : > { %v15270_v21 = vpop.f32.mrf.mxu1 }
 0x91b   : > { %v15271_v39 = vpop.f32.mrf.mxu1 }
 0x91c   : > { %v15272_v11 = vadd.f32 %v15271_v39, %v15270_v21 }
 0x91d   : > { %v15273_v10 = vpop.f32.mrf.mxu1 }
 0x91e   : > { %v12665_v0 = vadd.f32 %v15272_v11, %v12625_v58 }
 0x91f   : > { %v15274_v57 = vpop.f32.mrf.mxu1 }
 0x920   : > { %vm12670_vm5 = vcmp.gt.f32.partialorder %v12665_v0, 0.0  ;;  %v12671_v27 = vmul.f32 0.2, %v12665_v0 }
 0x922   : > { %v12672_v17 = vsel %vm12670_vm5, %v12665_v0, %v12671_v27 }
 0x923   : > { %v12673_v29 = vpack.c.bf16 %v12672_v17, %v12672_v17 }
 0x925   : > { %15284 = vmatmul.mubr.msk.bf16.vlgmr.msra.gmra.mxu0 %vm12697_vm6, %v12673_v29 }
 0x926   : > { %12945 = vmatpush1.bf16.msra.mxu0 %v15850_v63  ;;  %12964 = vmatprep.mubr.bf16.mxu0 %v16350_v4 }
 0x927   : > { %12946 = vmatprep.subr.bf16.mxu0 %v15858_v54 }
 0x92a   : > { %12947 = vmatpush1.bf16.msra.mxu0 %v15856_v47 }
 0x92b   : > { %13026 = vmatprep.subr.bf16.mxu0 %v15864_v31 }
 0x9e5   : > { %v12735_v19 = vpop.f32.mrf.mxu0 }
 0x9e6   : > { %v12736_v5 = vadd.f32 %v15186_v55, %v12735_v19 }
 0x9e7   : > { %v15285_v1 = vpop.f32.mrf.mxu0 }
 0x9e8   : > { %v12743_v14 = vpack.c.bf16 %v12736_v5, %v12736_v5  ;;  %12742 = vst.msk [vmem:[%s18764_s7] sm:$0x3] %vm12741_vm7, %v12736_v5 }
 0x9e9   : > { %v12738_v42 = vpop.f32.mrf.mxu0 }
 0x9ea   : > { %15214 = vmatmul.mubr.msk.bf16.vlgmr.msra.gmra.mxu1 %vm12697_vm6, %v12743_v14  ;;  %15215 = vmatmul.mubr.msk.bf16.vlgmr.msra.gmra.mxu0 %vm12697_vm6, %v12743_v14 }
 0x9eb   : > { %12986 = vmatpush1.bf16.msra.mxu1 %v15859_v59  ;;  %13027 = vmatpush1.bf16.msra.mxu0 %v15862_v60  ;;  %v15286_v32 = vpop.f32.mrf.mxu0 }
 0x9ec   : > { %12987 = vmatprep.subr.bf16.mxu1 %v15867_v61  ;;  %13028 = vmatprep.subr.bf16.mxu0 %v15870_v33 }
 0x9ed   : > { %13005 = vmatprep.mubr.bf16.mxu1 %v16350_v4  ;;  %13046 = vmatprep.mubr.bf16.mxu0 %v16350_v4 }
 0x9ef   : > { %12988 = vmatpush1.bf16.msra.mxu1 %v15865_v41  ;;  %13029 = vmatpush1.bf16.msra.mxu0 %v15868_v38 }
 0x9f0   : > { %13067 = vmatprep.subr.bf16.mxu1 %v15873_v23  ;;  %13108 = vmatprep.subr.bf16.mxu0 %v15876_v35 }
 0x9f2   : > { %15216 = vmatmul.mubr.msk.bf16.vlgmr.msra.gmra.mxu1 %vm12697_vm6, %v12743_v14  ;;  %15217 = vmatmul.mubr.msk.bf16.vlgmr.msra.gmra.mxu0 %vm12697_vm6, %v12743_v14 }
 0x9f3   : > { %13068 = vmatpush1.bf16.msra.mxu1 %v15871_v37  ;;  %13109 = vmatpush1.bf16.msra.mxu0 %v15874_v36 }
 0x9f4   : > { %13069 = vmatprep.subr.bf16.mxu1 %v15879_v22  ;;  %13110 = vmatprep.subr.bf16.mxu0 %v15882_v26 }
 0x9f5   : > { %13087 = vmatprep.mubr.bf16.mxu1 %v16350_v4  ;;  %13128 = vmatprep.mubr.bf16.mxu0 %v16350_v4 }
 0x9f7   : > { %13070 = vmatpush1.bf16.msra.mxu1 %v15877_v40  ;;  %13111 = vmatpush1.bf16.msra.mxu0 %v15880_v46 }
 0x9fa   : > { %15218 = vmatmul.mubr.msk.bf16.vlgmr.msra.gmra.mxu1 %vm12697_vm6, %v12743_v14  ;;  %15219 = vmatmul.mubr.msk.bf16.vlgmr.msra.gmra.mxu0 %vm12697_vm6, %v12743_v14 }
 0x9fb   : > { %16209 = shalt.err (!%p16206_p7)
}
 0x9fc   : > { %s16210_s1 = scalar_lea.hbm %s13240_s12, 32  ;;  %s16214_s13 = scalar_lea.hbm %s18924_s17, 64 }
 0x9fd   : > { %p16211_p10 = scmp.ne.s32.totalorder %s13240_s12, %s16210_s1  ;;  %p16215_p8 = scmp.lt.s32.totalorder %s13240_s12, %s18924_s17 }
 0x9fe   : > { %p16216_p0 = scmp.lt.s32.totalorder %s16214_s13, %s16210_s1 }
 0x9ff   : > { %p16212_p13 = pnand %p16211_p10, %p16478_p9 }
 0xa00   : > { %p16217_p1 = por %p16216_p0, %p16215_p8 }
 0xa01   : > { %p16213_p2 = pneg %p16212_p13 }
 0xa03   : > { %p16218_p12 = pnand %p16217_p1, %p16213_p2 }
 0xa05   : > { %16221 = shalt.err (!%p16218_p12)
}
 0xa06   : > { %15320 = dma.vmem_to_hbm [thread:$0]  (%p16478_p9), %s13243_s14, 32, %s13240_s12, %s13212_s23  }
 0xa07   : > { %s18805_s21 = scalar_lea.vmem [#allocation20], %s15293_s24  ;;  %s15296_s24 = smul.u32 384, %s18921_s26 }
 0xa08   : > { %s13228_s15 = sshll.u32 %s18805_s21, 4  ;;  %s18925_s14 = sld [smem:[#allocation46_spill]]  ;;  %s13229_s15 = int_to_ptr.vmem [resolvable:$true] %s13228_s15 }
 0xa09   : > { %s13207_s18 = scalar_lea.sflag [#allocation4], %s16654_s22  ;;  %s16222_s19 = scalar_lea.vmem %s13229_s15, 384 }
 0xa0a   : > { %p16223_p12 = scmp.ne.s32.totalorder %s13229_s15, %s16222_s19  ;;  %s16352_s26 = smov [#allocation20]  }
 0xa0b   : > { %s16226_s20 = sshll.u32 %s16352_s26, 4  ;;  %s16227_s20 = int_to_ptr.vmem [resolvable:$false] %s16226_s20 }
 0xa0c   : > { %p16224_p3 = pnand %p16223_p12, %p16478_p9  ;;  %s16228_s28 = scalar_lea.vmem %s16227_s20, 768 }
 0xa0d   : > { %p16229_p5 = scmp.lt.s32.totalorder %s13229_s15, %s16227_s20  ;;  %p16230_p6 = scmp.lt.s32.totalorder %s16228_s28, %s16222_s19 }
 0xa0e   : > { %s13226_s23 = scalar_lea.hbm %s18925_s14, %s15296_s24  ;;  %p16225_p4 = pneg %p16224_p3 }
 0xa0f   : > { %p16231_p7 = por %p16230_p6, %p16229_p5 }
 0xa11   : > { %p16232_p10 = pnand %p16231_p7, %p16225_p4 }
 0xaaa   : > { %v12925_v2 = vpop.f32.mrf.mxu1  ;;  %v12966_v43 = vpop.f32.mrf.mxu0 }
 0xaac   : > { %v12927_v34 = vpop.f32.mrf.mxu1  ;;  %v12968_v51 = vpop.f32.mrf.mxu0 }
 0xaad   : > { %v13149_v50 = vcombine.low %v12925_v2, %v12927_v34  ;;  %v13150_v52 = vcombine.low %v12966_v43, %v12968_v51 }
 0xaae   : > { %v12929_v9 = vpop.f32.mrf.mxu1  ;;  %v12970_v56 = vpop.f32.mrf.mxu0 }
 0xaaf   : > { %v13157_v16 = vrot.slane %v13149_v50, %v16745_v53  ;;  %v13164_v15 = vrot.slane %v13150_v52, %v16745_v53 }
 0xab0   : > { %v12930_v62 = vpop.f32.mrf.mxu1  ;;  %v12971_v12 = vpop.f32.mrf.mxu0 }
 0xab1   : > { %v13165_v25 = vcombine.low %v13157_v16, %v13164_v15 }
 0xab2   : > { %v13007_v48 = vpop.f32.mrf.mxu1  ;;  %v13048_v6 = vpop.f32.mrf.mxu0 }
 0xab3   : > { %13203 = vst [vmem:[%s18805_s21] sm:$0xff] %v13165_v25 }
 0xab4   : > { %v13009_v7 = vpop.f32.mrf.mxu1  ;;  %v13050_v8 = vpop.f32.mrf.mxu0 }
 0xab5   : > { %v13166_v18 = vcombine.low %v13007_v48, %v13009_v7  ;;  %v13167_v49 = vcombine.low %v13048_v6, %v13050_v8 }
 0xab6   : > { %v13011_v20 = vpop.f32.mrf.mxu1  ;;  %v13052_v24 = vpop.f32.mrf.mxu0 }
 0xab7   : > { %v13174_v13 = vrot.slane %v13166_v18, %v16745_v53  ;;  %v13181_v28 = vrot.slane %v13167_v49, %v16745_v53 }
 0xab8   : > { %v13012_v3 = vpop.f32.mrf.mxu1  ;;  %v13053_v21 = vpop.f32.mrf.mxu0 }
 0xab9   : > { %v13182_v39 = vcombine.low %v13174_v13, %v13181_v28 }
 0xaba   : > { %v13089_v58 = vpop.f32.mrf.mxu1  ;;  %v13130_v11 = vpop.f32.mrf.mxu0 }
 0xabb   : > { %13204 = vst [vmem:[%s18805_s21 + $0x8] sm:$0xff] %v13182_v39 }
 0xabc   : > { %v13091_v10 = vpop.f32.mrf.mxu1  ;;  %v13132_v0 = vpop.f32.mrf.mxu0 }
 0xabd   : > { %v13183_v57 = vcombine.low %v13089_v58, %v13091_v10  ;;  %v13184_v27 = vcombine.low %v13130_v11, %v13132_v0 }
 0xabe   : > { %v13093_v17 = vpop.f32.mrf.mxu1  ;;  %v13134_v63 = vpop.f32.mrf.mxu0 }
 0xabf   : > { %v13191_v29 = vrot.slane %v13183_v57, %v16745_v53  ;;  %v13198_v45 = vrot.slane %v13184_v27, %v16745_v53 }
 0xac0   : > { %v13094_v54 = vpop.f32.mrf.mxu1  ;;  %v13135_v44 = vpop.f32.mrf.mxu0 }
 0xac1   : > { %v13199_v47 = vcombine.low %v13191_v29, %v13198_v45 }
 0xac3   : > { %13205 = vst [vmem:[%s18805_s21 + $0x10] sm:$0xff] %v13199_v47 }
 0xac4   : > { %16235 = shalt.err (!%p16232_p10)
}
 0xac5   : > { %s16236_s1 = scalar_lea.hbm %s13226_s23, 384  ;;  %s16240_s3 = scalar_lea.hbm %s18925_s14, 768 }
 0xac6   : > { %p16237_p13 = scmp.ne.s32.totalorder %s13226_s23, %s16236_s1  ;;  %p16241_p0 = scmp.lt.s32.totalorder %s13226_s23, %s18925_s14 }
 0xac7   : > { %p16242_p1 = scmp.lt.s32.totalorder %s16240_s3, %s16236_s1 }
 0xac8   : > { %p16238_p2 = pnand %p16237_p13, %p16478_p9 }
 0xac9   : > { %p16243_p12 = por %p16242_p1, %p16241_p0 }
 0xaca   : > { %p16239_p8 = pneg %p16238_p2 }
 0xacc   : > { %p16244_p3 = pnand %p16243_p12, %p16239_p8 }
 0xace   : > { %16247 = shalt.err (!%p16244_p3)
}
 0xacf   : > { %15319 = dma.vmem_to_hbm [thread:$0]  (%p16478_p9), %s13229_s15, 384, %s13226_s23, %s13207_s18  }
 0xad0 PF: > { %s18926_s7 = sld [smem:[#allocation31_spill]] }
 0xad1   : > { %s18928_s24 = sld [smem:[#allocation35_spill]] }
 0xad6   : > { %s13254_s25 = sand.u32 1, %s18926_s7  }
 0xad7   : > { %p18929_p4 = scmp.ge.s32.totalorder %s18928_s24, 2  ;;  %s13255_s12 = scalar_lea.sflag [#allocation4], %s13254_s25 }
 0xad9   : > { %p15358_p5 = pnand %p18929_p4, %p16485_p11 }
 0xadb   : > { %p15359_p6 = pneg %p15358_p5 }
 0xadd   : > { %16297 = dma.done.wait (%p15359_p6), %s13255_s12, 384  }
 0xade   : > { %16299 = vsyncadd (%p15359_p6), %s13255_s12, 4294966912  ;;  %s13264_s19 = scalar_lea.sflag [#allocation22], %s13254_s25 }
 0xadf   : > { %16301 = dma.done.wait (%p15359_p6), %s13264_s19, 32  }
 0xae0   : > { %16303 = vsyncadd (%p15359_p6), %s13264_s19, 4294967264  ;;  %s48_s30 = sadd.s32 1, %s18928_s24   ;;  %s18930_s25 = sld [smem:[#allocation32_spill]] }
 0xae1   : > { %p45_p7 = scmp.ge.s32.totalorder %s48_s30, 4   ;;  %s18931_s26 = sld [smem:[#allocation33_spill]] }
 0xae2   : > { %s18932_s27 = sld [smem:[#allocation40_spill]]  ;;  %s18934_s28 = smov %s16322_s29 }
 0xae3   : > { %s18933_s15 = sld [smem:[#allocation37_spill]] }
 0xae5   :  { %47 = sbr.rel (!%p45_p7) target bundleno = 24 (0x18), region = 253 }
 0xae9   : > { %s18935_s29 = smov %s18933_s15 }
 0xaea   :  { %13269 = vsyncpa [#allocation3], 1 }
 0xaeb   :  { %13271 = vsyncpa [#allocation3 + $0x1], 1 }
 0xaec   :  { %13272 = vsyncpa [#allocation6], 1 }
 0xaed   :  { %13274 = vsyncpa [#allocation6 + $0x1], 1 }
 0xaee   :  { %13275 = vsyncpa [#allocation9], 1 }
 0xaef   :  { %13277 = vsyncpa [#allocation9 + $0x1], 1 }
 0xaf0   :  { %13278 = vsyncpa [#allocation12], 1 }
 0xaf1   :  { %13280 = vsyncpa [#allocation12 + $0x1], 1 }
 0xaf2   :  { %13281 = vsyncpa [#allocation15], 1 }
 0xaf3   :  { %13283 = vsyncpa [#allocation15 + $0x1], 1 }
 0xaf4   :  { %13284 = vsyncpa [#allocation18], 1 }
 0xaf5   :  { %13286 = vsyncpa [#allocation18 + $0x1], 1 }
 0xaf6   :  { %13287 = vsyncpa [#allocation4], 1 }
 0xaf7   :  { %13289 = vsyncpa [#allocation4 + $0x1], 1 }
 0xaf8   :  { %13290 = vsyncpa [#allocation22], 1 }
 0xaf9   :  { %13292 = vsyncpa [#allocation22 + $0x1], 1 }

</bundles_post_ra>
